<compile_context>
chip_gen: v6e
topology: v6e:2x2x1
jax: 0.10.0
libtpu: 0.0.40
codegen_flags: <defaults>
</compile_context>

<pallas_src>
import functools
import math

import jax
import jax.numpy as jnp
from jax.experimental import pallas as pl
from jax.experimental.pallas import tpu as pltpu

KH = 5  # conv kernel height
KW = 5  # conv kernel width


# -----------------------------------------------------------------------------
# Pallas kernels
# -----------------------------------------------------------------------------
def conv_relu_pool_kernel(x_ref, w_ref, b_ref, o_ref, *, tile_n, ho):
    """Fused Conv2d(5x5, s=1, p=2) + bias + ReLU + MaxPool2d(2) for tile_n images.

    x_ref: (2*tile_n, Hp/2, Wp*Cin) bf16 — zero-padded input rows split by row
           parity: x_ref[2*t + p, u, wp*Cin + ci] = x_pad[t, 2*u + p, wp, ci].
    w_ref: (2*KH, Wp*Cin, Wo*Cout) bf16 — banded weight matrices indexed by
           (pool-column parity b, kernel row dh) -> w_ref[b*KH + dh].
    b_ref: (1, Wo*Cout) f32 — conv bias tiled over pooled columns.
    o_ref: (tile_n, Ho, Wo*Cout) bf16 — pooled activations (lane-dense).

    For pool-window branch (a, b) in {0,1}^2:
        conv[2ph+a, 2pw+b, co] = sum_dh x_pad[2ph+a+dh, :, :] . Wband[b, dh]
    and padded row 2ph+a+dh lives in parity plane p=(a+dh)%2 at row offset
    q=(a+dh)//2, so every matmul LHS is a contiguous sublane slice of the
    VMEM block (no HBM im2col).  relu(max_branches + bias) == pool(relu(+bias)).
    """
    bias = b_ref[...]
    for t in range(tile_n):
        branch = []
        for a in range(2):            # row parity inside the 2x2 pool window
            for bcol in range(2):     # column parity inside the 2x2 pool window
                acc = None
                for dh in range(KH):
                    p = (a + dh) % 2
                    q = (a + dh) // 2
                    lhs = x_ref[2 * t + p, pl.ds(q, ho), :]
                    term = jnp.dot(lhs, w_ref[bcol * KH + dh],
                                   preferred_element_type=jnp.float32)
                    acc = term if acc is None else acc + term
                branch.append(acc)
        m = jnp.maximum(jnp.maximum(branch[0], branch[1]),
                        jnp.maximum(branch[2], branch[3]))
        o_ref[t] = jnp.maximum(m + bias, 0.0).astype(o_ref.dtype)


def linear_kernel(x_ref, w_ref, b_ref, o_ref):
    """o = x @ w + b, bf16 inputs, f32 accumulation, lane dim padded to 128."""
    o_ref[...] = (
        jnp.dot(x_ref[...], w_ref[...], preferred_element_type=jnp.float32)
        + b_ref[...]
    ).astype(o_ref.dtype)


# -----------------------------------------------------------------------------
# Wrappers (layout plumbing only: padding, parity split, weight reshapes)
# -----------------------------------------------------------------------------
def _round_up(x, m):
    return ((x + m - 1) // m) * m


def _banded_conv_weights(w_pt, wo, wp):
    """PyTorch (Cout,Cin,5,5) weight -> (2*KH, Wp*Cin, Wo*Cout) banded bf16 mats."""
    cout, cin = w_pt.shape[0], w_pt.shape[1]
    w_hwio = jnp.transpose(w_pt, (2, 3, 1, 0)).astype(jnp.float32)  # (KH,KW,Cin,Cout)
    mats = []
    for bcol in range(2):
        for dh in range(KH):
            tap = w_hwio[dh].reshape(KW * cin, cout)   # row = dw*Cin + ci
            mat = jnp.zeros((wp * cin, wo * cout), jnp.float32)
            for pw in range(wo):
                r0 = (2 * pw + bcol) * cin
                mat = mat.at[r0:r0 + KW * cin, pw * cout:(pw + 1) * cout].set(tap)
            mats.append(mat)
    return jnp.stack(mats, axis=0).astype(jnp.bfloat16)


def conv_relu_pool(x_nhwc, w_pt, b_pt, *, tile_n=8):
    """Conv2d(5,1,2) + ReLU + MaxPool2d(2) fused in one Pallas kernel.

    x_nhwc: (N, H, W, Cin) f32/bf16 -> returns (N, H//2, W//2, Cout) bf16.
    """
    n, h, w, cin = x_nhwc.shape
    cout = w_pt.shape[0]
    ho, wo = h // 2, w // 2
    hp, wp = h + 4, w + 4            # zero padding of 2 on each side
    hp2 = hp // 2
    k = wp * cin

    tile_n = max(1, min(tile_n, n))
    n_pad = _round_up(n, tile_n)

    # Pad, merge (W, Cin) into the lane dim, split padded rows by parity.
    xp = jnp.pad(x_nhwc, ((0, n_pad - n), (2, 2), (2, 2), (0, 0)))
    xp = xp.reshape(n_pad, hp2, 2, k).transpose(0, 2, 1, 3)       # (N, 2, Hp/2, K)
    xp = xp.reshape(n_pad * 2, hp2, k).astype(jnp.bfloat16)

    wb = _banded_conv_weights(w_pt, wo, wp)                        # (2*KH, K, Wo*Cout)
    brow = jnp.tile(b_pt.astype(jnp.float32), wo).reshape(1, wo * cout)

    grid = (n_pad // tile_n,)
    flops = n_pad * 4 * KH * 2 * ho * k * (wo * cout)
    bytes_accessed = (xp.size * 2 + wb.size * 2 + brow.size * 4
                      + n_pad * ho * wo * cout * 2)

    out = pl.pallas_call(
        functools.partial(conv_relu_pool_kernel, tile_n=tile_n, ho=ho),
        out_shape=jax.ShapeDtypeStruct((n_pad, ho, wo * cout), jnp.bfloat16),
        grid=grid,
        in_specs=[
            pl.BlockSpec((2 * tile_n, hp2, k), lambda i: (i, 0, 0)),
            pl.BlockSpec((2 * KH, k, wo * cout), lambda i: (0, 0, 0)),
            pl.BlockSpec((1, wo * cout), lambda i: (0, 0)),
        ],
        out_specs=pl.BlockSpec((tile_n, ho, wo * cout), lambda i: (i, 0, 0)),
        compiler_params=pltpu.CompilerParams(dimension_semantics=("parallel",)),
        cost_estimate=pl.CostEstimate(flops=flops, transcendentals=0,
                                      bytes_accessed=bytes_accessed),
    )(xp, wb, brow)
    return out[:n].reshape(n, ho, wo, cout)


def linear(feat, w_km, b_m, *, lane_pad=128, tile_rows=128):
    """feat: (N, K); w_km: (K, M); returns (N, M) f32 via a Pallas matmul."""
    n, k = feat.shape
    m = w_km.shape[1]
    m_pad = _round_up(m, lane_pad)
    tile = tile_rows if n >= tile_rows else _round_up(n, 8)
    n_pad = _round_up(n, tile)

    x = jnp.pad(feat.astype(jnp.bfloat16), ((0, n_pad - n), (0, 0)))
    wpad = jnp.pad(w_km.astype(jnp.bfloat16), ((0, 0), (0, m_pad - m)))
    bpad = jnp.pad(b_m.astype(jnp.float32), (0, m_pad - m)).reshape(1, m_pad)

    grid = (n_pad // tile,)
    flops = 2 * n_pad * k * m_pad
    bytes_accessed = x.size * 2 + wpad.size * 2 + bpad.size * 4 + n_pad * m_pad * 4

    out = pl.pallas_call(
        linear_kernel,
        out_shape=jax.ShapeDtypeStruct((n_pad, m_pad), jnp.float32),
        grid=grid,
        in_specs=[
            pl.BlockSpec((tile, k), lambda i: (i, 0)),
            pl.BlockSpec((k, m_pad), lambda i: (0, 0)),
            pl.BlockSpec((1, m_pad), lambda i: (0, 0)),
        ],
        out_specs=pl.BlockSpec((tile, m_pad), lambda i: (i, 0)),
        compiler_params=pltpu.CompilerParams(dimension_semantics=("parallel",)),
        cost_estimate=pl.CostEstimate(flops=flops, transcendentals=0,
                                      bytes_accessed=bytes_accessed),
    )(x, wpad, bpad)
    return out[:n, :m]


# -----------------------------------------------------------------------------
# Model: parameters + forward
# -----------------------------------------------------------------------------
def init_params(key, channel=1, y_dim=10):
    """Kaiming-uniform-style weights; PyTorch-default uniform biases."""
    k1, k2, k3, k4, k5, k6 = jax.random.split(key, 6)

    def kaiming_uniform(k, shape, fan_in):
        bound = math.sqrt(6.0 / fan_in)
        return jax.random.uniform(k, shape, jnp.float32, minval=-bound, maxval=bound)

    def bias_uniform(k, shape, fan_in):
        bound = 1.0 / math.sqrt(fan_in)
        return jax.random.uniform(k, shape, jnp.float32, minval=-bound, maxval=bound)

    return {
        "conv1_w": kaiming_uniform(k1, (16, channel, 5, 5), channel * 25),
        "conv1_b": bias_uniform(k4, (16,), channel * 25),
        "conv2_w": kaiming_uniform(k2, (32, 16, 5, 5), 16 * 25),
        "conv2_b": bias_uniform(k5, (32,), 16 * 25),
        "out_w": kaiming_uniform(k3, (10 if y_dim is None else y_dim, 32 * 7 * 7),
                                 32 * 7 * 7),
        "out_b": bias_uniform(k6, (y_dim,), 32 * 7 * 7),
    }


def simple_cnn3_forward(x_nchw, params, *, tile_n=8):
    """Forward pass matching SimpleCnn3.forward (eval mode). x_nchw: (N,1,28,28)."""
    n = x_nchw.shape[0]
    y_dim = params["out_w"].shape[0]
    x = jnp.transpose(x_nchw, (0, 2, 3, 1)).astype(jnp.float32)        # NCHW -> NHWC
    h1 = conv_relu_pool(x, params["conv1_w"], params["conv1_b"], tile_n=tile_n)
    h2 = conv_relu_pool(h1, params["conv2_w"], params["conv2_b"], tile_n=tile_n)
    # NHWC flatten; the Linear weight's input axis is permuted once from
    # PyTorch's (c,h,w) .view order, so no per-forward activation transpose.
    feat = h2.reshape(n, -1)
    w_lin = (params["out_w"].reshape(y_dim, 32, 7, 7)
             .transpose(2, 3, 1, 0).reshape(7 * 7 * 32, y_dim))
    return linear(feat, w_lin, params["out_b"])


# -----------------------------------------------------------------------------
# Pure-JAX (XLA) reference with matching mixed precision, for self-check
# -----------------------------------------------------------------------------
def reference_forward(x_nchw, params):
    x = jnp.transpose(x_nchw, (0, 2, 3, 1)).astype(jnp.bfloat16)

    def block(xi, w_pt, b_pt):
        w = jnp.transpose(w_pt, (2, 3, 1, 0)).astype(jnp.bfloat16)     # HWIO
        y = jax.lax.conv_general_dilated(
            xi, w, window_strides=(1, 1), padding=((2, 2), (2, 2)),
            dimension_numbers=("NHWC", "HWIO", "NHWC"),
            preferred_element_type=jnp.float32)
        y = jnp.maximum(y + b_pt.astype(jnp.float32)[None, None, None, :], 0.0)
        y = jax.lax.reduce_window(y, -jnp.inf, jax.lax.max,
                                  (1, 2, 2, 1), (1, 2, 2, 1), "VALID")
        return y.astype(jnp.bfloat16)

    h1 = block(x, params["conv1_w"], params["conv1_b"])
    h2 = block(h1, params["conv2_w"], params["conv2_b"])
    # PyTorch .view flattens NCHW (c, h, w) order; use original weight directly.
    feat = jnp.transpose(h2, (0, 3, 1, 2)).reshape(h2.shape[0], -1)
    return (jnp.dot(feat, params["out_w"].T.astype(jnp.bfloat16),
                    preferred_element_type=jnp.float32)
            + params["out_b"][None, :].astype(jnp.float32))


# -----------------------------------------------------------------------------
# Demo
# -----------------------------------------------------------------------------
if __name__ == "__main__":
    key = jax.random.PRNGKey(0)
    kx, kp = jax.random.split(key)
    # Spatial 28x28 and channel=1 are dictated by Linear(32*7*7, 10).
    x = jax.random.normal(kx, (2, 1, 28, 28), jnp.float32)
    params = init_params(kp, channel=1, y_dim=10)

    fwd = jax.jit(simple_cnn3_forward)
    y = jax.block_until_ready(fwd(x, params))

    assert y.shape == (2, 10), y.shape
    assert y.dtype == jnp.float32, y.dtype

    y_ref = jax.block_until_ready(reference_forward(x, params))
    max_err = float(jnp.max(jnp.abs(y - y_ref)))
    assert max_err < 1e-1, f"mismatch vs pure-JAX reference: {max_err}"

    print("KERNEL_OK")
</pallas_src>

<mosaic_0001>
module attributes {stable_mosaic.version = 11 : i64} {
  func.func @conv_relu_pool_kernel(%arg0: i32, %arg1: memref<4x16x32xbf16, #tpu.memory_space<vmem>>, %arg2: memref<10x32x224xbf16, #tpu.memory_space<vmem>>, %arg3: memref<1x224xf32, #tpu.memory_space<vmem>>, %arg4: memref<2x14x224xbf16, #tpu.memory_space<vmem>>) attributes {dimension_semantics = [#tpu.dimension_semantics<parallel>], iteration_bounds = array<i64: 1>, scalar_prefetch = 0 : i64, scratch_operands = 0 : i64, tpu.core_type = #tpu.core_type<tc>, window_params = [{transform_indices = @transform_0, window_bounds = array<i64: 4, 16, 32>}, {pipeline_mode = #tpu.pipeline_mode<synchronous>, transform_indices = @transform_1, window_bounds = array<i64: 10, 32, 224>}, {pipeline_mode = #tpu.pipeline_mode<synchronous>, transform_indices = @transform_2, window_bounds = array<i64: 1, 224>}, {transform_indices = @transform_3, window_bounds = array<i64: 2, 14, 224>}]} {
    %c0 = arith.constant 0 : index
    %c0_0 = arith.constant 0 : index
    %0 = vector.load %arg3[%c0, %c0_0] : memref<1x224xf32, #tpu.memory_space<vmem>>, vector<1x224xf32>
    %c0_1 = arith.constant 0 : index
    %c0_2 = arith.constant 0 : index
    %c0_3 = arith.constant 0 : index
    %1 = vector.load %arg1[%c0_1, %c0_2, %c0_3] : memref<4x16x32xbf16, #tpu.memory_space<vmem>>, vector<1x14x32xbf16>
    %2 = vector.shape_cast %1 : vector<1x14x32xbf16> to vector<14x32xbf16>
    %c0_4 = arith.constant 0 : index
    %c0_5 = arith.constant 0 : index
    %c0_6 = arith.constant 0 : index
    %3 = vector.load %arg2[%c0_4, %c0_5, %c0_6] : memref<10x32x224xbf16, #tpu.memory_space<vmem>>, vector<1x32x224xbf16>
    %4 = vector.shape_cast %3 : vector<1x32x224xbf16> to vector<32x224xbf16>
    %cst = arith.constant dense<0.000000e+00> : vector<14x224xf32>
    %5 = tpu.matmul %2, %4, %cst {dimension_numbers = #tpu.dot_dimension_numbers<[1], [0], [0], [1], [0, 0, 1, 1], [], []>} : vector<14x32xbf16>, vector<32x224xbf16>, vector<14x224xf32> -> vector<14x224xf32>
    %c1 = arith.constant 1 : index
    %c0_7 = arith.constant 0 : index
    %c0_8 = arith.constant 0 : index
    %6 = vector.load %arg1[%c1, %c0_7, %c0_8] : memref<4x16x32xbf16, #tpu.memory_space<vmem>>, vector<1x14x32xbf16>
    %7 = vector.shape_cast %6 : vector<1x14x32xbf16> to vector<14x32xbf16>
    %c1_9 = arith.constant 1 : index
    %c0_10 = arith.constant 0 : index
    %c0_11 = arith.constant 0 : index
    %8 = vector.load %arg2[%c1_9, %c0_10, %c0_11] : memref<10x32x224xbf16, #tpu.memory_space<vmem>>, vector<1x32x224xbf16>
    %9 = vector.shape_cast %8 : vector<1x32x224xbf16> to vector<32x224xbf16>
    %cst_12 = arith.constant dense<0.000000e+00> : vector<14x224xf32>
    %10 = tpu.matmul %7, %9, %cst_12 {dimension_numbers = #tpu.dot_dimension_numbers<[1], [0], [0], [1], [0, 0, 1, 1], [], []>} : vector<14x32xbf16>, vector<32x224xbf16>, vector<14x224xf32> -> vector<14x224xf32>
    %11 = arith.addf %5, %10 : vector<14x224xf32>
    %c0_13 = arith.constant 0 : index
    %c1_14 = arith.constant 1 : index
    %c0_15 = arith.constant 0 : index
    %12 = vector.load %arg1[%c0_13, %c1_14, %c0_15] : memref<4x16x32xbf16, #tpu.memory_space<vmem>>, vector<1x14x32xbf16>
    %13 = vector.shape_cast %12 : vector<1x14x32xbf16> to vector<14x32xbf16>
    %c2 = arith.constant 2 : index
    %c0_16 = arith.constant 0 : index
    %c0_17 = arith.constant 0 : index
    %14 = vector.load %arg2[%c2, %c0_16, %c0_17] : memref<10x32x224xbf16, #tpu.memory_space<vmem>>, vector<1x32x224xbf16>
    %15 = vector.shape_cast %14 : vector<1x32x224xbf16> to vector<32x224xbf16>
    %cst_18 = arith.constant dense<0.000000e+00> : vector<14x224xf32>
    %16 = tpu.matmul %13, %15, %cst_18 {dimension_numbers = #tpu.dot_dimension_numbers<[1], [0], [0], [1], [0, 0, 1, 1], [], []>} : vector<14x32xbf16>, vector<32x224xbf16>, vector<14x224xf32> -> vector<14x224xf32>
    %17 = arith.addf %11, %16 : vector<14x224xf32>
    %c1_19 = arith.constant 1 : index
    %c1_20 = arith.constant 1 : index
    %c0_21 = arith.constant 0 : index
    %18 = vector.load %arg1[%c1_19, %c1_20, %c0_21] : memref<4x16x32xbf16, #tpu.memory_space<vmem>>, vector<1x14x32xbf16>
    %19 = vector.shape_cast %18 : vector<1x14x32xbf16> to vector<14x32xbf16>
    %c3 = arith.constant 3 : index
    %c0_22 = arith.constant 0 : index
    %c0_23 = arith.constant 0 : index
    %20 = vector.load %arg2[%c3, %c0_22, %c0_23] : memref<10x32x224xbf16, #tpu.memory_space<vmem>>, vector<1x32x224xbf16>
    %21 = vector.shape_cast %20 : vector<1x32x224xbf16> to vector<32x224xbf16>
    %cst_24 = arith.constant dense<0.000000e+00> : vector<14x224xf32>
    %22 = tpu.matmul %19, %21, %cst_24 {dimension_numbers = #tpu.dot_dimension_numbers<[1], [0], [0], [1], [0, 0, 1, 1], [], []>} : vector<14x32xbf16>, vector<32x224xbf16>, vector<14x224xf32> -> vector<14x224xf32>
    %23 = arith.addf %17, %22 : vector<14x224xf32>
    %c0_25 = arith.constant 0 : index
    %c2_26 = arith.constant 2 : index
    %c0_27 = arith.constant 0 : index
    %24 = vector.load %arg1[%c0_25, %c2_26, %c0_27] : memref<4x16x32xbf16, #tpu.memory_space<vmem>>, vector<1x14x32xbf16>
    %25 = vector.shape_cast %24 : vector<1x14x32xbf16> to vector<14x32xbf16>
    %c4 = arith.constant 4 : index
    %c0_28 = arith.constant 0 : index
    %c0_29 = arith.constant 0 : index
    %26 = vector.load %arg2[%c4, %c0_28, %c0_29] : memref<10x32x224xbf16, #tpu.memory_space<vmem>>, vector<1x32x224xbf16>
    %27 = vector.shape_cast %26 : vector<1x32x224xbf16> to vector<32x224xbf16>
    %cst_30 = arith.constant dense<0.000000e+00> : vector<14x224xf32>
    %28 = tpu.matmul %25, %27, %cst_30 {dimension_numbers = #tpu.dot_dimension_numbers<[1], [0], [0], [1], [0, 0, 1, 1], [], []>} : vector<14x32xbf16>, vector<32x224xbf16>, vector<14x224xf32> -> vector<14x224xf32>
    %29 = arith.addf %23, %28 : vector<14x224xf32>
    %c0_31 = arith.constant 0 : index
    %c0_32 = arith.constant 0 : index
    %c0_33 = arith.constant 0 : index
    %30 = vector.load %arg1[%c0_31, %c0_32, %c0_33] : memref<4x16x32xbf16, #tpu.memory_space<vmem>>, vector<1x14x32xbf16>
    %31 = vector.shape_cast %30 : vector<1x14x32xbf16> to vector<14x32xbf16>
    %c5 = arith.constant 5 : index
    %c0_34 = arith.constant 0 : index
    %c0_35 = arith.constant 0 : index
    %32 = vector.load %arg2[%c5, %c0_34, %c0_35] : memref<10x32x224xbf16, #tpu.memory_space<vmem>>, vector<1x32x224xbf16>
    %33 = vector.shape_cast %32 : vector<1x32x224xbf16> to vector<32x224xbf16>
    %cst_36 = arith.constant dense<0.000000e+00> : vector<14x224xf32>
    %34 = tpu.matmul %31, %33, %cst_36 {dimension_numbers = #tpu.dot_dimension_numbers<[1], [0], [0], [1], [0, 0, 1, 1], [], []>} : vector<14x32xbf16>, vector<32x224xbf16>, vector<14x224xf32> -> vector<14x224xf32>
    %c1_37 = arith.constant 1 : index
    %c0_38 = arith.constant 0 : index
    %c0_39 = arith.constant 0 : index
    %35 = vector.load %arg1[%c1_37, %c0_38, %c0_39] : memref<4x16x32xbf16, #tpu.memory_space<vmem>>, vector<1x14x32xbf16>
    %36 = vector.shape_cast %35 : vector<1x14x32xbf16> to vector<14x32xbf16>
    %c6 = arith.constant 6 : index
    %c0_40 = arith.constant 0 : index
    %c0_41 = arith.constant 0 : index
    %37 = vector.load %arg2[%c6, %c0_40, %c0_41] : memref<10x32x224xbf16, #tpu.memory_space<vmem>>, vector<1x32x224xbf16>
    %38 = vector.shape_cast %37 : vector<1x32x224xbf16> to vector<32x224xbf16>
    %cst_42 = arith.constant dense<0.000000e+00> : vector<14x224xf32>
    %39 = tpu.matmul %36, %38, %cst_42 {dimension_numbers = #tpu.dot_dimension_numbers<[1], [0], [0], [1], [0, 0, 1, 1], [], []>} : vector<14x32xbf16>, vector<32x224xbf16>, vector<14x224xf32> -> vector<14x224xf32>
    %40 = arith.addf %34, %39 : vector<14x224xf32>
    %c0_43 = arith.constant 0 : index
    %c1_44 = arith.constant 1 : index
    %c0_45 = arith.constant 0 : index
    %41 = vector.load %arg1[%c0_43, %c1_44, %c0_45] : memref<4x16x32xbf16, #tpu.memory_space<vmem>>, vector<1x14x32xbf16>
    %42 = vector.shape_cast %41 : vector<1x14x32xbf16> to vector<14x32xbf16>
    %c7 = arith.constant 7 : index
    %c0_46 = arith.constant 0 : index
    %c0_47 = arith.constant 0 : index
    %43 = vector.load %arg2[%c7, %c0_46, %c0_47] : memref<10x32x224xbf16, #tpu.memory_space<vmem>>, vector<1x32x224xbf16>
    %44 = vector.shape_cast %43 : vector<1x32x224xbf16> to vector<32x224xbf16>
    %cst_48 = arith.constant dense<0.000000e+00> : vector<14x224xf32>
    %45 = tpu.matmul %42, %44, %cst_48 {dimension_numbers = #tpu.dot_dimension_numbers<[1], [0], [0], [1], [0, 0, 1, 1], [], []>} : vector<14x32xbf16>, vector<32x224xbf16>, vector<14x224xf32> -> vector<14x224xf32>
    %46 = arith.addf %40, %45 : vector<14x224xf32>
    %c1_49 = arith.constant 1 : index
    %c1_50 = arith.constant 1 : index
    %c0_51 = arith.constant 0 : index
    %47 = vector.load %arg1[%c1_49, %c1_50, %c0_51] : memref<4x16x32xbf16, #tpu.memory_space<vmem>>, vector<1x14x32xbf16>
    %48 = vector.shape_cast %47 : vector<1x14x32xbf16> to vector<14x32xbf16>
    %c8 = arith.constant 8 : index
    %c0_52 = arith.constant 0 : index
    %c0_53 = arith.constant 0 : index
    %49 = vector.load %arg2[%c8, %c0_52, %c0_53] : memref<10x32x224xbf16, #tpu.memory_space<vmem>>, vector<1x32x224xbf16>
    %50 = vector.shape_cast %49 : vector<1x32x224xbf16> to vector<32x224xbf16>
    %cst_54 = arith.constant dense<0.000000e+00> : vector<14x224xf32>
    %51 = tpu.matmul %48, %50, %cst_54 {dimension_numbers = #tpu.dot_dimension_numbers<[1], [0], [0], [1], [0, 0, 1, 1], [], []>} : vector<14x32xbf16>, vector<32x224xbf16>, vector<14x224xf32> -> vector<14x224xf32>
    %52 = arith.addf %46, %51 : vector<14x224xf32>
    %c0_55 = arith.constant 0 : index
    %c2_56 = arith.constant 2 : index
    %c0_57 = arith.constant 0 : index
    %53 = vector.load %arg1[%c0_55, %c2_56, %c0_57] : memref<4x16x32xbf16, #tpu.memory_space<vmem>>, vector<1x14x32xbf16>
    %54 = vector.shape_cast %53 : vector<1x14x32xbf16> to vector<14x32xbf16>
    %c9 = arith.constant 9 : index
    %c0_58 = arith.constant 0 : index
    %c0_59 = arith.constant 0 : index
    %55 = vector.load %arg2[%c9, %c0_58, %c0_59] : memref<10x32x224xbf16, #tpu.memory_space<vmem>>, vector<1x32x224xbf16>
    %56 = vector.shape_cast %55 : vector<1x32x224xbf16> to vector<32x224xbf16>
    %cst_60 = arith.constant dense<0.000000e+00> : vector<14x224xf32>
    %57 = tpu.matmul %54, %56, %cst_60 {dimension_numbers = #tpu.dot_dimension_numbers<[1], [0], [0], [1], [0, 0, 1, 1], [], []>} : vector<14x32xbf16>, vector<32x224xbf16>, vector<14x224xf32> -> vector<14x224xf32>
    %58 = arith.addf %52, %57 : vector<14x224xf32>
    %c1_61 = arith.constant 1 : index
    %c0_62 = arith.constant 0 : index
    %c0_63 = arith.constant 0 : index
    %59 = vector.load %arg1[%c1_61, %c0_62, %c0_63] : memref<4x16x32xbf16, #tpu.memory_space<vmem>>, vector<1x14x32xbf16>
    %60 = vector.shape_cast %59 : vector<1x14x32xbf16> to vector<14x32xbf16>
    %c0_64 = arith.constant 0 : index
    %c0_65 = arith.constant 0 : index
    %c0_66 = arith.constant 0 : index
    %61 = vector.load %arg2[%c0_64, %c0_65, %c0_66] : memref<10x32x224xbf16, #tpu.memory_space<vmem>>, vector<1x32x224xbf16>
    %62 = vector.shape_cast %61 : vector<1x32x224xbf16> to vector<32x224xbf16>
    %cst_67 = arith.constant dense<0.000000e+00> : vector<14x224xf32>
    %63 = tpu.matmul %60, %62, %cst_67 {dimension_numbers = #tpu.dot_dimension_numbers<[1], [0], [0], [1], [0, 0, 1, 1], [], []>} : vector<14x32xbf16>, vector<32x224xbf16>, vector<14x224xf32> -> vector<14x224xf32>
    %c0_68 = arith.constant 0 : index
    %c1_69 = arith.constant 1 : index
    %c0_70 = arith.constant 0 : index
    %64 = vector.load %arg1[%c0_68, %c1_69, %c0_70] : memref<4x16x32xbf16, #tpu.memory_space<vmem>>, vector<1x14x32xbf16>
    %65 = vector.shape_cast %64 : vector<1x14x32xbf16> to vector<14x32xbf16>
    %c1_71 = arith.constant 1 : index
    %c0_72 = arith.constant 0 : index
    %c0_73 = arith.constant 0 : index
    %66 = vector.load %arg2[%c1_71, %c0_72, %c0_73] : memref<10x32x224xbf16, #tpu.memory_space<vmem>>, vector<1x32x224xbf16>
    %67 = vector.shape_cast %66 : vector<1x32x224xbf16> to vector<32x224xbf16>
    %cst_74 = arith.constant dense<0.000000e+00> : vector<14x224xf32>
    %68 = tpu.matmul %65, %67, %cst_74 {dimension_numbers = #tpu.dot_dimension_numbers<[1], [0], [0], [1], [0, 0, 1, 1], [], []>} : vector<14x32xbf16>, vector<32x224xbf16>, vector<14x224xf32> -> vector<14x224xf32>
    %69 = arith.addf %63, %68 : vector<14x224xf32>
    %c1_75 = arith.constant 1 : index
    %c1_76 = arith.constant 1 : index
    %c0_77 = arith.constant 0 : index
    %70 = vector.load %arg1[%c1_75, %c1_76, %c0_77] : memref<4x16x32xbf16, #tpu.memory_space<vmem>>, vector<1x14x32xbf16>
    %71 = vector.shape_cast %70 : vector<1x14x32xbf16> to vector<14x32xbf16>
    %c2_78 = arith.constant 2 : index
    %c0_79 = arith.constant 0 : index
    %c0_80 = arith.constant 0 : index
    %72 = vector.load %arg2[%c2_78, %c0_79, %c0_80] : memref<10x32x224xbf16, #tpu.memory_space<vmem>>, vector<1x32x224xbf16>
    %73 = vector.shape_cast %72 : vector<1x32x224xbf16> to vector<32x224xbf16>
    %cst_81 = arith.constant dense<0.000000e+00> : vector<14x224xf32>
    %74 = tpu.matmul %71, %73, %cst_81 {dimension_numbers = #tpu.dot_dimension_numbers<[1], [0], [0], [1], [0, 0, 1, 1], [], []>} : vector<14x32xbf16>, vector<32x224xbf16>, vector<14x224xf32> -> vector<14x224xf32>
    %75 = arith.addf %69, %74 : vector<14x224xf32>
    %c0_82 = arith.constant 0 : index
    %c2_83 = arith.constant 2 : index
    %c0_84 = arith.constant 0 : index
    %76 = vector.load %arg1[%c0_82, %c2_83, %c0_84] : memref<4x16x32xbf16, #tpu.memory_space<vmem>>, vector<1x14x32xbf16>
    %77 = vector.shape_cast %76 : vector<1x14x32xbf16> to vector<14x32xbf16>
    %c3_85 = arith.constant 3 : index
    %c0_86 = arith.constant 0 : index
    %c0_87 = arith.constant 0 : index
    %78 = vector.load %arg2[%c3_85, %c0_86, %c0_87] : memref<10x32x224xbf16, #tpu.memory_space<vmem>>, vector<1x32x224xbf16>
    %79 = vector.shape_cast %78 : vector<1x32x224xbf16> to vector<32x224xbf16>
    %cst_88 = arith.constant dense<0.000000e+00> : vector<14x224xf32>
    %80 = tpu.matmul %77, %79, %cst_88 {dimension_numbers = #tpu.dot_dimension_numbers<[1], [0], [0], [1], [0, 0, 1, 1], [], []>} : vector<14x32xbf16>, vector<32x224xbf16>, vector<14x224xf32> -> vector<14x224xf32>
    %81 = arith.addf %75, %80 : vector<14x224xf32>
    %c1_89 = arith.constant 1 : index
    %c2_90 = arith.constant 2 : index
    %c0_91 = arith.constant 0 : index
    %82 = vector.load %arg1[%c1_89, %c2_90, %c0_91] : memref<4x16x32xbf16, #tpu.memory_space<vmem>>, vector<1x14x32xbf16>
    %83 = vector.shape_cast %82 : vector<1x14x32xbf16> to vector<14x32xbf16>
    %c4_92 = arith.constant 4 : index
    %c0_93 = arith.constant 0 : index
    %c0_94 = arith.constant 0 : index
    %84 = vector.load %arg2[%c4_92, %c0_93, %c0_94] : memref<10x32x224xbf16, #tpu.memory_space<vmem>>, vector<1x32x224xbf16>
    %85 = vector.shape_cast %84 : vector<1x32x224xbf16> to vector<32x224xbf16>
    %cst_95 = arith.constant dense<0.000000e+00> : vector<14x224xf32>
    %86 = tpu.matmul %83, %85, %cst_95 {dimension_numbers = #tpu.dot_dimension_numbers<[1], [0], [0], [1], [0, 0, 1, 1], [], []>} : vector<14x32xbf16>, vector<32x224xbf16>, vector<14x224xf32> -> vector<14x224xf32>
    %87 = arith.addf %81, %86 : vector<14x224xf32>
    %c1_96 = arith.constant 1 : index
    %c0_97 = arith.constant 0 : index
    %c0_98 = arith.constant 0 : index
    %88 = vector.load %arg1[%c1_96, %c0_97, %c0_98] : memref<4x16x32xbf16, #tpu.memory_space<vmem>>, vector<1x14x32xbf16>
    %89 = vector.shape_cast %88 : vector<1x14x32xbf16> to vector<14x32xbf16>
    %c5_99 = arith.constant 5 : index
    %c0_100 = arith.constant 0 : index
    %c0_101 = arith.constant 0 : index
    %90 = vector.load %arg2[%c5_99, %c0_100, %c0_101] : memref<10x32x224xbf16, #tpu.memory_space<vmem>>, vector<1x32x224xbf16>
    %91 = vector.shape_cast %90 : vector<1x32x224xbf16> to vector<32x224xbf16>
    %cst_102 = arith.constant dense<0.000000e+00> : vector<14x224xf32>
    %92 = tpu.matmul %89, %91, %cst_102 {dimension_numbers = #tpu.dot_dimension_numbers<[1], [0], [0], [1], [0, 0, 1, 1], [], []>} : vector<14x32xbf16>, vector<32x224xbf16>, vector<14x224xf32> -> vector<14x224xf32>
    %c0_103 = arith.constant 0 : index
    %c1_104 = arith.constant 1 : index
    %c0_105 = arith.constant 0 : index
    %93 = vector.load %arg1[%c0_103, %c1_104, %c0_105] : memref<4x16x32xbf16, #tpu.memory_space<vmem>>, vector<1x14x32xbf16>
    %94 = vector.shape_cast %93 : vector<1x14x32xbf16> to vector<14x32xbf16>
    %c6_106 = arith.constant 6 : index
    %c0_107 = arith.constant 0 : index
    %c0_108 = arith.constant 0 : index
    %95 = vector.load %arg2[%c6_106, %c0_107, %c0_108] : memref<10x32x224xbf16, #tpu.memory_space<vmem>>, vector<1x32x224xbf16>
    %96 = vector.shape_cast %95 : vector<1x32x224xbf16> to vector<32x224xbf16>
    %cst_109 = arith.constant dense<0.000000e+00> : vector<14x224xf32>
    %97 = tpu.matmul %94, %96, %cst_109 {dimension_numbers = #tpu.dot_dimension_numbers<[1], [0], [0], [1], [0, 0, 1, 1], [], []>} : vector<14x32xbf16>, vector<32x224xbf16>, vector<14x224xf32> -> vector<14x224xf32>
    %98 = arith.addf %92, %97 : vector<14x224xf32>
    %c1_110 = arith.constant 1 : index
    %c1_111 = arith.constant 1 : index
    %c0_112 = arith.constant 0 : index
    %99 = vector.load %arg1[%c1_110, %c1_111, %c0_112] : memref<4x16x32xbf16, #tpu.memory_space<vmem>>, vector<1x14x32xbf16>
    %100 = vector.shape_cast %99 : vector<1x14x32xbf16> to vector<14x32xbf16>
    %c7_113 = arith.constant 7 : index
    %c0_114 = arith.constant 0 : index
    %c0_115 = arith.constant 0 : index
    %101 = vector.load %arg2[%c7_113, %c0_114, %c0_115] : memref<10x32x224xbf16, #tpu.memory_space<vmem>>, vector<1x32x224xbf16>
    %102 = vector.shape_cast %101 : vector<1x32x224xbf16> to vector<32x224xbf16>
    %cst_116 = arith.constant dense<0.000000e+00> : vector<14x224xf32>
    %103 = tpu.matmul %100, %102, %cst_116 {dimension_numbers = #tpu.dot_dimension_numbers<[1], [0], [0], [1], [0, 0, 1, 1], [], []>} : vector<14x32xbf16>, vector<32x224xbf16>, vector<14x224xf32> -> vector<14x224xf32>
    %104 = arith.addf %98, %103 : vector<14x224xf32>
    %c0_117 = arith.constant 0 : index
    %c2_118 = arith.constant 2 : index
    %c0_119 = arith.constant 0 : index
    %105 = vector.load %arg1[%c0_117, %c2_118, %c0_119] : memref<4x16x32xbf16, #tpu.memory_space<vmem>>, vector<1x14x32xbf16>
    %106 = vector.shape_cast %105 : vector<1x14x32xbf16> to vector<14x32xbf16>
    %c8_120 = arith.constant 8 : index
    %c0_121 = arith.constant 0 : index
    %c0_122 = arith.constant 0 : index
    %107 = vector.load %arg2[%c8_120, %c0_121, %c0_122] : memref<10x32x224xbf16, #tpu.memory_space<vmem>>, vector<1x32x224xbf16>
    %108 = vector.shape_cast %107 : vector<1x32x224xbf16> to vector<32x224xbf16>
    %cst_123 = arith.constant dense<0.000000e+00> : vector<14x224xf32>
    %109 = tpu.matmul %106, %108, %cst_123 {dimension_numbers = #tpu.dot_dimension_numbers<[1], [0], [0], [1], [0, 0, 1, 1], [], []>} : vector<14x32xbf16>, vector<32x224xbf16>, vector<14x224xf32> -> vector<14x224xf32>
    %110 = arith.addf %104, %109 : vector<14x224xf32>
    %c1_124 = arith.constant 1 : index
    %c2_125 = arith.constant 2 : index
    %c0_126 = arith.constant 0 : index
    %111 = vector.load %arg1[%c1_124, %c2_125, %c0_126] : memref<4x16x32xbf16, #tpu.memory_space<vmem>>, vector<1x14x32xbf16>
    %112 = vector.shape_cast %111 : vector<1x14x32xbf16> to vector<14x32xbf16>
    %c9_127 = arith.constant 9 : index
    %c0_128 = arith.constant 0 : index
    %c0_129 = arith.constant 0 : index
    %113 = vector.load %arg2[%c9_127, %c0_128, %c0_129] : memref<10x32x224xbf16, #tpu.memory_space<vmem>>, vector<1x32x224xbf16>
    %114 = vector.shape_cast %113 : vector<1x32x224xbf16> to vector<32x224xbf16>
    %cst_130 = arith.constant dense<0.000000e+00> : vector<14x224xf32>
    %115 = tpu.matmul %112, %114, %cst_130 {dimension_numbers = #tpu.dot_dimension_numbers<[1], [0], [0], [1], [0, 0, 1, 1], [], []>} : vector<14x32xbf16>, vector<32x224xbf16>, vector<14x224xf32> -> vector<14x224xf32>
    %116 = arith.addf %110, %115 : vector<14x224xf32>
    %117 = arith.maximumf %29, %58 : vector<14x224xf32>
    %118 = arith.maximumf %87, %116 : vector<14x224xf32>
    %119 = arith.maximumf %117, %118 : vector<14x224xf32>
    %120 = vector.broadcast %0 : vector<1x224xf32> to vector<14x224xf32>
    %121 = arith.addf %119, %120 : vector<14x224xf32>
    %cst_131 = arith.constant 0.000000e+00 : f32
    %122 = vector.broadcast %cst_131 : f32 to vector<14x224xf32>
    %123 = arith.maximumf %121, %122 : vector<14x224xf32>
    %124 = arith.truncf %123 : vector<14x224xf32> to vector<14x224xbf16>
    %c0_132 = arith.constant 0 : index
    %c0_133 = arith.constant 0 : index
    %c0_134 = arith.constant 0 : index
    %125 = vector.load %arg4[%c0_132, %c0_133, %c0_134] : memref<2x14x224xbf16, #tpu.memory_space<vmem>>, vector<1x14x224xbf16>
    %126 = vector.shape_cast %125 : vector<1x14x224xbf16> to vector<14x224xbf16>
    %127 = vector.shape_cast %124 : vector<14x224xbf16> to vector<1x14x224xbf16>
    tpu.vector_store %arg4[%c0_132, %c0_133, %c0_134], %127 {strides = array<i32>} : memref<2x14x224xbf16, #tpu.memory_space<vmem>>, vector<1x14x224xbf16>,
    %c2_135 = arith.constant 2 : index
    %c0_136 = arith.constant 0 : index
    %c0_137 = arith.constant 0 : index
    %128 = vector.load %arg1[%c2_135, %c0_136, %c0_137] : memref<4x16x32xbf16, #tpu.memory_space<vmem>>, vector<1x14x32xbf16>
    %129 = vector.shape_cast %128 : vector<1x14x32xbf16> to vector<14x32xbf16>
    %c0_138 = arith.constant 0 : index
    %c0_139 = arith.constant 0 : index
    %c0_140 = arith.constant 0 : index
    %130 = vector.load %arg2[%c0_138, %c0_139, %c0_140] : memref<10x32x224xbf16, #tpu.memory_space<vmem>>, vector<1x32x224xbf16>
    %131 = vector.shape_cast %130 : vector<1x32x224xbf16> to vector<32x224xbf16>
    %cst_141 = arith.constant dense<0.000000e+00> : vector<14x224xf32>
    %132 = tpu.matmul %129, %131, %cst_141 {dimension_numbers = #tpu.dot_dimension_numbers<[1], [0], [0], [1], [0, 0, 1, 1], [], []>} : vector<14x32xbf16>, vector<32x224xbf16>, vector<14x224xf32> -> vector<14x224xf32>
    %c3_142 = arith.constant 3 : index
    %c0_143 = arith.constant 0 : index
    %c0_144 = arith.constant 0 : index
    %133 = vector.load %arg1[%c3_142, %c0_143, %c0_144] : memref<4x16x32xbf16, #tpu.memory_space<vmem>>, vector<1x14x32xbf16>
    %134 = vector.shape_cast %133 : vector<1x14x32xbf16> to vector<14x32xbf16>
    %c1_145 = arith.constant 1 : index
    %c0_146 = arith.constant 0 : index
    %c0_147 = arith.constant 0 : index
    %135 = vector.load %arg2[%c1_145, %c0_146, %c0_147] : memref<10x32x224xbf16, #tpu.memory_space<vmem>>, vector<1x32x224xbf16>
    %136 = vector.shape_cast %135 : vector<1x32x224xbf16> to vector<32x224xbf16>
    %cst_148 = arith.constant dense<0.000000e+00> : vector<14x224xf32>
    %137 = tpu.matmul %134, %136, %cst_148 {dimension_numbers = #tpu.dot_dimension_numbers<[1], [0], [0], [1], [0, 0, 1, 1], [], []>} : vector<14x32xbf16>, vector<32x224xbf16>, vector<14x224xf32> -> vector<14x224xf32>
    %138 = arith.addf %132, %137 : vector<14x224xf32>
    %c2_149 = arith.constant 2 : index
    %c1_150 = arith.constant 1 : index
    %c0_151 = arith.constant 0 : index
    %139 = vector.load %arg1[%c2_149, %c1_150, %c0_151] : memref<4x16x32xbf16, #tpu.memory_space<vmem>>, vector<1x14x32xbf16>
    %140 = vector.shape_cast %139 : vector<1x14x32xbf16> to vector<14x32xbf16>
    %c2_152 = arith.constant 2 : index
    %c0_153 = arith.constant 0 : index
    %c0_154 = arith.constant 0 : index
    %141 = vector.load %arg2[%c2_152, %c0_153, %c0_154] : memref<10x32x224xbf16, #tpu.memory_space<vmem>>, vector<1x32x224xbf16>
    %142 = vector.shape_cast %141 : vector<1x32x224xbf16> to vector<32x224xbf16>
    %cst_155 = arith.constant dense<0.000000e+00> : vector<14x224xf32>
    %143 = tpu.matmul %140, %142, %cst_155 {dimension_numbers = #tpu.dot_dimension_numbers<[1], [0], [0], [1], [0, 0, 1, 1], [], []>} : vector<14x32xbf16>, vector<32x224xbf16>, vector<14x224xf32> -> vector<14x224xf32>
    %144 = arith.addf %138, %143 : vector<14x224xf32>
    %c3_156 = arith.constant 3 : index
    %c1_157 = arith.constant 1 : index
    %c0_158 = arith.constant 0 : index
    %145 = vector.load %arg1[%c3_156, %c1_157, %c0_158] : memref<4x16x32xbf16, #tpu.memory_space<vmem>>, vector<1x14x32xbf16>
    %146 = vector.shape_cast %145 : vector<1x14x32xbf16> to vector<14x32xbf16>
    %c3_159 = arith.constant 3 : index
    %c0_160 = arith.constant 0 : index
    %c0_161 = arith.constant 0 : index
    %147 = vector.load %arg2[%c3_159, %c0_160, %c0_161] : memref<10x32x224xbf16, #tpu.memory_space<vmem>>, vector<1x32x224xbf16>
    %148 = vector.shape_cast %147 : vector<1x32x224xbf16> to vector<32x224xbf16>
    %cst_162 = arith.constant dense<0.000000e+00> : vector<14x224xf32>
    %149 = tpu.matmul %146, %148, %cst_162 {dimension_numbers = #tpu.dot_dimension_numbers<[1], [0], [0], [1], [0, 0, 1, 1], [], []>} : vector<14x32xbf16>, vector<32x224xbf16>, vector<14x224xf32> -> vector<14x224xf32>
    %150 = arith.addf %144, %149 : vector<14x224xf32>
    %c2_163 = arith.constant 2 : index
    %c2_164 = arith.constant 2 : index
    %c0_165 = arith.constant 0 : index
    %151 = vector.load %arg1[%c2_163, %c2_164, %c0_165] : memref<4x16x32xbf16, #tpu.memory_space<vmem>>, vector<1x14x32xbf16>
    %152 = vector.shape_cast %151 : vector<1x14x32xbf16> to vector<14x32xbf16>
    %c4_166 = arith.constant 4 : index
    %c0_167 = arith.constant 0 : index
    %c0_168 = arith.constant 0 : index
    %153 = vector.load %arg2[%c4_166, %c0_167, %c0_168] : memref<10x32x224xbf16, #tpu.memory_space<vmem>>, vector<1x32x224xbf16>
    %154 = vector.shape_cast %153 : vector<1x32x224xbf16> to vector<32x224xbf16>
    %cst_169 = arith.constant dense<0.000000e+00> : vector<14x224xf32>
    %155 = tpu.matmul %152, %154, %cst_169 {dimension_numbers = #tpu.dot_dimension_numbers<[1], [0], [0], [1], [0, 0, 1, 1], [], []>} : vector<14x32xbf16>, vector<32x224xbf16>, vector<14x224xf32> -> vector<14x224xf32>
    %156 = arith.addf %150, %155 : vector<14x224xf32>
    %c2_170 = arith.constant 2 : index
    %c0_171 = arith.constant 0 : index
    %c0_172 = arith.constant 0 : index
    %157 = vector.load %arg1[%c2_170, %c0_171, %c0_172] : memref<4x16x32xbf16, #tpu.memory_space<vmem>>, vector<1x14x32xbf16>
    %158 = vector.shape_cast %157 : vector<1x14x32xbf16> to vector<14x32xbf16>
    %c5_173 = arith.constant 5 : index
    %c0_174 = arith.constant 0 : index
    %c0_175 = arith.constant 0 : index
    %159 = vector.load %arg2[%c5_173, %c0_174, %c0_175] : memref<10x32x224xbf16, #tpu.memory_space<vmem>>, vector<1x32x224xbf16>
    %160 = vector.shape_cast %159 : vector<1x32x224xbf16> to vector<32x224xbf16>
    %cst_176 = arith.constant dense<0.000000e+00> : vector<14x224xf32>
    %161 = tpu.matmul %158, %160, %cst_176 {dimension_numbers = #tpu.dot_dimension_numbers<[1], [0], [0], [1], [0, 0, 1, 1], [], []>} : vector<14x32xbf16>, vector<32x224xbf16>, vector<14x224xf32> -> vector<14x224xf32>
    %c3_177 = arith.constant 3 : index
    %c0_178 = arith.constant 0 : index
    %c0_179 = arith.constant 0 : index
    %162 = vector.load %arg1[%c3_177, %c0_178, %c0_179] : memref<4x16x32xbf16, #tpu.memory_space<vmem>>, vector<1x14x32xbf16>
    %163 = vector.shape_cast %162 : vector<1x14x32xbf16> to vector<14x32xbf16>
    %c6_180 = arith.constant 6 : index
    %c0_181 = arith.constant 0 : index
    %c0_182 = arith.constant 0 : index
    %164 = vector.load %arg2[%c6_180, %c0_181, %c0_182] : memref<10x32x224xbf16, #tpu.memory_space<vmem>>, vector<1x32x224xbf16>
    %165 = vector.shape_cast %164 : vector<1x32x224xbf16> to vector<32x224xbf16>
    %cst_183 = arith.constant dense<0.000000e+00> : vector<14x224xf32>
    %166 = tpu.matmul %163, %165, %cst_183 {dimension_numbers = #tpu.dot_dimension_numbers<[1], [0], [0], [1], [0, 0, 1, 1], [], []>} : vector<14x32xbf16>, vector<32x224xbf16>, vector<14x224xf32> -> vector<14x224xf32>
    %167 = arith.addf %161, %166 : vector<14x224xf32>
    %c2_184 = arith.constant 2 : index
    %c1_185 = arith.constant 1 : index
    %c0_186 = arith.constant 0 : index
    %168 = vector.load %arg1[%c2_184, %c1_185, %c0_186] : memref<4x16x32xbf16, #tpu.memory_space<vmem>>, vector<1x14x32xbf16>
    %169 = vector.shape_cast %168 : vector<1x14x32xbf16> to vector<14x32xbf16>
    %c7_187 = arith.constant 7 : index
    %c0_188 = arith.constant 0 : index
    %c0_189 = arith.constant 0 : index
    %170 = vector.load %arg2[%c7_187, %c0_188, %c0_189] : memref<10x32x224xbf16, #tpu.memory_space<vmem>>, vector<1x32x224xbf16>
    %171 = vector.shape_cast %170 : vector<1x32x224xbf16> to vector<32x224xbf16>
    %cst_190 = arith.constant dense<0.000000e+00> : vector<14x224xf32>
    %172 = tpu.matmul %169, %171, %cst_190 {dimension_numbers = #tpu.dot_dimension_numbers<[1], [0], [0], [1], [0, 0, 1, 1], [], []>} : vector<14x32xbf16>, vector<32x224xbf16>, vector<14x224xf32> -> vector<14x224xf32>
    %173 = arith.addf %167, %172 : vector<14x224xf32>
    %c3_191 = arith.constant 3 : index
    %c1_192 = arith.constant 1 : index
    %c0_193 = arith.constant 0 : index
    %174 = vector.load %arg1[%c3_191, %c1_192, %c0_193] : memref<4x16x32xbf16, #tpu.memory_space<vmem>>, vector<1x14x32xbf16>
    %175 = vector.shape_cast %174 : vector<1x14x32xbf16> to vector<14x32xbf16>
    %c8_194 = arith.constant 8 : index
    %c0_195 = arith.constant 0 : index
    %c0_196 = arith.constant 0 : index
    %176 = vector.load %arg2[%c8_194, %c0_195, %c0_196] : memref<10x32x224xbf16, #tpu.memory_space<vmem>>, vector<1x32x224xbf16>
    %177 = vector.shape_cast %176 : vector<1x32x224xbf16> to vector<32x224xbf16>
    %cst_197 = arith.constant dense<0.000000e+00> : vector<14x224xf32>
    %178 = tpu.matmul %175, %177, %cst_197 {dimension_numbers = #tpu.dot_dimension_numbers<[1], [0], [0], [1], [0, 0, 1, 1], [], []>} : vector<14x32xbf16>, vector<32x224xbf16>, vector<14x224xf32> -> vector<14x224xf32>
    %179 = arith.addf %173, %178 : vector<14x224xf32>
    %c2_198 = arith.constant 2 : index
    %c2_199 = arith.constant 2 : index
    %c0_200 = arith.constant 0 : index
    %180 = vector.load %arg1[%c2_198, %c2_199, %c0_200] : memref<4x16x32xbf16, #tpu.memory_space<vmem>>, vector<1x14x32xbf16>
    %181 = vector.shape_cast %180 : vector<1x14x32xbf16> to vector<14x32xbf16>
    %c9_201 = arith.constant 9 : index
    %c0_202 = arith.constant 0 : index
    %c0_203 = arith.constant 0 : index
    %182 = vector.load %arg2[%c9_201, %c0_202, %c0_203] : memref<10x32x224xbf16, #tpu.memory_space<vmem>>, vector<1x32x224xbf16>
    %183 = vector.shape_cast %182 : vector<1x32x224xbf16> to vector<32x224xbf16>
    %cst_204 = arith.constant dense<0.000000e+00> : vector<14x224xf32>
    %184 = tpu.matmul %181, %183, %cst_204 {dimension_numbers = #tpu.dot_dimension_numbers<[1], [0], [0], [1], [0, 0, 1, 1], [], []>} : vector<14x32xbf16>, vector<32x224xbf16>, vector<14x224xf32> -> vector<14x224xf32>
    %185 = arith.addf %179, %184 : vector<14x224xf32>
    %c3_205 = arith.constant 3 : index
    %c0_206 = arith.constant 0 : index
    %c0_207 = arith.constant 0 : index
    %186 = vector.load %arg1[%c3_205, %c0_206, %c0_207] : memref<4x16x32xbf16, #tpu.memory_space<vmem>>, vector<1x14x32xbf16>
    %187 = vector.shape_cast %186 : vector<1x14x32xbf16> to vector<14x32xbf16>
    %c0_208 = arith.constant 0 : index
    %c0_209 = arith.constant 0 : index
    %c0_210 = arith.constant 0 : index
    %188 = vector.load %arg2[%c0_208, %c0_209, %c0_210] : memref<10x32x224xbf16, #tpu.memory_space<vmem>>, vector<1x32x224xbf16>
    %189 = vector.shape_cast %188 : vector<1x32x224xbf16> to vector<32x224xbf16>
    %cst_211 = arith.constant dense<0.000000e+00> : vector<14x224xf32>
    %190 = tpu.matmul %187, %189, %cst_211 {dimension_numbers = #tpu.dot_dimension_numbers<[1], [0], [0], [1], [0, 0, 1, 1], [], []>} : vector<14x32xbf16>, vector<32x224xbf16>, vector<14x224xf32> -> vector<14x224xf32>
    %c2_212 = arith.constant 2 : index
    %c1_213 = arith.constant 1 : index
    %c0_214 = arith.constant 0 : index
    %191 = vector.load %arg1[%c2_212, %c1_213, %c0_214] : memref<4x16x32xbf16, #tpu.memory_space<vmem>>, vector<1x14x32xbf16>
    %192 = vector.shape_cast %191 : vector<1x14x32xbf16> to vector<14x32xbf16>
    %c1_215 = arith.constant 1 : index
    %c0_216 = arith.constant 0 : index
    %c0_217 = arith.constant 0 : index
    %193 = vector.load %arg2[%c1_215, %c0_216, %c0_217] : memref<10x32x224xbf16, #tpu.memory_space<vmem>>, vector<1x32x224xbf16>
    %194 = vector.shape_cast %193 : vector<1x32x224xbf16> to vector<32x224xbf16>
    %cst_218 = arith.constant dense<0.000000e+00> : vector<14x224xf32>
    %195 = tpu.matmul %192, %194, %cst_218 {dimension_numbers = #tpu.dot_dimension_numbers<[1], [0], [0], [1], [0, 0, 1, 1], [], []>} : vector<14x32xbf16>, vector<32x224xbf16>, vector<14x224xf32> -> vector<14x224xf32>
    %196 = arith.addf %190, %195 : vector<14x224xf32>
    %c3_219 = arith.constant 3 : index
    %c1_220 = arith.constant 1 : index
    %c0_221 = arith.constant 0 : index
    %197 = vector.load %arg1[%c3_219, %c1_220, %c0_221] : memref<4x16x32xbf16, #tpu.memory_space<vmem>>, vector<1x14x32xbf16>
    %198 = vector.shape_cast %197 : vector<1x14x32xbf16> to vector<14x32xbf16>
    %c2_222 = arith.constant 2 : index
    %c0_223 = arith.constant 0 : index
    %c0_224 = arith.constant 0 : index
    %199 = vector.load %arg2[%c2_222, %c0_223, %c0_224] : memref<10x32x224xbf16, #tpu.memory_space<vmem>>, vector<1x32x224xbf16>
    %200 = vector.shape_cast %199 : vector<1x32x224xbf16> to vector<32x224xbf16>
    %cst_225 = arith.constant dense<0.000000e+00> : vector<14x224xf32>
    %201 = tpu.matmul %198, %200, %cst_225 {dimension_numbers = #tpu.dot_dimension_numbers<[1], [0], [0], [1], [0, 0, 1, 1], [], []>} : vector<14x32xbf16>, vector<32x224xbf16>, vector<14x224xf32> -> vector<14x224xf32>
    %202 = arith.addf %196, %201 : vector<14x224xf32>
    %c2_226 = arith.constant 2 : index
    %c2_227 = arith.constant 2 : index
    %c0_228 = arith.constant 0 : index
    %203 = vector.load %arg1[%c2_226, %c2_227, %c0_228] : memref<4x16x32xbf16, #tpu.memory_space<vmem>>, vector<1x14x32xbf16>
    %204 = vector.shape_cast %203 : vector<1x14x32xbf16> to vector<14x32xbf16>
    %c3_229 = arith.constant 3 : index
    %c0_230 = arith.constant 0 : index
    %c0_231 = arith.constant 0 : index
    %205 = vector.load %arg2[%c3_229, %c0_230, %c0_231] : memref<10x32x224xbf16, #tpu.memory_space<vmem>>, vector<1x32x224xbf16>
    %206 = vector.shape_cast %205 : vector<1x32x224xbf16> to vector<32x224xbf16>
    %cst_232 = arith.constant dense<0.000000e+00> : vector<14x224xf32>
    %207 = tpu.matmul %204, %206, %cst_232 {dimension_numbers = #tpu.dot_dimension_numbers<[1], [0], [0], [1], [0, 0, 1, 1], [], []>} : vector<14x32xbf16>, vector<32x224xbf16>, vector<14x224xf32> -> vector<14x224xf32>
    %208 = arith.addf %202, %207 : vector<14x224xf32>
    %c3_233 = arith.constant 3 : index
    %c2_234 = arith.constant 2 : index
    %c0_235 = arith.constant 0 : index
    %209 = vector.load %arg1[%c3_233, %c2_234, %c0_235] : memref<4x16x32xbf16, #tpu.memory_space<vmem>>, vector<1x14x32xbf16>
    %210 = vector.shape_cast %209 : vector<1x14x32xbf16> to vector<14x32xbf16>
    %c4_236 = arith.constant 4 : index
    %c0_237 = arith.constant 0 : index
    %c0_238 = arith.constant 0 : index
    %211 = vector.load %arg2[%c4_236, %c0_237, %c0_238] : memref<10x32x224xbf16, #tpu.memory_space<vmem>>, vector<1x32x224xbf16>
    %212 = vector.shape_cast %211 : vector<1x32x224xbf16> to vector<32x224xbf16>
    %cst_239 = arith.constant dense<0.000000e+00> : vector<14x224xf32>
    %213 = tpu.matmul %210, %212, %cst_239 {dimension_numbers = #tpu.dot_dimension_numbers<[1], [0], [0], [1], [0, 0, 1, 1], [], []>} : vector<14x32xbf16>, vector<32x224xbf16>, vector<14x224xf32> -> vector<14x224xf32>
    %214 = arith.addf %208, %213 : vector<14x224xf32>
    %c3_240 = arith.constant 3 : index
    %c0_241 = arith.constant 0 : index
    %c0_242 = arith.constant 0 : index
    %215 = vector.load %arg1[%c3_240, %c0_241, %c0_242] : memref<4x16x32xbf16, #tpu.memory_space<vmem>>, vector<1x14x32xbf16>
    %216 = vector.shape_cast %215 : vector<1x14x32xbf16> to vector<14x32xbf16>
    %c5_243 = arith.constant 5 : index
    %c0_244 = arith.constant 0 : index
    %c0_245 = arith.constant 0 : index
    %217 = vector.load %arg2[%c5_243, %c0_244, %c0_245] : memref<10x32x224xbf16, #tpu.memory_space<vmem>>, vector<1x32x224xbf16>
    %218 = vector.shape_cast %217 : vector<1x32x224xbf16> to vector<32x224xbf16>
    %cst_246 = arith.constant dense<0.000000e+00> : vector<14x224xf32>
    %219 = tpu.matmul %216, %218, %cst_246 {dimension_numbers = #tpu.dot_dimension_numbers<[1], [0], [0], [1], [0, 0, 1, 1], [], []>} : vector<14x32xbf16>, vector<32x224xbf16>, vector<14x224xf32> -> vector<14x224xf32>
    %c2_247 = arith.constant 2 : index
    %c1_248 = arith.constant 1 : index
    %c0_249 = arith.constant 0 : index
    %220 = vector.load %arg1[%c2_247, %c1_248, %c0_249] : memref<4x16x32xbf16, #tpu.memory_space<vmem>>, vector<1x14x32xbf16>
    %221 = vector.shape_cast %220 : vector<1x14x32xbf16> to vector<14x32xbf16>
    %c6_250 = arith.constant 6 : index
    %c0_251 = arith.constant 0 : index
    %c0_252 = arith.constant 0 : index
    %222 = vector.load %arg2[%c6_250, %c0_251, %c0_252] : memref<10x32x224xbf16, #tpu.memory_space<vmem>>, vector<1x32x224xbf16>
    %223 = vector.shape_cast %222 : vector<1x32x224xbf16> to vector<32x224xbf16>
    %cst_253 = arith.constant dense<0.000000e+00> : vector<14x224xf32>
    %224 = tpu.matmul %221, %223, %cst_253 {dimension_numbers = #tpu.dot_dimension_numbers<[1], [0], [0], [1], [0, 0, 1, 1], [], []>} : vector<14x32xbf16>, vector<32x224xbf16>, vector<14x224xf32> -> vector<14x224xf32>
    %225 = arith.addf %219, %224 : vector<14x224xf32>
    %c3_254 = arith.constant 3 : index
    %c1_255 = arith.constant 1 : index
    %c0_256 = arith.constant 0 : index
    %226 = vector.load %arg1[%c3_254, %c1_255, %c0_256] : memref<4x16x32xbf16, #tpu.memory_space<vmem>>, vector<1x14x32xbf16>
    %227 = vector.shape_cast %226 : vector<1x14x32xbf16> to vector<14x32xbf16>
    %c7_257 = arith.constant 7 : index
    %c0_258 = arith.constant 0 : index
    %c0_259 = arith.constant 0 : index
    %228 = vector.load %arg2[%c7_257, %c0_258, %c0_259] : memref<10x32x224xbf16, #tpu.memory_space<vmem>>, vector<1x32x224xbf16>
    %229 = vector.shape_cast %228 : vector<1x32x224xbf16> to vector<32x224xbf16>
    %cst_260 = arith.constant dense<0.000000e+00> : vector<14x224xf32>
    %230 = tpu.matmul %227, %229, %cst_260 {dimension_numbers = #tpu.dot_dimension_numbers<[1], [0], [0], [1], [0, 0, 1, 1], [], []>} : vector<14x32xbf16>, vector<32x224xbf16>, vector<14x224xf32> -> vector<14x224xf32>
    %231 = arith.addf %225, %230 : vector<14x224xf32>
    %c2_261 = arith.constant 2 : index
    %c2_262 = arith.constant 2 : index
    %c0_263 = arith.constant 0 : index
    %232 = vector.load %arg1[%c2_261, %c2_262, %c0_263] : memref<4x16x32xbf16, #tpu.memory_space<vmem>>, vector<1x14x32xbf16>
    %233 = vector.shape_cast %232 : vector<1x14x32xbf16> to vector<14x32xbf16>
    %c8_264 = arith.constant 8 : index
    %c0_265 = arith.constant 0 : index
    %c0_266 = arith.constant 0 : index
    %234 = vector.load %arg2[%c8_264, %c0_265, %c0_266] : memref<10x32x224xbf16, #tpu.memory_space<vmem>>, vector<1x32x224xbf16>
    %235 = vector.shape_cast %234 : vector<1x32x224xbf16> to vector<32x224xbf16>
    %cst_267 = arith.constant dense<0.000000e+00> : vector<14x224xf32>
    %236 = tpu.matmul %233, %235, %cst_267 {dimension_numbers = #tpu.dot_dimension_numbers<[1], [0], [0], [1], [0, 0, 1, 1], [], []>} : vector<14x32xbf16>, vector<32x224xbf16>, vector<14x224xf32> -> vector<14x224xf32>
    %237 = arith.addf %231, %236 : vector<14x224xf32>
    %c3_268 = arith.constant 3 : index
    %c2_269 = arith.constant 2 : index
    %c0_270 = arith.constant 0 : index
    %238 = vector.load %arg1[%c3_268, %c2_269, %c0_270] : memref<4x16x32xbf16, #tpu.memory_space<vmem>>, vector<1x14x32xbf16>
    %239 = vector.shape_cast %238 : vector<1x14x32xbf16> to vector<14x32xbf16>
    %c9_271 = arith.constant 9 : index
    %c0_272 = arith.constant 0 : index
    %c0_273 = arith.constant 0 : index
    %240 = vector.load %arg2[%c9_271, %c0_272, %c0_273] : memref<10x32x224xbf16, #tpu.memory_space<vmem>>, vector<1x32x224xbf16>
    %241 = vector.shape_cast %240 : vector<1x32x224xbf16> to vector<32x224xbf16>
    %cst_274 = arith.constant dense<0.000000e+00> : vector<14x224xf32>
    %242 = tpu.matmul %239, %241, %cst_274 {dimension_numbers = #tpu.dot_dimension_numbers<[1], [0], [0], [1], [0, 0, 1, 1], [], []>} : vector<14x32xbf16>, vector<32x224xbf16>, vector<14x224xf32> -> vector<14x224xf32>
    %243 = arith.addf %237, %242 : vector<14x224xf32>
    %244 = arith.maximumf %156, %185 : vector<14x224xf32>
    %245 = arith.maximumf %214, %243 : vector<14x224xf32>
    %246 = arith.maximumf %244, %245 : vector<14x224xf32>
    %247 = vector.broadcast %0 : vector<1x224xf32> to vector<14x224xf32>
    %248 = arith.addf %246, %247 : vector<14x224xf32>
    %cst_275 = arith.constant 0.000000e+00 : f32
    %249 = vector.broadcast %cst_275 : f32 to vector<14x224xf32>
    %250 = arith.maximumf %248, %249 : vector<14x224xf32>
    %251 = arith.truncf %250 : vector<14x224xf32> to vector<14x224xbf16>
    %c1_276 = arith.constant 1 : index
    %c0_277 = arith.constant 0 : index
    %c0_278 = arith.constant 0 : index
    %252 = vector.load %arg4[%c1_276, %c0_277, %c0_278] : memref<2x14x224xbf16, #tpu.memory_space<vmem>>, vector<1x14x224xbf16>
    %253 = vector.shape_cast %252 : vector<1x14x224xbf16> to vector<14x224xbf16>
    %254 = vector.shape_cast %251 : vector<14x224xbf16> to vector<1x14x224xbf16>
    tpu.vector_store %arg4[%c1_276, %c0_277, %c0_278], %254 {strides = array<i32>} : memref<2x14x224xbf16, #tpu.memory_space<vmem>>, vector<1x14x224xbf16>,
    return
  }
  func.func @transform_0(%arg0: i32) -> (i32, i32, i32) {
    %c0_i32 = arith.constant 0 : i32
    %c0_i32_0 = arith.constant 0 : i32
    %c0_i32_1 = arith.constant 0 : i32
    return %arg0, %c0_i32, %c0_i32_0 : i32, i32, i32
  }
  func.func @transform_1(%arg0: i32) -> (i32, i32, i32) {
    %c0_i32 = arith.constant 0 : i32
    %c0_i32_0 = arith.constant 0 : i32
    %c0_i32_1 = arith.constant 0 : i32
    %c0_i32_2 = arith.constant 0 : i32
    return %c0_i32, %c0_i32_0, %c0_i32_1 : i32, i32, i32
  }
  func.func @transform_2(%arg0: i32) -> (i32, i32) {
    %c0_i32 = arith.constant 0 : i32
    %c0_i32_0 = arith.constant 0 : i32
    %c0_i32_1 = arith.constant 0 : i32
    return %c0_i32, %c0_i32_0 : i32, i32
  }
  func.func @transform_3(%arg0: i32) -> (i32, i32, i32) {
    %c0_i32 = arith.constant 0 : i32
    %c0_i32_0 = arith.constant 0 : i32
    %c0_i32_1 = arith.constant 0 : i32
    return %arg0, %c0_i32, %c0_i32_0 : i32, i32, i32
  }
}

module attributes {stable_mosaic.version = 11 : i64} {
  func.func @conv_relu_pool_kernel(%arg0: i32, %arg1: memref<4x9x288xbf16, #tpu.memory_space<vmem>>, %arg2: memref<10x288x224xbf16, #tpu.memory_space<vmem>>, %arg3: memref<1x224xf32, #tpu.memory_space<vmem>>, %arg4: memref<2x7x224xbf16, #tpu.memory_space<vmem>>) attributes {dimension_semantics = [#tpu.dimension_semantics<parallel>], iteration_bounds = array<i64: 1>, scalar_prefetch = 0 : i64, scratch_operands = 0 : i64, tpu.core_type = #tpu.core_type<tc>, window_params = [{transform_indices = @transform_0, window_bounds = array<i64: 4, 9, 288>}, {pipeline_mode = #tpu.pipeline_mode<synchronous>, transform_indices = @transform_1, window_bounds = array<i64: 10, 288, 224>}, {pipeline_mode = #tpu.pipeline_mode<synchronous>, transform_indices = @transform_2, window_bounds = array<i64: 1, 224>}, {transform_indices = @transform_3, window_bounds = array<i64: 2, 7, 224>}]} {
    %c0 = arith.constant 0 : index
    %c0_0 = arith.constant 0 : index
    %0 = vector.load %arg3[%c0, %c0_0] : memref<1x224xf32, #tpu.memory_space<vmem>>, vector<1x224xf32>
    %c0_1 = arith.constant 0 : index
    %c0_2 = arith.constant 0 : index
    %c0_3 = arith.constant 0 : index
    %1 = vector.load %arg1[%c0_1, %c0_2, %c0_3] : memref<4x9x288xbf16, #tpu.memory_space<vmem>>, vector<1x7x288xbf16>
    %2 = vector.shape_cast %1 : vector<1x7x288xbf16> to vector<7x288xbf16>
    %c0_4 = arith.constant 0 : index
    %c0_5 = arith.constant 0 : index
    %c0_6 = arith.constant 0 : index
    %3 = vector.load %arg2[%c0_4, %c0_5, %c0_6] : memref<10x288x224xbf16, #tpu.memory_space<vmem>>, vector<1x288x224xbf16>
    %4 = vector.shape_cast %3 : vector<1x288x224xbf16> to vector<288x224xbf16>
    %cst = arith.constant dense<0.000000e+00> : vector<7x224xf32>
    %5 = tpu.matmul %2, %4, %cst {dimension_numbers = #tpu.dot_dimension_numbers<[1], [0], [0], [1], [0, 0, 1, 1], [], []>} : vector<7x288xbf16>, vector<288x224xbf16>, vector<7x224xf32> -> vector<7x224xf32>
    %c1 = arith.constant 1 : index
    %c0_7 = arith.constant 0 : index
    %c0_8 = arith.constant 0 : index
    %6 = vector.load %arg1[%c1, %c0_7, %c0_8] : memref<4x9x288xbf16, #tpu.memory_space<vmem>>, vector<1x7x288xbf16>
    %7 = vector.shape_cast %6 : vector<1x7x288xbf16> to vector<7x288xbf16>
    %c1_9 = arith.constant 1 : index
    %c0_10 = arith.constant 0 : index
    %c0_11 = arith.constant 0 : index
    %8 = vector.load %arg2[%c1_9, %c0_10, %c0_11] : memref<10x288x224xbf16, #tpu.memory_space<vmem>>, vector<1x288x224xbf16>
    %9 = vector.shape_cast %8 : vector<1x288x224xbf16> to vector<288x224xbf16>
    %cst_12 = arith.constant dense<0.000000e+00> : vector<7x224xf32>
    %10 = tpu.matmul %7, %9, %cst_12 {dimension_numbers = #tpu.dot_dimension_numbers<[1], [0], [0], [1], [0, 0, 1, 1], [], []>} : vector<7x288xbf16>, vector<288x224xbf16>, vector<7x224xf32> -> vector<7x224xf32>
    %11 = arith.addf %5, %10 : vector<7x224xf32>
    %c0_13 = arith.constant 0 : index
    %c1_14 = arith.constant 1 : index
    %c0_15 = arith.constant 0 : index
    %12 = vector.load %arg1[%c0_13, %c1_14, %c0_15] : memref<4x9x288xbf16, #tpu.memory_space<vmem>>, vector<1x7x288xbf16>
    %13 = vector.shape_cast %12 : vector<1x7x288xbf16> to vector<7x288xbf16>
    %c2 = arith.constant 2 : index
    %c0_16 = arith.constant 0 : index
    %c0_17 = arith.constant 0 : index
    %14 = vector.load %arg2[%c2, %c0_16, %c0_17] : memref<10x288x224xbf16, #tpu.memory_space<vmem>>, vector<1x288x224xbf16>
    %15 = vector.shape_cast %14 : vector<1x288x224xbf16> to vector<288x224xbf16>
    %cst_18 = arith.constant dense<0.000000e+00> : vector<7x224xf32>
    %16 = tpu.matmul %13, %15, %cst_18 {dimension_numbers = #tpu.dot_dimension_numbers<[1], [0], [0], [1], [0, 0, 1, 1], [], []>} : vector<7x288xbf16>, vector<288x224xbf16>, vector<7x224xf32> -> vector<7x224xf32>
    %17 = arith.addf %11, %16 : vector<7x224xf32>
    %c1_19 = arith.constant 1 : index
    %c1_20 = arith.constant 1 : index
    %c0_21 = arith.constant 0 : index
    %18 = vector.load %arg1[%c1_19, %c1_20, %c0_21] : memref<4x9x288xbf16, #tpu.memory_space<vmem>>, vector<1x7x288xbf16>
    %19 = vector.shape_cast %18 : vector<1x7x288xbf16> to vector<7x288xbf16>
    %c3 = arith.constant 3 : index
    %c0_22 = arith.constant 0 : index
    %c0_23 = arith.constant 0 : index
    %20 = vector.load %arg2[%c3, %c0_22, %c0_23] : memref<10x288x224xbf16, #tpu.memory_space<vmem>>, vector<1x288x224xbf16>
    %21 = vector.shape_cast %20 : vector<1x288x224xbf16> to vector<288x224xbf16>
    %cst_24 = arith.constant dense<0.000000e+00> : vector<7x224xf32>
    %22 = tpu.matmul %19, %21, %cst_24 {dimension_numbers = #tpu.dot_dimension_numbers<[1], [0], [0], [1], [0, 0, 1, 1], [], []>} : vector<7x288xbf16>, vector<288x224xbf16>, vector<7x224xf32> -> vector<7x224xf32>
    %23 = arith.addf %17, %22 : vector<7x224xf32>
    %c0_25 = arith.constant 0 : index
    %c2_26 = arith.constant 2 : index
    %c0_27 = arith.constant 0 : index
    %24 = vector.load %arg1[%c0_25, %c2_26, %c0_27] : memref<4x9x288xbf16, #tpu.memory_space<vmem>>, vector<1x7x288xbf16>
    %25 = vector.shape_cast %24 : vector<1x7x288xbf16> to vector<7x288xbf16>
    %c4 = arith.constant 4 : index
    %c0_28 = arith.constant 0 : index
    %c0_29 = arith.constant 0 : index
    %26 = vector.load %arg2[%c4, %c0_28, %c0_29] : memref<10x288x224xbf16, #tpu.memory_space<vmem>>, vector<1x288x224xbf16>
    %27 = vector.shape_cast %26 : vector<1x288x224xbf16> to vector<288x224xbf16>
    %cst_30 = arith.constant dense<0.000000e+00> : vector<7x224xf32>
    %28 = tpu.matmul %25, %27, %cst_30 {dimension_numbers = #tpu.dot_dimension_numbers<[1], [0], [0], [1], [0, 0, 1, 1], [], []>} : vector<7x288xbf16>, vector<288x224xbf16>, vector<7x224xf32> -> vector<7x224xf32>
    %29 = arith.addf %23, %28 : vector<7x224xf32>
    %c0_31 = arith.constant 0 : index
    %c0_32 = arith.constant 0 : index
    %c0_33 = arith.constant 0 : index
    %30 = vector.load %arg1[%c0_31, %c0_32, %c0_33] : memref<4x9x288xbf16, #tpu.memory_space<vmem>>, vector<1x7x288xbf16>
    %31 = vector.shape_cast %30 : vector<1x7x288xbf16> to vector<7x288xbf16>
    %c5 = arith.constant 5 : index
    %c0_34 = arith.constant 0 : index
    %c0_35 = arith.constant 0 : index
    %32 = vector.load %arg2[%c5, %c0_34, %c0_35] : memref<10x288x224xbf16, #tpu.memory_space<vmem>>, vector<1x288x224xbf16>
    %33 = vector.shape_cast %32 : vector<1x288x224xbf16> to vector<288x224xbf16>
    %cst_36 = arith.constant dense<0.000000e+00> : vector<7x224xf32>
    %34 = tpu.matmul %31, %33, %cst_36 {dimension_numbers = #tpu.dot_dimension_numbers<[1], [0], [0], [1], [0, 0, 1, 1], [], []>} : vector<7x288xbf16>, vector<288x224xbf16>, vector<7x224xf32> -> vector<7x224xf32>
    %c1_37 = arith.constant 1 : index
    %c0_38 = arith.constant 0 : index
    %c0_39 = arith.constant 0 : index
    %35 = vector.load %arg1[%c1_37, %c0_38, %c0_39] : memref<4x9x288xbf16, #tpu.memory_space<vmem>>, vector<1x7x288xbf16>
    %36 = vector.shape_cast %35 : vector<1x7x288xbf16> to vector<7x288xbf16>
    %c6 = arith.constant 6 : index
    %c0_40 = arith.constant 0 : index
    %c0_41 = arith.constant 0 : index
    %37 = vector.load %arg2[%c6, %c0_40, %c0_41] : memref<10x288x224xbf16, #tpu.memory_space<vmem>>, vector<1x288x224xbf16>
    %38 = vector.shape_cast %37 : vector<1x288x224xbf16> to vector<288x224xbf16>
    %cst_42 = arith.constant dense<0.000000e+00> : vector<7x224xf32>
    %39 = tpu.matmul %36, %38, %cst_42 {dimension_numbers = #tpu.dot_dimension_numbers<[1], [0], [0], [1], [0, 0, 1, 1], [], []>} : vector<7x288xbf16>, vector<288x224xbf16>, vector<7x224xf32> -> vector<7x224xf32>
    %40 = arith.addf %34, %39 : vector<7x224xf32>
    %c0_43 = arith.constant 0 : index
    %c1_44 = arith.constant 1 : index
    %c0_45 = arith.constant 0 : index
    %41 = vector.load %arg1[%c0_43, %c1_44, %c0_45] : memref<4x9x288xbf16, #tpu.memory_space<vmem>>, vector<1x7x288xbf16>
    %42 = vector.shape_cast %41 : vector<1x7x288xbf16> to vector<7x288xbf16>
    %c7 = arith.constant 7 : index
    %c0_46 = arith.constant 0 : index
    %c0_47 = arith.constant 0 : index
    %43 = vector.load %arg2[%c7, %c0_46, %c0_47] : memref<10x288x224xbf16, #tpu.memory_space<vmem>>, vector<1x288x224xbf16>
    %44 = vector.shape_cast %43 : vector<1x288x224xbf16> to vector<288x224xbf16>
    %cst_48 = arith.constant dense<0.000000e+00> : vector<7x224xf32>
    %45 = tpu.matmul %42, %44, %cst_48 {dimension_numbers = #tpu.dot_dimension_numbers<[1], [0], [0], [1], [0, 0, 1, 1], [], []>} : vector<7x288xbf16>, vector<288x224xbf16>, vector<7x224xf32> -> vector<7x224xf32>
    %46 = arith.addf %40, %45 : vector<7x224xf32>
    %c1_49 = arith.constant 1 : index
    %c1_50 = arith.constant 1 : index
    %c0_51 = arith.constant 0 : index
    %47 = vector.load %arg1[%c1_49, %c1_50, %c0_51] : memref<4x9x288xbf16, #tpu.memory_space<vmem>>, vector<1x7x288xbf16>
    %48 = vector.shape_cast %47 : vector<1x7x288xbf16> to vector<7x288xbf16>
    %c8 = arith.constant 8 : index
    %c0_52 = arith.constant 0 : index
    %c0_53 = arith.constant 0 : index
    %49 = vector.load %arg2[%c8, %c0_52, %c0_53] : memref<10x288x224xbf16, #tpu.memory_space<vmem>>, vector<1x288x224xbf16>
    %50 = vector.shape_cast %49 : vector<1x288x224xbf16> to vector<288x224xbf16>
    %cst_54 = arith.constant dense<0.000000e+00> : vector<7x224xf32>
    %51 = tpu.matmul %48, %50, %cst_54 {dimension_numbers = #tpu.dot_dimension_numbers<[1], [0], [0], [1], [0, 0, 1, 1], [], []>} : vector<7x288xbf16>, vector<288x224xbf16>, vector<7x224xf32> -> vector<7x224xf32>
    %52 = arith.addf %46, %51 : vector<7x224xf32>
    %c0_55 = arith.constant 0 : index
    %c2_56 = arith.constant 2 : index
    %c0_57 = arith.constant 0 : index
    %53 = vector.load %arg1[%c0_55, %c2_56, %c0_57] : memref<4x9x288xbf16, #tpu.memory_space<vmem>>, vector<1x7x288xbf16>
    %54 = vector.shape_cast %53 : vector<1x7x288xbf16> to vector<7x288xbf16>
    %c9 = arith.constant 9 : index
    %c0_58 = arith.constant 0 : index
    %c0_59 = arith.constant 0 : index
    %55 = vector.load %arg2[%c9, %c0_58, %c0_59] : memref<10x288x224xbf16, #tpu.memory_space<vmem>>, vector<1x288x224xbf16>
    %56 = vector.shape_cast %55 : vector<1x288x224xbf16> to vector<288x224xbf16>
    %cst_60 = arith.constant dense<0.000000e+00> : vector<7x224xf32>
    %57 = tpu.matmul %54, %56, %cst_60 {dimension_numbers = #tpu.dot_dimension_numbers<[1], [0], [0], [1], [0, 0, 1, 1], [], []>} : vector<7x288xbf16>, vector<288x224xbf16>, vector<7x224xf32> -> vector<7x224xf32>
    %58 = arith.addf %52, %57 : vector<7x224xf32>
    %c1_61 = arith.constant 1 : index
    %c0_62 = arith.constant 0 : index
    %c0_63 = arith.constant 0 : index
    %59 = vector.load %arg1[%c1_61, %c0_62, %c0_63] : memref<4x9x288xbf16, #tpu.memory_space<vmem>>, vector<1x7x288xbf16>
    %60 = vector.shape_cast %59 : vector<1x7x288xbf16> to vector<7x288xbf16>
    %c0_64 = arith.constant 0 : index
    %c0_65 = arith.constant 0 : index
    %c0_66 = arith.constant 0 : index
    %61 = vector.load %arg2[%c0_64, %c0_65, %c0_66] : memref<10x288x224xbf16, #tpu.memory_space<vmem>>, vector<1x288x224xbf16>
    %62 = vector.shape_cast %61 : vector<1x288x224xbf16> to vector<288x224xbf16>
    %cst_67 = arith.constant dense<0.000000e+00> : vector<7x224xf32>
    %63 = tpu.matmul %60, %62, %cst_67 {dimension_numbers = #tpu.dot_dimension_numbers<[1], [0], [0], [1], [0, 0, 1, 1], [], []>} : vector<7x288xbf16>, vector<288x224xbf16>, vector<7x224xf32> -> vector<7x224xf32>
    %c0_68 = arith.constant 0 : index
    %c1_69 = arith.constant 1 : index
    %c0_70 = arith.constant 0 : index
    %64 = vector.load %arg1[%c0_68, %c1_69, %c0_70] : memref<4x9x288xbf16, #tpu.memory_space<vmem>>, vector<1x7x288xbf16>
    %65 = vector.shape_cast %64 : vector<1x7x288xbf16> to vector<7x288xbf16>
    %c1_71 = arith.constant 1 : index
    %c0_72 = arith.constant 0 : index
    %c0_73 = arith.constant 0 : index
    %66 = vector.load %arg2[%c1_71, %c0_72, %c0_73] : memref<10x288x224xbf16, #tpu.memory_space<vmem>>, vector<1x288x224xbf16>
    %67 = vector.shape_cast %66 : vector<1x288x224xbf16> to vector<288x224xbf16>
    %cst_74 = arith.constant dense<0.000000e+00> : vector<7x224xf32>
    %68 = tpu.matmul %65, %67, %cst_74 {dimension_numbers = #tpu.dot_dimension_numbers<[1], [0], [0], [1], [0, 0, 1, 1], [], []>} : vector<7x288xbf16>, vector<288x224xbf16>, vector<7x224xf32> -> vector<7x224xf32>
    %69 = arith.addf %63, %68 : vector<7x224xf32>
    %c1_75 = arith.constant 1 : index
    %c1_76 = arith.constant 1 : index
    %c0_77 = arith.constant 0 : index
    %70 = vector.load %arg1[%c1_75, %c1_76, %c0_77] : memref<4x9x288xbf16, #tpu.memory_space<vmem>>, vector<1x7x288xbf16>
    %71 = vector.shape_cast %70 : vector<1x7x288xbf16> to vector<7x288xbf16>
    %c2_78 = arith.constant 2 : index
    %c0_79 = arith.constant 0 : index
    %c0_80 = arith.constant 0 : index
    %72 = vector.load %arg2[%c2_78, %c0_79, %c0_80] : memref<10x288x224xbf16, #tpu.memory_space<vmem>>, vector<1x288x224xbf16>
    %73 = vector.shape_cast %72 : vector<1x288x224xbf16> to vector<288x224xbf16>
    %cst_81 = arith.constant dense<0.000000e+00> : vector<7x224xf32>
    %74 = tpu.matmul %71, %73, %cst_81 {dimension_numbers = #tpu.dot_dimension_numbers<[1], [0], [0], [1], [0, 0, 1, 1], [], []>} : vector<7x288xbf16>, vector<288x224xbf16>, vector<7x224xf32> -> vector<7x224xf32>
    %75 = arith.addf %69, %74 : vector<7x224xf32>
    %c0_82 = arith.constant 0 : index
    %c2_83 = arith.constant 2 : index
    %c0_84 = arith.constant 0 : index
    %76 = vector.load %arg1[%c0_82, %c2_83, %c0_84] : memref<4x9x288xbf16, #tpu.memory_space<vmem>>, vector<1x7x288xbf16>
    %77 = vector.shape_cast %76 : vector<1x7x288xbf16> to vector<7x288xbf16>
    %c3_85 = arith.constant 3 : index
    %c0_86 = arith.constant 0 : index
    %c0_87 = arith.constant 0 : index
    %78 = vector.load %arg2[%c3_85, %c0_86, %c0_87] : memref<10x288x224xbf16, #tpu.memory_space<vmem>>, vector<1x288x224xbf16>
    %79 = vector.shape_cast %78 : vector<1x288x224xbf16> to vector<288x224xbf16>
    %cst_88 = arith.constant dense<0.000000e+00> : vector<7x224xf32>
    %80 = tpu.matmul %77, %79, %cst_88 {dimension_numbers = #tpu.dot_dimension_numbers<[1], [0], [0], [1], [0, 0, 1, 1], [], []>} : vector<7x288xbf16>, vector<288x224xbf16>, vector<7x224xf32> -> vector<7x224xf32>
    %81 = arith.addf %75, %80 : vector<7x224xf32>
    %c1_89 = arith.constant 1 : index
    %c2_90 = arith.constant 2 : index
    %c0_91 = arith.constant 0 : index
    %82 = vector.load %arg1[%c1_89, %c2_90, %c0_91] : memref<4x9x288xbf16, #tpu.memory_space<vmem>>, vector<1x7x288xbf16>
    %83 = vector.shape_cast %82 : vector<1x7x288xbf16> to vector<7x288xbf16>
    %c4_92 = arith.constant 4 : index
    %c0_93 = arith.constant 0 : index
    %c0_94 = arith.constant 0 : index
    %84 = vector.load %arg2[%c4_92, %c0_93, %c0_94] : memref<10x288x224xbf16, #tpu.memory_space<vmem>>, vector<1x288x224xbf16>
    %85 = vector.shape_cast %84 : vector<1x288x224xbf16> to vector<288x224xbf16>
    %cst_95 = arith.constant dense<0.000000e+00> : vector<7x224xf32>
    %86 = tpu.matmul %83, %85, %cst_95 {dimension_numbers = #tpu.dot_dimension_numbers<[1], [0], [0], [1], [0, 0, 1, 1], [], []>} : vector<7x288xbf16>, vector<288x224xbf16>, vector<7x224xf32> -> vector<7x224xf32>
    %87 = arith.addf %81, %86 : vector<7x224xf32>
    %c1_96 = arith.constant 1 : index
    %c0_97 = arith.constant 0 : index
    %c0_98 = arith.constant 0 : index
    %88 = vector.load %arg1[%c1_96, %c0_97, %c0_98] : memref<4x9x288xbf16, #tpu.memory_space<vmem>>, vector<1x7x288xbf16>
    %89 = vector.shape_cast %88 : vector<1x7x288xbf16> to vector<7x288xbf16>
    %c5_99 = arith.constant 5 : index
    %c0_100 = arith.constant 0 : index
    %c0_101 = arith.constant 0 : index
    %90 = vector.load %arg2[%c5_99, %c0_100, %c0_101] : memref<10x288x224xbf16, #tpu.memory_space<vmem>>, vector<1x288x224xbf16>
    %91 = vector.shape_cast %90 : vector<1x288x224xbf16> to vector<288x224xbf16>
    %cst_102 = arith.constant dense<0.000000e+00> : vector<7x224xf32>
    %92 = tpu.matmul %89, %91, %cst_102 {dimension_numbers = #tpu.dot_dimension_numbers<[1], [0], [0], [1], [0, 0, 1, 1], [], []>} : vector<7x288xbf16>, vector<288x224xbf16>, vector<7x224xf32> -> vector<7x224xf32>
    %c0_103 = arith.constant 0 : index
    %c1_104 = arith.constant 1 : index
    %c0_105 = arith.constant 0 : index
    %93 = vector.load %arg1[%c0_103, %c1_104, %c0_105] : memref<4x9x288xbf16, #tpu.memory_space<vmem>>, vector<1x7x288xbf16>
    %94 = vector.shape_cast %93 : vector<1x7x288xbf16> to vector<7x288xbf16>
    %c6_106 = arith.constant 6 : index
    %c0_107 = arith.constant 0 : index
    %c0_108 = arith.constant 0 : index
    %95 = vector.load %arg2[%c6_106, %c0_107, %c0_108] : memref<10x288x224xbf16, #tpu.memory_space<vmem>>, vector<1x288x224xbf16>
    %96 = vector.shape_cast %95 : vector<1x288x224xbf16> to vector<288x224xbf16>
    %cst_109 = arith.constant dense<0.000000e+00> : vector<7x224xf32>
    %97 = tpu.matmul %94, %96, %cst_109 {dimension_numbers = #tpu.dot_dimension_numbers<[1], [0], [0], [1], [0, 0, 1, 1], [], []>} : vector<7x288xbf16>, vector<288x224xbf16>, vector<7x224xf32> -> vector<7x224xf32>
    %98 = arith.addf %92, %97 : vector<7x224xf32>
    %c1_110 = arith.constant 1 : index
    %c1_111 = arith.constant 1 : index
    %c0_112 = arith.constant 0 : index
    %99 = vector.load %arg1[%c1_110, %c1_111, %c0_112] : memref<4x9x288xbf16, #tpu.memory_space<vmem>>, vector<1x7x288xbf16>
    %100 = vector.shape_cast %99 : vector<1x7x288xbf16> to vector<7x288xbf16>
    %c7_113 = arith.constant 7 : index
    %c0_114 = arith.constant 0 : index
    %c0_115 = arith.constant 0 : index
    %101 = vector.load %arg2[%c7_113, %c0_114, %c0_115] : memref<10x288x224xbf16, #tpu.memory_space<vmem>>, vector<1x288x224xbf16>
    %102 = vector.shape_cast %101 : vector<1x288x224xbf16> to vector<288x224xbf16>
    %cst_116 = arith.constant dense<0.000000e+00> : vector<7x224xf32>
    %103 = tpu.matmul %100, %102, %cst_116 {dimension_numbers = #tpu.dot_dimension_numbers<[1], [0], [0], [1], [0, 0, 1, 1], [], []>} : vector<7x288xbf16>, vector<288x224xbf16>, vector<7x224xf32> -> vector<7x224xf32>
    %104 = arith.addf %98, %103 : vector<7x224xf32>
    %c0_117 = arith.constant 0 : index
    %c2_118 = arith.constant 2 : index
    %c0_119 = arith.constant 0 : index
    %105 = vector.load %arg1[%c0_117, %c2_118, %c0_119] : memref<4x9x288xbf16, #tpu.memory_space<vmem>>, vector<1x7x288xbf16>
    %106 = vector.shape_cast %105 : vector<1x7x288xbf16> to vector<7x288xbf16>
    %c8_120 = arith.constant 8 : index
    %c0_121 = arith.constant 0 : index
    %c0_122 = arith.constant 0 : index
    %107 = vector.load %arg2[%c8_120, %c0_121, %c0_122] : memref<10x288x224xbf16, #tpu.memory_space<vmem>>, vector<1x288x224xbf16>
    %108 = vector.shape_cast %107 : vector<1x288x224xbf16> to vector<288x224xbf16>
    %cst_123 = arith.constant dense<0.000000e+00> : vector<7x224xf32>
    %109 = tpu.matmul %106, %108, %cst_123 {dimension_numbers = #tpu.dot_dimension_numbers<[1], [0], [0], [1], [0, 0, 1, 1], [], []>} : vector<7x288xbf16>, vector<288x224xbf16>, vector<7x224xf32> -> vector<7x224xf32>
    %110 = arith.addf %104, %109 : vector<7x224xf32>
    %c1_124 = arith.constant 1 : index
    %c2_125 = arith.constant 2 : index
    %c0_126 = arith.constant 0 : index
    %111 = vector.load %arg1[%c1_124, %c2_125, %c0_126] : memref<4x9x288xbf16, #tpu.memory_space<vmem>>, vector<1x7x288xbf16>
    %112 = vector.shape_cast %111 : vector<1x7x288xbf16> to vector<7x288xbf16>
    %c9_127 = arith.constant 9 : index
    %c0_128 = arith.constant 0 : index
    %c0_129 = arith.constant 0 : index
    %113 = vector.load %arg2[%c9_127, %c0_128, %c0_129] : memref<10x288x224xbf16, #tpu.memory_space<vmem>>, vector<1x288x224xbf16>
    %114 = vector.shape_cast %113 : vector<1x288x224xbf16> to vector<288x224xbf16>
    %cst_130 = arith.constant dense<0.000000e+00> : vector<7x224xf32>
    %115 = tpu.matmul %112, %114, %cst_130 {dimension_numbers = #tpu.dot_dimension_numbers<[1], [0], [0], [1], [0, 0, 1, 1], [], []>} : vector<7x288xbf16>, vector<288x224xbf16>, vector<7x224xf32> -> vector<7x224xf32>
    %116 = arith.addf %110, %115 : vector<7x224xf32>
    %117 = arith.maximumf %29, %58 : vector<7x224xf32>
    %118 = arith.maximumf %87, %116 : vector<7x224xf32>
    %119 = arith.maximumf %117, %118 : vector<7x224xf32>
    %120 = vector.broadcast %0 : vector<1x224xf32> to vector<7x224xf32>
    %121 = arith.addf %119, %120 : vector<7x224xf32>
    %cst_131 = arith.constant 0.000000e+00 : f32
    %122 = vector.broadcast %cst_131 : f32 to vector<7x224xf32>
    %123 = arith.maximumf %121, %122 : vector<7x224xf32>
    %124 = arith.truncf %123 : vector<7x224xf32> to vector<7x224xbf16>
    %c0_132 = arith.constant 0 : index
    %c0_133 = arith.constant 0 : index
    %c0_134 = arith.constant 0 : index
    %125 = vector.load %arg4[%c0_132, %c0_133, %c0_134] : memref<2x7x224xbf16, #tpu.memory_space<vmem>>, vector<1x7x224xbf16>
    %126 = vector.shape_cast %125 : vector<1x7x224xbf16> to vector<7x224xbf16>
    %127 = vector.shape_cast %124 : vector<7x224xbf16> to vector<1x7x224xbf16>
    tpu.vector_store %arg4[%c0_132, %c0_133, %c0_134], %127 {strides = array<i32>} : memref<2x7x224xbf16, #tpu.memory_space<vmem>>, vector<1x7x224xbf16>,
    %c2_135 = arith.constant 2 : index
    %c0_136 = arith.constant 0 : index
    %c0_137 = arith.constant 0 : index
    %128 = vector.load %arg1[%c2_135, %c0_136, %c0_137] : memref<4x9x288xbf16, #tpu.memory_space<vmem>>, vector<1x7x288xbf16>
    %129 = vector.shape_cast %128 : vector<1x7x288xbf16> to vector<7x288xbf16>
    %c0_138 = arith.constant 0 : index
    %c0_139 = arith.constant 0 : index
    %c0_140 = arith.constant 0 : index
    %130 = vector.load %arg2[%c0_138, %c0_139, %c0_140] : memref<10x288x224xbf16, #tpu.memory_space<vmem>>, vector<1x288x224xbf16>
    %131 = vector.shape_cast %130 : vector<1x288x224xbf16> to vector<288x224xbf16>
    %cst_141 = arith.constant dense<0.000000e+00> : vector<7x224xf32>
    %132 = tpu.matmul %129, %131, %cst_141 {dimension_numbers = #tpu.dot_dimension_numbers<[1], [0], [0], [1], [0, 0, 1, 1], [], []>} : vector<7x288xbf16>, vector<288x224xbf16>, vector<7x224xf32> -> vector<7x224xf32>
    %c3_142 = arith.constant 3 : index
    %c0_143 = arith.constant 0 : index
    %c0_144 = arith.constant 0 : index
    %133 = vector.load %arg1[%c3_142, %c0_143, %c0_144] : memref<4x9x288xbf16, #tpu.memory_space<vmem>>, vector<1x7x288xbf16>
    %134 = vector.shape_cast %133 : vector<1x7x288xbf16> to vector<7x288xbf16>
    %c1_145 = arith.constant 1 : index
    %c0_146 = arith.constant 0 : index
    %c0_147 = arith.constant 0 : index
    %135 = vector.load %arg2[%c1_145, %c0_146, %c0_147] : memref<10x288x224xbf16, #tpu.memory_space<vmem>>, vector<1x288x224xbf16>
    %136 = vector.shape_cast %135 : vector<1x288x224xbf16> to vector<288x224xbf16>
    %cst_148 = arith.constant dense<0.000000e+00> : vector<7x224xf32>
    %137 = tpu.matmul %134, %136, %cst_148 {dimension_numbers = #tpu.dot_dimension_numbers<[1], [0], [0], [1], [0, 0, 1, 1], [], []>} : vector<7x288xbf16>, vector<288x224xbf16>, vector<7x224xf32> -> vector<7x224xf32>
    %138 = arith.addf %132, %137 : vector<7x224xf32>
    %c2_149 = arith.constant 2 : index
    %c1_150 = arith.constant 1 : index
    %c0_151 = arith.constant 0 : index
    %139 = vector.load %arg1[%c2_149, %c1_150, %c0_151] : memref<4x9x288xbf16, #tpu.memory_space<vmem>>, vector<1x7x288xbf16>
    %140 = vector.shape_cast %139 : vector<1x7x288xbf16> to vector<7x288xbf16>
    %c2_152 = arith.constant 2 : index
    %c0_153 = arith.constant 0 : index
    %c0_154 = arith.constant 0 : index
    %141 = vector.load %arg2[%c2_152, %c0_153, %c0_154] : memref<10x288x224xbf16, #tpu.memory_space<vmem>>, vector<1x288x224xbf16>
    %142 = vector.shape_cast %141 : vector<1x288x224xbf16> to vector<288x224xbf16>
    %cst_155 = arith.constant dense<0.000000e+00> : vector<7x224xf32>
    %143 = tpu.matmul %140, %142, %cst_155 {dimension_numbers = #tpu.dot_dimension_numbers<[1], [0], [0], [1], [0, 0, 1, 1], [], []>} : vector<7x288xbf16>, vector<288x224xbf16>, vector<7x224xf32> -> vector<7x224xf32>
    %144 = arith.addf %138, %143 : vector<7x224xf32>
    %c3_156 = arith.constant 3 : index
    %c1_157 = arith.constant 1 : index
    %c0_158 = arith.constant 0 : index
    %145 = vector.load %arg1[%c3_156, %c1_157, %c0_158] : memref<4x9x288xbf16, #tpu.memory_space<vmem>>, vector<1x7x288xbf16>
    %146 = vector.shape_cast %145 : vector<1x7x288xbf16> to vector<7x288xbf16>
    %c3_159 = arith.constant 3 : index
    %c0_160 = arith.constant 0 : index
    %c0_161 = arith.constant 0 : index
    %147 = vector.load %arg2[%c3_159, %c0_160, %c0_161] : memref<10x288x224xbf16, #tpu.memory_space<vmem>>, vector<1x288x224xbf16>
    %148 = vector.shape_cast %147 : vector<1x288x224xbf16> to vector<288x224xbf16>
    %cst_162 = arith.constant dense<0.000000e+00> : vector<7x224xf32>
    %149 = tpu.matmul %146, %148, %cst_162 {dimension_numbers = #tpu.dot_dimension_numbers<[1], [0], [0], [1], [0, 0, 1, 1], [], []>} : vector<7x288xbf16>, vector<288x224xbf16>, vector<7x224xf32> -> vector<7x224xf32>
    %150 = arith.addf %144, %149 : vector<7x224xf32>
    %c2_163 = arith.constant 2 : index
    %c2_164 = arith.constant 2 : index
    %c0_165 = arith.constant 0 : index
    %151 = vector.load %arg1[%c2_163, %c2_164, %c0_165] : memref<4x9x288xbf16, #tpu.memory_space<vmem>>, vector<1x7x288xbf16>
    %152 = vector.shape_cast %151 : vector<1x7x288xbf16> to vector<7x288xbf16>
    %c4_166 = arith.constant 4 : index
    %c0_167 = arith.constant 0 : index
    %c0_168 = arith.constant 0 : index
    %153 = vector.load %arg2[%c4_166, %c0_167, %c0_168] : memref<10x288x224xbf16, #tpu.memory_space<vmem>>, vector<1x288x224xbf16>
    %154 = vector.shape_cast %153 : vector<1x288x224xbf16> to vector<288x224xbf16>
    %cst_169 = arith.constant dense<0.000000e+00> : vector<7x224xf32>
    %155 = tpu.matmul %152, %154, %cst_169 {dimension_numbers = #tpu.dot_dimension_numbers<[1], [0], [0], [1], [0, 0, 1, 1], [], []>} : vector<7x288xbf16>, vector<288x224xbf16>, vector<7x224xf32> -> vector<7x224xf32>
    %156 = arith.addf %150, %155 : vector<7x224xf32>
    %c2_170 = arith.constant 2 : index
    %c0_171 = arith.constant 0 : index
    %c0_172 = arith.constant 0 : index
    %157 = vector.load %arg1[%c2_170, %c0_171, %c0_172] : memref<4x9x288xbf16, #tpu.memory_space<vmem>>, vector<1x7x288xbf16>
    %158 = vector.shape_cast %157 : vector<1x7x288xbf16> to vector<7x288xbf16>
    %c5_173 = arith.constant 5 : index
    %c0_174 = arith.constant 0 : index
    %c0_175 = arith.constant 0 : index
    %159 = vector.load %arg2[%c5_173, %c0_174, %c0_175] : memref<10x288x224xbf16, #tpu.memory_space<vmem>>, vector<1x288x224xbf16>
    %160 = vector.shape_cast %159 : vector<1x288x224xbf16> to vector<288x224xbf16>
    %cst_176 = arith.constant dense<0.000000e+00> : vector<7x224xf32>
    %161 = tpu.matmul %158, %160, %cst_176 {dimension_numbers = #tpu.dot_dimension_numbers<[1], [0], [0], [1], [0, 0, 1, 1], [], []>} : vector<7x288xbf16>, vector<288x224xbf16>, vector<7x224xf32> -> vector<7x224xf32>
    %c3_177 = arith.constant 3 : index
    %c0_178 = arith.constant 0 : index
    %c0_179 = arith.constant 0 : index
    %162 = vector.load %arg1[%c3_177, %c0_178, %c0_179] : memref<4x9x288xbf16, #tpu.memory_space<vmem>>, vector<1x7x288xbf16>
    %163 = vector.shape_cast %162 : vector<1x7x288xbf16> to vector<7x288xbf16>
    %c6_180 = arith.constant 6 : index
    %c0_181 = arith.constant 0 : index
    %c0_182 = arith.constant 0 : index
    %164 = vector.load %arg2[%c6_180, %c0_181, %c0_182] : memref<10x288x224xbf16, #tpu.memory_space<vmem>>, vector<1x288x224xbf16>
    %165 = vector.shape_cast %164 : vector<1x288x224xbf16> to vector<288x224xbf16>
    %cst_183 = arith.constant dense<0.000000e+00> : vector<7x224xf32>
    %166 = tpu.matmul %163, %165, %cst_183 {dimension_numbers = #tpu.dot_dimension_numbers<[1], [0], [0], [1], [0, 0, 1, 1], [], []>} : vector<7x288xbf16>, vector<288x224xbf16>, vector<7x224xf32> -> vector<7x224xf32>
    %167 = arith.addf %161, %166 : vector<7x224xf32>
    %c2_184 = arith.constant 2 : index
    %c1_185 = arith.constant 1 : index
    %c0_186 = arith.constant 0 : index
    %168 = vector.load %arg1[%c2_184, %c1_185, %c0_186] : memref<4x9x288xbf16, #tpu.memory_space<vmem>>, vector<1x7x288xbf16>
    %169 = vector.shape_cast %168 : vector<1x7x288xbf16> to vector<7x288xbf16>
    %c7_187 = arith.constant 7 : index
    %c0_188 = arith.constant 0 : index
    %c0_189 = arith.constant 0 : index
    %170 = vector.load %arg2[%c7_187, %c0_188, %c0_189] : memref<10x288x224xbf16, #tpu.memory_space<vmem>>, vector<1x288x224xbf16>
    %171 = vector.shape_cast %170 : vector<1x288x224xbf16> to vector<288x224xbf16>
    %cst_190 = arith.constant dense<0.000000e+00> : vector<7x224xf32>
    %172 = tpu.matmul %169, %171, %cst_190 {dimension_numbers = #tpu.dot_dimension_numbers<[1], [0], [0], [1], [0, 0, 1, 1], [], []>} : vector<7x288xbf16>, vector<288x224xbf16>, vector<7x224xf32> -> vector<7x224xf32>
    %173 = arith.addf %167, %172 : vector<7x224xf32>
    %c3_191 = arith.constant 3 : index
    %c1_192 = arith.constant 1 : index
    %c0_193 = arith.constant 0 : index
    %174 = vector.load %arg1[%c3_191, %c1_192, %c0_193] : memref<4x9x288xbf16, #tpu.memory_space<vmem>>, vector<1x7x288xbf16>
    %175 = vector.shape_cast %174 : vector<1x7x288xbf16> to vector<7x288xbf16>
    %c8_194 = arith.constant 8 : index
    %c0_195 = arith.constant 0 : index
    %c0_196 = arith.constant 0 : index
    %176 = vector.load %arg2[%c8_194, %c0_195, %c0_196] : memref<10x288x224xbf16, #tpu.memory_space<vmem>>, vector<1x288x224xbf16>
    %177 = vector.shape_cast %176 : vector<1x288x224xbf16> to vector<288x224xbf16>
    %cst_197 = arith.constant dense<0.000000e+00> : vector<7x224xf32>
    %178 = tpu.matmul %175, %177, %cst_197 {dimension_numbers = #tpu.dot_dimension_numbers<[1], [0], [0], [1], [0, 0, 1, 1], [], []>} : vector<7x288xbf16>, vector<288x224xbf16>, vector<7x224xf32> -> vector<7x224xf32>
    %179 = arith.addf %173, %178 : vector<7x224xf32>
    %c2_198 = arith.constant 2 : index
    %c2_199 = arith.constant 2 : index
    %c0_200 = arith.constant 0 : index
    %180 = vector.load %arg1[%c2_198, %c2_199, %c0_200] : memref<4x9x288xbf16, #tpu.memory_space<vmem>>, vector<1x7x288xbf16>
    %181 = vector.shape_cast %180 : vector<1x7x288xbf16> to vector<7x288xbf16>
    %c9_201 = arith.constant 9 : index
    %c0_202 = arith.constant 0 : index
    %c0_203 = arith.constant 0 : index
    %182 = vector.load %arg2[%c9_201, %c0_202, %c0_203] : memref<10x288x224xbf16, #tpu.memory_space<vmem>>, vector<1x288x224xbf16>
    %183 = vector.shape_cast %182 : vector<1x288x224xbf16> to vector<288x224xbf16>
    %cst_204 = arith.constant dense<0.000000e+00> : vector<7x224xf32>
    %184 = tpu.matmul %181, %183, %cst_204 {dimension_numbers = #tpu.dot_dimension_numbers<[1], [0], [0], [1], [0, 0, 1, 1], [], []>} : vector<7x288xbf16>, vector<288x224xbf16>, vector<7x224xf32> -> vector<7x224xf32>
    %185 = arith.addf %179, %184 : vector<7x224xf32>
    %c3_205 = arith.constant 3 : index
    %c0_206 = arith.constant 0 : index
    %c0_207 = arith.constant 0 : index
    %186 = vector.load %arg1[%c3_205, %c0_206, %c0_207] : memref<4x9x288xbf16, #tpu.memory_space<vmem>>, vector<1x7x288xbf16>
    %187 = vector.shape_cast %186 : vector<1x7x288xbf16> to vector<7x288xbf16>
    %c0_208 = arith.constant 0 : index
    %c0_209 = arith.constant 0 : index
    %c0_210 = arith.constant 0 : index
    %188 = vector.load %arg2[%c0_208, %c0_209, %c0_210] : memref<10x288x224xbf16, #tpu.memory_space<vmem>>, vector<1x288x224xbf16>
    %189 = vector.shape_cast %188 : vector<1x288x224xbf16> to vector<288x224xbf16>
    %cst_211 = arith.constant dense<0.000000e+00> : vector<7x224xf32>
    %190 = tpu.matmul %187, %189, %cst_211 {dimension_numbers = #tpu.dot_dimension_numbers<[1], [0], [0], [1], [0, 0, 1, 1], [], []>} : vector<7x288xbf16>, vector<288x224xbf16>, vector<7x224xf32> -> vector<7x224xf32>
    %c2_212 = arith.constant 2 : index
    %c1_213 = arith.constant 1 : index
    %c0_214 = arith.constant 0 : index
    %191 = vector.load %arg1[%c2_212, %c1_213, %c0_214] : memref<4x9x288xbf16, #tpu.memory_space<vmem>>, vector<1x7x288xbf16>
    %192 = vector.shape_cast %191 : vector<1x7x288xbf16> to vector<7x288xbf16>
    %c1_215 = arith.constant 1 : index
    %c0_216 = arith.constant 0 : index
    %c0_217 = arith.constant 0 : index
    %193 = vector.load %arg2[%c1_215, %c0_216, %c0_217] : memref<10x288x224xbf16, #tpu.memory_space<vmem>>, vector<1x288x224xbf16>
    %194 = vector.shape_cast %193 : vector<1x288x224xbf16> to vector<288x224xbf16>
    %cst_218 = arith.constant dense<0.000000e+00> : vector<7x224xf32>
    %195 = tpu.matmul %192, %194, %cst_218 {dimension_numbers = #tpu.dot_dimension_numbers<[1], [0], [0], [1], [0, 0, 1, 1], [], []>} : vector<7x288xbf16>, vector<288x224xbf16>, vector<7x224xf32> -> vector<7x224xf32>
    %196 = arith.addf %190, %195 : vector<7x224xf32>
    %c3_219 = arith.constant 3 : index
    %c1_220 = arith.constant 1 : index
    %c0_221 = arith.constant 0 : index
    %197 = vector.load %arg1[%c3_219, %c1_220, %c0_221] : memref<4x9x288xbf16, #tpu.memory_space<vmem>>, vector<1x7x288xbf16>
    %198 = vector.shape_cast %197 : vector<1x7x288xbf16> to vector<7x288xbf16>
    %c2_222 = arith.constant 2 : index
    %c0_223 = arith.constant 0 : index
    %c0_224 = arith.constant 0 : index
    %199 = vector.load %arg2[%c2_222, %c0_223, %c0_224] : memref<10x288x224xbf16, #tpu.memory_space<vmem>>, vector<1x288x224xbf16>
    %200 = vector.shape_cast %199 : vector<1x288x224xbf16> to vector<288x224xbf16>
    %cst_225 = arith.constant dense<0.000000e+00> : vector<7x224xf32>
    %201 = tpu.matmul %198, %200, %cst_225 {dimension_numbers = #tpu.dot_dimension_numbers<[1], [0], [0], [1], [0, 0, 1, 1], [], []>} : vector<7x288xbf16>, vector<288x224xbf16>, vector<7x224xf32> -> vector<7x224xf32>
    %202 = arith.addf %196, %201 : vector<7x224xf32>
    %c2_226 = arith.constant 2 : index
    %c2_227 = arith.constant 2 : index
    %c0_228 = arith.constant 0 : index
    %203 = vector.load %arg1[%c2_226, %c2_227, %c0_228] : memref<4x9x288xbf16, #tpu.memory_space<vmem>>, vector<1x7x288xbf16>
    %204 = vector.shape_cast %203 : vector<1x7x288xbf16> to vector<7x288xbf16>
    %c3_229 = arith.constant 3 : index
    %c0_230 = arith.constant 0 : index
    %c0_231 = arith.constant 0 : index
    %205 = vector.load %arg2[%c3_229, %c0_230, %c0_231] : memref<10x288x224xbf16, #tpu.memory_space<vmem>>, vector<1x288x224xbf16>
    %206 = vector.shape_cast %205 : vector<1x288x224xbf16> to vector<288x224xbf16>
    %cst_232 = arith.constant dense<0.000000e+00> : vector<7x224xf32>
    %207 = tpu.matmul %204, %206, %cst_232 {dimension_numbers = #tpu.dot_dimension_numbers<[1], [0], [0], [1], [0, 0, 1, 1], [], []>} : vector<7x288xbf16>, vector<288x224xbf16>, vector<7x224xf32> -> vector<7x224xf32>
    %208 = arith.addf %202, %207 : vector<7x224xf32>
    %c3_233 = arith.constant 3 : index
    %c2_234 = arith.constant 2 : index
    %c0_235 = arith.constant 0 : index
    %209 = vector.load %arg1[%c3_233, %c2_234, %c0_235] : memref<4x9x288xbf16, #tpu.memory_space<vmem>>, vector<1x7x288xbf16>
    %210 = vector.shape_cast %209 : vector<1x7x288xbf16> to vector<7x288xbf16>
    %c4_236 = arith.constant 4 : index
    %c0_237 = arith.constant 0 : index
    %c0_238 = arith.constant 0 : index
    %211 = vector.load %arg2[%c4_236, %c0_237, %c0_238] : memref<10x288x224xbf16, #tpu.memory_space<vmem>>, vector<1x288x224xbf16>
    %212 = vector.shape_cast %211 : vector<1x288x224xbf16> to vector<288x224xbf16>
    %cst_239 = arith.constant dense<0.000000e+00> : vector<7x224xf32>
    %213 = tpu.matmul %210, %212, %cst_239 {dimension_numbers = #tpu.dot_dimension_numbers<[1], [0], [0], [1], [0, 0, 1, 1], [], []>} : vector<7x288xbf16>, vector<288x224xbf16>, vector<7x224xf32> -> vector<7x224xf32>
    %214 = arith.addf %208, %213 : vector<7x224xf32>
    %c3_240 = arith.constant 3 : index
    %c0_241 = arith.constant 0 : index
    %c0_242 = arith.constant 0 : index
    %215 = vector.load %arg1[%c3_240, %c0_241, %c0_242] : memref<4x9x288xbf16, #tpu.memory_space<vmem>>, vector<1x7x288xbf16>
    %216 = vector.shape_cast %215 : vector<1x7x288xbf16> to vector<7x288xbf16>
    %c5_243 = arith.constant 5 : index
    %c0_244 = arith.constant 0 : index
    %c0_245 = arith.constant 0 : index
    %217 = vector.load %arg2[%c5_243, %c0_244, %c0_245] : memref<10x288x224xbf16, #tpu.memory_space<vmem>>, vector<1x288x224xbf16>
    %218 = vector.shape_cast %217 : vector<1x288x224xbf16> to vector<288x224xbf16>
    %cst_246 = arith.constant dense<0.000000e+00> : vector<7x224xf32>
    %219 = tpu.matmul %216, %218, %cst_246 {dimension_numbers = #tpu.dot_dimension_numbers<[1], [0], [0], [1], [0, 0, 1, 1], [], []>} : vector<7x288xbf16>, vector<288x224xbf16>, vector<7x224xf32> -> vector<7x224xf32>
    %c2_247 = arith.constant 2 : index
    %c1_248 = arith.constant 1 : index
    %c0_249 = arith.constant 0 : index
    %220 = vector.load %arg1[%c2_247, %c1_248, %c0_249] : memref<4x9x288xbf16, #tpu.memory_space<vmem>>, vector<1x7x288xbf16>
    %221 = vector.shape_cast %220 : vector<1x7x288xbf16> to vector<7x288xbf16>
    %c6_250 = arith.constant 6 : index
    %c0_251 = arith.constant 0 : index
    %c0_252 = arith.constant 0 : index
    %222 = vector.load %arg2[%c6_250, %c0_251, %c0_252] : memref<10x288x224xbf16, #tpu.memory_space<vmem>>, vector<1x288x224xbf16>
    %223 = vector.shape_cast %222 : vector<1x288x224xbf16> to vector<288x224xbf16>
    %cst_253 = arith.constant dense<0.000000e+00> : vector<7x224xf32>
    %224 = tpu.matmul %221, %223, %cst_253 {dimension_numbers = #tpu.dot_dimension_numbers<[1], [0], [0], [1], [0, 0, 1, 1], [], []>} : vector<7x288xbf16>, vector<288x224xbf16>, vector<7x224xf32> -> vector<7x224xf32>
    %225 = arith.addf %219, %224 : vector<7x224xf32>
    %c3_254 = arith.constant 3 : index
    %c1_255 = arith.constant 1 : index
    %c0_256 = arith.constant 0 : index
    %226 = vector.load %arg1[%c3_254, %c1_255, %c0_256] : memref<4x9x288xbf16, #tpu.memory_space<vmem>>, vector<1x7x288xbf16>
    %227 = vector.shape_cast %226 : vector<1x7x288xbf16> to vector<7x288xbf16>
    %c7_257 = arith.constant 7 : index
    %c0_258 = arith.constant 0 : index
    %c0_259 = arith.constant 0 : index
    %228 = vector.load %arg2[%c7_257, %c0_258, %c0_259] : memref<10x288x224xbf16, #tpu.memory_space<vmem>>, vector<1x288x224xbf16>
    %229 = vector.shape_cast %228 : vector<1x288x224xbf16> to vector<288x224xbf16>
    %cst_260 = arith.constant dense<0.000000e+00> : vector<7x224xf32>
    %230 = tpu.matmul %227, %229, %cst_260 {dimension_numbers = #tpu.dot_dimension_numbers<[1], [0], [0], [1], [0, 0, 1, 1], [], []>} : vector<7x288xbf16>, vector<288x224xbf16>, vector<7x224xf32> -> vector<7x224xf32>
    %231 = arith.addf %225, %230 : vector<7x224xf32>
    %c2_261 = arith.constant 2 : index
    %c2_262 = arith.constant 2 : index
    %c0_263 = arith.constant 0 : index
    %232 = vector.load %arg1[%c2_261, %c2_262, %c0_263] : memref<4x9x288xbf16, #tpu.memory_space<vmem>>, vector<1x7x288xbf16>
    %233 = vector.shape_cast %232 : vector<1x7x288xbf16> to vector<7x288xbf16>
    %c8_264 = arith.constant 8 : index
    %c0_265 = arith.constant 0 : index
    %c0_266 = arith.constant 0 : index
    %234 = vector.load %arg2[%c8_264, %c0_265, %c0_266] : memref<10x288x224xbf16, #tpu.memory_space<vmem>>, vector<1x288x224xbf16>
    %235 = vector.shape_cast %234 : vector<1x288x224xbf16> to vector<288x224xbf16>
    %cst_267 = arith.constant dense<0.000000e+00> : vector<7x224xf32>
    %236 = tpu.matmul %233, %235, %cst_267 {dimension_numbers = #tpu.dot_dimension_numbers<[1], [0], [0], [1], [0, 0, 1, 1], [], []>} : vector<7x288xbf16>, vector<288x224xbf16>, vector<7x224xf32> -> vector<7x224xf32>
    %237 = arith.addf %231, %236 : vector<7x224xf32>
    %c3_268 = arith.constant 3 : index
    %c2_269 = arith.constant 2 : index
    %c0_270 = arith.constant 0 : index
    %238 = vector.load %arg1[%c3_268, %c2_269, %c0_270] : memref<4x9x288xbf16, #tpu.memory_space<vmem>>, vector<1x7x288xbf16>
    %239 = vector.shape_cast %238 : vector<1x7x288xbf16> to vector<7x288xbf16>
    %c9_271 = arith.constant 9 : index
    %c0_272 = arith.constant 0 : index
    %c0_273 = arith.constant 0 : index
    %240 = vector.load %arg2[%c9_271, %c0_272, %c0_273] : memref<10x288x224xbf16, #tpu.memory_space<vmem>>, vector<1x288x224xbf16>
    %241 = vector.shape_cast %240 : vector<1x288x224xbf16> to vector<288x224xbf16>
    %cst_274 = arith.constant dense<0.000000e+00> : vector<7x224xf32>
    %242 = tpu.matmul %239, %241, %cst_274 {dimension_numbers = #tpu.dot_dimension_numbers<[1], [0], [0], [1], [0, 0, 1, 1], [], []>} : vector<7x288xbf16>, vector<288x224xbf16>, vector<7x224xf32> -> vector<7x224xf32>
    %243 = arith.addf %237, %242 : vector<7x224xf32>
    %244 = arith.maximumf %156, %185 : vector<7x224xf32>
    %245 = arith.maximumf %214, %243 : vector<7x224xf32>
    %246 = arith.maximumf %244, %245 : vector<7x224xf32>
    %247 = vector.broadcast %0 : vector<1x224xf32> to vector<7x224xf32>
    %248 = arith.addf %246, %247 : vector<7x224xf32>
    %cst_275 = arith.constant 0.000000e+00 : f32
    %249 = vector.broadcast %cst_275 : f32 to vector<7x224xf32>
    %250 = arith.maximumf %248, %249 : vector<7x224xf32>
    %251 = arith.truncf %250 : vector<7x224xf32> to vector<7x224xbf16>
    %c1_276 = arith.constant 1 : index
    %c0_277 = arith.constant 0 : index
    %c0_278 = arith.constant 0 : index
    %252 = vector.load %arg4[%c1_276, %c0_277, %c0_278] : memref<2x7x224xbf16, #tpu.memory_space<vmem>>, vector<1x7x224xbf16>
    %253 = vector.shape_cast %252 : vector<1x7x224xbf16> to vector<7x224xbf16>
    %254 = vector.shape_cast %251 : vector<7x224xbf16> to vector<1x7x224xbf16>
    tpu.vector_store %arg4[%c1_276, %c0_277, %c0_278], %254 {strides = array<i32>} : memref<2x7x224xbf16, #tpu.memory_space<vmem>>, vector<1x7x224xbf16>,
    return
  }
  func.func @transform_0(%arg0: i32) -> (i32, i32, i32) {
    %c0_i32 = arith.constant 0 : i32
    %c0_i32_0 = arith.constant 0 : i32
    %c0_i32_1 = arith.constant 0 : i32
    return %arg0, %c0_i32, %c0_i32_0 : i32, i32, i32
  }
  func.func @transform_1(%arg0: i32) -> (i32, i32, i32) {
    %c0_i32 = arith.constant 0 : i32
    %c0_i32_0 = arith.constant 0 : i32
    %c0_i32_1 = arith.constant 0 : i32
    %c0_i32_2 = arith.constant 0 : i32
    return %c0_i32, %c0_i32_0, %c0_i32_1 : i32, i32, i32
  }
  func.func @transform_2(%arg0: i32) -> (i32, i32) {
    %c0_i32 = arith.constant 0 : i32
    %c0_i32_0 = arith.constant 0 : i32
    %c0_i32_1 = arith.constant 0 : i32
    return %c0_i32, %c0_i32_0 : i32, i32
  }
  func.func @transform_3(%arg0: i32) -> (i32, i32, i32) {
    %c0_i32 = arith.constant 0 : i32
    %c0_i32_0 = arith.constant 0 : i32
    %c0_i32_1 = arith.constant 0 : i32
    return %arg0, %c0_i32, %c0_i32_0 : i32, i32, i32
  }
}

module attributes {stable_mosaic.version = 11 : i64} {
  func.func @linear_kernel(%arg0: i32, %arg1: memref<8x1568xbf16, #tpu.memory_space<vmem>>, %arg2: memref<1568x128xbf16, #tpu.memory_space<vmem>>, %arg3: memref<1x128xf32, #tpu.memory_space<vmem>>, %arg4: memref<8x128xf32, #tpu.memory_space<vmem>>) attributes {dimension_semantics = [#tpu.dimension_semantics<parallel>], iteration_bounds = array<i64: 1>, scalar_prefetch = 0 : i64, scratch_operands = 0 : i64, tpu.core_type = #tpu.core_type<tc>, window_params = [{transform_indices = @transform_0, window_bounds = array<i64: 8, 1568>}, {pipeline_mode = #tpu.pipeline_mode<synchronous>, transform_indices = @transform_1, window_bounds = array<i64: 1568, 128>}, {pipeline_mode = #tpu.pipeline_mode<synchronous>, transform_indices = @transform_2, window_bounds = array<i64: 1, 128>}, {transform_indices = @transform_3, window_bounds = array<i64: 8, 128>}]} {
    %c0 = arith.constant 0 : index
    %c0_0 = arith.constant 0 : index
    %0 = vector.load %arg1[%c0, %c0_0] : memref<8x1568xbf16, #tpu.memory_space<vmem>>, vector<8x1568xbf16>
    %c0_1 = arith.constant 0 : index
    %c0_2 = arith.constant 0 : index
    %1 = vector.load %arg2[%c0_1, %c0_2] : memref<1568x128xbf16, #tpu.memory_space<vmem>>, vector<1568x128xbf16>
    %cst = arith.constant dense<0.000000e+00> : vector<8x128xf32>
    %2 = tpu.matmul %0, %1, %cst {dimension_numbers = #tpu.dot_dimension_numbers<[1], [0], [0], [1], [0, 0, 1, 1], [], []>} : vector<8x1568xbf16>, vector<1568x128xbf16>, vector<8x128xf32> -> vector<8x128xf32>
    %c0_3 = arith.constant 0 : index
    %c0_4 = arith.constant 0 : index
    %3 = vector.load %arg3[%c0_3, %c0_4] : memref<1x128xf32, #tpu.memory_space<vmem>>, vector<1x128xf32>
    %4 = vector.broadcast %3 : vector<1x128xf32> to vector<8x128xf32>
    %5 = arith.addf %2, %4 : vector<8x128xf32>
    %c0_5 = arith.constant 0 : index
    %c0_6 = arith.constant 0 : index
    %6 = vector.load %arg4[%c0_5, %c0_6] : memref<8x128xf32, #tpu.memory_space<vmem>>, vector<8x128xf32>
    tpu.vector_store %arg4[%c0_5, %c0_6], %5 {strides = array<i32>} : memref<8x128xf32, #tpu.memory_space<vmem>>, vector<8x128xf32>,
    return
  }
  func.func @transform_0(%arg0: i32) -> (i32, i32) {
    %c0_i32 = arith.constant 0 : i32
    %c0_i32_0 = arith.constant 0 : i32
    return %arg0, %c0_i32 : i32, i32
  }
  func.func @transform_1(%arg0: i32) -> (i32, i32) {
    %c0_i32 = arith.constant 0 : i32
    %c0_i32_0 = arith.constant 0 : i32
    %c0_i32_1 = arith.constant 0 : i32
    return %c0_i32, %c0_i32_0 : i32, i32
  }
  func.func @transform_2(%arg0: i32) -> (i32, i32) {
    %c0_i32 = arith.constant 0 : i32
    %c0_i32_0 = arith.constant 0 : i32
    %c0_i32_1 = arith.constant 0 : i32
    return %c0_i32, %c0_i32_0 : i32, i32
  }
  func.func @transform_3(%arg0: i32) -> (i32, i32) {
    %c0_i32 = arith.constant 0 : i32
    %c0_i32_0 = arith.constant 0 : i32
    return %arg0, %c0_i32 : i32, i32
  }
}

</mosaic_0001>

<bundles_post_ra>
// kernel: tile.13
= control target key start
LH: loop header
LB: loop body
LE: loop exit
PB: predicated region body
PF: predicated region fallthrough
CT: control target
= control target key end

     0   :  { %s28_s0 = inlined_call_operand.vmem [shape: f32[16], index: 0, kind: input, shape index: {}]   ;;  %s29_s1 = inlined_call_operand.vmem [shape: f32[14,16], index: 1, kind: output, shape index: {}]  }
   0x1   :  { %v4_v0 = vld [vmem:[%s28_s0] ss:$0 sm:$0xff] }
   0x2   :  { %5 = vst [vmem:[%s29_s1] sm:$0xff] %v4_v0  ;;  %8 = vst [vmem:[%s29_s1 + $0x8] sm:$0xff] %v4_v0 }

// kernel: tile.14
= control target key start
LH: loop header
LB: loop body
LE: loop exit
PB: predicated region body
PF: predicated region fallthrough
CT: control target
= control target key end

     0   :  { %s19_s8 = smov 3  ;;  %s82_s9 = smov 112   ;;  %vm4_vm0 = vcmask 130048   ;;  %vm10_vm1 = vcmask 1048448   ;;  %vm16_vm2 = vcmask 917248   ;;  %vm23_vm3 = vcmask 786048   ;;  %s129_s0 = inlined_call_operand.vmem [shape: f32[14,16], index: 0, kind: input, shape index: {}]   ;;  %s130_s1 = inlined_call_operand.vmem [shape: f32[1,224], index: 1, kind: output, shape index: {}]  }
   0x1   :  { %v67_v0 = vld [vmem:[%s129_s0 + $0x7] sm:$0x1]   ;;  %v69_v1 = vld [vmem:[%s129_s0 + $0x5] ss:$8 sm:%s19_s8]   ;;  %s83_s12 = smov 80   ;;  %s26_s15 = smov 3 }
   0x2   :  { %8 = vrot.lane.b32.xlu0 %v67_v0, %s82_s9  ;;  %21 = vrot.lane.b32.xlu1 %v69_v1, %s83_s12  ;;  %v68_v2 = vld [vmem:[%s129_s0 + $0x6] sm:$0x1]   ;;  %s33_s18 = smov 3  ;;  %s40_s19 = smov 3  ;;  %vm30_vm4 = vcmask 654848   ;;  %vm37_vm5 = vcmask 523648  }
   0x3   :  { %v70_v3 = vld [vmem:[%s129_s0 + $0x4] ss:$8 sm:%s26_s15]   ;;  %s84_s20 = smov 96   ;;  %s85_s21 = smov 64   ;;  %v71_v4 = vld [vmem:[%s129_s0 + $0x3] ss:$8 sm:%s33_s18]  }
   0x4   :  { %s2_s24 = smov 3  ;;  %v72_v5 = vld [vmem:[%s129_s0 + $0x2] ss:$8 sm:%s40_s19]   ;;  %s47_s27 = smov 3  ;;  %vm44_vm6 = vcmask 392448   ;;  %vm51_vm7 = vcmask 261248  }
   0x5   :  { %v3_v6 = vld [vmem:[%s129_s0] ss:$8 sm:%s2_s24]   ;;  %s86_s30 = smov 48   ;;  %s87_s2 = smov 32   ;;  %v73_v7 = vld [vmem:[%s129_s0 + $0x1] ss:$8 sm:%s47_s27]  }
   0x6   :  { %14 = vrot.lane.b32.xlu0 %v68_v2, %s84_s20  ;;  %28 = vrot.lane.b32.xlu1 %v70_v3, %s85_s21  ;;  %5 = vst.msk [vmem:[#allocation0] ss:$8 sm:$0x3] %vm4_vm0, %v3_v6   ;;  %s88_s0 = smov 16  }
   0xa   :  { %35 = vrot.lane.b32.xlu0 %v71_v4, %s86_s30  ;;  %42 = vrot.lane.b32.xlu1 %v72_v5, %s87_s2 }
   0xe   :  { %49 = vrot.lane.b32.xlu0 %v73_v7, %s88_s0 }
  0x74   :  { %v9_v8 = vpop.permute.xlu0 %8   ;;  %v22_v9 = vpop.permute.xlu1 %21  }
  0x75   :  { %11 = vst.msk [vmem:[#allocation0] sm:$0x1] %vm10_vm1, %v9_v8  }
  0x78   :  { %v15_v10 = vpop.permute.xlu0 %14   ;;  %v29_v11 = vpop.permute.xlu1 %28  }
  0x79   :  { %17 = vst.msk [vmem:[#allocation0] sm:$0x1] %vm16_vm2, %v15_v10  }
  0x7a   :  { %24 = vst.msk [vmem:[#allocation0] ss:$8 sm:$0x3] %vm23_vm3, %v22_v9  }
  0x7b   :  { %31 = vst.msk [vmem:[#allocation0] ss:$8 sm:$0x3] %vm30_vm4, %v29_v11  }
  0x7c   :  { %v36_v12 = vpop.permute.xlu0 %35   ;;  %v43_v13 = vpop.permute.xlu1 %42  }
  0x7d   :  { %38 = vst.msk [vmem:[#allocation0] ss:$8 sm:$0x3] %vm37_vm5, %v36_v12  }
  0x7e   :  { %45 = vst.msk [vmem:[#allocation0] ss:$8 sm:$0x3] %vm44_vm6, %v43_v13  }
  0x80   :  { %v50_v14 = vpop.permute.xlu0 %49  }
  0x81   :  { %52 = vst.msk [vmem:[#allocation0] ss:$8 sm:$0x3] %vm51_vm7, %v50_v14  }
  0x88   :  { %v57_v15 = vld [vmem:[#allocation0] sm:$0x1]  ;;  %v62_v16 = vld [vmem:[#allocation0 + $0x8] sm:$0x1] }
  0x89   :  { %60 = vst [vmem:[%s130_s1] sm:$0x1] %v57_v15  ;;  %74 = vst [vmem:[%s130_s1 + $0x1] sm:$0x1] %v62_v16 }

// kernel: tile.18
= control target key start
LH: loop header
LB: loop body
LE: loop exit
PB: predicated region body
PF: predicated region fallthrough
CT: control target
= control target key end

     0   :  { %s22_s0 = inlined_call_operand.vmem [shape: f32[32], index: 0, kind: input, shape index: {}]   ;;  %s23_s1 = inlined_call_operand.vmem [shape: f32[7,32], index: 1, kind: output, shape index: {}]  }
   0x1   :  { %v4_v0 = vld [vmem:[%s22_s0] ss:$0 sm:$0xff] }
   0x2   :  { %5 = vst [vmem:[%s23_s1] sm:$0xff] %v4_v0 }

// kernel: tile.19
= control target key start
LH: loop header
LB: loop body
LE: loop exit
PB: predicated region body
PF: predicated region fallthrough
CT: control target
= control target key end

     0   :  { %s13_s8 = smov 3  ;;  %s47_s9 = smov 96   ;;  %vm4_vm0 = vcmask 261120   ;;  %vm10_vm1 = vcmask 1048320   ;;  %vm17_vm2 = vcmask 785920   ;;  %vm24_vm3 = vcmask 523520   ;;  %s78_s0 = inlined_call_operand.vmem [shape: f32[7,32], index: 0, kind: input, shape index: {}]   ;;  %s79_s1 = inlined_call_operand.vmem [shape: f32[1,224], index: 1, kind: output, shape index: {}]  }
   0x1   :  { %v40_v0 = vld [vmem:[%s78_s0 + $0x3] sm:$0x1]   ;;  %s20_s10 = smov 3  ;;  %v41_v1 = vld [vmem:[%s78_s0 + $0x2] ss:$4 sm:%s13_s8]   ;;  %s2_s15 = smov 3 }
   0x2   :  { %8 = vrot.lane.b32.xlu0 %v40_v0, %s47_s9  ;;  %v42_v2 = vld [vmem:[%s78_s0 + $0x1] ss:$4 sm:%s20_s10]   ;;  %s48_s16 = smov 32  }
   0x3   :  { %22 = vrot.lane.b32.xlu1 %v42_v2, %s48_s16  ;;  %v3_v3 = vld [vmem:[%s78_s0] ss:$4 sm:%s2_s15]   ;;  %s49_s0 = smov 64  }
   0x4   :  { %5 = vst.msk [vmem:[#allocation0] ss:$8 sm:$0x3] %vm4_vm0, %v3_v3  }
   0x6   :  { %15 = vrot.lane.b32.xlu0 %v41_v1, %s49_s0 }
  0x74   :  { %v9_v4 = vpop.permute.xlu0 %8  }
  0x75   :  { %11 = vst.msk [vmem:[#allocation0] sm:$0x1] %vm10_vm1, %v9_v4   ;;  %v23_v5 = vpop.permute.xlu1 %22  }
  0x78   :  { %v16_v6 = vpop.permute.xlu0 %15  }
  0x79   :  { %18 = vst.msk [vmem:[#allocation0] ss:$8 sm:$0x3] %vm17_vm2, %v16_v6  }
  0x7a   :  { %25 = vst.msk [vmem:[#allocation0] ss:$8 sm:$0x3] %vm24_vm3, %v23_v5  }
  0x81   :  { %v30_v7 = vld [vmem:[#allocation0] sm:$0x1]  ;;  %v35_v8 = vld [vmem:[#allocation0 + $0x8] sm:$0x1] }
  0x82   :  { %33 = vst [vmem:[%s79_s1] sm:$0x1] %v30_v7  ;;  %43 = vst [vmem:[%s79_s1 + $0x1] sm:$0x1] %v35_v8 }

// kernel: simple_cnn3_forward.3
= control target key start
LH: loop header
LB: loop body
LE: loop exit
PB: predicated region body
PF: predicated region fallthrough
CT: control target
= control target key end

     0   :  { %v2842_v1 = vmov 0   ;;  %vm55_vm0 = vcmask 261120   ;;  %vm1282_vm1 = vcmask 1043456   ;;  %vm1283_vm2 = vcmask 785412   ;;  %s3609_s1 = inlined_call_operand.vmem [shape: bf16[10,32,224], index: 1, kind: input, shape index: {}]   ;;  %s3610_s0 = inlined_call_operand.vmem [shape: bf16[4,16,32], index: 0, kind: input, shape index: {}]   ;;  %s3611_s2 = inlined_call_operand.vmem [shape: f32[1,224], index: 2, kind: input, shape index: {}]   ;;  %s3612_s3 = inlined_call_operand.vmem [shape: bf16[2,14,224], index: 3, kind: output, shape index: {}]  }
   0x1   :  { %v2866_v0 = vld [vmem:[%s3609_s1 + $0x34] ss:$8 sps:$4 sm:$0xff]   ;;  %91 = vmatprep.mubr.bf16.mxu0 %v2842_v1  ;;  %162 = vmatprep.mubr.bf16.mxu1 %v2842_v1  ;;  %v2879_v3 = vld [vmem:[%s3609_s1 + $0x30] ss:$8 sps:$4 sm:$0xff]   ;;  %v2890_v5 = vld [vmem:[%s3609_s1 + $0x24] ss:$8 sps:$4 sm:$0xff]  }
   0x2   :  { %v2873_v2 = vld [vmem:[%s3609_s1 + $0x14] ss:$8 sps:$4 sm:$0xff]   ;;  %71 = vmatprep.subr.bf16.mxu0 %v2866_v0  ;;  %v2884_v4 = vld [vmem:[%s3609_s1 + $0x10] ss:$8 sps:$4 sm:$0xff]   ;;  %v2897_v6 = vld [vmem:[%s3609_s1 + $0x4] ss:$8 sps:$4 sm:$0xff]  }
   0x3   :  { %142 = vmatprep.subr.bf16.mxu1 %v2873_v2  ;;  %72 = vmatpush1.bf16.msra.mxu0 %v2879_v3  ;;  %v2902_v7 = vld [vmem:[%s3609_s1 + $0x20] ss:$8 sps:$4 sm:$0xff]   ;;  %v2544_v10 = vld [vmem:[%s3610_s0 + $0xc] sm:$0x7]  ;;  %v17_v15 = vld [vmem:[%s3610_s0 + $0x4] sm:$0x7] }
   0x4   :  { %143 = vmatpush1.bf16.msra.mxu1 %v2884_v4  ;;  %73 = vmatprep.subr.bf16.mxu0 %v2890_v5  ;;  %v2908_v8 = vld [vmem:[%s3609_s1] ss:$8 sps:$4 sm:$0xff]   ;;  %v2920_v11 = vld [vmem:[%s3610_s0 + $0xc] sm:$0xf]  ;;  %v173_v16 = vld [vmem:[%s3610_s0 + $0x4] sm:$0xf] }
   0x5   :  { %v2543_v9 = vld [vmem:[%s3610_s0 + $0x8] sm:$0xf]  ;;  %144 = vmatprep.subr.bf16.mxu1 %v2897_v6  ;;  %v16_v12 = vld [vmem:[%s3610_s0] sm:$0xf]  ;;  %v2941_v19 = vld [vmem:[%s3609_s1 + $0x50] ss:$8 sps:$4 sm:$0xff]  }
   0x6   :  { %v2925_v13 = vcombine.low %v2543_v9, %v2544_v10  ;;  %v2576_v14 = vcombine.low %v2543_v9, %v2920_v11  ;;  %v2936_v17 = vcombine.low %v16_v12, %v17_v15  ;;  %v2565_v18 = vcombine.low %v16_v12, %v173_v16  ;;  %v2946_v21 = vld [vmem:[%s3609_s1 + $0x54] ss:$8 sps:$4 sm:$0xff]   ;;  %v2951_v23 = vld [vmem:[%s3609_s1 + $0x70] ss:$8 sps:$4 sm:$0xff]   ;;  %v2965_v27 = vld [vmem:[%s3609_s1 + $0x40] ss:$8 sps:$4 sm:$0xff]  }
   0x7   :  { %74 = vmatpush1.bf16.msra.mxu0 %v2902_v7  ;;  %v2956_v24 = vld [vmem:[%s3609_s1 + $0x74] ss:$8 sps:$4 sm:$0xff]   ;;  %v2972_v30 = vld [vmem:[%s3609_s1 + $0x44] ss:$8 sps:$4 sm:$0xff]   ;;  %v2979_v31 = vld [vmem:[%s3609_s1 + $0x60] ss:$8 sps:$4 sm:$0xff]  }
   0x8   :  { %145 = vmatpush1.bf16.msra.mxu1 %v2908_v8  ;;  %v271_v20 = vshll.u32 %v2576_v14, 16  ;;  %v185_v22 = vshll.u32 %v2565_v18, 16  ;;  %v269_v25 = vshrl.u32 %v2576_v14, 16  ;;  %v183_v26 = vshrl.u32 %v2565_v18, 16  ;;  %224 = vmatprep.subr.bf16.mxu0 %v2946_v21  ;;  %v2984_v32 = vld [vmem:[%s3609_s1 + $0x64] ss:$8 sps:$4 sm:$0xff]   ;;  %vm3512_vm3 = vmor %vm1283_vm2, %vm1282_vm1 }
   0x9   :  { %310 = vmatprep.subr.bf16.mxu1 %v2956_v24  ;;  %v2991_v33 = vld [vmem:[%s3609_s1 + $0x94] ss:$8 sps:$4 sm:$0xff]   ;;  %v345_v34 = vld [vmem:[%s3610_s0] sm:$0xe]  ;;  %v3012_v38 = vld [vmem:[%s3609_s1 + $0x90] ss:$8 sps:$4 sm:$0xff]  }
   0xa   :  { %2554 = vmatmul.mubr.msk.bf16.vlgmr.msra.gmra.mxu0 %vm55_vm0, %v2925_v13  ;;  %v273_v28 = vrot.slane %v271_v20, 1  ;;  %v187_v29 = vrot.slane %v185_v22, 1  ;;  %v3005_v37 = vld [vmem:[%s3609_s1 + $0xd4] ss:$8 sps:$4 sm:$0xff]   ;;  %v3017_v39 = vld [vmem:[%s3609_s1 + $0xd0] ss:$8 sps:$4 sm:$0xff]   ;;  %v2586_v42 = vcombine.low %v345_v34, %v173_v16 }
   0xb   :  { %2560 = vmatmul.mubr.msk.bf16.vlgmr.msra.gmra.mxu1 %vm55_vm0, %v2936_v17  ;;  %225 = vmatpush1.bf16.msra.mxu0 %v2941_v19  ;;  %v3024_v40 = vld [vmem:[%s3609_s1 + $0x84] ss:$8 sps:$4 sm:$0xff]   ;;  %v3040_v43 = vld [vmem:[%s3609_s1 + $0x80] ss:$8 sps:$4 sm:$0xff]   ;;  %v3052_v45 = vld [vmem:[%s3609_s1 + $0xb4] ss:$8 sps:$4 sm:$0xff]  }
   0xc   :  { %311 = vmatpush1.bf16.msra.mxu1 %v2951_v23  ;;  %226 = vmatprep.subr.bf16.mxu0 %v2972_v30  ;;  %v2998_v35 = vor.u32 %v187_v29, %v183_v26  ;;  %v3000_v36 = vor.u32 %v273_v28, %v269_v25  ;;  %v3029_v41 = vld [vmem:[%s3609_s1 + $0xc4] ss:$8 sps:$4 sm:$0xff]   ;;  %v3045_v44 = vld [vmem:[%s3609_s1 + $0xc0] ss:$8 sps:$4 sm:$0xff]   ;;  %v3057_v46 = vld [vmem:[%s3609_s1 + $0xf4] ss:$8 sps:$4 sm:$0xff]  }
   0xd   :  { %244 = vmatprep.mubr.bf16.mxu0 %v2842_v1  ;;  %312 = vmatprep.subr.bf16.mxu1 %v2984_v32  ;;  %v3061_v47 = vrot.slane %v2586_v42, 1  ;;  %v3068_v48 = vld [vmem:[%s3609_s1 + $0xb0] ss:$8 sps:$4 sm:$0xff]   ;;  %v3080_v50 = vld [vmem:[%s3609_s1 + $0xa4] ss:$8 sps:$4 sm:$0xff]   ;;  %vm1286_vm4 = vcmask 1042432  }
   0xe   :  { %330 = vmatprep.mubr.bf16.mxu1 %v2842_v1  ;;  %v3073_v49 = vld [vmem:[%s3609_s1 + $0xf0] ss:$8 sps:$4 sm:$0xff]   ;;  %v3085_v51 = vld [vmem:[%s3609_s1 + $0xe4] ss:$8 sps:$4 sm:$0xff]   ;;  %v3096_v52 = vld [vmem:[%s3609_s1 + $0xa0] ss:$8 sps:$4 sm:$0xff]  }
   0xf   :  { %227 = vmatpush1.bf16.msra.mxu0 %v2965_v27  ;;  %v3101_v53 = vld [vmem:[%s3609_s1 + $0xe0] ss:$8 sps:$4 sm:$0xff]   ;;  %v3108_v54 = vld [vmem:[%s3609_s1 + $0x114] ss:$8 sps:$4 sm:$0xff]   ;;  %v3122_v56 = vld [vmem:[%s3609_s1 + $0x110] ss:$8 sps:$4 sm:$0xff]  }
  0x10   :  { %313 = vmatpush1.bf16.msra.mxu1 %v2979_v31  ;;  %390 = vmatprep.subr.bf16.mxu0 %v2991_v33  ;;  %v3113_v55 = vld [vmem:[%s3609_s1 + $0x134] ss:$8 sps:$4 sm:$0xff]   ;;  %v3127_v57 = vld [vmem:[%s3609_s1 + $0x130] ss:$8 sps:$4 sm:$0xff]   ;;  %v3134_v58 = vld [vmem:[%s3609_s1 + $0x104] ss:$8 sps:$4 sm:$0xff]  }
  0x11   :  { %467 = vmatprep.subr.bf16.mxu1 %v3005_v37  ;;  %v3139_v59 = vld [vmem:[%s3609_s1 + $0x124] ss:$8 sps:$4 sm:$0xff]   ;;  %v3150_v60 = vld [vmem:[%s3609_s1 + $0x100] ss:$8 sps:$4 sm:$0xff]   ;;  %v3239_v10 = vld [vmem:[%s3610_s0 + $0x1c] sm:$0xf] }
  0x12   :  { %2570 = vmatmul.mubr.msk.bf16.vlgmr.msra.gmra.mxu0 %vm55_vm0, %v2998_v35  ;;  %v3155_v61 = vld [vmem:[%s3609_s1 + $0x120] ss:$8 sps:$4 sm:$0xff]   ;;  %v2653_v12 = vld [vmem:[%s3610_s0 + $0x18] sm:$0xf]  ;;  %v2654_v16 = vld [vmem:[%s3610_s0 + $0x1c] sm:$0x7] }
  0x13   :  { %2581 = vmatmul.mubr.msk.bf16.vlgmr.msra.gmra.mxu1 %vm55_vm0, %v3000_v36  ;;  %391 = vmatpush1.bf16.msra.mxu0 %v3012_v38  ;;  %v2641_v62 = vld [vmem:[%s3610_s0 + $0x8] sm:$0xe]  ;;  %v2687_v14 = vcombine.low %v2653_v12, %v3239_v10  ;;  %v3268_v18 = vcombine.low %v2653_v12, %v2654_v16  ;;  %v2693_v42 = vld [vmem:[%s3610_s0 + $0x10] sm:$0xe]  ;;  %vm1287_vm5 = vcmask 784388  }
  0x14   :  { %468 = vmatpush1.bf16.msra.mxu1 %v3017_v39  ;;  %392 = vmatprep.subr.bf16.mxu0 %v3024_v40  ;;  %v2642_v63 = vcombine.low %v2641_v62, %v2920_v11  ;;  %v2671_v11 = vld [vmem:[%s3610_s0 + $0x14] sm:$0xf]  ;;  %vm3524_vm6 = vmor %vm1287_vm5, %vm1286_vm4 }
  0x15   :  { %469 = vmatprep.subr.bf16.mxu1 %v3029_v41  ;;  %410 = vmatprep.mubr.bf16.mxu0 %v2842_v1  ;;  %v1542_v25 = vshll.u32 %v2687_v14, 16  ;;  %v1540_v29 = vshrl.u32 %v2687_v14, 16 }
  0x16   :  { %487 = vmatprep.mubr.bf16.mxu1 %v2842_v1  ;;  %v961_v9 = vrot.slane %v2642_v63, 1 }
  0x17   :  { %393 = vmatpush1.bf16.msra.mxu0 %v3040_v43  ;;  %v1544_v34 = vrot.slane %v1542_v25, 1 }
  0x18   :  { %470 = vmatpush1.bf16.msra.mxu1 %v3045_v44  ;;  %530 = vmatprep.subr.bf16.mxu0 %v3052_v45 }
  0x19   :  { %598 = vmatprep.subr.bf16.mxu1 %v3057_v46 }
  0x1a   :  { %2591 = vmatmul.mubr.msk.bf16.vlgmr.msra.gmra.mxu0 %vm55_vm0, %v3061_v47 }
  0x1b   :  { %2604 = vmatmul.mubr.msk.bf16.vlgmr.msra.gmra.mxu1 %vm55_vm0, %v2925_v13  ;;  %531 = vmatpush1.bf16.msra.mxu0 %v3068_v48 }
  0x1c   :  { %599 = vmatpush1.bf16.msra.mxu1 %v3073_v49  ;;  %532 = vmatprep.subr.bf16.mxu0 %v3080_v50 }
  0x1d   :  { %600 = vmatprep.subr.bf16.mxu1 %v3085_v51  ;;  %550 = vmatprep.mubr.bf16.mxu0 %v2842_v1 }
  0x1e   :  { %618 = vmatprep.mubr.bf16.mxu1 %v2842_v1 }
  0x1f   :  { %533 = vmatpush1.bf16.msra.mxu0 %v3096_v52 }
  0x20   :  { %601 = vmatpush1.bf16.msra.mxu1 %v3101_v53  ;;  %670 = vmatprep.subr.bf16.mxu0 %v3108_v54 }
  0x21   :  { %742 = vmatprep.subr.bf16.mxu1 %v3113_v55 }
  0x22   :  { %2609 = vmatmul.mubr.msk.bf16.vlgmr.msra.gmra.mxu0 %vm55_vm0, %v2936_v17  ;;  %v2652_v17 = vld [vmem:[%s3610_s0 + $0x14] sm:$0x7] }
  0x23   :  { %2618 = vmatmul.mubr.msk.bf16.vlgmr.msra.gmra.mxu1 %vm55_vm0, %v2998_v35  ;;  %671 = vmatpush1.bf16.msra.mxu0 %v3122_v56 }
  0x24   :  { %743 = vmatpush1.bf16.msra.mxu1 %v3127_v57  ;;  %672 = vmatprep.subr.bf16.mxu0 %v3134_v58 }
  0x25   :  { %744 = vmatprep.subr.bf16.mxu1 %v3139_v59  ;;  %690 = vmatprep.mubr.bf16.mxu0 %v2842_v1 }
  0x26   :  { %762 = vmatprep.mubr.bf16.mxu1 %v2842_v1 }
  0x27   :  { %673 = vmatpush1.bf16.msra.mxu0 %v3150_v60 }
  0x28   :  { %745 = vmatpush1.bf16.msra.mxu1 %v3155_v61  ;;  %789 = vmatprep.subr.bf16.mxu0 %v2866_v0 }
  0x29   :  { %832 = vmatprep.subr.bf16.mxu1 %v2873_v2 }
  0x2a   :  { %2627 = vmatmul.mubr.msk.bf16.vlgmr.msra.gmra.mxu0 %vm55_vm0, %v3000_v36 }
  0x2b   :  { %2636 = vmatmul.mubr.msk.bf16.vlgmr.msra.gmra.mxu1 %vm55_vm0, %v3061_v47  ;;  %790 = vmatpush1.bf16.msra.mxu0 %v2879_v3 }
  0x2c   :  { %833 = vmatpush1.bf16.msra.mxu1 %v2884_v4  ;;  %791 = vmatprep.subr.bf16.mxu0 %v2890_v5 }
  0x2d   :  { %834 = vmatprep.subr.bf16.mxu1 %v2897_v6  ;;  %809 = vmatprep.mubr.bf16.mxu0 %v2842_v1 }
  0x2e   :  { %852 = vmatprep.mubr.bf16.mxu1 %v2842_v1 }
  0x2f   :  { %792 = vmatpush1.bf16.msra.mxu0 %v2902_v7 }
  0x30   :  { %835 = vmatpush1.bf16.msra.mxu1 %v2908_v8  ;;  %875 = vmatprep.subr.bf16.mxu0 %v2946_v21 }
  0x31   :  { %922 = vmatprep.subr.bf16.mxu1 %v2956_v24 }
  0x32   :  { %2637 = vmatmul.mubr.msk.bf16.vlgmr.msra.gmra.mxu0 %vm55_vm0, %v2998_v35 }
  0x33   :  { %2638 = vmatmul.mubr.msk.bf16.vlgmr.msra.gmra.mxu1 %vm55_vm0, %v2925_v13  ;;  %876 = vmatpush1.bf16.msra.mxu0 %v2941_v19 }
  0x34   :  { %923 = vmatpush1.bf16.msra.mxu1 %v2951_v23  ;;  %877 = vmatprep.subr.bf16.mxu0 %v2972_v30 }
  0x35   :  { %924 = vmatprep.subr.bf16.mxu1 %v2984_v32  ;;  %895 = vmatprep.mubr.bf16.mxu0 %v2842_v1 }
  0x36   :  { %942 = vmatprep.mubr.bf16.mxu1 %v2842_v1 }
  0x37   :  { %878 = vmatpush1.bf16.msra.mxu0 %v2965_v27 }
  0x38   :  { %925 = vmatpush1.bf16.msra.mxu1 %v2979_v31  ;;  %977 = vmatprep.subr.bf16.mxu0 %v2991_v33 }
  0x39   :  { %1024 = vmatprep.subr.bf16.mxu1 %v3005_v37 }
  0x3a   :  { %2639 = vmatmul.mubr.msk.bf16.vlgmr.msra.gmra.mxu0 %vm55_vm0, %v3000_v36 }
  0x3b   :  { %2640 = vmatmul.mubr.msk.bf16.vlgmr.msra.gmra.mxu1 %vm55_vm0, %v3061_v47  ;;  %978 = vmatpush1.bf16.msra.mxu0 %v3012_v38 }
  0x3c   :  { %1025 = vmatpush1.bf16.msra.mxu1 %v3017_v39  ;;  %979 = vmatprep.subr.bf16.mxu0 %v3024_v40 }
  0x3d   :  { %1026 = vmatprep.subr.bf16.mxu1 %v3029_v41  ;;  %997 = vmatprep.mubr.bf16.mxu0 %v2842_v1 }
  0x3e   :  { %1044 = vmatprep.mubr.bf16.mxu1 %v2842_v1 }
  0x3f   :  { %980 = vmatpush1.bf16.msra.mxu0 %v3040_v43 }
  0x40   :  { %1027 = vmatpush1.bf16.msra.mxu1 %v3045_v44  ;;  %1067 = vmatprep.subr.bf16.mxu0 %v3052_v45 }
  0x41   :  { %1110 = vmatprep.subr.bf16.mxu1 %v3057_v46 }
  0x42   :  { %2643 = vmatmul.mubr.msk.bf16.vlgmr.msra.gmra.mxu0 %vm55_vm0, %v961_v9 }
  0x43   :  { %2644 = vmatmul.mubr.msk.bf16.vlgmr.msra.gmra.mxu1 %vm55_vm0, %v2998_v35  ;;  %1068 = vmatpush1.bf16.msra.mxu0 %v3068_v48 }
  0x44   :  { %1111 = vmatpush1.bf16.msra.mxu1 %v3073_v49  ;;  %1069 = vmatprep.subr.bf16.mxu0 %v3080_v50 }
  0x45   :  { %1112 = vmatprep.subr.bf16.mxu1 %v3085_v51  ;;  %1087 = vmatprep.mubr.bf16.mxu0 %v2842_v1 }
  0x46   :  { %1130 = vmatprep.mubr.bf16.mxu1 %v2842_v1 }
  0x47   :  { %1070 = vmatpush1.bf16.msra.mxu0 %v3096_v52 }
  0x48   :  { %1113 = vmatpush1.bf16.msra.mxu1 %v3101_v53  ;;  %1157 = vmatprep.subr.bf16.mxu0 %v3108_v54 }
  0x49   :  { %1204 = vmatprep.subr.bf16.mxu1 %v3113_v55 }
  0x4a   :  { %2645 = vmatmul.mubr.msk.bf16.vlgmr.msra.gmra.mxu0 %vm55_vm0, %v2925_v13  ;;  %v2651_v13 = vld [vmem:[%s3610_s0 + $0x10] sm:$0xf] }
  0x4b   :  { %2646 = vmatmul.mubr.msk.bf16.vlgmr.msra.gmra.mxu1 %vm55_vm0, %v3000_v36  ;;  %1158 = vmatpush1.bf16.msra.mxu0 %v3122_v56  ;;  %v2676_v15 = vcombine.low %v2651_v13, %v2671_v11  ;;  %v2665_v20 = vcombine.low %v2651_v13, %v2652_v17  ;;  %v3285_v36 = vor.u32 %v1544_v34, %v1540_v29 }
  0x4c   :  { %1205 = vmatpush1.bf16.msra.mxu1 %v3127_v57  ;;  %1159 = vmatprep.subr.bf16.mxu0 %v3134_v58 }
  0x4d   :  { %1206 = vmatprep.subr.bf16.mxu1 %v3139_v59  ;;  %1177 = vmatprep.mubr.bf16.mxu0 %v2842_v1  ;;  %v1457_v22 = vshll.u32 %v2676_v15, 16  ;;  %v1455_v26 = vshrl.u32 %v2676_v15, 16 }
  0x4e   :  { %1224 = vmatprep.mubr.bf16.mxu1 %v2842_v1 }
  0x4f   :  { %1160 = vmatpush1.bf16.msra.mxu0 %v3150_v60  ;;  %v1459_v28 = vrot.slane %v1457_v22, 1 }
  0x50   :  { %1207 = vmatpush1.bf16.msra.mxu1 %v3155_v61  ;;  %1344 = vmatprep.subr.bf16.mxu0 %v2866_v0 }
  0x51   :  { %1415 = vmatprep.subr.bf16.mxu1 %v2873_v2  ;;  %v3283_v35 = vor.u32 %v1459_v28, %v1455_v26 }
  0x52   :  { %2647 = vmatmul.mubr.msk.bf16.vlgmr.msra.gmra.mxu0 %vm55_vm0, %v3061_v47  ;;  %v2698_v47 = vcombine.low %v2693_v42, %v2671_v11 }
  0x53   :  { %2648 = vmatmul.mubr.msk.bf16.vlgmr.msra.gmra.mxu1 %vm55_vm0, %v961_v9  ;;  %1345 = vmatpush1.bf16.msra.mxu0 %v2879_v3 }
  0x54   :  { %1416 = vmatpush1.bf16.msra.mxu1 %v2884_v4  ;;  %1346 = vmatprep.subr.bf16.mxu0 %v2890_v5  ;;  %v3304_v62 = vrot.slane %v2698_v47, 1 }
  0x55   :  { %1417 = vmatprep.subr.bf16.mxu1 %v2897_v6  ;;  %1364 = vmatprep.mubr.bf16.mxu0 %v2842_v1 }
  0x56   :  { %1435 = vmatprep.mubr.bf16.mxu1 %v2842_v1 }
  0x57   :  { %1347 = vmatpush1.bf16.msra.mxu0 %v2902_v7 }
  0x58   :  { %1418 = vmatpush1.bf16.msra.mxu1 %v2908_v8  ;;  %1496 = vmatprep.subr.bf16.mxu0 %v2946_v21 }
  0x59   :  { %1581 = vmatprep.subr.bf16.mxu1 %v2956_v24 }
  0x5a   :  { %2664 = vmatmul.mubr.msk.bf16.vlgmr.msra.gmra.mxu0 %vm55_vm0, %v3268_v18 }
  0x5b   :  { %2670 = vmatmul.mubr.msk.bf16.vlgmr.msra.gmra.mxu1 %vm55_vm0, %v2665_v20  ;;  %1497 = vmatpush1.bf16.msra.mxu0 %v2941_v19 }
  0x5c   :  { %1582 = vmatpush1.bf16.msra.mxu1 %v2951_v23  ;;  %1498 = vmatprep.subr.bf16.mxu0 %v2972_v30 }
  0x5d   :  { %1583 = vmatprep.subr.bf16.mxu1 %v2984_v32  ;;  %1516 = vmatprep.mubr.bf16.mxu0 %v2842_v1 }
  0x5e   :  { %1601 = vmatprep.mubr.bf16.mxu1 %v2842_v1 }
  0x5f   :  { %1499 = vmatpush1.bf16.msra.mxu0 %v2965_v27 }
  0x60   :  { %1584 = vmatpush1.bf16.msra.mxu1 %v2979_v31  ;;  %1660 = vmatprep.subr.bf16.mxu0 %v2991_v33 }
  0x61   :  { %1735 = vmatprep.subr.bf16.mxu1 %v3005_v37 }
  0x62   :  { %2681 = vmatmul.mubr.msk.bf16.vlgmr.msra.gmra.mxu0 %vm55_vm0, %v3283_v35 }
  0x63   :  { %2692 = vmatmul.mubr.msk.bf16.vlgmr.msra.gmra.mxu1 %vm55_vm0, %v3285_v36  ;;  %1661 = vmatpush1.bf16.msra.mxu0 %v3012_v38 }
  0x64   :  { %1736 = vmatpush1.bf16.msra.mxu1 %v3017_v39  ;;  %1662 = vmatprep.subr.bf16.mxu0 %v3024_v40 }
  0x65   :  { %1737 = vmatprep.subr.bf16.mxu1 %v3029_v41  ;;  %1680 = vmatprep.mubr.bf16.mxu0 %v2842_v1 }
  0x66   :  { %1755 = vmatprep.mubr.bf16.mxu1 %v2842_v1 }
  0x67   :  { %1663 = vmatpush1.bf16.msra.mxu0 %v3040_v43 }
  0x68   :  { %1738 = vmatpush1.bf16.msra.mxu1 %v3045_v44  ;;  %1798 = vmatprep.subr.bf16.mxu0 %v3052_v45 }
  0x69   :  { %1865 = vmatprep.subr.bf16.mxu1 %v3057_v46 }
  0x6a   :  { %2703 = vmatmul.mubr.msk.bf16.vlgmr.msra.gmra.mxu0 %vm55_vm0, %v3304_v62 }
  0x6b   :  { %2716 = vmatmul.mubr.msk.bf16.vlgmr.msra.gmra.mxu1 %vm55_vm0, %v3268_v18  ;;  %1799 = vmatpush1.bf16.msra.mxu0 %v3068_v48 }
  0x6c   :  { %1866 = vmatpush1.bf16.msra.mxu1 %v3073_v49  ;;  %1800 = vmatprep.subr.bf16.mxu0 %v3080_v50 }
  0x6d   :  { %1867 = vmatprep.subr.bf16.mxu1 %v3085_v51  ;;  %1818 = vmatprep.mubr.bf16.mxu0 %v2842_v1 }
  0x6e   :  { %1885 = vmatprep.mubr.bf16.mxu1 %v2842_v1 }
  0x6f   :  { %1801 = vmatpush1.bf16.msra.mxu0 %v3096_v52 }
  0x70   :  { %1868 = vmatpush1.bf16.msra.mxu1 %v3101_v53  ;;  %1936 = vmatprep.subr.bf16.mxu0 %v3108_v54 }
  0x71   :  { %2007 = vmatprep.subr.bf16.mxu1 %v3113_v55 }
  0x72   :  { %2721 = vmatmul.mubr.msk.bf16.vlgmr.msra.gmra.mxu0 %vm55_vm0, %v2665_v20 }
  0x73   :  { %2730 = vmatmul.mubr.msk.bf16.vlgmr.msra.gmra.mxu1 %vm55_vm0, %v3283_v35  ;;  %1937 = vmatpush1.bf16.msra.mxu0 %v3122_v56 }
  0x74   :  { %2008 = vmatpush1.bf16.msra.mxu1 %v3127_v57  ;;  %1938 = vmatprep.subr.bf16.mxu0 %v3134_v58 }
  0x75   :  { %2009 = vmatprep.subr.bf16.mxu1 %v3139_v59  ;;  %1956 = vmatprep.mubr.bf16.mxu0 %v2842_v1 }
  0x76   :  { %2027 = vmatprep.mubr.bf16.mxu1 %v2842_v1 }
  0x77   :  { %1939 = vmatpush1.bf16.msra.mxu0 %v3150_v60 }
  0x78   :  { %2010 = vmatpush1.bf16.msra.mxu1 %v3155_v61  ;;  %2054 = vmatprep.subr.bf16.mxu0 %v2866_v0  ;;  %v2753_v0 = vld [vmem:[%s3610_s0 + $0x18] sm:$0xe] }
  0x79   :  { %2097 = vmatprep.subr.bf16.mxu1 %v2873_v2  ;;  %v2754_v2 = vcombine.low %v2753_v0, %v3239_v10 }
  0x7a   :  { %2739 = vmatmul.mubr.msk.bf16.vlgmr.msra.gmra.mxu0 %vm55_vm0, %v3285_v36 }
  0x7b   :  { %2748 = vmatmul.mubr.msk.bf16.vlgmr.msra.gmra.mxu1 %vm55_vm0, %v3304_v62  ;;  %2055 = vmatpush1.bf16.msra.mxu0 %v2879_v3  ;;  %v2226_v3 = vrot.slane %v2754_v2, 1 }
  0x7c   :  { %2098 = vmatpush1.bf16.msra.mxu1 %v2884_v4  ;;  %2056 = vmatprep.subr.bf16.mxu0 %v2890_v5 }
  0x7d   :  { %2099 = vmatprep.subr.bf16.mxu1 %v2897_v6  ;;  %2074 = vmatprep.mubr.bf16.mxu0 %v2842_v1 }
  0x7e   :  { %2117 = vmatprep.mubr.bf16.mxu1 %v2842_v1 }
  0x7f   :  { %2057 = vmatpush1.bf16.msra.mxu0 %v2902_v7 }
  0x80   :  { %2100 = vmatpush1.bf16.msra.mxu1 %v2908_v8  ;;  %2140 = vmatprep.subr.bf16.mxu0 %v2946_v21 }
  0x81   :  { %2187 = vmatprep.subr.bf16.mxu1 %v2956_v24 }
  0x82   :  { %2749 = vmatmul.mubr.msk.bf16.vlgmr.msra.gmra.mxu0 %vm55_vm0, %v3283_v35 }
  0x83   :  { %2750 = vmatmul.mubr.msk.bf16.vlgmr.msra.gmra.mxu1 %vm55_vm0, %v3268_v18  ;;  %2141 = vmatpush1.bf16.msra.mxu0 %v2941_v19 }
  0x84   :  { %2188 = vmatpush1.bf16.msra.mxu1 %v2951_v23  ;;  %2142 = vmatprep.subr.bf16.mxu0 %v2972_v30 }
  0x85   :  { %2189 = vmatprep.subr.bf16.mxu1 %v2984_v32  ;;  %2160 = vmatprep.mubr.bf16.mxu0 %v2842_v1 }
  0x86   :  { %2207 = vmatprep.mubr.bf16.mxu1 %v2842_v1 }
  0x87   :  { %2143 = vmatpush1.bf16.msra.mxu0 %v2965_v27 }
  0x88   :  { %2190 = vmatpush1.bf16.msra.mxu1 %v2979_v31  ;;  %2242 = vmatprep.subr.bf16.mxu0 %v2991_v33 }
  0x89   :  { %2289 = vmatprep.subr.bf16.mxu1 %v3005_v37 }
  0x8a   :  { %2751 = vmatmul.mubr.msk.bf16.vlgmr.msra.gmra.mxu0 %vm55_vm0, %v3285_v36 }
  0x8b   :  { %2752 = vmatmul.mubr.msk.bf16.vlgmr.msra.gmra.mxu1 %vm55_vm0, %v3304_v62  ;;  %2243 = vmatpush1.bf16.msra.mxu0 %v3012_v38 }
  0x8c   :  { %2290 = vmatpush1.bf16.msra.mxu1 %v3017_v39  ;;  %2244 = vmatprep.subr.bf16.mxu0 %v3024_v40 }
  0x8d   :  { %2291 = vmatprep.subr.bf16.mxu1 %v3029_v41  ;;  %2262 = vmatprep.mubr.bf16.mxu0 %v2842_v1 }
  0x8e   :  { %2309 = vmatprep.mubr.bf16.mxu1 %v2842_v1 }
  0x8f   :  { %2245 = vmatpush1.bf16.msra.mxu0 %v3040_v43 }
  0x90   :  { %2292 = vmatpush1.bf16.msra.mxu1 %v3045_v44  ;;  %2332 = vmatprep.subr.bf16.mxu0 %v3052_v45 }
  0x91   :  { %2375 = vmatprep.subr.bf16.mxu1 %v3057_v46 }
  0x92   :  { %2755 = vmatmul.mubr.msk.bf16.vlgmr.msra.gmra.mxu0 %vm55_vm0, %v2226_v3 }
  0x93   :  { %2756 = vmatmul.mubr.msk.bf16.vlgmr.msra.gmra.mxu1 %vm55_vm0, %v3283_v35  ;;  %2333 = vmatpush1.bf16.msra.mxu0 %v3068_v48 }
  0x94   :  { %2376 = vmatpush1.bf16.msra.mxu1 %v3073_v49  ;;  %2334 = vmatprep.subr.bf16.mxu0 %v3080_v50 }
  0x95   :  { %2377 = vmatprep.subr.bf16.mxu1 %v3085_v51  ;;  %2352 = vmatprep.mubr.bf16.mxu0 %v2842_v1 }
  0x96   :  { %2395 = vmatprep.mubr.bf16.mxu1 %v2842_v1 }
  0x97   :  { %2335 = vmatpush1.bf16.msra.mxu0 %v3096_v52 }
  0x98   :  { %2378 = vmatpush1.bf16.msra.mxu1 %v3101_v53  ;;  %2422 = vmatprep.subr.bf16.mxu0 %v3108_v54 }
  0x99   :  { %2469 = vmatprep.subr.bf16.mxu1 %v3113_v55 }
  0x9a   :  { %2757 = vmatmul.mubr.msk.bf16.vlgmr.msra.gmra.mxu0 %vm55_vm0, %v3268_v18 }
  0x9b   :  { %2758 = vmatmul.mubr.msk.bf16.vlgmr.msra.gmra.mxu1 %vm55_vm0, %v3285_v36  ;;  %2423 = vmatpush1.bf16.msra.mxu0 %v3122_v56 }
  0x9c   :  { %2470 = vmatpush1.bf16.msra.mxu1 %v3127_v57  ;;  %2424 = vmatprep.subr.bf16.mxu0 %v3134_v58 }
  0x9d   :  { %2471 = vmatprep.subr.bf16.mxu1 %v3139_v59  ;;  %2442 = vmatprep.mubr.bf16.mxu0 %v2842_v1 }
  0x9e   :  { %2489 = vmatprep.mubr.bf16.mxu1 %v2842_v1 }
  0x9f   :  { %2425 = vmatpush1.bf16.msra.mxu0 %v3150_v60 }
  0xa0   :  { %2472 = vmatpush1.bf16.msra.mxu1 %v3155_v61 }
  0xa2   :  { %2759 = vmatmul.mubr.msk.bf16.vlgmr.msra.gmra.mxu0 %vm55_vm0, %v3304_v62 }
  0xa3   :  { %2760 = vmatmul.mubr.msk.bf16.vlgmr.msra.gmra.mxu1 %vm55_vm0, %v2226_v3 }
  0xca   :  { %v93_v4 = vpop.f32.mrf.mxu0 }
  0xcb   :  { %v164_v5 = vpop.f32.mrf.mxu1 }
  0xcc   :  { %v165_v6 = vadd.f32 %v164_v5, %v93_v4  ;;  %v95_v7 = vpop.f32.mrf.mxu0  ;;  %v1252_v4 = vlaneseq }
  0xcd   :  { %v166_v8 = vpop.f32.mrf.mxu1 }
  0xce   :  { %v3411_v19 = vadd.f32 %v166_v8, %v95_v7  ;;  %v97_v21 = vpop.f32.mrf.mxu0 }
  0xcf   :  { %v168_v23 = vpop.f32.mrf.mxu1 }
  0xd0   :  { %v169_v24 = vadd.f32 %v168_v23, %v97_v21  ;;  %v99_v1 = vpop.f32.mrf.mxu0  ;;  %v1253_v21 = vshrl.u32 %v1252_v4, 7 }
  0xd1   :  { %v170_v27 = vpop.f32.mrf.mxu1 }
  0xd2   :  { %v3413_v30 = vadd.f32 %v170_v27, %v99_v1  ;;  %v246_v31 = vpop.f32.mrf.mxu0 }
  0xd3   :  { %v332_v32 = vpop.f32.mrf.mxu1  ;;  %v255_v33 = vadd.f32 %v246_v31, %v165_v6 }
  0xd4   :  { %v3415_v37 = vpop.f32.mrf.mxu0 }
  0xd5   :  { %v3417_v38 = vpop.f32.mrf.mxu1  ;;  %v3419_v39 = vadd.f32 %v332_v32, %v255_v33  ;;  %v1254_v32 = vsub.s32 0, %v1253_v21  ;;  %v1258_v33 = vsub.s32 1, %v1253_v21 }
  0xd6   :  { %v250_v40 = vpop.f32.mrf.mxu0 }
  0xd7   :  { %v336_v41 = vpop.f32.mrf.mxu1  ;;  %v257_v43 = vadd.f32 %v250_v40, %v169_v24  ;;  %v256_v40 = vadd.f32 %v3415_v37, %v3411_v19 }
  0xd8   :  { %v252_v44 = vpop.f32.mrf.mxu0 }
  0xd9   :  { %v3421_v45 = vpop.f32.mrf.mxu1  ;;  %v3423_v46 = vadd.f32 %v336_v41, %v257_v43  ;;  %v15_v41 = vld [vmem:[%s3611_s2] sm:$0x3]  ;;  %v258_v43 = vadd.f32 %v252_v44, %v3413_v30  ;;  %v342_v21 = vadd.f32 %v3417_v38, %v256_v40 }
  0xda   :  { %v3425_v48 = vpop.f32.mrf.mxu0 }
  0xdb   :  { %v489_v49 = vpop.f32.mrf.mxu1 }
  0xdc   :  { %v3427_v50 = vpop.f32.mrf.mxu0 }
  0xdd   :  { %v491_v51 = vpop.f32.mrf.mxu1 }
  0xde   :  { %v3429_v52 = vpop.f32.mrf.mxu0 }
  0xdf   :  { %v493_v53 = vpop.f32.mrf.mxu1 }
  0xe0   :  { %v3431_v54 = vpop.f32.mrf.mxu0 }
  0xe1   :  { %3619 = vst [vmem:[#allocation2_spill] sm:$0xff] %v3431_v54  ;;  %v495_v55 = vpop.f32.mrf.mxu1 }
  0xe2   :  { %v552_v56 = vpop.f32.mrf.mxu0 }
  0xe3   :  { %v620_v57 = vpop.f32.mrf.mxu1  ;;  %v553_v1 = vadd.f32 %v552_v56, %v489_v49 }
  0xe4   :  { %v554_v58 = vpop.f32.mrf.mxu0 }
  0xe5   :  { %v622_v59 = vpop.f32.mrf.mxu1  ;;  %v555_v54 = vadd.f32 %v554_v58, %v491_v51 }
  0xe6   :  { %v556_v60 = vpop.f32.mrf.mxu0 }
  0xe7   :  { %v3433_v61 = vpop.f32.mrf.mxu1 }
  0xe8   :  { %v558_v63 = vpop.f32.mrf.mxu0 }
  0xe9   :  { %v3435_v9 = vpop.f32.mrf.mxu1  ;;  %v559_v19 = vadd.f32 %v558_v63, %v495_v55 }
  0xea   :  { %v692_v10 = vpop.f32.mrf.mxu0 }
  0xeb   :  { %v3437_v11 = vpop.f32.mrf.mxu1 }
  0xec   :  { %v3439_v12 = vpop.f32.mrf.mxu0 }
  0xed   :  { %v3441_v13 = vpop.f32.mrf.mxu1 }
  0xee   :  { %v3443_v14 = vpop.f32.mrf.mxu0 }
  0xef   :  { %v3445_v15 = vpop.f32.mrf.mxu1 }
  0xf0   :  { %3620 = vst [vmem:[#allocation3_spill] sm:$0xff] %v3445_v15  ;;  %v3447_v16 = vpop.f32.mrf.mxu0  ;;  %v344_v15 = vadd.f32 %v3421_v45, %v258_v43 }
  0xf1   :  { %v3449_v17 = vpop.f32.mrf.mxu1 }
  0xf2   :  { %3621 = vst [vmem:[#allocation4_spill] sm:$0xff] %v3449_v17  ;;  %v811_v18 = vpop.f32.mrf.mxu0  ;;  %v557_v17 = vadd.f32 %v556_v60, %v493_v53  ;;  %v421_v53 = vadd.f32 %v3425_v48, %v3419_v39 }
  0xf3   :  { %v854_v20 = vpop.f32.mrf.mxu1 }
  0xf4   :  { %v813_v22 = vpop.f32.mrf.mxu0  ;;  %v855_v37 = vadd.f32 %v854_v20, %v811_v18 }
  0xf5   :  { %v856_v25 = vpop.f32.mrf.mxu1 }
  0xf6   :  { %v815_v26 = vpop.f32.mrf.mxu0  ;;  %v857_v44 = vadd.f32 %v856_v25, %v813_v22 }
  0xf7   :  { %v858_v28 = vpop.f32.mrf.mxu1 }
  0xf8   :  { %v817_v29 = vpop.f32.mrf.mxu0  ;;  %v859_v55 = vadd.f32 %v858_v28, %v815_v26 }
  0xf9   :  { %v860_v34 = vpop.f32.mrf.mxu1 }
  0xfa   :  { %v897_v35 = vpop.f32.mrf.mxu0 }
  0xfb   :  { %v3451_v36 = vpop.f32.mrf.mxu1  ;;  %v906_v60 = vadd.f32 %v897_v35, %v855_v37 }
  0xfc   :  { %v899_v42 = vpop.f32.mrf.mxu0 }
  0xfd   :  { %v3453_v47 = vpop.f32.mrf.mxu1  ;;  %v907_v63 = vadd.f32 %v899_v42, %v857_v44 }
  0xfe   :  { %v901_v62 = vpop.f32.mrf.mxu0 }
  0xff   :  { %v3455_v0 = vpop.f32.mrf.mxu1  ;;  %v908_v22 = vadd.f32 %v901_v62, %v859_v55 }
 0x100   :  { %3622 = vst [vmem:[#allocation5_spill] sm:$0xff] %v3455_v0  ;;  %v3457_v2 = vpop.f32.mrf.mxu0 }
 0x101   :  { %v3459_v3 = vpop.f32.mrf.mxu1 }
 0x102   :  { %3623 = vst [vmem:[#allocation6_spill] sm:$0xff] %v3459_v3  ;;  %v3461_v5 = vpop.f32.mrf.mxu0 }
 0x103   :  { %3624 = vst [vmem:[#allocation7_spill] sm:$0xff] %v3461_v5  ;;  %v1046_v6 = vpop.f32.mrf.mxu1  ;;  %v630_v5 = vadd.f32 %v622_v59, %v555_v54  ;;  %v423_v54 = vadd.f32 %v3429_v52, %v3423_v46  ;;  %v632_v59 = vadd.f32 %v3435_v9, %v559_v19  ;;  %v954_v52 = vadd.f32 %v3453_v47, %v907_v63 }
 0x104   :  { %v3463_v7 = vpop.f32.mrf.mxu0 }
 0x105   :  { %3625 = vst [vmem:[#allocation8_spill] sm:$0xff] %v3463_v7  ;;  %v1048_v8 = vpop.f32.mrf.mxu1  ;;  %v3477_v7 = vrot.slane %v15_v41, %v1258_v33  ;;  %v702_v38 = vadd.f32 %v3439_v12, %v630_v5  ;;  %v953_v12 = vadd.f32 %v3451_v36, %v906_v60  ;;  %v704_v46 = vadd.f32 %v3447_v16, %v632_v59  ;;  %v3631_v36 = vld [vmem:[#allocation3_spill] sm:$0xff] }
 0x106   :  { %v3465_v23 = vpop.f32.mrf.mxu0 }
 0x107   :  { %3626 = vst [vmem:[#allocation9_spill] sm:$0xff] %v3465_v23  ;;  %v1050_v24 = vpop.f32.mrf.mxu1  ;;  %v629_v23 = vadd.f32 %v620_v57, %v553_v1  ;;  %3629 = vst [vmem:[#allocation12_spill] sm:$0xff] %v3477_v7  ;;  %v422_v57 = vadd.f32 %v3427_v50, %v342_v21  ;;  %v861_v50 = vadd.f32 %v860_v34, %v817_v29 }
 0x108   :  { %v3467_v27 = vpop.f32.mrf.mxu0  ;;  %v774_v35 = vadd.f32 %v3441_v13, %v702_v38 }
 0x109   :  { %3627 = vst [vmem:[#allocation10_spill] sm:$0xff] %v3467_v27  ;;  %v1052_v31 = vpop.f32.mrf.mxu1  ;;  %v3475_v27 = vrot.slane %v15_v41, %v1254_v32  ;;  %v701_v30 = vadd.f32 %v692_v10, %v629_v23  ;;  %v631_v32 = vadd.f32 %v3433_v61, %v557_v17  ;;  %v909_v9 = vadd.f32 %v3457_v2, %v861_v50  ;;  %v3634_v41 = vld [vmem:[#allocation4_spill] sm:$0xff] }
 0x10a   :  { %v1089_v4 = vpop.f32.mrf.mxu0  ;;  %v1240_v40 = vmax.f32 %v422_v57, %v774_v35  ;;  %v776_v43 = vadd.f32 %v3634_v41, %v704_v46  ;;  %v3639_v46 = vmov 0 }
 0x10b   :  { %v1132_v3 = vpop.f32.mrf.mxu1  ;;  %3628 = vst [vmem:[#allocation11_spill] sm:$0xff] %v3475_v27  ;;  %v1090_v0 = vadd.f32 %v1089_v4, %v1046_v6  ;;  %v773_v39 = vadd.f32 %v3437_v11, %v701_v30  ;;  %v703_v48 = vadd.f32 %v3443_v14, %v631_v32  ;;  %v3630_v14 = vld [vmem:[#allocation7_spill] sm:$0xff]  ;;  %v3632_v6 = vld [vmem:[#allocation5_spill] sm:$0xff]  ;;  %v3635_v4 = vld [vmem:[#allocation6_spill] sm:$0xff]  ;;  %v3640_v46 = vsel %vm3512_vm3, 4294967295, %v3639_v46 }
 0x10c   :  { %v1091_v49 = vpop.f32.mrf.mxu0  ;;  %v1008_v29 = vadd.f32 %v3630_v14, %v953_v12  ;;  %v3633_v23 = vld [vmem:[#allocation8_spill] sm:$0xff]  ;;  %3641 = vst [vmem:[#allocation7_spill] sm:$0xff] %v3640_v46 }
 0x10d   :  { %v1134_v56 = vpop.f32.mrf.mxu1  ;;  %v1092_v1 = vadd.f32 %v1091_v49, %v1048_v8  ;;  %v1141_v10 = vadd.f32 %v1132_v3, %v1090_v0  ;;  %v1239_v3 = vmax.f32 %v421_v53, %v773_v39  ;;  %v775_v5 = vadd.f32 %v3631_v36, %v703_v48  ;;  %v3637_v53 = vld [vmem:[#allocation2_spill] sm:$0xff] }
 0x10e   :  { %v1093_v51 = vpop.f32.mrf.mxu0  ;;  %v955_v8 = vadd.f32 %v3632_v6, %v908_v22  ;;  %v1009_v13 = vadd.f32 %v3633_v23, %v954_v52  ;;  %v956_v49 = vadd.f32 %v3635_v4, %v909_v9  ;;  %v424_v60 = vadd.f32 %v3637_v53, %v344_v15 }
 0x10f   :  { %v1136_v58 = vpop.f32.mrf.mxu1  ;;  %v1094_v20 = vadd.f32 %v1093_v51, %v1050_v24  ;;  %v1142_v25 = vadd.f32 %v1134_v56, %v1092_v1  ;;  %v3636_v56 = vld [vmem:[#allocation9_spill] sm:$0xff]  ;;  %v1241_v1 = vmax.f32 %v423_v54, %v775_v5  ;;  %v3642_v36 = vmov 0 }
 0x110   :  { %v1095_v18 = vpop.f32.mrf.mxu0  ;;  %v1010_v21 = vadd.f32 %v3636_v56, %v955_v8  ;;  %v3638_v32 = vld [vmem:[#allocation10_spill] sm:$0xff]  ;;  %v1242_v48 = vmax.f32 %v424_v60, %v776_v43  ;;  %v3643_v36 = vsel %vm3524_vm6, 4294967295, %v3642_v36 }
 0x111   :  { %v1138_v45 = vpop.f32.mrf.mxu1  ;;  %v1096_v26 = vadd.f32 %v1095_v18, %v1052_v31  ;;  %v1143_v34 = vadd.f32 %v1136_v58, %v1094_v20  ;;  %v1011_v38 = vadd.f32 %v3638_v32, %v956_v49  ;;  %3644 = vst [vmem:[#allocation3_spill] sm:$0xff] %v3643_v36 }
 0x112   :  { %v1179_v61 = vpop.f32.mrf.mxu0 }
 0x113   :  { %v1226_v17 = vpop.f32.mrf.mxu1  ;;  %v1188_v28 = vadd.f32 %v1179_v61, %v1141_v10  ;;  %v1144_v31 = vadd.f32 %v1138_v45, %v1096_v26 }
 0x114   :  { %v1181_v11 = vpop.f32.mrf.mxu0 }
 0x115   :  { %v1228_v42 = vpop.f32.mrf.mxu1  ;;  %v1235_v62 = vadd.f32 %v1226_v17, %v1188_v28  ;;  %v1189_v0 = vadd.f32 %v1181_v11, %v1142_v25 }
 0x116   :  { %v1183_v24 = vpop.f32.mrf.mxu0 }
 0x117   :  { %v1230_v16 = vpop.f32.mrf.mxu1  ;;  %v1243_v47 = vmax.f32 %v1008_v29, %v1235_v62  ;;  %v1236_v33 = vadd.f32 %v1228_v42, %v1189_v0  ;;  %v1190_v2 = vadd.f32 %v1183_v24, %v1143_v34 }
 0x118   :  { %v1185_v19 = vpop.f32.mrf.mxu0 }
 0x119   :  { %v1232_v37 = vpop.f32.mrf.mxu1  ;;  %v1247_v30 = vmax.f32 %v1239_v3, %v1243_v47  ;;  %v1244_v44 = vmax.f32 %v1009_v13, %v1236_v33  ;;  %v1237_v51 = vadd.f32 %v1230_v16, %v1190_v2  ;;  %v1191_v58 = vadd.f32 %v1185_v19, %v1144_v31 }
 0x11a   :  { %v1366_v55 = vpop.f32.mrf.mxu0 }
 0x11b   :  { %v1437_v63 = vpop.f32.mrf.mxu1  ;;  %v1262_v57 = vadd.f32 %v3475_v27, %v1247_v30  ;;  %v1248_v18 = vmax.f32 %v1240_v40, %v1244_v44  ;;  %v1245_v45 = vmax.f32 %v1010_v21, %v1237_v51  ;;  %v1238_v59 = vadd.f32 %v1232_v37, %v1191_v58 }
 0x11c   :  { %v1438_v10 = vadd.f32 %v1437_v63, %v1366_v55  ;;  %v1368_v20 = vpop.f32.mrf.mxu0 }
 0x11d   :  { %v1439_v39 = vpop.f32.mrf.mxu1  ;;  %v1263_v50 = vadd.f32 %v3477_v7, %v1248_v18  ;;  %v1249_v22 = vmax.f32 %v1241_v1, %v1245_v45  ;;  %v1246_v15 = vmax.f32 %v1011_v38, %v1238_v59  ;;  %v1266_v54 = vmax.f32 %v1262_v57, 0.0 }
 0x11e   :  { %v3507_v61 = vadd.f32 %v1439_v39, %v1368_v20  ;;  %v1370_v17 = vpop.f32.mrf.mxu0 }
 0x11f   :  { %v1441_v12 = vpop.f32.mrf.mxu1  ;;  %v1267_v25 = vmax.f32 %v1263_v50, 0.0  ;;  %v1264_v26 = vadd.f32 %v3475_v27, %v1249_v22  ;;  %v1250_v28 = vmax.f32 %v1242_v48, %v1246_v15 }
 0x120   :  { %v1442_v35 = vadd.f32 %v1441_v12, %v1370_v17  ;;  %v1372_v52 = vpop.f32.mrf.mxu0 }
 0x121   :  { %v1443_v9 = vpop.f32.mrf.mxu1  ;;  %v2765_v11 = vpack.c.bf16 %v1267_v25, %v1266_v54  ;;  %v1265_v42 = vadd.f32 %v3477_v7, %v1250_v28  ;;  %v1268_v62 = vmax.f32 %v1264_v26, 0.0 }
 0x122   :  { %v3517_v14 = vadd.f32 %v1443_v9, %v1372_v52  ;;  %v1518_v29 = vpop.f32.mrf.mxu0 }
 0x123   :  { %v1603_v34 = vpop.f32.mrf.mxu1  ;;  %1285 = vst.msk [vmem:[%s3612_s3] sm:$0xff] %vm3512_vm3, %v2765_v11  ;;  %v1269_v0 = vmax.f32 %v1265_v42, 0.0  ;;  %v1527_v3 = vadd.f32 %v1518_v29, %v1438_v10 }
 0x124   :  { %v1520_v5 = vpop.f32.mrf.mxu0 }
 0x125   :  { %v3528_v6 = vpop.f32.mrf.mxu1  ;;  %v2766_v8 = vpack.c.bf16 %v1269_v0, %v1268_v62  ;;  %v3530_v23 = vadd.f32 %v1603_v34, %v1527_v3 }
 0x126   :  { %v1522_v13 = vpop.f32.mrf.mxu0 }
 0x127   :  { %v1607_v24 = vpop.f32.mrf.mxu1  ;;  %1289 = vst.msk [vmem:[%s3612_s3 + $0x8] sm:$0x77] %vm3524_vm6, %v2766_v8  ;;  %v1529_v16 = vadd.f32 %v1522_v13, %v1442_v35  ;;  %v1528_v13 = vadd.f32 %v1520_v5, %v3507_v61 }
 0x128   :  { %v1524_v31 = vpop.f32.mrf.mxu0 }
 0x129   :  { %v3537_v47 = vpop.f32.mrf.mxu1  ;;  %v3539_v33 = vadd.f32 %v1607_v24, %v1529_v16  ;;  %v1530_v24 = vadd.f32 %v1524_v31, %v3517_v14 }
 0x12a   :  { %v3541_v2 = vpop.f32.mrf.mxu0 }
 0x12b   :  { %v1757_v40 = vpop.f32.mrf.mxu1  ;;  %v1691_v14 = vadd.f32 %v3541_v2, %v3530_v23 }
 0x12c   :  { %v3543_v41 = vpop.f32.mrf.mxu0 }
 0x12d   :  { %v1759_v43 = vpop.f32.mrf.mxu1 }
 0x12e   :  { %v3545_v4 = vpop.f32.mrf.mxu0 }
 0x12f   :  { %v1761_v49 = vpop.f32.mrf.mxu1 }
 0x130   :  { %v3547_v56 = vpop.f32.mrf.mxu0 }
 0x131   :  { %3645 = vst [vmem:[#allocation5_spill] sm:$0xff] %v3547_v56  ;;  %v1763_v21 = vpop.f32.mrf.mxu1 }
 0x132   :  { %v1820_v19 = vpop.f32.mrf.mxu0 }
 0x133   :  { %v1887_v37 = vpop.f32.mrf.mxu1  ;;  %v1821_v0 = vadd.f32 %v1820_v19, %v1757_v40  ;;  %v1615_v40 = vadd.f32 %v3537_v47, %v1530_v24  ;;  %v1693_v47 = vadd.f32 %v3545_v4, %v3539_v33 }
 0x134   :  { %v1822_v30 = vpop.f32.mrf.mxu0 }
 0x135   :  { %v1889_v44 = vpop.f32.mrf.mxu1  ;;  %v1823_v16 = vadd.f32 %v1822_v30, %v1759_v43  ;;  %v1896_v7 = vadd.f32 %v1887_v37, %v1821_v0 }
 0x136   :  { %v1824_v51 = vpop.f32.mrf.mxu0 }
 0x137   :  { %v1891_v58 = vpop.f32.mrf.mxu1  ;;  %v1825_v27 = vadd.f32 %v1824_v51, %v1761_v49  ;;  %v1897_v19 = vadd.f32 %v1889_v44, %v1823_v16 }
 0x138   :  { %v1826_v53 = vpop.f32.mrf.mxu0  ;;  %v3659_v16 = vld [vmem:[#allocation5_spill] sm:$0xff] }
 0x139   :  { %v3549_v60 = vpop.f32.mrf.mxu1  ;;  %v1898_v37 = vadd.f32 %v1891_v58, %v1825_v27 }
 0x13a   :  { %v1958_v1 = vpop.f32.mrf.mxu0 }
 0x13b   :  { %v3551_v32 = vpop.f32.mrf.mxu1 }
 0x13c   :  { %v1960_v38 = vpop.f32.mrf.mxu0 }
 0x13d   :  { %v3553_v55 = vpop.f32.mrf.mxu1  ;;  %v1968_v30 = vadd.f32 %v1960_v38, %v1897_v19  ;;  %v1694_v19 = vadd.f32 %v3659_v16, %v1615_v40 }
 0x13e   :  { %v3555_v63 = vpop.f32.mrf.mxu0 }
 0x13f   :  { %v3557_v57 = vpop.f32.mrf.mxu1  ;;  %v1969_v23 = vadd.f32 %v3555_v63, %v1898_v37 }
 0x140   :  { %3646 = vst [vmem:[#allocation8_spill] sm:$0xff] %v3557_v57  ;;  %v3559_v18 = vpop.f32.mrf.mxu0 }
 0x141   :  { %v3561_v45 = vpop.f32.mrf.mxu1 }
 0x142   :  { %3647 = vst [vmem:[#allocation4_spill] sm:$0xff] %v3561_v45  ;;  %v2076_v59 = vpop.f32.mrf.mxu0  ;;  %v1613_v45 = vadd.f32 %v3528_v6, %v1528_v13 }
 0x143   :  { %v2119_v10 = vpop.f32.mrf.mxu1 }
 0x144   :  { %v2078_v20 = vpop.f32.mrf.mxu0  ;;  %v1692_v31 = vadd.f32 %v3543_v41, %v1613_v45 }
 0x145   :  { %v2121_v39 = vpop.f32.mrf.mxu1 }
 0x146   :  { %v2080_v48 = vpop.f32.mrf.mxu0  ;;  %v2122_v57 = vadd.f32 %v2121_v39, %v2078_v20 }
 0x147   :  { %v2123_v50 = vpop.f32.mrf.mxu1 }
 0x148   :  { %v2082_v22 = vpop.f32.mrf.mxu0  ;;  %v2124_v6 = vadd.f32 %v2123_v50, %v2080_v48  ;;  %v3653_v50 = vld [vmem:[#allocation8_spill] sm:$0xff] }
 0x149   :  { %v2125_v15 = vpop.f32.mrf.mxu1 }
 0x14a   :  { %v2162_v54 = vpop.f32.mrf.mxu0  ;;  %v2126_v2 = vadd.f32 %v2125_v15, %v2082_v22  ;;  %v2040_v22 = vadd.f32 %v3653_v50, %v1969_v23 }
 0x14b   :  { %v2209_v17 = vpop.f32.mrf.mxu1 }
 0x14c   :  { %v2164_v12 = vpop.f32.mrf.mxu0 }
 0x14d   :  { %v2211_v25 = vpop.f32.mrf.mxu1 }
 0x14e   :  { %v2166_v26 = vpop.f32.mrf.mxu0 }
 0x14f   :  { %v3563_v28 = vpop.f32.mrf.mxu1  ;;  %v2173_v41 = vadd.f32 %v2166_v26, %v2124_v6 }
 0x150   :  { %3648 = vst [vmem:[#allocation6_spill] sm:$0xff] %v3563_v28  ;;  %v2168_v35 = vpop.f32.mrf.mxu0 }
 0x151   :  { %v3565_v52 = vpop.f32.mrf.mxu1 }
 0x152   :  { %3649 = vst [vmem:[#allocation9_spill] sm:$0xff] %v3565_v52  ;;  %v2264_v9 = vpop.f32.mrf.mxu0 }
 0x153   :  { %v2311_v11 = vpop.f32.mrf.mxu1 }
 0x154   :  { %v3567_v42 = vpop.f32.mrf.mxu0 }
 0x155   :  { %3650 = vst [vmem:[#allocation2_spill] sm:$0xff] %v3567_v42  ;;  %v2313_v29 = vpop.f32.mrf.mxu1  ;;  %v1827_v42 = vadd.f32 %v1826_v53, %v1763_v21  ;;  %v2172_v21 = vadd.f32 %v2164_v12, %v2122_v57 }
 0x156   :  { %v3569_v34 = vpop.f32.mrf.mxu0 }
 0x157   :  { %3651 = vst [vmem:[#allocation10_spill] sm:$0xff] %v3569_v34  ;;  %v2315_v62 = vpop.f32.mrf.mxu1  ;;  %v2120_v34 = vadd.f32 %v2119_v10, %v2076_v59  ;;  %v2039_v59 = vadd.f32 %v3553_v55, %v1968_v30  ;;  %v2219_v4 = vadd.f32 %v2211_v25, %v2172_v21  ;;  %v3654_v15 = vld [vmem:[#allocation6_spill] sm:$0xff] }
 0x158   :  { %v3571_v3 = vpop.f32.mrf.mxu0 }
 0x159   :  { %3652 = vst [vmem:[#allocation13_spill] sm:$0xff] %v3571_v3  ;;  %v2317_v8 = vpop.f32.mrf.mxu1  ;;  %v1967_v3 = vadd.f32 %v1958_v1, %v1896_v7  ;;  %v2171_v43 = vadd.f32 %v2162_v54, %v2120_v34  ;;  %v1899_v7 = vadd.f32 %v3549_v60, %v1827_v42  ;;  %v2174_v60 = vadd.f32 %v2168_v35, %v2126_v2 }
 0x15a   :  { %v2354_v36 = vpop.f32.mrf.mxu0  ;;  %v2220_v54 = vadd.f32 %v3654_v15, %v2173_v41  ;;  %v2505_v35 = vmax.f32 %v1692_v31, %v2039_v59 }
 0x15b   :  { %v2397_v46 = vpop.f32.mrf.mxu1  ;;  %v2355_v28 = vadd.f32 %v2354_v36, %v2311_v11  ;;  %v2038_v1 = vadd.f32 %v3551_v32, %v1967_v3  ;;  %v2218_v58 = vadd.f32 %v2209_v17, %v2171_v43  ;;  %v1970_v33 = vadd.f32 %v3559_v18, %v1899_v7  ;;  %v3656_v11 = vld [vmem:[#allocation4_spill] sm:$0xff] }
 0x15c   :  { %v2356_v56 = vpop.f32.mrf.mxu0  ;;  %v3655_v17 = vld [vmem:[#allocation2_spill] sm:$0xff] }
 0x15d   :  { %v2399_v52 = vpop.f32.mrf.mxu1  ;;  %v2357_v49 = vadd.f32 %v2356_v56, %v2313_v29  ;;  %v2406_v44 = vadd.f32 %v2397_v46, %v2355_v28  ;;  %v2273_v20 = vadd.f32 %v2264_v9, %v2218_v58  ;;  %v2504_v48 = vmax.f32 %v1691_v14, %v2038_v1  ;;  %v3657_v9 = vld [vmem:[#allocation9_spill] sm:$0xff] }
 0x15e   :  { %v2358_v61 = vpop.f32.mrf.mxu0  ;;  %v2274_v12 = vadd.f32 %v3655_v17, %v2219_v4  ;;  %v2041_v42 = vadd.f32 %v3656_v11, %v1970_v33  ;;  %v2221_v29 = vadd.f32 %v3657_v9, %v2174_v60  ;;  %v3658_v34 = vld [vmem:[#allocation10_spill] sm:$0xff] }
 0x15f   :  { %v2401_v5 = vpop.f32.mrf.mxu1  ;;  %v2359_v53 = vadd.f32 %v2358_v61, %v2315_v62  ;;  %v2407_v38 = vadd.f32 %v2399_v52, %v2357_v49  ;;  %v2275_v62 = vadd.f32 %v3658_v34, %v2220_v54  ;;  %v2506_v61 = vmax.f32 %v1693_v47, %v2040_v22  ;;  %v3661_v49 = vld [vmem:[#allocation11_spill] sm:$0xff] }
 0x160   :  { %v2360_v51 = vpop.f32.mrf.mxu0  ;;  %v2507_v21 = vmax.f32 %v1694_v19, %v2041_v42 }
 0x161   :  { %v2403_v36 = vpop.f32.mrf.mxu1  ;;  %v2361_v57 = vadd.f32 %v2360_v51, %v2317_v8  ;;  %v2408_v32 = vadd.f32 %v2401_v5, %v2359_v53  ;;  %v3660_v5 = vld [vmem:[#allocation13_spill] sm:$0xff]  ;;  %v3662_v51 = vld [vmem:[#allocation12_spill] sm:$0xff] }
 0x162   :  { %v2444_v56 = vpop.f32.mrf.mxu0  ;;  %v2276_v14 = vadd.f32 %v3660_v5, %v2221_v29 }
 0x163   :  { %v2491_v27 = vpop.f32.mrf.mxu1  ;;  %v2453_v45 = vadd.f32 %v2444_v56, %v2406_v44  ;;  %v2409_v55 = vadd.f32 %v2403_v36, %v2361_v57 }
 0x164   :  { %v2446_v46 = vpop.f32.mrf.mxu0 }
 0x165   :  { %v2493_v10 = vpop.f32.mrf.mxu1  ;;  %v2500_v39 = vadd.f32 %v2491_v27, %v2453_v45  ;;  %v2454_v63 = vadd.f32 %v2446_v46, %v2407_v38 }
 0x166   :  { %v2448_v26 = vpop.f32.mrf.mxu0 }
 0x167   :  { %v2495_v28 = vpop.f32.mrf.mxu1  ;;  %v2508_v52 = vmax.f32 %v2273_v20, %v2500_v39  ;;  %v2501_v18 = vadd.f32 %v2493_v10, %v2454_v63  ;;  %v2455_v25 = vadd.f32 %v2448_v26, %v2408_v32 }
 0x168   :  { %v2450_v0 = vpop.f32.mrf.mxu0 }
 0x169   :  { %v2512_v3 = vmax.f32 %v2504_v48, %v2508_v52  ;;  %v2509_v8 = vmax.f32 %v2274_v12, %v2501_v18  ;;  %v2502_v13 = vadd.f32 %v2495_v28, %v2455_v25  ;;  %v2456_v24 = vadd.f32 %v2450_v0, %v2409_v55  ;;  %v2497_v43 = vpop.f32.mrf.mxu1 }
 0x16b   :  { %v2516_v37 = vadd.f32 %v2512_v3, %v3661_v49  ;;  %v2513_v31 = vmax.f32 %v2505_v35, %v2509_v8  ;;  %v2510_v30 = vmax.f32 %v2275_v62, %v2502_v13  ;;  %v2503_v6 = vadd.f32 %v2497_v43, %v2456_v24 }
 0x16d   :  { %v2517_v36 = vadd.f32 %v2513_v31, %v3662_v51  ;;  %v2514_v7 = vmax.f32 %v2506_v61, %v2510_v30  ;;  %v2511_v44 = vmax.f32 %v2276_v14, %v2503_v6  ;;  %v2520_v53 = vmax.f32 %v2516_v37, 0.0 }
 0x16f   :  { %v2521_v1 = vmax.f32 %v2517_v36, 0.0  ;;  %v2518_v23 = vadd.f32 %v2514_v7, %v3661_v49  ;;  %v2515_v2 = vmax.f32 %v2507_v21, %v2511_v44 }
 0x171   :  { %v2767_v40 = vpack.c.bf16 %v2521_v1, %v2520_v53  ;;  %v2519_v47 = vadd.f32 %v2515_v2, %v3662_v51  ;;  %v2522_v56 = vmax.f32 %v2518_v23, 0.0 }
 0x173   :  { %2763 = vst.msk [vmem:[%s3612_s3 + $0x10] sm:$0xff] %vm3512_vm3, %v2767_v40  ;;  %v2523_v27 = vmax.f32 %v2519_v47, 0.0 }
 0x175   :  { %v2768_v58 = vpack.c.bf16 %v2523_v27, %v2522_v56 }
 0x177   :  { %2764 = vst.msk [vmem:[%s3612_s3 + $0x18] sm:$0x77] %vm3524_vm6, %v2768_v58 }

// kernel: simple_cnn3_forward.5
= control target key start
LH: loop header
LB: loop body
LE: loop exit
PB: predicated region body
PF: predicated region fallthrough
CT: control target
= control target key end

     0   :  { %vm1517_vm0 = vmmov 0   ;;  %vm858_vm1 = vcmask 261120   ;;  %s1859_s1 = inlined_call_operand.vmem [shape: bf16[1568,128], index: 1, kind: input, shape index: {}]   ;;  %s1860_s0 = inlined_call_operand.vmem [shape: bf16[8,1568], index: 0, kind: input, shape index: {}]   ;;  %s1861_s2 = inlined_call_operand.vmem [shape: f32[1,128], index: 2, kind: input, shape index: {}]   ;;  %s1862_s3 = inlined_call_operand.vmem [shape: f32[8,128], index: 3, kind: output, shape index: {}]  }
   0x1   :  { %v1405_v0 = vld [vmem:[%s1859_s1 + $0x78] sm:$0xff]   ;;  %v1409_v4 = vld [vmem:[%s1859_s1 + $0x70] sm:$0xff]   ;;  %v1413_v8 = vld [vmem:[%s1859_s1 + $0x68] sm:$0xff]  }
   0x2   :  { %v1406_v1 = vld [vmem:[%s1859_s1 + $0xf8] sm:$0xff]   ;;  %1260 = vmatprep.subr.bf16.mxu0 %v1405_v0  ;;  %v1410_v5 = vld [vmem:[%s1859_s1 + $0xf0] sm:$0xff]   ;;  %v1414_v9 = vld [vmem:[%s1859_s1 + $0xe8] sm:$0xff]  }
   0x3   :  { %v1407_v2 = vld [vmem:[%s1859_s1 + $0x38] sm:$0xff]   ;;  %1282 = vmatprep.subr.bf16.mxu1 %v1406_v1  ;;  %v1411_v6 = vld [vmem:[%s1859_s1 + $0x30] sm:$0xff]   ;;  %v1415_v10 = vld [vmem:[%s1859_s1 + $0x28] sm:$0xff]  }
   0x4   :  { %v1408_v3 = vld [vmem:[%s1859_s1 + $0xb8] sm:$0xff]   ;;  %1261 = vmatpush3.bf16.msra.mxu0 %v1407_v2  ;;  %v1412_v7 = vld [vmem:[%s1859_s1 + $0xb0] sm:$0xff]   ;;  %v1416_v11 = vld [vmem:[%s1859_s1 + $0xa8] sm:$0xff]  }
   0x5   :  { %1283 = vmatpush3.bf16.msra.mxu1 %v1408_v3  ;;  %1262 = vmatprep.subr.bf16.mxu0 %v1409_v4  ;;  %v1417_v12 = vld [vmem:[%s1859_s1 + $0x60] sm:$0xff]   ;;  %v1421_v16 = vld [vmem:[%s1859_s1 + $0x58] sm:$0xff]   ;;  %v1425_v20 = vld [vmem:[%s1859_s1 + $0x50] sm:$0xff]  }
   0x6   :  { %1284 = vmatprep.subr.bf16.mxu1 %v1410_v5  ;;  %v1418_v13 = vld [vmem:[%s1859_s1 + $0xe0] sm:$0xff]   ;;  %v1422_v17 = vld [vmem:[%s1859_s1 + $0xd8] sm:$0xff]   ;;  %v1426_v21 = vld [vmem:[%s1859_s1 + $0xd0] sm:$0xff]  }
   0x7   :  { %v1419_v14 = vld [vmem:[%s1859_s1 + $0x20] sm:$0xff]   ;;  %v1423_v18 = vld [vmem:[%s1859_s1 + $0x18] sm:$0xff]   ;;  %v1427_v22 = vld [vmem:[%s1859_s1 + $0x10] sm:$0xff]  }
   0x8   :  { %1263 = vmatpush3.bf16.msra.mxu0 %v1411_v6  ;;  %v1420_v15 = vld [vmem:[%s1859_s1 + $0xa0] sm:$0xff]   ;;  %v1424_v19 = vld [vmem:[%s1859_s1 + $0x98] sm:$0xff]   ;;  %v1428_v23 = vld [vmem:[%s1859_s1 + $0x90] sm:$0xff]  }
   0x9   :  { %1285 = vmatpush3.bf16.msra.mxu1 %v1412_v7  ;;  %1264 = vmatprep.subr.bf16.mxu0 %v1413_v8  ;;  %v1429_v24 = vld [vmem:[%s1859_s1 + $0x48] sm:$0xff]   ;;  %v1433_v28 = vld [vmem:[%s1859_s1 + $0x40] sm:$0xff]   ;;  %v1441_v38 = vld [vmem:[%s1859_s1 + $0x178] sm:$0xff]  }
   0xa   :  { %1286 = vmatprep.subr.bf16.mxu1 %v1414_v9  ;;  %v1430_v25 = vld [vmem:[%s1859_s1 + $0xc8] sm:$0xff]   ;;  %v1434_v29 = vld [vmem:[%s1859_s1 + $0xc0] sm:$0xff]   ;;  %v1442_v39 = vld [vmem:[%s1859_s1 + $0x1f8] sm:$0xff]  }
   0xb   :  { %v1431_v26 = vld [vmem:[%s1859_s1 + $0x8] sm:$0xff]   ;;  %v1435_v30 = vld [vmem:[%s1859_s1] sm:$0xff]   ;;  %v1443_v40 = vld [vmem:[%s1859_s1 + $0x138] sm:$0xff]  }
   0xc   :  { %1265 = vmatpush3.bf16.msra.mxu0 %v1415_v10  ;;  %v1432_v27 = vld [vmem:[%s1859_s1 + $0x88] sm:$0xff]   ;;  %v1436_v31 = vld [vmem:[%s1859_s1 + $0x80] sm:$0xff]   ;;  %v1444_v41 = vld [vmem:[%s1859_s1 + $0x1b8] sm:$0xff]  }
   0xd   :  { %1287 = vmatpush3.bf16.msra.mxu1 %v1416_v11  ;;  %1266 = vmatprep.subr.bf16.mxu0 %v1417_v12  ;;  %v15_v32 = vld [vmem:[%s1860_s0] sm:$0xff]  ;;  %v16_v33 = vld [vmem:[%s1860_s0 + $0x8] sm:$0xff]  ;;  %v1445_v42 = vld [vmem:[%s1859_s1 + $0x170] sm:$0xff]  }
   0xe   :  { %1288 = vmatprep.subr.bf16.mxu1 %v1418_v13  ;;  %v1148_v34 = vcombine.low %v15_v32, %v15_v32  ;;  %v1149_v35 = vcombine.high %v15_v32, %v15_v32  ;;  %v1150_v36 = vcombine.low %v16_v33, %v16_v33  ;;  %v1151_v37 = vcombine.high %v16_v33, %v16_v33  ;;  %v1446_v43 = vld [vmem:[%s1859_s1 + $0x1f0] sm:$0xff]   ;;  %v1449_v46 = vld [vmem:[%s1859_s1 + $0x168] sm:$0xff]   ;;  %v1453_v50 = vld [vmem:[%s1859_s1 + $0x160] sm:$0xff]  }
   0xf   :  { %v1447_v44 = vld [vmem:[%s1859_s1 + $0x130] sm:$0xff]   ;;  %v1450_v47 = vld [vmem:[%s1859_s1 + $0x1e8] sm:$0xff]   ;;  %v1454_v51 = vld [vmem:[%s1859_s1 + $0x1e0] sm:$0xff]  }
  0x10   :  { %1267 = vmatpush3.bf16.msra.mxu0 %v1419_v14  ;;  %894 = vmatprep.mubr.bf16.mxu0 %v1149_v35  ;;  %v1448_v45 = vld [vmem:[%s1859_s1 + $0x1b0] sm:$0xff]   ;;  %v1451_v48 = vld [vmem:[%s1859_s1 + $0x128] sm:$0xff]   ;;  %v1455_v52 = vld [vmem:[%s1859_s1 + $0x120] sm:$0xff]  }
  0x11   :  { %1289 = vmatpush3.bf16.msra.mxu1 %v1420_v15  ;;  %1268 = vmatprep.subr.bf16.mxu0 %v1421_v16  ;;  %v1452_v49 = vld [vmem:[%s1859_s1 + $0x1a8] sm:$0xff]   ;;  %v1456_v53 = vld [vmem:[%s1859_s1 + $0x1a0] sm:$0xff]   ;;  %v1457_v54 = vld [vmem:[%s1859_s1 + $0x158] sm:$0xff]  }
  0x12   :  { %1290 = vmatprep.subr.bf16.mxu1 %v1422_v17  ;;  %934 = vmatprep.mubr.bf16.mxu1 %v1151_v37  ;;  %v1458_v55 = vld [vmem:[%s1859_s1 + $0x1d8] sm:$0xff]   ;;  %v1461_v58 = vld [vmem:[%s1859_s1 + $0x150] sm:$0xff]   ;;  %v1465_v62 = vld [vmem:[%s1859_s1 + $0x148] sm:$0xff]  }
  0x13   :  { %v1459_v56 = vld [vmem:[%s1859_s1 + $0x118] sm:$0xff]   ;;  %v1462_v59 = vld [vmem:[%s1859_s1 + $0x1d0] sm:$0xff]   ;;  %v1466_v63 = vld [vmem:[%s1859_s1 + $0x1c8] sm:$0xff]  }
  0x14   :  { %1269 = vmatpush3.bf16.msra.mxu0 %v1423_v18  ;;  %v1460_v57 = vld [vmem:[%s1859_s1 + $0x198] sm:$0xff]   ;;  %v1463_v60 = vld [vmem:[%s1859_s1 + $0x110] sm:$0xff]   ;;  %v1467_v0 = vld [vmem:[%s1859_s1 + $0x108] sm:$0xff]  }
  0x15   :  { %1291 = vmatpush3.bf16.msra.mxu1 %v1424_v19  ;;  %1270 = vmatprep.subr.bf16.mxu0 %v1425_v20  ;;  %v1464_v61 = vld [vmem:[%s1859_s1 + $0x190] sm:$0xff]   ;;  %v1468_v1 = vld [vmem:[%s1859_s1 + $0x188] sm:$0xff]   ;;  %v1469_v2 = vld [vmem:[%s1859_s1 + $0x140] sm:$0xff]  }
  0x16   :  { %1292 = vmatprep.subr.bf16.mxu1 %v1426_v21  ;;  %v1470_v3 = vld [vmem:[%s1859_s1 + $0x1c0] sm:$0xff]   ;;  %v17_v6 = vld [vmem:[%s1860_s0 + $0x10] sm:$0xff]  ;;  %v18_v9 = vld [vmem:[%s1860_s0 + $0x18] sm:$0xff] }
  0x17   :  { %v1471_v4 = vld [vmem:[%s1859_s1 + $0x100] sm:$0xff]   ;;  %v1152_v7 = vcombine.low %v17_v6, %v17_v6  ;;  %v1153_v8 = vcombine.high %v17_v6, %v17_v6  ;;  %v1154_v10 = vcombine.low %v18_v9, %v18_v9  ;;  %v1155_v11 = vcombine.high %v18_v9, %v18_v9  ;;  %v1477_v12 = vld [vmem:[%s1859_s1 + $0x278] sm:$0xff]   ;;  %v1481_v16 = vld [vmem:[%s1859_s1 + $0x270] sm:$0xff]  }
  0x18   :  { %1271 = vmatpush3.bf16.msra.mxu0 %v1427_v22  ;;  %v1472_v5 = vld [vmem:[%s1859_s1 + $0x180] sm:$0xff]   ;;  %v1478_v13 = vld [vmem:[%s1859_s1 + $0x2f8] sm:$0xff]   ;;  %v1482_v17 = vld [vmem:[%s1859_s1 + $0x2f0] sm:$0xff]  }
  0x19   :  { %1293 = vmatpush3.bf16.msra.mxu1 %v1428_v23  ;;  %1272 = vmatprep.subr.bf16.mxu0 %v1429_v24  ;;  %v1479_v14 = vld [vmem:[%s1859_s1 + $0x238] sm:$0xff]   ;;  %v1483_v18 = vld [vmem:[%s1859_s1 + $0x230] sm:$0xff]   ;;  %v1485_v20 = vld [vmem:[%s1859_s1 + $0x268] sm:$0xff]  }
  0x1a   :  { %1294 = vmatprep.subr.bf16.mxu1 %v1430_v25  ;;  %v1480_v15 = vld [vmem:[%s1859_s1 + $0x2b8] sm:$0xff]   ;;  %v1484_v19 = vld [vmem:[%s1859_s1 + $0x2b0] sm:$0xff]   ;;  %v1486_v21 = vld [vmem:[%s1859_s1 + $0x2e8] sm:$0xff]  }
  0x1b   :  { %v1487_v22 = vld [vmem:[%s1859_s1 + $0x228] sm:$0xff]   ;;  %v1489_v24 = vld [vmem:[%s1859_s1 + $0x260] sm:$0xff]   ;;  %v1497_v32 = vld [vmem:[%s1859_s1 + $0x250] sm:$0xff]  }
  0x1c   :  { %1273 = vmatpush3.bf16.msra.mxu0 %v1431_v26  ;;  %v1488_v23 = vld [vmem:[%s1859_s1 + $0x2a8] sm:$0xff]   ;;  %v1490_v25 = vld [vmem:[%s1859_s1 + $0x2e0] sm:$0xff]   ;;  %v1498_v33 = vld [vmem:[%s1859_s1 + $0x2d0] sm:$0xff]  }
  0x1d   :  { %1295 = vmatpush3.bf16.msra.mxu1 %v1432_v27  ;;  %1274 = vmatprep.subr.bf16.mxu0 %v1433_v28  ;;  %v1491_v26 = vld [vmem:[%s1859_s1 + $0x220] sm:$0xff]   ;;  %v1493_v28 = vld [vmem:[%s1859_s1 + $0x258] sm:$0xff]   ;;  %v1500_v35 = vld [vmem:[%s1859_s1 + $0x290] sm:$0xff]  }
  0x1e   :  { %1296 = vmatprep.subr.bf16.mxu1 %v1434_v29  ;;  %v1492_v27 = vld [vmem:[%s1859_s1 + $0x2a0] sm:$0xff]   ;;  %v1494_v29 = vld [vmem:[%s1859_s1 + $0x2d8] sm:$0xff]   ;;  %v1502_v37 = vld [vmem:[%s1859_s1 + $0x2c8] sm:$0xff]  }
  0x20   :  { %1275 = vmatpush3.bf16.msra.mxu0 %v1435_v30  ;;  %v1495_v30 = vld [vmem:[%s1859_s1 + $0x218] sm:$0xff]  }
  0x21   :  { %1297 = vmatpush3.bf16.msra.mxu1 %v1436_v31  ;;  %1304 = vmatprep.subr.bf16.mxu0 %v1441_v38  ;;  %v1496_v31 = vld [vmem:[%s1859_s1 + $0x298] sm:$0xff]   ;;  %v1503_v38 = vld [vmem:[%s1859_s1 + $0x208] sm:$0xff]  }
  0x22   :  { %1326 = vmatprep.subr.bf16.mxu1 %v1442_v39  ;;  %v1504_v39 = vld [vmem:[%s1859_s1 + $0x288] sm:$0xff]  }
  0x23   :  { %895 = vmatmul.mubr.bf16.vlgmr.msra.gmra.mxu0 %v1148_v34  ;;  %v1499_v34 = vld [vmem:[%s1859_s1 + $0x210] sm:$0xff]  }
  0x24   :  { %935 = vmatmul.mubr.bf16.vlgmr.msra.gmra.mxu1 %v1150_v36  ;;  %1305 = vmatpush3.bf16.msra.mxu0 %v1443_v40  ;;  %v1501_v36 = vld [vmem:[%s1859_s1 + $0x248] sm:$0xff]   ;;  %v1505_v40 = vld [vmem:[%s1859_s1 + $0x240] sm:$0xff]  }
  0x25   :  { %1327 = vmatpush3.bf16.msra.mxu1 %v1444_v41  ;;  %1306 = vmatprep.subr.bf16.mxu0 %v1445_v42  ;;  %v1506_v41 = vld [vmem:[%s1859_s1 + $0x2c0] sm:$0xff]  }
  0x26   :  { %1328 = vmatprep.subr.bf16.mxu1 %v1446_v43  ;;  %974 = vmatprep.mubr.bf16.mxu0 %v1153_v8  ;;  %v1507_v42 = vld [vmem:[%s1859_s1 + $0x200] sm:$0xff]  }
  0x27   :  { %1014 = vmatprep.mubr.bf16.mxu1 %v1155_v11  ;;  %v1508_v43 = vld [vmem:[%s1859_s1 + $0x280] sm:$0xff]  }
  0x28   :  { %1307 = vmatpush3.bf16.msra.mxu0 %v1447_v44  ;;  %v19_v44 = vld [vmem:[%s1860_s0 + $0x20] sm:$0xff] }
  0x29   :  { %1329 = vmatpush3.bf16.msra.mxu1 %v1448_v45  ;;  %1308 = vmatprep.subr.bf16.mxu0 %v1449_v46  ;;  %v20_v45 = vld [vmem:[%s1860_s0 + $0x28] sm:$0xff]  ;;  %v1156_v46 = vcombine.low %v19_v44, %v19_v44 }
  0x2a   :  { %1330 = vmatprep.subr.bf16.mxu1 %v1450_v47  ;;  %v1157_v47 = vcombine.high %v19_v44, %v19_v44 }
  0x2c   :  { %1309 = vmatpush3.bf16.msra.mxu0 %v1451_v48  ;;  %v1158_v48 = vcombine.low %v20_v45, %v20_v45 }
  0x2d   :  { %1331 = vmatpush3.bf16.msra.mxu1 %v1452_v49  ;;  %1310 = vmatprep.subr.bf16.mxu0 %v1453_v50  ;;  %v1159_v49 = vcombine.high %v20_v45, %v20_v45  ;;  %v1513_v50 = vld [vmem:[%s1859_s1 + $0x308] sm:$0xff]  }
  0x2e   :  { %1332 = vmatprep.subr.bf16.mxu1 %v1454_v51  ;;  %v1516_v51 = vmov 0.0  }
  0x30   :  { %1311 = vmatpush3.bf16.msra.mxu0 %v1455_v52  ;;  %v1514_v52 = vld [vmem:[%s1859_s1 + $0x300] sm:$0xff]  }
  0x31   :  { %1333 = vmatpush3.bf16.msra.mxu1 %v1456_v53  ;;  %1312 = vmatprep.subr.bf16.mxu0 %v1457_v54  ;;  %v1515_v53 = vld [vmem:[%s1860_s0 + $0x30] ss:$0 sps:$4 sm:$0xff]  }
  0x32   :  { %1334 = vmatprep.subr.bf16.mxu1 %v1458_v55 }
  0x34   :  { %1313 = vmatpush3.bf16.msra.mxu0 %v1459_v56 }
  0x35   :  { %1335 = vmatpush3.bf16.msra.mxu1 %v1460_v57  ;;  %1314 = vmatprep.subr.bf16.mxu0 %v1461_v58 }
  0x36   :  { %1336 = vmatprep.subr.bf16.mxu1 %v1462_v59 }
  0x38   :  { %1315 = vmatpush3.bf16.msra.mxu0 %v1463_v60 }
  0x39   :  { %1337 = vmatpush3.bf16.msra.mxu1 %v1464_v61  ;;  %1316 = vmatprep.subr.bf16.mxu0 %v1465_v62 }
  0x3a   :  { %1338 = vmatprep.subr.bf16.mxu1 %v1466_v63 }
  0x3c   :  { %1317 = vmatpush3.bf16.msra.mxu0 %v1467_v0 }
  0x3d   :  { %1339 = vmatpush3.bf16.msra.mxu1 %v1468_v1  ;;  %1318 = vmatprep.subr.bf16.mxu0 %v1469_v2 }
  0x3e   :  { %1340 = vmatprep.subr.bf16.mxu1 %v1470_v3 }
  0x40   :  { %1319 = vmatpush3.bf16.msra.mxu0 %v1471_v4 }
  0x41   :  { %1341 = vmatpush3.bf16.msra.mxu1 %v1472_v5  ;;  %1348 = vmatprep.subr.bf16.mxu0 %v1477_v12 }
  0x42   :  { %1370 = vmatprep.subr.bf16.mxu1 %v1478_v13 }
  0x43   :  { %975 = vmatmul.mubr.bf16.vlgmr.msra.gmra.mxu0 %v1152_v7  ;;  %v1147_v7 = vld [vmem:[%s1861_s2] ss:$0 sm:$0xff] }
  0x44   :  { %1015 = vmatmul.mubr.bf16.vlgmr.msra.gmra.mxu1 %v1154_v10  ;;  %1349 = vmatpush3.bf16.msra.mxu0 %v1479_v14 }
  0x45   :  { %1371 = vmatpush3.bf16.msra.mxu1 %v1480_v15  ;;  %1350 = vmatprep.subr.bf16.mxu0 %v1481_v16 }
  0x46   :  { %1372 = vmatprep.subr.bf16.mxu1 %v1482_v17  ;;  %1054 = vmatprep.mubr.bf16.mxu0 %v1157_v47 }
  0x47   :  { %1094 = vmatprep.mubr.bf16.mxu1 %v1159_v49 }
  0x48   :  { %1351 = vmatpush3.bf16.msra.mxu0 %v1483_v18 }
  0x49   :  { %1373 = vmatpush3.bf16.msra.mxu1 %v1484_v19  ;;  %1352 = vmatprep.subr.bf16.mxu0 %v1485_v20 }
  0x4a   :  { %1374 = vmatprep.subr.bf16.mxu1 %v1486_v21 }
  0x4c   :  { %1353 = vmatpush3.bf16.msra.mxu0 %v1487_v22 }
  0x4d   :  { %1375 = vmatpush3.bf16.msra.mxu1 %v1488_v23  ;;  %1354 = vmatprep.subr.bf16.mxu0 %v1489_v24 }
  0x4e   :  { %1376 = vmatprep.subr.bf16.mxu1 %v1490_v25 }
  0x50   :  { %1355 = vmatpush3.bf16.msra.mxu0 %v1491_v26 }
  0x51   :  { %1377 = vmatpush3.bf16.msra.mxu1 %v1492_v27  ;;  %1356 = vmatprep.subr.bf16.mxu0 %v1493_v28 }
  0x52   :  { %1378 = vmatprep.subr.bf16.mxu1 %v1494_v29 }
  0x54   :  { %1357 = vmatpush3.bf16.msra.mxu0 %v1495_v30 }
  0x55   :  { %1379 = vmatpush3.bf16.msra.mxu1 %v1496_v31  ;;  %1358 = vmatprep.subr.bf16.mxu0 %v1497_v32 }
  0x56   :  { %1380 = vmatprep.subr.bf16.mxu1 %v1498_v33 }
  0x58   :  { %1359 = vmatpush3.bf16.msra.mxu0 %v1499_v34 }
  0x59   :  { %1381 = vmatpush3.bf16.msra.mxu1 %v1500_v35  ;;  %1360 = vmatprep.subr.bf16.mxu0 %v1501_v36 }
  0x5a   :  { %1382 = vmatprep.subr.bf16.mxu1 %v1502_v37 }
  0x5c   :  { %1361 = vmatpush3.bf16.msra.mxu0 %v1503_v38 }
  0x5d   :  { %1383 = vmatpush3.bf16.msra.mxu1 %v1504_v39  ;;  %1362 = vmatprep.subr.bf16.mxu0 %v1505_v40 }
  0x5e   :  { %1384 = vmatprep.subr.bf16.mxu1 %v1506_v41 }
  0x60   :  { %1363 = vmatpush3.bf16.msra.mxu0 %v1507_v42 }
  0x61   :  { %1385 = vmatpush3.bf16.msra.mxu1 %v1508_v43  ;;  %1395 = vmatprep.subr.bf16.mxu0 %v1516_v51 }
  0x63   :  { %1055 = vmatmul.mubr.bf16.vlgmr.msra.gmra.mxu0 %v1156_v46 }
  0x64   :  { %1095 = vmatmul.mubr.bf16.vlgmr.msra.gmra.mxu1 %v1158_v48  ;;  %1396 = vmatpush3.bf16.msra.mxu0 %v1513_v50 }
  0x65   :  { %1397 = vmatprep.subr.bf16.mxu0 %v1516_v51  ;;  %1399 = vmatprep.mubr.msk.bf16.mxu0 %vm1517_vm0, %v1516_v51 }
  0x68   :  { %1398 = vmatpush3.bf16.msra.mxu0 %v1514_v52 }
  0x6b   :  { %1400 = vmatmul.mubr.msk.bf16.vlgmr.msra.gmra.mxu0 %vm858_vm1, %v1515_v53 }
  0xe3   :  { %v1276_v54 = vpop.f32.mrf.mxu0 }
  0xe4   :  { %v1298_v55 = vpop.f32.mrf.mxu1 }
  0xe5   :  { %v1277_v56 = vpop.f32.mrf.mxu0 }
  0xe6   :  { %v1299_v57 = vpop.f32.mrf.mxu1  ;;  %v1278_v6 = vadd.f32 %v1277_v56, %v1276_v54 }
  0xe7   :  { %v1279_v58 = vpop.f32.mrf.mxu0  ;;  %v1300_v9 = vadd.f32 %v1299_v57, %v1298_v55 }
  0xe8   :  { %v1301_v59 = vpop.f32.mrf.mxu1  ;;  %v897_v8 = vadd.f32 %v1278_v6, %v1147_v7 }
  0xe9   :  { %v1280_v60 = vpop.f32.mrf.mxu0 }
  0xea   :  { %v1302_v61 = vpop.f32.mrf.mxu1  ;;  %v937_v11 = vadd.f32 %v1300_v9, %v897_v8 }
 0x103   :  { %v1320_v62 = vpop.f32.mrf.mxu0 }
 0x104   :  { %v1342_v63 = vpop.f32.mrf.mxu1 }
 0x105   :  { %v1321_v0 = vpop.f32.mrf.mxu0 }
 0x106   :  { %v1343_v1 = vpop.f32.mrf.mxu1  ;;  %v1322_v10 = vadd.f32 %v1321_v0, %v1320_v62 }
 0x107   :  { %v1323_v2 = vpop.f32.mrf.mxu0  ;;  %v1344_v13 = vadd.f32 %v1343_v1, %v1342_v63 }
 0x108   :  { %v1345_v3 = vpop.f32.mrf.mxu1  ;;  %v977_v12 = vadd.f32 %v1322_v10, %v937_v11 }
 0x109   :  { %v1324_v4 = vpop.f32.mrf.mxu0 }
 0x10a   :  { %v1346_v5 = vpop.f32.mrf.mxu1  ;;  %v1017_v17 = vadd.f32 %v1344_v13, %v977_v12 }
 0x123   :  { %v1364_v14 = vpop.f32.mrf.mxu0 }
 0x124   :  { %v1386_v15 = vpop.f32.mrf.mxu1 }
 0x125   :  { %v1365_v16 = vpop.f32.mrf.mxu0 }
 0x126   :  { %v1366_v18 = vadd.f32 %v1365_v16, %v1364_v14  ;;  %v1387_v19 = vpop.f32.mrf.mxu1 }
 0x127   :  { %v1388_v20 = vadd.f32 %v1387_v19, %v1386_v15  ;;  %v1367_v21 = vpop.f32.mrf.mxu0 }
 0x128   :  { %v1057_v22 = vadd.f32 %v1366_v18, %v1017_v17  ;;  %v1389_v23 = vpop.f32.mrf.mxu1 }
 0x129   :  { %v1368_v24 = vpop.f32.mrf.mxu0 }
 0x12a   :  { %v1390_v25 = vpop.f32.mrf.mxu1  ;;  %v1097_v26 = vadd.f32 %v1388_v20, %v1057_v22 }
 0x12b   :  { %v1136_v27 = vpop.f32.mrf.mxu0 }
 0x12c   :  { %v1137_v28 = vadd.f32 %v1136_v27, %v1097_v26 }
 0x12d   :  { %v1401_v29 = vpop.f32.mrf.mxu0 }
 0x12e   :  { %1142 = vst [vmem:[%s1862_s3] sm:$0xff] %v1137_v28 }
 0x12f   :  { %v1139_v30 = vpop.f32.mrf.mxu0 }
 0x131   :  { %v1402_v31 = vpop.f32.mrf.mxu0 }

// kernel: simple_cnn3_forward.4
= control target key start
LH: loop header
LB: loop body
LE: loop exit
PB: predicated region body
PF: predicated region fallthrough
CT: control target
= control target key end

     0   :  { %v11292_v1 = vmov 0   ;;  %vm284_vm0 = vcmask 261120   ;;  %vm4010_vm1 = vcmask 1043456   ;;  %vm4011_vm2 = vsmask.f32 3328  ;;  %s16305_s1 = inlined_call_operand.vmem [shape: bf16[10,288,224], index: 1, kind: input, shape index: {}]   ;;  %s16306_s0 = inlined_call_operand.vmem [shape: bf16[4,9,288], index: 0, kind: input, shape index: {}]   ;;  %s16307_s2 = inlined_call_operand.vmem [shape: f32[1,224], index: 2, kind: input, shape index: {}]   ;;  %s16308_s3 = inlined_call_operand.vmem [shape: bf16[2,7,224], index: 3, kind: output, shape index: {}]  }
   0x1   :  { %v9459_v0 = vld [vmem:[%s16305_s1 + $0x194] ss:$8 sps:$4 sm:$0xff]   ;;  %361 = vmatprep.mubr.bf16.mxu1 %v11292_v1  ;;  %v9463_v3 = vld [vmem:[%s16305_s1 + $0x190] ss:$8 sps:$4 sm:$0xff]   ;;  %v9465_v5 = vld [vmem:[%s16305_s1 + $0x184] ss:$8 sps:$4 sm:$0xff]  }
   0x2   :  { %v9461_v2 = vld [vmem:[%s16305_s1 + $0x234] ss:$8 sps:$4 sm:$0xff]   ;;  %288 = vmatprep.subr.bf16.mxu0 %v9459_v0  ;;  %v9464_v4 = vld [vmem:[%s16305_s1 + $0x230] ss:$8 sps:$4 sm:$0xff]   ;;  %v9467_v6 = vld [vmem:[%s16305_s1 + $0x224] ss:$8 sps:$4 sm:$0xff]  }
   0x3   :  { %341 = vmatprep.subr.bf16.mxu1 %v9461_v2  ;;  %289 = vmatpush1.bf16.msra.mxu0 %v9463_v3  ;;  %v9469_v7 = vld [vmem:[%s16305_s1 + $0x180] ss:$8 sps:$4 sm:$0xff]   ;;  %v9471_v9 = vld [vmem:[%s16305_s1 + $0x174] ss:$8 sps:$4 sm:$0xff]   ;;  %v9474_v11 = vld [vmem:[%s16305_s1 + $0x70] ss:$8 sps:$4 sm:$0xff]  }
   0x4   :  { %342 = vmatpush1.bf16.msra.mxu1 %v9464_v4  ;;  %290 = vmatprep.subr.bf16.mxu0 %v9465_v5  ;;  %v9470_v8 = vld [vmem:[%s16305_s1 + $0x220] ss:$8 sps:$4 sm:$0xff]   ;;  %v9476_v12 = vld [vmem:[%s16305_s1 + $0x74] ss:$8 sps:$4 sm:$0xff]   ;;  %v9477_v13 = vld [vmem:[%s16305_s1 + $0x170] ss:$8 sps:$4 sm:$0xff]  }
   0x5   :  { %343 = vmatprep.subr.bf16.mxu1 %v9467_v6  ;;  %v11344_v10 = vld [vmem:[%s16306_s0 + $0x20] ss:$0 sps:$4 sm:$0xff]   ;;  %v9478_v14 = vld [vmem:[%s16305_s1 + $0x164] ss:$8 sps:$4 sm:$0xff]   ;;  %v9484_v18 = vld [vmem:[%s16305_s1 + $0x154] ss:$8 sps:$4 sm:$0xff]  }
   0x6   :  { %v9482_v15 = vld [vmem:[%s16305_s1 + $0x64] ss:$8 sps:$4 sm:$0xff]   ;;  %v9480_v16 = vld [vmem:[%s16305_s1 + $0x60] ss:$8 sps:$4 sm:$0xff]   ;;  %v9488_v19 = vld [vmem:[%s16305_s1 + $0x54] ss:$8 sps:$4 sm:$0xff]  }
   0x7   :  { %291 = vmatpush1.bf16.msra.mxu0 %v9469_v7  ;;  %v9483_v17 = vld [vmem:[%s16305_s1 + $0x160] ss:$8 sps:$4 sm:$0xff]   ;;  %v9486_v20 = vld [vmem:[%s16305_s1 + $0x50] ss:$8 sps:$4 sm:$0xff]   ;;  %v9490_v22 = vld [vmem:[%s16305_s1 + $0x144] ss:$8 sps:$4 sm:$0xff]  }
   0x8   :  { %344 = vmatpush1.bf16.msra.mxu1 %v9470_v8  ;;  %292 = vmatprep.subr.bf16.mxu0 %v9471_v9  ;;  %v9489_v21 = vld [vmem:[%s16305_s1 + $0x150] ss:$8 sps:$4 sm:$0xff]   ;;  %v9494_v23 = vld [vmem:[%s16305_s1 + $0x44] ss:$8 sps:$4 sm:$0xff]   ;;  %v9492_v24 = vld [vmem:[%s16305_s1 + $0x40] ss:$8 sps:$4 sm:$0xff]  }
   0x9   :  { %563 = vmatprep.subr.bf16.mxu1 %v9476_v12  ;;  %v9495_v25 = vld [vmem:[%s16305_s1 + $0x140] ss:$8 sps:$4 sm:$0xff]   ;;  %v9496_v26 = vld [vmem:[%s16305_s1 + $0x134] ss:$8 sps:$4 sm:$0xff]   ;;  %v9498_v28 = vld [vmem:[%s16305_s1 + $0x30] ss:$8 sps:$4 sm:$0xff]  }
   0xa   :  { %v9500_v27 = vld [vmem:[%s16305_s1 + $0x34] ss:$8 sps:$4 sm:$0xff]   ;;  %v9501_v29 = vld [vmem:[%s16305_s1 + $0x130] ss:$8 sps:$4 sm:$0xff]   ;;  %v9502_v30 = vld [vmem:[%s16305_s1 + $0x124] ss:$8 sps:$4 sm:$0xff]  }
   0xb   :  { %8079 = vmatmul.mubr.msk.bf16.vlgmr.msra.gmra.mxu1 %vm284_vm0, %v11344_v10  ;;  %293 = vmatpush1.bf16.msra.mxu0 %v9477_v13  ;;  %v9506_v31 = vld [vmem:[%s16305_s1 + $0x24] ss:$8 sps:$4 sm:$0xff]   ;;  %v9504_v32 = vld [vmem:[%s16305_s1 + $0x20] ss:$8 sps:$4 sm:$0xff]   ;;  %v9508_v34 = vld [vmem:[%s16305_s1 + $0x214] ss:$8 sps:$4 sm:$0xff]  }
   0xc   :  { %564 = vmatpush1.bf16.msra.mxu1 %v9474_v11  ;;  %294 = vmatprep.subr.bf16.mxu0 %v9478_v14  ;;  %v9507_v33 = vld [vmem:[%s16305_s1 + $0x120] ss:$8 sps:$4 sm:$0xff]   ;;  %v9512_v35 = vld [vmem:[%s16305_s1 + $0x14] ss:$8 sps:$4 sm:$0xff]   ;;  %v9510_v36 = vld [vmem:[%s16305_s1 + $0x10] ss:$8 sps:$4 sm:$0xff]  }
   0xd   :  { %565 = vmatprep.subr.bf16.mxu1 %v9482_v15  ;;  %v9513_v37 = vld [vmem:[%s16305_s1 + $0x210] ss:$8 sps:$4 sm:$0xff]   ;;  %v9514_v38 = vld [vmem:[%s16305_s1 + $0x204] ss:$8 sps:$4 sm:$0xff]   ;;  %v9516_v40 = vld [vmem:[%s16305_s1] ss:$8 sps:$4 sm:$0xff]  }
   0xe   :  { %v9518_v39 = vld [vmem:[%s16305_s1 + $0x4] ss:$8 sps:$4 sm:$0xff]   ;;  %v9519_v41 = vld [vmem:[%s16305_s1 + $0x200] ss:$8 sps:$4 sm:$0xff]   ;;  %v9520_v42 = vld [vmem:[%s16305_s1 + $0x1f4] ss:$8 sps:$4 sm:$0xff]  }
   0xf   :  { %295 = vmatpush1.bf16.msra.mxu0 %v9483_v17  ;;  %v9524_v43 = vld [vmem:[%s16305_s1 + $0xf4] ss:$8 sps:$4 sm:$0xff]   ;;  %v9522_v44 = vld [vmem:[%s16305_s1 + $0xf0] ss:$8 sps:$4 sm:$0xff]   ;;  %v9526_v46 = vld [vmem:[%s16305_s1 + $0x1e4] ss:$8 sps:$4 sm:$0xff]  }
  0x10   :  { %566 = vmatpush1.bf16.msra.mxu1 %v9480_v16  ;;  %296 = vmatprep.subr.bf16.mxu0 %v9484_v18  ;;  %v9525_v45 = vld [vmem:[%s16305_s1 + $0x1f0] ss:$8 sps:$4 sm:$0xff]   ;;  %v9530_v47 = vld [vmem:[%s16305_s1 + $0xe4] ss:$8 sps:$4 sm:$0xff]   ;;  %v9528_v48 = vld [vmem:[%s16305_s1 + $0xe0] ss:$8 sps:$4 sm:$0xff]  }
  0x11   :  { %567 = vmatprep.subr.bf16.mxu1 %v9488_v19  ;;  %v8002_v49 = vld [vmem:[%s16306_s0 + $0x18] sm:$0xff]  ;;  %v9531_v50 = vld [vmem:[%s16305_s1 + $0x1e0] ss:$8 sps:$4 sm:$0xff]   ;;  %v9538_v56 = vld [vmem:[%s16305_s1 + $0x1c4] ss:$8 sps:$4 sm:$0xff]   ;;  %vm4013_vm3 = vcmask 785412  }
  0x12   :  { %v9532_v51 = vld [vmem:[%s16305_s1 + $0x1d4] ss:$8 sps:$4 sm:$0xff]   ;;  %v11471_v52 = vcombine.high %v8002_v49, %v8002_v49  ;;  %v9534_v54 = vld [vmem:[%s16305_s1 + $0xd0] ss:$8 sps:$4 sm:$0xff]   ;;  %v9542_v57 = vld [vmem:[%s16305_s1 + $0xc4] ss:$8 sps:$4 sm:$0xff]   ;;  %v11531_v9 = vcombine.low %v8002_v49, %v8002_v49 }
  0x13   :  { %297 = vmatpush1.bf16.msra.mxu0 %v9489_v21  ;;  %v9536_v53 = vld [vmem:[%s16305_s1 + $0xd4] ss:$8 sps:$4 sm:$0xff]   ;;  %v9537_v55 = vld [vmem:[%s16305_s1 + $0x1d0] ss:$8 sps:$4 sm:$0xff]   ;;  %v16_v58 = vld [vmem:[%s16306_s0] sm:$0xff] }
  0x14   :  { %568 = vmatpush1.bf16.msra.mxu1 %v9486_v20  ;;  %298 = vmatprep.subr.bf16.mxu0 %v9490_v22  ;;  %v11492_v59 = vcombine.high %v16_v58, %v16_v58  ;;  %v9540_v60 = vld [vmem:[%s16305_s1 + $0xc0] ss:$8 sps:$4 sm:$0xff]   ;;  %v9544_v62 = vld [vmem:[%s16305_s1 + $0x1b4] ss:$8 sps:$4 sm:$0xff]   ;;  %v9546_v0 = vld [vmem:[%s16305_s1 + $0xb0] ss:$8 sps:$4 sm:$0xff]  }
  0x15   :  { %569 = vmatprep.subr.bf16.mxu1 %v9494_v23  ;;  %320 = vmatprep.mubr.bf16.mxu0 %v11471_v52  ;;  %v9543_v61 = vld [vmem:[%s16305_s1 + $0x1c0] ss:$8 sps:$4 sm:$0xff]   ;;  %v9548_v63 = vld [vmem:[%s16305_s1 + $0xb4] ss:$8 sps:$4 sm:$0xff]   ;;  %v9549_v2 = vld [vmem:[%s16305_s1 + $0x1b0] ss:$8 sps:$4 sm:$0xff]   ;;  %v11564_v23 = vcombine.low %v16_v58, %v16_v58 }
  0x16   :  { %595 = vmatprep.mubr.bf16.mxu1 %v11492_v59  ;;  %v9550_v3 = vld [vmem:[%s16305_s1 + $0x1a4] ss:$8 sps:$4 sm:$0xff]   ;;  %v9552_v5 = vld [vmem:[%s16305_s1 + $0xa0] ss:$8 sps:$4 sm:$0xff]   ;;  %v9560_v7 = vld [vmem:[%s16305_s1 + $0x94] ss:$8 sps:$4 sm:$0xff]  }
  0x17   :  { %299 = vmatpush1.bf16.msra.mxu0 %v9495_v25  ;;  %v9554_v4 = vld [vmem:[%s16305_s1 + $0xa4] ss:$8 sps:$4 sm:$0xff]   ;;  %v9555_v6 = vld [vmem:[%s16305_s1 + $0x1a0] ss:$8 sps:$4 sm:$0xff]   ;;  %v9563_v8 = vld [vmem:[%s16305_s1 + $0x114] ss:$8 sps:$4 sm:$0xff]  }
  0x18   :  { %570 = vmatpush1.bf16.msra.mxu1 %v9492_v24  ;;  %300 = vmatprep.subr.bf16.mxu0 %v9496_v26  ;;  %v9558_v11 = vld [vmem:[%s16305_s1 + $0x90] ss:$8 sps:$4 sm:$0xff]   ;;  %v9566_v13 = vld [vmem:[%s16305_s1 + $0x84] ss:$8 sps:$4 sm:$0xff]   ;;  %v692_v15 = vshll.u32 %v11492_v59, 16  ;;  %v690_v21 = vshrl.u32 %v11492_v59, 16  ;;  %vm14528_vm5 = vmand %vm4010_vm1, %vm4011_vm2 }
  0x19   :  { %571 = vmatprep.subr.bf16.mxu1 %v9500_v27  ;;  %v9561_v12 = vld [vmem:[%s16305_s1 + $0x110] ss:$8 sps:$4 sm:$0xff]   ;;  %v9569_v14 = vld [vmem:[%s16305_s1 + $0x104] ss:$8 sps:$4 sm:$0xff]   ;;  %v9564_v16 = vld [vmem:[%s16305_s1 + $0x80] ss:$8 sps:$4 sm:$0xff]  }
  0x1a   :  { %v9567_v17 = vld [vmem:[%s16305_s1 + $0x100] ss:$8 sps:$4 sm:$0xff]   ;;  %v9575_v19 = vld [vmem:[%s16305_s1 + $0x2b4] ss:$8 sps:$4 sm:$0xff]   ;;  %v694_v22 = vrot.slane %v692_v15, 1 }
  0x1b   :  { %301 = vmatpush1.bf16.msra.mxu0 %v9501_v29  ;;  %v9572_v18 = vld [vmem:[%s16306_s0 + $0x8] ss:$0 sps:$4 sm:$0xff]   ;;  %v9578_v20 = vld [vmem:[%s16305_s1 + $0x354] ss:$8 sps:$4 sm:$0xff]   ;;  %v9573_v25 = vld [vmem:[%s16305_s1 + $0x2b0] ss:$8 sps:$4 sm:$0xff]  }
  0x1c   :  { %572 = vmatpush1.bf16.msra.mxu1 %v9498_v28  ;;  %302 = vmatprep.subr.bf16.mxu0 %v9502_v30  ;;  %v698_v24 = vshll.u32 %v9572_v18, 16  ;;  %v9576_v26 = vld [vmem:[%s16305_s1 + $0x350] ss:$8 sps:$4 sm:$0xff]   ;;  %v9581_v27 = vld [vmem:[%s16305_s1 + $0x2a4] ss:$8 sps:$4 sm:$0xff]   ;;  %v11578_v29 = vor.u32 %v694_v22, %v690_v21  ;;  %v1018_v30 = vshll.u32 %v11471_v52, 16 }
  0x1d   :  { %573 = vmatprep.subr.bf16.mxu1 %v9506_v31  ;;  %v9584_v28 = vld [vmem:[%s16305_s1 + $0x344] ss:$8 sps:$4 sm:$0xff]   ;;  %v696_v31 = vshrl.u32 %v9572_v18, 16  ;;  %v9597_v49 = vld [vmem:[%s16305_s1 + $0x270] ss:$8 sps:$4 sm:$0xff]  }
  0x1e   :  { %v9609_v58 = vld [vmem:[%s16305_s1 + $0x250] ss:$8 sps:$4 sm:$0xff]   ;;  %v9650_v21 = vld [vmem:[%s16305_s1 + $0x434] ss:$8 sps:$4 sm:$0xff]   ;;  %vm4014_vm4 = vsmask.f32 7424 }
  0x1f   :  { %303 = vmatpush1.bf16.msra.mxu0 %v9507_v33  ;;  %v9579_v33 = vld [vmem:[%s16305_s1 + $0x2a0] ss:$8 sps:$4 sm:$0xff]   ;;  %v9636_v15 = vld [vmem:[%s16305_s1 + $0x450] ss:$8 sps:$4 sm:$0xff]   ;;  %vm14543_vm6 = vmand %vm4013_vm3, %vm4014_vm4 }
  0x20   :  { %574 = vmatpush1.bf16.msra.mxu1 %v9504_v32  ;;  %304 = vmatprep.subr.bf16.mxu0 %v9508_v34  ;;  %v700_v32 = vrot.slane %v698_v24, 1  ;;  %v9582_v34 = vld [vmem:[%s16305_s1 + $0x340] ss:$8 sps:$4 sm:$0xff]   ;;  %v9645_v22 = vld [vmem:[%s16305_s1 + $0x2f0] ss:$8 sps:$4 sm:$0xff]   ;;  %vm4016_vm7 = vmor %vm14543_vm6, %vm14528_vm5 }
  0x21   :  { %575 = vmatprep.subr.bf16.mxu1 %v9512_v35  ;;  %v9587_v35 = vld [vmem:[%s16305_s1 + $0x294] ss:$8 sps:$4 sm:$0xff]   ;;  %v9648_v24 = vld [vmem:[%s16305_s1 + $0x430] ss:$8 sps:$4 sm:$0xff]  }
  0x23   :  { %305 = vmatpush2.bf16.msra.mxu0 %v9513_v37  ;;  %v1016_v37 = vshrl.u32 %v11471_v52, 16 }
  0x24   :  { %576 = vmatpush1.bf16.msra.mxu1 %v9510_v36  ;;  %306 = vmatprep.subr.bf16.mxu0 %v9514_v38  ;;  %v9590_v36 = vld [vmem:[%s16305_s1 + $0x3d4] ss:$8 sps:$4 sm:$0xff]   ;;  %v1020_v38 = vrot.slane %v1018_v30, 1 }
  0x25   :  { %577 = vmatprep.subr.bf16.mxu1 %v9518_v39  ;;  %v11598_v39 = vor.u32 %v700_v32, %v696_v31  ;;  %v9659_v30 = vld [vmem:[%s16305_s1 + $0x2d4] ss:$8 sps:$4 sm:$0xff]   ;;  %v9657_v32 = vld [vmem:[%s16305_s1 + $0x2d0] ss:$8 sps:$4 sm:$0xff]  }
  0x26   :  { %v9662_v31 = vld [vmem:[%s16305_s1 + $0x414] ss:$8 sps:$4 sm:$0xff]  }
  0x27   :  { %307 = vmatpush2.bf16.msra.mxu0 %v9519_v41  ;;  %v9588_v41 = vld [vmem:[%s16305_s1 + $0x3d0] ss:$8 sps:$4 sm:$0xff]  }
  0x28   :  { %578 = vmatpush1.bf16.msra.mxu1 %v9516_v40  ;;  %308 = vmatprep.subr.bf16.mxu0 %v9520_v42  ;;  %v9585_v40 = vld [vmem:[%s16305_s1 + $0x290] ss:$8 sps:$4 sm:$0xff]   ;;  %v9593_v42 = vld [vmem:[%s16305_s1 + $0x284] ss:$8 sps:$4 sm:$0xff]  }
  0x29   :  { %579 = vmatprep.subr.bf16.mxu1 %v9524_v43  ;;  %v9596_v43 = vld [vmem:[%s16305_s1 + $0x3c4] ss:$8 sps:$4 sm:$0xff]  }
  0x2b   :  { %309 = vmatpush2.bf16.msra.mxu0 %v9525_v45  ;;  %v9591_v45 = vld [vmem:[%s16305_s1 + $0x280] ss:$8 sps:$4 sm:$0xff]  }
  0x2c   :  { %580 = vmatpush2.bf16.msra.mxu1 %v9522_v44  ;;  %310 = vmatprep.subr.bf16.mxu0 %v9526_v46  ;;  %v11612_v44 = vor.u32 %v1020_v38, %v1016_v37  ;;  %v9594_v46 = vld [vmem:[%s16305_s1 + $0x3c0] ss:$8 sps:$4 sm:$0xff]   ;;  %v683_v38 = vshrl.u32 %v11564_v23, 16 }
  0x2d   :  { %581 = vmatprep.subr.bf16.mxu1 %v9530_v47  ;;  %v9599_v47 = vld [vmem:[%s16305_s1 + $0x274] ss:$8 sps:$4 sm:$0xff]   ;;  %v9663_v37 = vld [vmem:[%s16305_s1 + $0x2c0] ss:$8 sps:$4 sm:$0xff]  }
  0x2f   :  { %311 = vmatpush2.bf16.msra.mxu0 %v9531_v50  ;;  %v9600_v50 = vld [vmem:[%s16305_s1 + $0x3b0] ss:$8 sps:$4 sm:$0xff]  }
  0x30   :  { %582 = vmatpush2.bf16.msra.mxu1 %v9528_v48  ;;  %312 = vmatprep.subr.bf16.mxu0 %v9532_v51  ;;  %v9602_v48 = vld [vmem:[%s16305_s1 + $0x3b4] ss:$8 sps:$4 sm:$0xff]   ;;  %v9605_v51 = vld [vmem:[%s16305_s1 + $0x264] ss:$8 sps:$4 sm:$0xff]  }
  0x31   :  { %583 = vmatprep.subr.bf16.mxu1 %v9536_v53  ;;  %v9608_v53 = vld [vmem:[%s16305_s1 + $0x3a4] ss:$8 sps:$4 sm:$0xff]  }
  0x33   :  { %313 = vmatpush2.bf16.msra.mxu0 %v9537_v55  ;;  %v9606_v55 = vld [vmem:[%s16305_s1 + $0x3a0] ss:$8 sps:$4 sm:$0xff]  }
  0x34   :  { %584 = vmatpush2.bf16.msra.mxu1 %v9534_v54  ;;  %314 = vmatprep.subr.bf16.mxu0 %v9538_v56  ;;  %v9603_v54 = vld [vmem:[%s16305_s1 + $0x260] ss:$8 sps:$4 sm:$0xff]   ;;  %v9611_v56 = vld [vmem:[%s16305_s1 + $0x254] ss:$8 sps:$4 sm:$0xff]  }
  0x35   :  { %585 = vmatprep.subr.bf16.mxu1 %v9542_v57  ;;  %v9614_v57 = vld [vmem:[%s16305_s1 + $0x394] ss:$8 sps:$4 sm:$0xff]  }
  0x37   :  { %315 = vmatpush2.bf16.msra.mxu0 %v9543_v61  ;;  %v9617_v61 = vld [vmem:[%s16305_s1 + $0x244] ss:$8 sps:$4 sm:$0xff]  }
  0x38   :  { %586 = vmatpush2.bf16.msra.mxu1 %v9540_v60  ;;  %316 = vmatprep.subr.bf16.mxu0 %v9544_v62  ;;  %v9612_v60 = vld [vmem:[%s16305_s1 + $0x390] ss:$8 sps:$4 sm:$0xff]   ;;  %v9620_v62 = vld [vmem:[%s16305_s1 + $0x384] ss:$8 sps:$4 sm:$0xff]  }
  0x39   :  { %587 = vmatprep.subr.bf16.mxu1 %v9548_v63  ;;  %v9615_v63 = vld [vmem:[%s16305_s1 + $0x240] ss:$8 sps:$4 sm:$0xff]  }
  0x3b   :  { %317 = vmatpush2.bf16.msra.mxu0 %v9549_v2  ;;  %v9623_v2 = vld [vmem:[%s16305_s1 + $0x334] ss:$8 sps:$4 sm:$0xff]  }
  0x3c   :  { %588 = vmatpush2.bf16.msra.mxu1 %v9546_v0  ;;  %318 = vmatprep.subr.bf16.mxu0 %v9550_v3  ;;  %v9618_v0 = vld [vmem:[%s16305_s1 + $0x380] ss:$8 sps:$4 sm:$0xff]   ;;  %v9626_v3 = vld [vmem:[%s16305_s1 + $0x374] ss:$8 sps:$4 sm:$0xff]  }
  0x3d   :  { %589 = vmatprep.subr.bf16.mxu1 %v9554_v4  ;;  %v9621_v4 = vld [vmem:[%s16305_s1 + $0x330] ss:$8 sps:$4 sm:$0xff]  }
  0x3f   :  { %319 = vmatpush2.bf16.msra.mxu0 %v9555_v6  ;;  %v9629_v6 = vld [vmem:[%s16305_s1 + $0x324] ss:$8 sps:$4 sm:$0xff]  }
  0x40   :  { %590 = vmatpush2.bf16.msra.mxu1 %v9552_v5  ;;  %616 = vmatprep.subr.bf16.mxu0 %v9563_v8  ;;  %v9624_v5 = vld [vmem:[%s16305_s1 + $0x370] ss:$8 sps:$4 sm:$0xff]   ;;  %v9627_v8 = vld [vmem:[%s16305_s1 + $0x320] ss:$8 sps:$4 sm:$0xff]  }
  0x41   :  { %591 = vmatprep.subr.bf16.mxu1 %v9560_v7  ;;  %v9632_v7 = vld [vmem:[%s16305_s1 + $0x364] ss:$8 sps:$4 sm:$0xff]  }
  0x42   :  { %321 = vmatmul.mubr.bf16.vlgmr.msra.gmra.mxu0 %v11531_v9 }
  0x43   :  { %617 = vmatpush1.bf16.msra.mxu0 %v9561_v12  ;;  %636 = vmatprep.mubr.bf16.mxu0 %v11292_v1  ;;  %v9635_v12 = vld [vmem:[%s16305_s1 + $0x314] ss:$8 sps:$4 sm:$0xff]  }
  0x44   :  { %592 = vmatpush2.bf16.msra.mxu1 %v9558_v11  ;;  %618 = vmatprep.subr.bf16.mxu0 %v9569_v14  ;;  %v9630_v11 = vld [vmem:[%s16305_s1 + $0x360] ss:$8 sps:$4 sm:$0xff]   ;;  %v9633_v14 = vld [vmem:[%s16305_s1 + $0x310] ss:$8 sps:$4 sm:$0xff]  }
  0x45   :  { %593 = vmatprep.subr.bf16.mxu1 %v9566_v13  ;;  %v9638_v13 = vld [vmem:[%s16305_s1 + $0x454] ss:$8 sps:$4 sm:$0xff]  }
  0x47   :  { %619 = vmatpush1.bf16.msra.mxu0 %v9567_v17  ;;  %v9644_v17 = vld [vmem:[%s16305_s1 + $0x444] ss:$8 sps:$4 sm:$0xff]  }
  0x48   :  { %594 = vmatpush2.bf16.msra.mxu1 %v9564_v16  ;;  %887 = vmatprep.subr.bf16.mxu0 %v9575_v19  ;;  %v9641_v16 = vld [vmem:[%s16305_s1 + $0x304] ss:$8 sps:$4 sm:$0xff]   ;;  %v9642_v19 = vld [vmem:[%s16305_s1 + $0x440] ss:$8 sps:$4 sm:$0xff]  }
  0x49   :  { %940 = vmatprep.subr.bf16.mxu1 %v9578_v20  ;;  %v9647_v20 = vld [vmem:[%s16305_s1 + $0x2f4] ss:$8 sps:$4 sm:$0xff]  }
  0x4a   :  { %8119 = vmatmul.mubr.msk.bf16.vlgmr.msra.gmra.mxu0 %vm284_vm0, %v9572_v18  ;;  %v9639_v18 = vld [vmem:[%s16305_s1 + $0x300] ss:$8 sps:$4 sm:$0xff]  }
  0x4b   :  { %596 = vmatmul.mubr.bf16.vlgmr.msra.gmra.mxu1 %v11564_v23  ;;  %888 = vmatpush1.bf16.msra.mxu0 %v9573_v25  ;;  %v9653_v25 = vld [vmem:[%s16305_s1 + $0x2e4] ss:$8 sps:$4 sm:$0xff]  }
  0x4c   :  { %941 = vmatpush1.bf16.msra.mxu1 %v9576_v26  ;;  %889 = vmatprep.subr.bf16.mxu0 %v9581_v27  ;;  %v9656_v26 = vld [vmem:[%s16305_s1 + $0x424] ss:$8 sps:$4 sm:$0xff]   ;;  %v9651_v27 = vld [vmem:[%s16305_s1 + $0x2e0] ss:$8 sps:$4 sm:$0xff]  }
  0x4d   :  { %942 = vmatprep.subr.bf16.mxu1 %v9584_v28  ;;  %960 = vmatprep.mubr.bf16.mxu1 %v11292_v1  ;;  %v9654_v28 = vld [vmem:[%s16305_s1 + $0x420] ss:$8 sps:$4 sm:$0xff]  }
  0x4e   :  { %919 = vmatprep.mubr.bf16.mxu0 %v11578_v29 }
  0x4f   :  { %890 = vmatpush1.bf16.msra.mxu0 %v9579_v33  ;;  %v685_v33 = vshll.u32 %v11564_v23, 16 }
  0x50   :  { %943 = vmatpush1.bf16.msra.mxu1 %v9582_v34  ;;  %891 = vmatprep.subr.bf16.mxu0 %v9587_v35  ;;  %v9660_v34 = vld [vmem:[%s16305_s1 + $0x410] ss:$8 sps:$4 sm:$0xff]   ;;  %v9665_v35 = vld [vmem:[%s16305_s1 + $0x2c4] ss:$8 sps:$4 sm:$0xff]  }
  0x51   :  { %1213 = vmatprep.subr.bf16.mxu1 %v9590_v36  ;;  %v9668_v36 = vld [vmem:[%s16305_s1 + $0x404] ss:$8 sps:$4 sm:$0xff]  }
  0x53   :  { %8192 = vmatmul.mubr.msk.bf16.vlgmr.msra.gmra.mxu1 %vm284_vm0, %v11598_v39  ;;  %892 = vmatpush1.bf16.msra.mxu0 %v9585_v40  ;;  %v687_v40 = vrot.slane %v685_v33, 1  ;;  %v9721_v33 = vld [vmem:[%s16305_s1 + $0x6f0] ss:$8 sps:$4 sm:$0xff]  }
  0x54   :  { %1214 = vmatpush1.bf16.msra.mxu1 %v9588_v41  ;;  %893 = vmatprep.subr.bf16.mxu0 %v9593_v42  ;;  %v9666_v41 = vld [vmem:[%s16305_s1 + $0x400] ss:$8 sps:$4 sm:$0xff]   ;;  %v9671_v42 = vld [vmem:[%s16305_s1 + $0x3f4] ss:$8 sps:$4 sm:$0xff]  }
  0x55   :  { %1215 = vmatprep.subr.bf16.mxu1 %v9596_v43  ;;  %1245 = vmatprep.mubr.bf16.mxu1 %v11612_v44  ;;  %v9674_v43 = vld [vmem:[%s16305_s1 + $0x474] ss:$8 sps:$4 sm:$0xff]  }
  0x57   :  { %894 = vmatpush1.bf16.msra.mxu0 %v9591_v45  ;;  %v1024_v45 = vshll.u32 %v11344_v10, 16 }
  0x58   :  { %1216 = vmatpush1.bf16.msra.mxu1 %v9594_v46  ;;  %895 = vmatprep.subr.bf16.mxu0 %v9599_v47  ;;  %v11776_v46 = vor.u32 %v687_v40, %v683_v38  ;;  %v9669_v47 = vld [vmem:[%s16305_s1 + $0x3f0] ss:$8 sps:$4 sm:$0xff]   ;;  %v9732_v38 = vld [vmem:[%s16305_s1 + $0x574] ss:$8 sps:$4 sm:$0xff]  }
  0x59   :  { %1217 = vmatprep.subr.bf16.mxu1 %v9602_v48  ;;  %v1011_v48 = vshll.u32 %v11531_v9, 16  ;;  %v9735_v40 = vld [vmem:[%s16305_s1 + $0x6d4] ss:$8 sps:$4 sm:$0xff]  }
  0x5b   :  { %896 = vmatpush1.bf16.msra.mxu0 %v9597_v49  ;;  %v9672_v49 = vld [vmem:[%s16305_s1 + $0x470] ss:$8 sps:$4 sm:$0xff]  }
  0x5c   :  { %1218 = vmatpush1.bf16.msra.mxu1 %v9600_v50  ;;  %897 = vmatprep.subr.bf16.mxu0 %v9605_v51  ;;  %v9677_v50 = vld [vmem:[%s16305_s1 + $0x3e4] ss:$8 sps:$4 sm:$0xff]  }
  0x5d   :  { %1219 = vmatprep.subr.bf16.mxu1 %v9608_v53  ;;  %v9680_v51 = vld [vmem:[%s16305_s1 + $0x464] ss:$8 sps:$4 sm:$0xff]   ;;  %v1022_v53 = vshrl.u32 %v11344_v10, 16  ;;  %v9683_v10 = vld [vmem:[%s16305_s1 + $0x4f4] ss:$8 sps:$4 sm:$0xff]  }
  0x5f   :  { %898 = vmatpush1.bf16.msra.mxu0 %v9603_v54  ;;  %v1026_v54 = vrot.slane %v1024_v45, 1  ;;  %v9741_v45 = vld [vmem:[%s16305_s1 + $0x6c4] ss:$8 sps:$4 sm:$0xff]  }
  0x60   :  { %1220 = vmatpush1.bf16.msra.mxu1 %v9606_v55  ;;  %899 = vmatprep.subr.bf16.mxu0 %v9611_v56  ;;  %v9675_v55 = vld [vmem:[%s16305_s1 + $0x3e0] ss:$8 sps:$4 sm:$0xff]   ;;  %v1009_v56 = vshrl.u32 %v11531_v9, 16 }
  0x61   :  { %1221 = vmatprep.subr.bf16.mxu1 %v9614_v57  ;;  %v1013_v57 = vrot.slane %v1011_v48, 1  ;;  %v9739_v48 = vld [vmem:[%s16305_s1 + $0x6c0] ss:$8 sps:$4 sm:$0xff]  }
  0x63   :  { %900 = vmatpush1.bf16.msra.mxu0 %v9609_v58  ;;  %v9678_v58 = vld [vmem:[%s16305_s1 + $0x460] ss:$8 sps:$4 sm:$0xff]  }
  0x64   :  { %1222 = vmatpush1.bf16.msra.mxu1 %v9612_v60  ;;  %901 = vmatprep.subr.bf16.mxu0 %v9617_v61  ;;  %v9686_v60 = vld [vmem:[%s16305_s1 + $0x594] ss:$8 sps:$4 sm:$0xff]   ;;  %v9778_v61 = vld [vmem:[%s16306_s0 + $0x4] ss:$12 sps:$4 sm:$0x1e]  }
  0x65   :  { %1223 = vmatprep.subr.bf16.mxu1 %v9620_v62  ;;  %v11810_v62 = vor.u32 %v1013_v57, %v1009_v56  ;;  %v9748_v56 = vld [vmem:[%s16305_s1 + $0x540] ss:$8 sps:$4 sm:$0xff]  }
  0x66   :  { %v9751_v57 = vld [vmem:[%s16305_s1 + $0x7a0] ss:$8 sps:$4 sm:$0xff]  }
  0x67   :  { %902 = vmatpush1.bf16.msra.mxu0 %v9615_v63  ;;  %v11812_v63 = vor.u32 %v1026_v54, %v1022_v53  ;;  %v9745_v53 = vld [vmem:[%s16305_s1 + $0x7b0] ss:$8 sps:$4 sm:$0xff]   ;;  %v9750_v54 = vld [vmem:[%s16305_s1 + $0x544] ss:$8 sps:$4 sm:$0xff]  }
  0x68   :  { %1224 = vmatpush1.bf16.msra.mxu1 %v9618_v0  ;;  %903 = vmatprep.subr.bf16.mxu0 %v9623_v2  ;;  %v9681_v0 = vld [vmem:[%s16305_s1 + $0x4f0] ss:$8 sps:$4 sm:$0xff]  }
  0x69   :  { %1225 = vmatprep.subr.bf16.mxu1 %v9626_v3  ;;  %v9684_v2 = vld [vmem:[%s16305_s1 + $0x590] ss:$8 sps:$4 sm:$0xff]   ;;  %v9689_v3 = vld [vmem:[%s16305_s1 + $0x4e4] ss:$8 sps:$4 sm:$0xff]  }
  0x6b   :  { %904 = vmatpush2.bf16.msra.mxu0 %v9621_v4  ;;  %v9692_v4 = vld [vmem:[%s16305_s1 + $0x584] ss:$8 sps:$4 sm:$0xff]  }
  0x6c   :  { %1226 = vmatpush1.bf16.msra.mxu1 %v9624_v5  ;;  %905 = vmatprep.subr.bf16.mxu0 %v9629_v6  ;;  %v9687_v5 = vld [vmem:[%s16305_s1 + $0x4e0] ss:$8 sps:$4 sm:$0xff]   ;;  %v11829_v6 = vrot.slane %v9778_v61, 1  ;;  %v9757_v61 = vld [vmem:[%s16305_s1 + $0x790] ss:$8 sps:$4 sm:$0xff]  }
  0x6d   :  { %1227 = vmatprep.subr.bf16.mxu1 %v9632_v7  ;;  %v9696_v7 = vld [vmem:[%s16306_s0 + $0x8] ss:$12 sps:$4 sm:$0x1e]  }
  0x6f   :  { %906 = vmatpush2.bf16.msra.mxu0 %v9627_v8  ;;  %v9690_v8 = vld [vmem:[%s16305_s1 + $0x580] ss:$8 sps:$4 sm:$0xff]  }
  0x70   :  { %1228 = vmatpush1.bf16.msra.mxu1 %v9630_v11  ;;  %907 = vmatprep.subr.bf16.mxu0 %v9635_v12  ;;  %v9695_v11 = vld [vmem:[%s16305_s1 + $0x4d4] ss:$8 sps:$4 sm:$0xff]  }
  0x71   :  { %1229 = vmatprep.subr.bf16.mxu1 %v9638_v13  ;;  %v9699_v12 = vld [vmem:[%s16305_s1 + $0x734] ss:$8 sps:$4 sm:$0xff]   ;;  %v9693_v13 = vld [vmem:[%s16305_s1 + $0x4d0] ss:$8 sps:$4 sm:$0xff]  }
  0x73   :  { %908 = vmatpush2.bf16.msra.mxu0 %v9633_v14  ;;  %v11851_v14 = vrot.slane %v9696_v7, 1  ;;  %v9771_v7 = vld [vmem:[%s16305_s1 + $0x774] ss:$8 sps:$4 sm:$0xff]  }
  0x74   :  { %1230 = vmatpush2.bf16.msra.mxu1 %v9636_v15  ;;  %909 = vmatprep.subr.bf16.mxu0 %v9641_v16  ;;  %v9697_v15 = vld [vmem:[%s16305_s1 + $0x730] ss:$8 sps:$4 sm:$0xff]   ;;  %v9702_v16 = vld [vmem:[%s16305_s1 + $0x4c4] ss:$8 sps:$4 sm:$0xff]  }
  0x75   :  { %1231 = vmatprep.subr.bf16.mxu1 %v9644_v17  ;;  %v9705_v17 = vld [vmem:[%s16305_s1 + $0x724] ss:$8 sps:$4 sm:$0xff]  }
  0x77   :  { %910 = vmatpush2.bf16.msra.mxu0 %v9639_v18  ;;  %v9700_v18 = vld [vmem:[%s16305_s1 + $0x4c0] ss:$8 sps:$4 sm:$0xff]  }
  0x78   :  { %1232 = vmatpush2.bf16.msra.mxu1 %v9642_v19  ;;  %911 = vmatprep.subr.bf16.mxu0 %v9647_v20  ;;  %v9703_v19 = vld [vmem:[%s16305_s1 + $0x720] ss:$8 sps:$4 sm:$0xff]   ;;  %v9708_v20 = vld [vmem:[%s16305_s1 + $0x4b4] ss:$8 sps:$4 sm:$0xff]  }
  0x79   :  { %1233 = vmatprep.subr.bf16.mxu1 %v9650_v21  ;;  %v9711_v21 = vld [vmem:[%s16305_s1 + $0x714] ss:$8 sps:$4 sm:$0xff]  }
  0x7b   :  { %912 = vmatpush2.bf16.msra.mxu0 %v9645_v22  ;;  %v9706_v22 = vld [vmem:[%s16305_s1 + $0x4b0] ss:$8 sps:$4 sm:$0xff]  }
  0x7c   :  { %1234 = vmatpush2.bf16.msra.mxu1 %v9648_v24  ;;  %913 = vmatprep.subr.bf16.mxu0 %v9653_v25  ;;  %v9709_v24 = vld [vmem:[%s16305_s1 + $0x710] ss:$8 sps:$4 sm:$0xff]   ;;  %v9714_v25 = vld [vmem:[%s16305_s1 + $0x4a4] ss:$8 sps:$4 sm:$0xff]  }
  0x7d   :  { %1235 = vmatprep.subr.bf16.mxu1 %v9656_v26  ;;  %v9717_v26 = vld [vmem:[%s16305_s1 + $0x704] ss:$8 sps:$4 sm:$0xff]  }
  0x7f   :  { %914 = vmatpush2.bf16.msra.mxu0 %v9651_v27  ;;  %v9712_v27 = vld [vmem:[%s16305_s1 + $0x4a0] ss:$8 sps:$4 sm:$0xff]  }
  0x80   :  { %1236 = vmatpush2.bf16.msra.mxu1 %v9654_v28  ;;  %915 = vmatprep.subr.bf16.mxu0 %v9659_v30  ;;  %v9715_v28 = vld [vmem:[%s16305_s1 + $0x700] ss:$8 sps:$4 sm:$0xff]   ;;  %v9720_v30 = vld [vmem:[%s16305_s1 + $0x494] ss:$8 sps:$4 sm:$0xff]  }
  0x81   :  { %1237 = vmatprep.subr.bf16.mxu1 %v9662_v31  ;;  %v9723_v31 = vld [vmem:[%s16305_s1 + $0x6f4] ss:$8 sps:$4 sm:$0xff]  }
  0x83   :  { %916 = vmatpush2.bf16.msra.mxu0 %v9657_v32  ;;  %v9718_v32 = vld [vmem:[%s16305_s1 + $0x490] ss:$8 sps:$4 sm:$0xff]  }
  0x84   :  { %1238 = vmatpush2.bf16.msra.mxu1 %v9660_v34  ;;  %917 = vmatprep.subr.bf16.mxu0 %v9665_v35  ;;  %v9726_v34 = vld [vmem:[%s16305_s1 + $0x484] ss:$8 sps:$4 sm:$0xff]  }
  0x85   :  { %1239 = vmatprep.subr.bf16.mxu1 %v9668_v36  ;;  %v9729_v35 = vld [vmem:[%s16305_s1 + $0x6e4] ss:$8 sps:$4 sm:$0xff]   ;;  %v9724_v36 = vld [vmem:[%s16305_s1 + $0x480] ss:$8 sps:$4 sm:$0xff]  }
  0x87   :  { %918 = vmatpush2.bf16.msra.mxu0 %v9663_v37  ;;  %v9727_v37 = vld [vmem:[%s16305_s1 + $0x6e0] ss:$8 sps:$4 sm:$0xff]  }
  0x88   :  { %1240 = vmatpush2.bf16.msra.mxu1 %v9666_v41  ;;  %1266 = vmatprep.subr.bf16.mxu0 %v9674_v43  ;;  %v9730_v41 = vld [vmem:[%s16305_s1 + $0x570] ss:$8 sps:$4 sm:$0xff]   ;;  %v9738_v43 = vld [vmem:[%s16305_s1 + $0x564] ss:$8 sps:$4 sm:$0xff]  }
  0x89   :  { %1241 = vmatprep.subr.bf16.mxu1 %v9671_v42  ;;  %v9733_v42 = vld [vmem:[%s16305_s1 + $0x6d0] ss:$8 sps:$4 sm:$0xff]  }
  0x8a   :  { %920 = vmatmul.mubr.bf16.vlgmr.msra.gmra.mxu0 %v11776_v46 }
  0x8b   :  { %1267 = vmatpush1.bf16.msra.mxu0 %v9672_v49  ;;  %1286 = vmatprep.mubr.bf16.mxu0 %v11292_v1  ;;  %v9744_v49 = vld [vmem:[%s16305_s1 + $0x554] ss:$8 sps:$4 sm:$0xff]  }
  0x8c   :  { %1242 = vmatpush2.bf16.msra.mxu1 %v9669_v47  ;;  %1268 = vmatprep.subr.bf16.mxu0 %v9680_v51  ;;  %v9736_v47 = vld [vmem:[%s16305_s1 + $0x560] ss:$8 sps:$4 sm:$0xff]   ;;  %v9742_v51 = vld [vmem:[%s16305_s1 + $0x550] ss:$8 sps:$4 sm:$0xff]  }
  0x8d   :  { %1243 = vmatprep.subr.bf16.mxu1 %v9677_v50  ;;  %v9747_v50 = vld [vmem:[%s16305_s1 + $0x7b4] ss:$8 sps:$4 sm:$0xff]  }
  0x8f   :  { %1269 = vmatpush1.bf16.msra.mxu0 %v9678_v58  ;;  %v9756_v58 = vld [vmem:[%s16305_s1 + $0x534] ss:$8 sps:$4 sm:$0xff]  }
  0x90   :  { %1244 = vmatpush2.bf16.msra.mxu1 %v9675_v55  ;;  %1539 = vmatprep.subr.bf16.mxu0 %v9683_v10  ;;  %v9753_v55 = vld [vmem:[%s16305_s1 + $0x7a4] ss:$8 sps:$4 sm:$0xff]   ;;  %v9759_v10 = vld [vmem:[%s16305_s1 + $0x794] ss:$8 sps:$4 sm:$0xff]  }
  0x91   :  { %1592 = vmatprep.subr.bf16.mxu1 %v9686_v60  ;;  %v9754_v60 = vld [vmem:[%s16305_s1 + $0x530] ss:$8 sps:$4 sm:$0xff]  }
  0x92   :  { %8265 = vmatmul.mubr.msk.bf16.vlgmr.msra.gmra.mxu0 %vm284_vm0, %v11812_v63 }
  0x93   :  { %1246 = vmatmul.mubr.bf16.vlgmr.msra.gmra.mxu1 %v11810_v62  ;;  %1540 = vmatpush1.bf16.msra.mxu0 %v9681_v0  ;;  %v9762_v0 = vld [vmem:[%s16305_s1 + $0x524] ss:$8 sps:$4 sm:$0xff]  }
  0x94   :  { %1593 = vmatpush1.bf16.msra.mxu1 %v9684_v2  ;;  %1541 = vmatprep.subr.bf16.mxu0 %v9689_v3  ;;  %v9765_v2 = vld [vmem:[%s16305_s1 + $0x784] ss:$8 sps:$4 sm:$0xff]   ;;  %v9760_v3 = vld [vmem:[%s16305_s1 + $0x520] ss:$8 sps:$4 sm:$0xff]  }
  0x95   :  { %1594 = vmatprep.subr.bf16.mxu1 %v9692_v4  ;;  %1612 = vmatprep.mubr.bf16.mxu1 %v11292_v1  ;;  %v9763_v4 = vld [vmem:[%s16305_s1 + $0x780] ss:$8 sps:$4 sm:$0xff]  }
  0x96   :  { %1571 = vmatprep.mubr.bf16.mxu0 %v11829_v6 }
  0x97   :  { %1542 = vmatpush1.bf16.msra.mxu0 %v9687_v5  ;;  %v9768_v5 = vld [vmem:[%s16305_s1 + $0x514] ss:$8 sps:$4 sm:$0xff]  }
  0x98   :  { %1595 = vmatpush1.bf16.msra.mxu1 %v9690_v8  ;;  %1543 = vmatprep.subr.bf16.mxu0 %v9695_v11  ;;  %v9766_v8 = vld [vmem:[%s16305_s1 + $0x510] ss:$8 sps:$4 sm:$0xff]  }
  0x99   :  { %1877 = vmatprep.subr.bf16.mxu1 %v9699_v12  ;;  %v9769_v11 = vld [vmem:[%s16305_s1 + $0x770] ss:$8 sps:$4 sm:$0xff]   ;;  %v9774_v12 = vld [vmem:[%s16305_s1 + $0x504] ss:$8 sps:$4 sm:$0xff]  }
  0x9b   :  { %8341 = vmatmul.mubr.msk.bf16.vlgmr.msra.gmra.mxu1 %vm284_vm0, %v11851_v14  ;;  %1544 = vmatpush1.bf16.msra.mxu0 %v9693_v13  ;;  %v9777_v13 = vld [vmem:[%s16305_s1 + $0x764] ss:$8 sps:$4 sm:$0xff]  }
  0x9c   :  { %1878 = vmatpush1.bf16.msra.mxu1 %v9697_v15  ;;  %1545 = vmatprep.subr.bf16.mxu0 %v9702_v16  ;;  %v9772_v15 = vld [vmem:[%s16305_s1 + $0x500] ss:$8 sps:$4 sm:$0xff]  }
  0x9d   :  { %1879 = vmatprep.subr.bf16.mxu1 %v9705_v17  ;;  %1909 = vmatprep.mubr.bf16.mxu1 %v11471_v52  ;;  %v9780_v17 = vld [vmem:[%s16306_s0] ss:$12 sps:$4 sm:$0x1e]  }
  0x9f   :  { %1546 = vmatpush1.bf16.msra.mxu0 %v9700_v18  ;;  %v9775_v18 = vld [vmem:[%s16305_s1 + $0x760] ss:$8 sps:$4 sm:$0xff]  }
  0xa0   :  { %1880 = vmatpush1.bf16.msra.mxu1 %v9703_v19  ;;  %1547 = vmatprep.subr.bf16.mxu0 %v9708_v20  ;;  %v9783_v20 = vld [vmem:[%s16305_s1 + $0x754] ss:$8 sps:$4 sm:$0xff]  }
  0xa1   :  { %1881 = vmatprep.subr.bf16.mxu1 %v9711_v21  ;;  %v9786_v21 = vld [vmem:[%s16305_s1 + $0x7d4] ss:$8 sps:$4 sm:$0xff]  }
  0xa3   :  { %1548 = vmatpush1.bf16.msra.mxu0 %v9706_v22 }
  0xa4   :  { %1882 = vmatpush1.bf16.msra.mxu1 %v9709_v24  ;;  %1549 = vmatprep.subr.bf16.mxu0 %v9714_v25  ;;  %v12028_v24 = vrot.slane %v9780_v17, 1  ;;  %v9781_v25 = vld [vmem:[%s16305_s1 + $0x750] ss:$8 sps:$4 sm:$0xff]  }
  0xa5   :  { %1883 = vmatprep.subr.bf16.mxu1 %v9717_v26  ;;  %v9784_v26 = vld [vmem:[%s16305_s1 + $0x7d0] ss:$8 sps:$4 sm:$0xff]  }
  0xa6   :  { %v9844_v17 = vld [vmem:[%s16305_s1 + $0x7f0] ss:$8 sps:$4 sm:$0xff]  }
  0xa7   :  { %1550 = vmatpush1.bf16.msra.mxu0 %v9712_v27 }
  0xa8   :  { %1884 = vmatpush1.bf16.msra.mxu1 %v9715_v28  ;;  %1551 = vmatprep.subr.bf16.mxu0 %v9720_v30  ;;  %v9789_v28 = vld [vmem:[%s16305_s1 + $0x744] ss:$8 sps:$4 sm:$0xff]  }
  0xa9   :  { %1885 = vmatprep.subr.bf16.mxu1 %v9723_v31  ;;  %v9792_v30 = vld [vmem:[%s16305_s1 + $0x7c4] ss:$8 sps:$4 sm:$0xff]   ;;  %v9787_v31 = vld [vmem:[%s16305_s1 + $0x740] ss:$8 sps:$4 sm:$0xff]  }
  0xab   :  { %1552 = vmatpush1.bf16.msra.mxu0 %v9718_v32  ;;  %v9790_v32 = vld [vmem:[%s16305_s1 + $0x7c0] ss:$8 sps:$4 sm:$0xff]  }
  0xac   :  { %1886 = vmatpush1.bf16.msra.mxu1 %v9721_v33  ;;  %1553 = vmatprep.subr.bf16.mxu0 %v9726_v34  ;;  %v9795_v33 = vld [vmem:[%s16305_s1 + $0x614] ss:$8 sps:$4 sm:$0xff]  }
  0xad   :  { %1887 = vmatprep.subr.bf16.mxu1 %v9729_v35  ;;  %v9798_v34 = vld [vmem:[%s16305_s1 + $0x6b4] ss:$8 sps:$4 sm:$0xff]   ;;  %v9793_v35 = vld [vmem:[%s16305_s1 + $0x610] ss:$8 sps:$4 sm:$0xff]  }
  0xaf   :  { %1554 = vmatpush1.bf16.msra.mxu0 %v9724_v36  ;;  %v9796_v36 = vld [vmem:[%s16305_s1 + $0x6b0] ss:$8 sps:$4 sm:$0xff]  }
  0xb0   :  { %1888 = vmatpush1.bf16.msra.mxu1 %v9727_v37  ;;  %1555 = vmatprep.subr.bf16.mxu0 %v9732_v38  ;;  %v9801_v37 = vld [vmem:[%s16305_s1 + $0x604] ss:$8 sps:$4 sm:$0xff]  }
  0xb1   :  { %1889 = vmatprep.subr.bf16.mxu1 %v9735_v40  ;;  %v9804_v38 = vld [vmem:[%s16305_s1 + $0x6a4] ss:$8 sps:$4 sm:$0xff]   ;;  %v10567_v40 = vld [vmem:[%s16306_s0 + $0x20] ss:$0 sps:$4 sm:$0xff]  }
  0xb3   :  { %1556 = vmatpush2.bf16.msra.mxu0 %v9730_v41  ;;  %v9799_v41 = vld [vmem:[%s16305_s1 + $0x600] ss:$8 sps:$4 sm:$0xff]  }
  0xb4   :  { %1890 = vmatpush1.bf16.msra.mxu1 %v9733_v42  ;;  %1557 = vmatprep.subr.bf16.mxu0 %v9738_v43  ;;  %v9802_v42 = vld [vmem:[%s16305_s1 + $0x6a0] ss:$8 sps:$4 sm:$0xff]   ;;  %v9807_v43 = vld [vmem:[%s16305_s1 + $0x5f4] ss:$8 sps:$4 sm:$0xff]  }
  0xb5   :  { %1891 = vmatprep.subr.bf16.mxu1 %v9741_v45  ;;  %v9810_v45 = vld [vmem:[%s16305_s1 + $0x854] ss:$8 sps:$4 sm:$0xff]  }
  0xb7   :  { %1558 = vmatpush2.bf16.msra.mxu0 %v9736_v47  ;;  %v9805_v47 = vld [vmem:[%s16305_s1 + $0x5f0] ss:$8 sps:$4 sm:$0xff]  }
  0xb8   :  { %1892 = vmatpush1.bf16.msra.mxu1 %v9739_v48  ;;  %1559 = vmatprep.subr.bf16.mxu0 %v9744_v49  ;;  %v9808_v48 = vld [vmem:[%s16305_s1 + $0x850] ss:$8 sps:$4 sm:$0xff]   ;;  %v9813_v49 = vld [vmem:[%s16305_s1 + $0x5e4] ss:$8 sps:$4 sm:$0xff]  }
  0xb9   :  { %1893 = vmatprep.subr.bf16.mxu1 %v9747_v50  ;;  %v10568_v50 = vld [vmem:[%s16306_s0 + $0x8] ss:$0 sps:$4 sm:$0xff]  }
  0xbb   :  { %1560 = vmatpush2.bf16.msra.mxu0 %v9742_v51  ;;  %v9811_v51 = vld [vmem:[%s16305_s1 + $0x5e0] ss:$8 sps:$4 sm:$0xff]  }
  0xbc   :  { %1894 = vmatpush2.bf16.msra.mxu1 %v9745_v53  ;;  %1561 = vmatprep.subr.bf16.mxu0 %v9750_v54  ;;  %v9814_v53 = vld [vmem:[%s16305_s1 + $0x840] ss:$8 sps:$4 sm:$0xff]   ;;  %v9819_v54 = vld [vmem:[%s16305_s1 + $0x5d4] ss:$8 sps:$4 sm:$0xff]  }
  0xbd   :  { %1895 = vmatprep.subr.bf16.mxu1 %v9753_v55  ;;  %v9822_v55 = vld [vmem:[%s16305_s1 + $0x834] ss:$8 sps:$4 sm:$0xff]  }
  0xbf   :  { %1562 = vmatpush2.bf16.msra.mxu0 %v9748_v56  ;;  %v9817_v56 = vld [vmem:[%s16305_s1 + $0x5d0] ss:$8 sps:$4 sm:$0xff]  }
  0xc0   :  { %1896 = vmatpush2.bf16.msra.mxu1 %v9751_v57  ;;  %1563 = vmatprep.subr.bf16.mxu0 %v9756_v58  ;;  %v9820_v57 = vld [vmem:[%s16305_s1 + $0x830] ss:$8 sps:$4 sm:$0xff]   ;;  %v9825_v58 = vld [vmem:[%s16305_s1 + $0x5c4] ss:$8 sps:$4 sm:$0xff]  }
  0xc1   :  { %1897 = vmatprep.subr.bf16.mxu1 %v9759_v10  ;;  %v9828_v10 = vld [vmem:[%s16305_s1 + $0x824] ss:$8 sps:$4 sm:$0xff]  }
  0xc3   :  { %1564 = vmatpush2.bf16.msra.mxu0 %v9754_v60  ;;  %v9823_v60 = vld [vmem:[%s16305_s1 + $0x5c0] ss:$8 sps:$4 sm:$0xff]  }
  0xc4   :  { %1898 = vmatpush2.bf16.msra.mxu1 %v9757_v61  ;;  %1565 = vmatprep.subr.bf16.mxu0 %v9762_v0  ;;  %v9826_v61 = vld [vmem:[%s16305_s1 + $0x820] ss:$8 sps:$4 sm:$0xff]   ;;  %v9831_v0 = vld [vmem:[%s16305_s1 + $0x5b4] ss:$8 sps:$4 sm:$0xff]  }
  0xc5   :  { %1899 = vmatprep.subr.bf16.mxu1 %v9765_v2  ;;  %v9834_v2 = vld [vmem:[%s16305_s1 + $0x814] ss:$8 sps:$4 sm:$0xff]  }
  0xc7   :  { %1566 = vmatpush2.bf16.msra.mxu0 %v9760_v3  ;;  %v9829_v3 = vld [vmem:[%s16305_s1 + $0x5b0] ss:$8 sps:$4 sm:$0xff]  }
  0xc8   :  { %1900 = vmatpush2.bf16.msra.mxu1 %v9763_v4  ;;  %1567 = vmatprep.subr.bf16.mxu0 %v9768_v5  ;;  %v9832_v4 = vld [vmem:[%s16305_s1 + $0x810] ss:$8 sps:$4 sm:$0xff]   ;;  %v9837_v5 = vld [vmem:[%s16305_s1 + $0x5a4] ss:$8 sps:$4 sm:$0xff]  }
  0xc9   :  { %1901 = vmatprep.subr.bf16.mxu1 %v9771_v7  ;;  %v9840_v7 = vld [vmem:[%s16305_s1 + $0x804] ss:$8 sps:$4 sm:$0xff]  }
  0xcb   :  { %v12012_v16 = vpop.f32.mrf.mxu1  ;;  %1568 = vmatpush2.bf16.msra.mxu0 %v9766_v8  ;;  %v9835_v8 = vld [vmem:[%s16305_s1 + $0x5a0] ss:$8 sps:$4 sm:$0xff]  }
  0xcc   :  { %1902 = vmatpush2.bf16.msra.mxu1 %v9769_v11  ;;  %1569 = vmatprep.subr.bf16.mxu0 %v9774_v12  ;;  %v9838_v11 = vld [vmem:[%s16305_s1 + $0x800] ss:$8 sps:$4 sm:$0xff]   ;;  %v9843_v12 = vld [vmem:[%s16305_s1 + $0x694] ss:$8 sps:$4 sm:$0xff]  }
  0xcd   :  { %v12020_v19 = vpop.f32.mrf.mxu1  ;;  %1903 = vmatprep.subr.bf16.mxu1 %v9777_v13  ;;  %v9846_v13 = vld [vmem:[%s16305_s1 + $0x7f4] ss:$8 sps:$4 sm:$0xff]  }
  0xcf   :  { %v367_v22 = vpop.f32.mrf.mxu1  ;;  %1570 = vmatpush2.bf16.msra.mxu0 %v9772_v15  ;;  %v9841_v15 = vld [vmem:[%s16305_s1 + $0x690] ss:$8 sps:$4 sm:$0xff]  }
  0xd0   :  { %1904 = vmatpush2.bf16.msra.mxu1 %v9775_v18  ;;  %1930 = vmatprep.subr.bf16.mxu0 %v9786_v21  ;;  %v9849_v18 = vld [vmem:[%s16305_s1 + $0x684] ss:$8 sps:$4 sm:$0xff]   ;;  %v9847_v21 = vld [vmem:[%s16305_s1 + $0x680] ss:$8 sps:$4 sm:$0xff]  }
  0xd1   :  { %v368_v27 = vpop.f32.mrf.mxu1  ;;  %1905 = vmatprep.subr.bf16.mxu1 %v9783_v20  ;;  %v9852_v20 = vld [vmem:[%s16305_s1 + $0x7e4] ss:$8 sps:$4 sm:$0xff]   ;;  %v9850_v22 = vld [vmem:[%s16305_s1 + $0x7e0] ss:$8 sps:$4 sm:$0xff]  }
  0xd2   :  { %1572 = vmatmul.mubr.bf16.vlgmr.msra.gmra.mxu0 %v12028_v24  ;;  %v9853_v27 = vld [vmem:[%s16305_s1 + $0x670] ss:$8 sps:$4 sm:$0xff]  }
  0xd3   :  { %1931 = vmatpush1.bf16.msra.mxu0 %v9784_v26  ;;  %1950 = vmatprep.mubr.bf16.mxu0 %v11292_v1  ;;  %v9858_v26 = vld [vmem:[%s16305_s1 + $0x8d4] ss:$8 sps:$4 sm:$0xff]  }
  0xd4   :  { %1906 = vmatpush2.bf16.msra.mxu1 %v9781_v25  ;;  %1932 = vmatprep.subr.bf16.mxu0 %v9792_v30  ;;  %v9855_v25 = vld [vmem:[%s16305_s1 + $0x674] ss:$8 sps:$4 sm:$0xff]   ;;  %v9861_v30 = vld [vmem:[%s16305_s1 + $0x664] ss:$8 sps:$4 sm:$0xff]  }
  0xd5   :  { %1907 = vmatprep.subr.bf16.mxu1 %v9789_v28  ;;  %v9856_v28 = vld [vmem:[%s16305_s1 + $0x8d0] ss:$8 sps:$4 sm:$0xff]  }
  0xd7   :  { %1933 = vmatpush1.bf16.msra.mxu0 %v9790_v32  ;;  %v9859_v32 = vld [vmem:[%s16305_s1 + $0x660] ss:$8 sps:$4 sm:$0xff]  }
  0xd8   :  { %1908 = vmatpush2.bf16.msra.mxu1 %v9787_v31  ;;  %2139 = vmatprep.subr.bf16.mxu0 %v9795_v33  ;;  %v9864_v31 = vld [vmem:[%s16305_s1 + $0x8c4] ss:$8 sps:$4 sm:$0xff]   ;;  %v9862_v33 = vld [vmem:[%s16305_s1 + $0x8c0] ss:$8 sps:$4 sm:$0xff]  }
  0xd9   :  { %2192 = vmatprep.subr.bf16.mxu1 %v9798_v34 }
  0xda   :  { %8450 = vmatmul.mubr.msk.bf16.vlgmr.msra.gmra.mxu0 %vm284_vm0, %v10567_v40 }
  0xdb   :  { %1910 = vmatmul.mubr.bf16.vlgmr.msra.gmra.mxu1 %v11531_v9  ;;  %2140 = vmatpush1.bf16.msra.mxu0 %v9793_v35  ;;  %v9867_v35 = vld [vmem:[%s16305_s1 + $0x654] ss:$8 sps:$4 sm:$0xff]  }
  0xdc   :  { %2193 = vmatpush1.bf16.msra.mxu1 %v9796_v36  ;;  %2141 = vmatprep.subr.bf16.mxu0 %v9801_v37  ;;  %v9870_v36 = vld [vmem:[%s16305_s1 + $0x8b4] ss:$8 sps:$4 sm:$0xff]  }
  0xdd   :  { %2194 = vmatprep.subr.bf16.mxu1 %v9804_v38  ;;  %2212 = vmatprep.mubr.bf16.mxu1 %v11292_v1 }
  0xde   :  { %2171 = vmatprep.mubr.bf16.mxu0 %v11492_v59  ;;  %v9816_v59 = vld [vmem:[%s16305_s1 + $0x844] ss:$8 sps:$4 sm:$0xff]  }
  0xdf   :  { %2142 = vmatpush1.bf16.msra.mxu0 %v9799_v41  ;;  %v9865_v41 = vld [vmem:[%s16305_s1 + $0x650] ss:$8 sps:$4 sm:$0xff]  }
  0xe0   :  { %2195 = vmatpush1.bf16.msra.mxu1 %v9802_v42  ;;  %2143 = vmatprep.subr.bf16.mxu0 %v9807_v43  ;;  %v9868_v42 = vld [vmem:[%s16305_s1 + $0x8b0] ss:$8 sps:$4 sm:$0xff]  }
  0xe1   :  { %2438 = vmatprep.subr.bf16.mxu1 %v9810_v45  ;;  %v9876_v45 = vld [vmem:[%s16305_s1 + $0x8a4] ss:$8 sps:$4 sm:$0xff]  }
  0xe3   :  { %8487 = vmatmul.mubr.msk.bf16.vlgmr.msra.gmra.mxu1 %vm284_vm0, %v10568_v50  ;;  %2144 = vmatpush1.bf16.msra.mxu0 %v9805_v47  ;;  %v9871_v47 = vld [vmem:[%s16305_s1 + $0x640] ss:$8 sps:$4 sm:$0xff]   ;;  %v9879_v50 = vld [vmem:[%s16305_s1 + $0x634] ss:$8 sps:$4 sm:$0xff]  }
  0xe4   :  { %2439 = vmatpush1.bf16.msra.mxu1 %v9808_v48  ;;  %2145 = vmatprep.subr.bf16.mxu0 %v9813_v49  ;;  %v9874_v48 = vld [vmem:[%s16305_s1 + $0x8a0] ss:$8 sps:$4 sm:$0xff]  }
  0xe5   :  { %2440 = vmatprep.subr.bf16.mxu1 %v9816_v59  ;;  %2470 = vmatprep.mubr.bf16.mxu1 %v11578_v29 }
  0xe7   :  { %2146 = vmatpush1.bf16.msra.mxu0 %v9811_v51  ;;  %v9882_v51 = vld [vmem:[%s16305_s1 + $0x894] ss:$8 sps:$4 sm:$0xff]  }
  0xe8   :  { %2441 = vmatpush1.bf16.msra.mxu1 %v9814_v53  ;;  %2147 = vmatprep.subr.bf16.mxu0 %v9819_v54 }
  0xe9   :  { %2442 = vmatprep.subr.bf16.mxu1 %v9822_v55 }
  0xeb   :  { %2148 = vmatpush1.bf16.msra.mxu0 %v9817_v56 }
  0xec   :  { %2443 = vmatpush1.bf16.msra.mxu1 %v9820_v57  ;;  %2149 = vmatprep.subr.bf16.mxu0 %v9825_v58  ;;  %v9877_v58 = vld [vmem:[%s16305_s1 + $0x630] ss:$8 sps:$4 sm:$0xff]  }
  0xed   :  { %2444 = vmatprep.subr.bf16.mxu1 %v9828_v10  ;;  %v9880_v10 = vld [vmem:[%s16305_s1 + $0x890] ss:$8 sps:$4 sm:$0xff]  }
  0xef   :  { %2150 = vmatpush1.bf16.msra.mxu0 %v9823_v60 }
  0xf0   :  { %2445 = vmatpush1.bf16.msra.mxu1 %v9826_v61  ;;  %2151 = vmatprep.subr.bf16.mxu0 %v9831_v0  ;;  %v9885_v0 = vld [vmem:[%s16305_s1 + $0x624] ss:$8 sps:$4 sm:$0xff]  }
  0xf1   :  { %2446 = vmatprep.subr.bf16.mxu1 %v9834_v2  ;;  %v9888_v2 = vld [vmem:[%s16305_s1 + $0x884] ss:$8 sps:$4 sm:$0xff]  }
  0xf3   :  { %2152 = vmatpush1.bf16.msra.mxu0 %v9829_v3 }
  0xf4   :  { %2447 = vmatpush1.bf16.msra.mxu1 %v9832_v4  ;;  %2153 = vmatprep.subr.bf16.mxu0 %v9837_v5 }
  0xf5   :  { %2448 = vmatprep.subr.bf16.mxu1 %v9840_v7  ;;  %v9883_v7 = vld [vmem:[%s16305_s1 + $0x620] ss:$8 sps:$4 sm:$0xff]  }
  0xf7   :  { %2154 = vmatpush1.bf16.msra.mxu0 %v9835_v8  ;;  %v9886_v8 = vld [vmem:[%s16305_s1 + $0x880] ss:$8 sps:$4 sm:$0xff]  }
  0xf8   :  { %2449 = vmatpush1.bf16.msra.mxu1 %v9838_v11  ;;  %2155 = vmatprep.subr.bf16.mxu0 %v9843_v12  ;;  %v9891_v12 = vld [vmem:[%s16305_s1 + $0x874] ss:$8 sps:$4 sm:$0xff]  }
  0xf9   :  { %2450 = vmatprep.subr.bf16.mxu1 %v9846_v13  ;;  %v9894_v13 = vld [vmem:[%s16305_s1 + $0x8f4] ss:$8 sps:$4 sm:$0xff]  }
  0xfb   :  { %2156 = vmatpush2.bf16.msra.mxu0 %v9841_v15 }
  0xfc   :  { %2451 = vmatpush1.bf16.msra.mxu1 %v9844_v17  ;;  %2157 = vmatprep.subr.bf16.mxu0 %v9849_v18  ;;  %v9889_v17 = vld [vmem:[%s16305_s1 + $0x870] ss:$8 sps:$4 sm:$0xff]  }
  0xfd   :  { %2452 = vmatprep.subr.bf16.mxu1 %v9852_v20  ;;  %v9892_v18 = vld [vmem:[%s16305_s1 + $0x8f0] ss:$8 sps:$4 sm:$0xff]  }
  0xff   :  { %2158 = vmatpush2.bf16.msra.mxu0 %v9847_v21  ;;  %v9897_v21 = vld [vmem:[%s16305_s1 + $0x864] ss:$8 sps:$4 sm:$0xff]  }
 0x100   :  { %2453 = vmatpush1.bf16.msra.mxu1 %v9850_v22  ;;  %2159 = vmatprep.subr.bf16.mxu0 %v9855_v25  ;;  %v9900_v22 = vld [vmem:[%s16305_s1 + $0x8e4] ss:$8 sps:$4 sm:$0xff]  }
 0x101   :  { %2454 = vmatprep.subr.bf16.mxu1 %v9858_v26  ;;  %v9895_v26 = vld [vmem:[%s16305_s1 + $0x860] ss:$8 sps:$4 sm:$0xff]  }
 0x102   :  { %v322_v34 = vpop.f32.mrf.mxu0 }
 0x103   :  { %v364_v37 = vadd.f32 %v12012_v16, %v322_v34  ;;  %2160 = vmatpush2.bf16.msra.mxu0 %v9853_v27  ;;  %v9873_v16 = vld [vmem:[%s16305_s1 + $0x644] ss:$8 sps:$4 sm:$0xff]   ;;  %v9898_v27 = vld [vmem:[%s16305_s1 + $0x8e0] ss:$8 sps:$4 sm:$0xff]  }
 0x104   :  { %2455 = vmatpush2.bf16.msra.mxu1 %v9856_v28  ;;  %v324_v38 = vpop.f32.mrf.mxu0  ;;  %2161 = vmatprep.subr.bf16.mxu0 %v9861_v30  ;;  %v9903_v28 = vld [vmem:[%s16305_s1 + $0x974] ss:$8 sps:$4 sm:$0xff]   ;;  %v9907_v34 = vld [vmem:[%s16305_s1 + $0x960] ss:$8 sps:$4 sm:$0xff]  }
 0x105   :  { %2456 = vmatprep.subr.bf16.mxu1 %v9864_v31  ;;  %v366_v40 = vadd.f32 %v12020_v19, %v324_v38  ;;  %v9906_v30 = vld [vmem:[%s16305_s1 + $0xa14] ss:$8 sps:$4 sm:$0xff]   ;;  %v9901_v31 = vld [vmem:[%s16305_s1 + $0x970] ss:$8 sps:$4 sm:$0xff]  }
 0x106   :  { %v326_v43 = vpop.f32.mrf.mxu0  ;;  %v9913_v38 = vld [vmem:[%s16305_s1 + $0x950] ss:$8 sps:$4 sm:$0xff]  }
 0x107   :  { %2162 = vmatpush2.bf16.msra.mxu0 %v9859_v32  ;;  %v9909_v32 = vld [vmem:[%s16305_s1 + $0x964] ss:$8 sps:$4 sm:$0xff]   ;;  %v9919_v43 = vld [vmem:[%s16305_s1 + $0x940] ss:$8 sps:$4 sm:$0xff]  }
 0x108   :  { %2457 = vmatpush2.bf16.msra.mxu1 %v9862_v33  ;;  %v327_v19 = vpop.f32.mrf.mxu0  ;;  %2163 = vmatprep.subr.bf16.mxu0 %v9867_v35  ;;  %v9912_v33 = vld [vmem:[%s16305_s1 + $0xa04] ss:$8 sps:$4 sm:$0xff]   ;;  %v9910_v35 = vld [vmem:[%s16305_s1 + $0xa00] ss:$8 sps:$4 sm:$0xff]  }
 0x109   :  { %2458 = vmatprep.subr.bf16.mxu1 %v9870_v36  ;;  %v9915_v36 = vld [vmem:[%s16305_s1 + $0x954] ss:$8 sps:$4 sm:$0xff]  }
 0x10a   :  { %v638_v59 = vpop.f32.mrf.mxu0  ;;  %v9930_v19 = vld [vmem:[%s16305_s1 + $0xa74] ss:$8 sps:$4 sm:$0xff]  }
 0x10b   :  { %v597_v49 = vpop.f32.mrf.mxu1  ;;  %2164 = vmatpush2.bf16.msra.mxu0 %v9865_v41  ;;  %v9921_v41 = vld [vmem:[%s16305_s1 + $0x944] ss:$8 sps:$4 sm:$0xff]  }
 0x10c   :  { %v598_v53 = vadd.f32 %v597_v49, %v364_v37  ;;  %2459 = vmatpush2.bf16.msra.mxu1 %v9868_v42  ;;  %v640_v55 = vpop.f32.mrf.mxu0  ;;  %2165 = vmatprep.subr.bf16.mxu0 %v9873_v16  ;;  %v9918_v37 = vld [vmem:[%s16305_s1 + $0xa94] ss:$8 sps:$4 sm:$0xff]   ;;  %v9924_v42 = vld [vmem:[%s16305_s1 + $0xa84] ss:$8 sps:$4 sm:$0xff]   ;;  %v9922_v16 = vld [vmem:[%s16305_s1 + $0xa80] ss:$8 sps:$4 sm:$0xff]  }
 0x10d   :  { %v599_v54 = vpop.f32.mrf.mxu1  ;;  %2460 = vmatprep.subr.bf16.mxu1 %v9876_v45  ;;  %v9927_v45 = vld [vmem:[%s16305_s1 + $0x934] ss:$8 sps:$4 sm:$0xff]   ;;  %v9933_v49 = vld [vmem:[%s16305_s1 + $0x924] ss:$8 sps:$4 sm:$0xff]  }
 0x10e   :  { %v12238_v56 = vadd.f32 %v638_v59, %v598_v53  ;;  %v600_v57 = vadd.f32 %v599_v54, %v366_v40  ;;  %v642_v61 = vpop.f32.mrf.mxu0  ;;  %v9916_v40 = vld [vmem:[%s16305_s1 + $0xa90] ss:$8 sps:$4 sm:$0xff]   ;;  %v9936_v59 = vld [vmem:[%s16305_s1 + $0xa64] ss:$8 sps:$4 sm:$0xff]   ;;  %v9939_v53 = vld [vmem:[%s16305_s1 + $0x914] ss:$8 sps:$4 sm:$0xff]  }
 0x10f   :  { %v601_v60 = vpop.f32.mrf.mxu1  ;;  %2166 = vmatpush2.bf16.msra.mxu0 %v9871_v47  ;;  %v9925_v47 = vld [vmem:[%s16305_s1 + $0x930] ss:$8 sps:$4 sm:$0xff]   ;;  %v9942_v54 = vld [vmem:[%s16305_s1 + $0xa54] ss:$8 sps:$4 sm:$0xff]   ;;  %v9946_v61 = vld [vmem:[%s16305_s1 + $0xa40] ss:$8 sps:$4 sm:$0xff]  }
 0x110   :  { %v12252_v3 = vadd.f32 %v640_v55, %v600_v57  ;;  %2461 = vmatpush2.bf16.msra.mxu1 %v9874_v48  ;;  %v643_v5 = vpop.f32.mrf.mxu0  ;;  %2167 = vmatprep.subr.bf16.mxu0 %v9879_v50  ;;  %v9928_v48 = vld [vmem:[%s16305_s1 + $0xa70] ss:$8 sps:$4 sm:$0xff]   ;;  %v9931_v50 = vld [vmem:[%s16305_s1 + $0x920] ss:$8 sps:$4 sm:$0xff]  }
 0x111   :  { %v602_v4 = vpop.f32.mrf.mxu1  ;;  %2462 = vmatprep.subr.bf16.mxu1 %v9882_v51  ;;  %v9934_v51 = vld [vmem:[%s16305_s1 + $0xa60] ss:$8 sps:$4 sm:$0xff]   ;;  %v9937_v55 = vld [vmem:[%s16305_s1 + $0x910] ss:$8 sps:$4 sm:$0xff]  }
 0x112   :  { %v9940_v57 = vld [vmem:[%s16305_s1 + $0xa50] ss:$8 sps:$4 sm:$0xff]   ;;  %v9943_v60 = vld [vmem:[%s16305_s1 + $0x900] ss:$8 sps:$4 sm:$0xff]  }
 0x113   :  { %v12260_v11 = vpop.f32.mrf.mxu1  ;;  %2168 = vmatpush2.bf16.msra.mxu0 %v9877_v58  ;;  %v9945_v58 = vld [vmem:[%s16305_s1 + $0x904] ss:$8 sps:$4 sm:$0xff]   ;;  %v9949_v4 = vld [vmem:[%s16305_s1 + $0x9f0] ss:$8 sps:$4 sm:$0xff]  }
 0x114   :  { %2463 = vmatpush2.bf16.msra.mxu1 %v9880_v10  ;;  %2169 = vmatprep.subr.bf16.mxu0 %v9885_v0  ;;  %v9948_v10 = vld [vmem:[%s16305_s1 + $0xa44] ss:$8 sps:$4 sm:$0xff]   ;;  %v9951_v0 = vld [vmem:[%s16305_s1 + $0x9f4] ss:$8 sps:$4 sm:$0xff]   ;;  %v9952_v5 = vld [vmem:[%s16305_s1 + $0xa30] ss:$8 sps:$4 sm:$0xff]  }
 0x115   :  { %v12268_v15 = vpop.f32.mrf.mxu1  ;;  %2464 = vmatprep.subr.bf16.mxu1 %v9888_v2  ;;  %v9954_v2 = vld [vmem:[%s16305_s1 + $0xa34] ss:$8 sps:$4 sm:$0xff]  }
 0x117   :  { %v966_v20 = vpop.f32.mrf.mxu1  ;;  %2170 = vmatpush2.bf16.msra.mxu0 %v9883_v7  ;;  %v9957_v7 = vld [vmem:[%s16305_s1 + $0x9e4] ss:$8 sps:$4 sm:$0xff]  }
 0x118   :  { %2465 = vmatpush2.bf16.msra.mxu1 %v9886_v8  ;;  %2491 = vmatprep.subr.bf16.mxu0 %v9894_v13  ;;  %v9960_v8 = vld [vmem:[%s16305_s1 + $0xa24] ss:$8 sps:$4 sm:$0xff]   ;;  %v9958_v13 = vld [vmem:[%s16305_s1 + $0xa20] ss:$8 sps:$4 sm:$0xff]   ;;  %v9961_v20 = vld [vmem:[%s16305_s1 + $0x9d0] ss:$8 sps:$4 sm:$0xff]  }
 0x119   :  { %v967_v25 = vpop.f32.mrf.mxu1  ;;  %2466 = vmatprep.subr.bf16.mxu1 %v9891_v12  ;;  %v9955_v12 = vld [vmem:[%s16305_s1 + $0x9e0] ss:$8 sps:$4 sm:$0xff]  }
 0x11a   :  { %2172 = vmatmul.mubr.bf16.vlgmr.msra.gmra.mxu0 %v11564_v23  ;;  %v9904_v23 = vld [vmem:[%s16305_s1 + $0xa10] ss:$8 sps:$4 sm:$0xff]   ;;  %v9972_v25 = vld [vmem:[%s16305_s1 + $0xb04] ss:$8 sps:$4 sm:$0xff]  }
 0x11b   :  { %2492 = vmatpush1.bf16.msra.mxu0 %v9892_v18  ;;  %2511 = vmatprep.mubr.bf16.mxu0 %v11292_v1  ;;  %v9966_v18 = vld [vmem:[%s16305_s1 + $0xb14] ss:$8 sps:$4 sm:$0xff]  }
 0x11c   :  { %2467 = vmatpush2.bf16.msra.mxu1 %v9889_v17  ;;  %2493 = vmatprep.subr.bf16.mxu0 %v9900_v22  ;;  %v9963_v17 = vld [vmem:[%s16305_s1 + $0x9d4] ss:$8 sps:$4 sm:$0xff]   ;;  %v9969_v22 = vld [vmem:[%s16305_s1 + $0x9c4] ss:$8 sps:$4 sm:$0xff]  }
 0x11d   :  { %2468 = vmatprep.subr.bf16.mxu1 %v9897_v21  ;;  %v9964_v21 = vld [vmem:[%s16305_s1 + $0xb10] ss:$8 sps:$4 sm:$0xff]  }
 0x11f   :  { %2494 = vmatpush1.bf16.msra.mxu0 %v9898_v27  ;;  %v9970_v27 = vld [vmem:[%s16305_s1 + $0xb00] ss:$8 sps:$4 sm:$0xff]  }
 0x120   :  { %2469 = vmatpush2.bf16.msra.mxu1 %v9895_v26  ;;  %2739 = vmatprep.subr.bf16.mxu0 %v9903_v28  ;;  %v9967_v26 = vld [vmem:[%s16305_s1 + $0x9c0] ss:$8 sps:$4 sm:$0xff]  }
 0x121   :  { %2792 = vmatprep.subr.bf16.mxu1 %v9906_v30  ;;  %v9975_v30 = vld [vmem:[%s16305_s1 + $0x9b4] ss:$8 sps:$4 sm:$0xff]  }
 0x122   :  { %8560 = vmatmul.mubr.msk.bf16.vlgmr.msra.gmra.mxu0 %vm284_vm0, %v11598_v39 }
 0x123   :  { %2471 = vmatmul.mubr.bf16.vlgmr.msra.gmra.mxu1 %v11776_v46  ;;  %2740 = vmatpush1.bf16.msra.mxu0 %v9901_v31  ;;  %v9978_v31 = vld [vmem:[%s16305_s1 + $0xaf4] ss:$8 sps:$4 sm:$0xff]  }
 0x124   :  { %2793 = vmatpush1.bf16.msra.mxu1 %v9904_v23  ;;  %2741 = vmatprep.subr.bf16.mxu0 %v9909_v32 }
 0x125   :  { %2794 = vmatprep.subr.bf16.mxu1 %v9912_v33  ;;  %2812 = vmatprep.mubr.bf16.mxu1 %v11292_v1 }
 0x126   :  { %2771 = vmatprep.mubr.bf16.mxu0 %v11612_v44 }
 0x127   :  { %2742 = vmatpush1.bf16.msra.mxu0 %v9907_v34 }
 0x128   :  { %2795 = vmatpush1.bf16.msra.mxu1 %v9910_v35  ;;  %2743 = vmatprep.subr.bf16.mxu0 %v9915_v36  ;;  %v9973_v35 = vld [vmem:[%s16305_s1 + $0x9b0] ss:$8 sps:$4 sm:$0xff]  }
 0x129   :  { %3040 = vmatprep.subr.bf16.mxu1 %v9918_v37  ;;  %v9976_v36 = vld [vmem:[%s16305_s1 + $0xaf0] ss:$8 sps:$4 sm:$0xff]  }
 0x12b   :  { %8633 = vmatmul.mubr.msk.bf16.vlgmr.msra.gmra.mxu1 %vm284_vm0, %v11812_v63  ;;  %2744 = vmatpush1.bf16.msra.mxu0 %v9913_v38  ;;  %v9984_v38 = vld [vmem:[%s16305_s1 + $0xae4] ss:$8 sps:$4 sm:$0xff]  }
 0x12c   :  { %3041 = vmatpush1.bf16.msra.mxu1 %v9916_v40  ;;  %2745 = vmatprep.subr.bf16.mxu0 %v9921_v41  ;;  %v9979_v40 = vld [vmem:[%s16305_s1 + $0x9a0] ss:$8 sps:$4 sm:$0xff]  }
 0x12d   :  { %3042 = vmatprep.subr.bf16.mxu1 %v9924_v42  ;;  %3072 = vmatprep.mubr.bf16.mxu1 %v11829_v6  ;;  %v9982_v41 = vld [vmem:[%s16305_s1 + $0xae0] ss:$8 sps:$4 sm:$0xff]  }
 0x12f   :  { %2746 = vmatpush1.bf16.msra.mxu0 %v9919_v43 }
 0x130   :  { %3043 = vmatpush1.bf16.msra.mxu1 %v9922_v16  ;;  %2747 = vmatprep.subr.bf16.mxu0 %v9927_v45  ;;  %v9987_v16 = vld [vmem:[%s16305_s1 + $0x994] ss:$8 sps:$4 sm:$0xff]  }
 0x131   :  { %3044 = vmatprep.subr.bf16.mxu1 %v9930_v19 }
 0x133   :  { %2748 = vmatpush1.bf16.msra.mxu0 %v9925_v47 }
 0x134   :  { %3045 = vmatpush1.bf16.msra.mxu1 %v9928_v48  ;;  %2749 = vmatprep.subr.bf16.mxu0 %v9933_v49 }
 0x135   :  { %3046 = vmatprep.subr.bf16.mxu1 %v9936_v59  ;;  %v9985_v59 = vld [vmem:[%s16305_s1 + $0x990] ss:$8 sps:$4 sm:$0xff]  }
 0x137   :  { %2750 = vmatpush1.bf16.msra.mxu0 %v9931_v50  ;;  %v9988_v50 = vld [vmem:[%s16305_s1 + $0xad0] ss:$8 sps:$4 sm:$0xff]  }
 0x138   :  { %3047 = vmatpush1.bf16.msra.mxu1 %v9934_v51  ;;  %2751 = vmatprep.subr.bf16.mxu0 %v9939_v53 }
 0x139   :  { %3048 = vmatprep.subr.bf16.mxu1 %v9942_v54  ;;  %v9993_v54 = vld [vmem:[%s16305_s1 + $0x984] ss:$8 sps:$4 sm:$0xff]  }
 0x13b   :  { %2752 = vmatpush1.bf16.msra.mxu0 %v9937_v55  ;;  %v9996_v55 = vld [vmem:[%s16305_s1 + $0xac4] ss:$8 sps:$4 sm:$0xff]  }
 0x13c   :  { %3049 = vmatpush1.bf16.msra.mxu1 %v9940_v57  ;;  %2753 = vmatprep.subr.bf16.mxu0 %v9945_v58 }
 0x13d   :  { %3050 = vmatprep.subr.bf16.mxu1 %v9948_v10 }
 0x13f   :  { %2754 = vmatpush1.bf16.msra.mxu0 %v9943_v60  ;;  %v9991_v60 = vld [vmem:[%s16305_s1 + $0x980] ss:$8 sps:$4 sm:$0xff]  }
 0x140   :  { %3051 = vmatpush1.bf16.msra.mxu1 %v9946_v61  ;;  %2755 = vmatprep.subr.bf16.mxu0 %v9951_v0  ;;  %v9994_v61 = vld [vmem:[%s16305_s1 + $0xac0] ss:$8 sps:$4 sm:$0xff]  }
 0x141   :  { %3052 = vmatprep.subr.bf16.mxu1 %v9954_v2  ;;  %v9999_v2 = vld [vmem:[%s16305_s1 + $0xab4] ss:$8 sps:$4 sm:$0xff]  }
 0x143   :  { %2756 = vmatpush2.bf16.msra.mxu0 %v9949_v4  ;;  %v10002_v4 = vld [vmem:[%s16305_s1 + $0xb34] ss:$8 sps:$4 sm:$0xff]  }
 0x144   :  { %3053 = vmatpush1.bf16.msra.mxu1 %v9952_v5  ;;  %2757 = vmatprep.subr.bf16.mxu0 %v9957_v7  ;;  %v9997_v7 = vld [vmem:[%s16305_s1 + $0xab0] ss:$8 sps:$4 sm:$0xff]  }
 0x145   :  { %3054 = vmatprep.subr.bf16.mxu1 %v9960_v8  ;;  %v10000_v8 = vld [vmem:[%s16305_s1 + $0xb30] ss:$8 sps:$4 sm:$0xff]  }
 0x147   :  { %2758 = vmatpush2.bf16.msra.mxu0 %v9955_v12 }
 0x148   :  { %3055 = vmatpush1.bf16.msra.mxu1 %v9958_v13  ;;  %2759 = vmatprep.subr.bf16.mxu0 %v9963_v17  ;;  %v10005_v13 = vld [vmem:[%s16305_s1 + $0xaa4] ss:$8 sps:$4 sm:$0xff]  }
 0x149   :  { %3056 = vmatprep.subr.bf16.mxu1 %v9966_v18  ;;  %v10008_v17 = vld [vmem:[%s16305_s1 + $0xb24] ss:$8 sps:$4 sm:$0xff]  }
 0x14a   :  { %v921_v28 = vpop.f32.mrf.mxu0 }
 0x14b   :  { %v963_v23 = vadd.f32 %v12260_v11, %v921_v28  ;;  %2760 = vmatpush2.bf16.msra.mxu0 %v9961_v20  ;;  %v9981_v11 = vld [vmem:[%s16305_s1 + $0x9a4] ss:$8 sps:$4 sm:$0xff]   ;;  %v10003_v20 = vld [vmem:[%s16305_s1 + $0xaa0] ss:$8 sps:$4 sm:$0xff]  }
 0x14c   :  { %3057 = vmatpush2.bf16.msra.mxu1 %v9964_v21  ;;  %v923_v32 = vpop.f32.mrf.mxu0  ;;  %2761 = vmatprep.subr.bf16.mxu0 %v9969_v22  ;;  %v10006_v21 = vld [vmem:[%s16305_s1 + $0xb20] ss:$8 sps:$4 sm:$0xff]   ;;  %v10569_v22 = vld [vmem:[%s16305_s1 + $0x194] ss:$8 sps:$4 sm:$0xff]   ;;  %v10573_v28 = vld [vmem:[%s16305_s1 + $0x184] ss:$8 sps:$4 sm:$0xff]  }
 0x14d   :  { %3058 = vmatprep.subr.bf16.mxu1 %v9972_v25  ;;  %v969_v33 = vadd.f32 %v963_v23, %v12238_v56  ;;  %v965_v34 = vadd.f32 %v12268_v15, %v923_v32  ;;  %v10570_v25 = vld [vmem:[%s16305_s1 + $0x234] ss:$8 sps:$4 sm:$0xff]   ;;  %v10576_v23 = vld [vmem:[%s16305_s1 + $0x220] ss:$8 sps:$4 sm:$0xff]  }
 0x14e   :  { %v925_v37 = vpop.f32.mrf.mxu0  ;;  %v10577_v32 = vld [vmem:[%s16305_s1 + $0x174] ss:$8 sps:$4 sm:$0xff]  }
 0x14f   :  { %v970_v56 = vadd.f32 %v965_v34, %v12252_v3  ;;  %2762 = vmatpush2.bf16.msra.mxu0 %v9967_v26  ;;  %v9990_v3 = vld [vmem:[%s16305_s1 + $0xad4] ss:$8 sps:$4 sm:$0xff]   ;;  %v10571_v26 = vld [vmem:[%s16305_s1 + $0x190] ss:$8 sps:$4 sm:$0xff]   ;;  %v10582_v37 = vld [vmem:[%s16305_s1 + $0x64] ss:$8 sps:$4 sm:$0xff]  }
 0x150   :  { %3059 = vmatpush2.bf16.msra.mxu1 %v9970_v27  ;;  %v926_v15 = vpop.f32.mrf.mxu0  ;;  %2763 = vmatprep.subr.bf16.mxu0 %v9975_v30  ;;  %v10572_v27 = vld [vmem:[%s16305_s1 + $0x230] ss:$8 sps:$4 sm:$0xff]   ;;  %v10574_v30 = vld [vmem:[%s16305_s1 + $0x224] ss:$8 sps:$4 sm:$0xff]  }
 0x151   :  { %3060 = vmatprep.subr.bf16.mxu1 %v9978_v31  ;;  %v10575_v31 = vld [vmem:[%s16305_s1 + $0x180] ss:$8 sps:$4 sm:$0xff]   ;;  %v10579_v34 = vld [vmem:[%s16305_s1 + $0x170] ss:$8 sps:$4 sm:$0xff]   ;;  %v10586_v15 = vld [vmem:[%s16305_s1 + $0x54] ss:$8 sps:$4 sm:$0xff]  }
 0x152   :  { %v1288_v43 = vpop.f32.mrf.mxu0 }
 0x153   :  { %v1247_v42 = vpop.f32.mrf.mxu1  ;;  %2764 = vmatpush2.bf16.msra.mxu0 %v9973_v35  ;;  %v10580_v35 = vld [vmem:[%s16305_s1 + $0x70] ss:$8 sps:$4 sm:$0xff]  }
 0x154   :  { %v1289_v45 = vadd.f32 %v1288_v43, %v1247_v42  ;;  %3061 = vmatpush2.bf16.msra.mxu1 %v9976_v36  ;;  %v1290_v47 = vpop.f32.mrf.mxu0  ;;  %2765 = vmatprep.subr.bf16.mxu0 %v9981_v11  ;;  %v10581_v36 = vld [vmem:[%s16305_s1 + $0x164] ss:$8 sps:$4 sm:$0xff]   ;;  %v10583_v11 = vld [vmem:[%s16305_s1 + $0x160] ss:$8 sps:$4 sm:$0xff]  }
 0x155   :  { %v1249_v19 = vpop.f32.mrf.mxu1  ;;  %3062 = vmatprep.subr.bf16.mxu1 %v9984_v38  ;;  %v10584_v38 = vld [vmem:[%s16305_s1 + $0x60] ss:$8 sps:$4 sm:$0xff]   ;;  %v10589_v42 = vld [vmem:[%s16305_s1 + $0x144] ss:$8 sps:$4 sm:$0xff]  }
 0x156   :  { %v12476_v48 = vadd.f32 %v1289_v45, %v969_v33  ;;  %v1291_v49 = vadd.f32 %v1290_v47, %v1249_v19  ;;  %v1292_v53 = vpop.f32.mrf.mxu0  ;;  %v10578_v33 = vld [vmem:[%s16305_s1 + $0x74] ss:$8 sps:$4 sm:$0xff]   ;;  %v10590_v43 = vld [vmem:[%s16305_s1 + $0x44] ss:$8 sps:$4 sm:$0xff]   ;;  %v10595_v47 = vld [vmem:[%s16305_s1 + $0x130] ss:$8 sps:$4 sm:$0xff]  }
 0x157   :  { %v1251_v51 = vpop.f32.mrf.mxu1  ;;  %2766 = vmatpush2.bf16.msra.mxu0 %v9979_v40  ;;  %v10587_v40 = vld [vmem:[%s16305_s1 + $0x150] ss:$8 sps:$4 sm:$0xff]   ;;  %v10593_v45 = vld [vmem:[%s16305_s1 + $0x134] ss:$8 sps:$4 sm:$0xff]   ;;  %v10600_v53 = vld [vmem:[%s16305_s1 + $0x20] ss:$8 sps:$4 sm:$0xff]  }
 0x158   :  { %v12490_v57 = vadd.f32 %v1291_v49, %v970_v56  ;;  %3063 = vmatpush2.bf16.msra.mxu1 %v9982_v41  ;;  %v1293_v10 = vpop.f32.mrf.mxu0  ;;  %2767 = vmatprep.subr.bf16.mxu0 %v9987_v16  ;;  %v10585_v56 = vld [vmem:[%s16305_s1 + $0x154] ss:$8 sps:$4 sm:$0xff]   ;;  %v10588_v41 = vld [vmem:[%s16305_s1 + $0x50] ss:$8 sps:$4 sm:$0xff]   ;;  %v10591_v16 = vld [vmem:[%s16305_s1 + $0x140] ss:$8 sps:$4 sm:$0xff]  }
 0x159   :  { %v1252_v58 = vpop.f32.mrf.mxu1  ;;  %3064 = vmatprep.subr.bf16.mxu1 %v9990_v3  ;;  %v10592_v3 = vld [vmem:[%s16305_s1 + $0x40] ss:$8 sps:$4 sm:$0xff]   ;;  %v10594_v19 = vld [vmem:[%s16305_s1 + $0x34] ss:$8 sps:$4 sm:$0xff]   ;;  %v10596_v49 = vld [vmem:[%s16305_s1 + $0x30] ss:$8 sps:$4 sm:$0xff]  }
 0x15a   :  { %v10599_v51 = vld [vmem:[%s16305_s1 + $0x120] ss:$8 sps:$4 sm:$0xff]   ;;  %v10603_v58 = vld [vmem:[%s16305_s1 + $0x210] ss:$8 sps:$4 sm:$0xff]  }
 0x15b   :  { %v12498_v0 = vpop.f32.mrf.mxu1  ;;  %2768 = vmatpush2.bf16.msra.mxu0 %v9985_v59  ;;  %v10597_v59 = vld [vmem:[%s16305_s1 + $0x124] ss:$8 sps:$4 sm:$0xff]   ;;  %v10604_v10 = vld [vmem:[%s16305_s1 + $0x10] ss:$8 sps:$4 sm:$0xff]  }
 0x15c   :  { %3065 = vmatpush2.bf16.msra.mxu1 %v9988_v50  ;;  %2769 = vmatprep.subr.bf16.mxu0 %v9993_v54  ;;  %v10598_v50 = vld [vmem:[%s16305_s1 + $0x24] ss:$8 sps:$4 sm:$0xff]   ;;  %v10601_v54 = vld [vmem:[%s16305_s1 + $0x214] ss:$8 sps:$4 sm:$0xff]  }
 0x15d   :  { %v12506_v5 = vpop.f32.mrf.mxu1  ;;  %3066 = vmatprep.subr.bf16.mxu1 %v9996_v55  ;;  %v10602_v55 = vld [vmem:[%s16305_s1 + $0x14] ss:$8 sps:$4 sm:$0xff]  }
 0x15f   :  { %v1618_v12 = vpop.f32.mrf.mxu1  ;;  %2770 = vmatpush2.bf16.msra.mxu0 %v9991_v60  ;;  %v10605_v60 = vld [vmem:[%s16305_s1 + $0x204] ss:$8 sps:$4 sm:$0xff]  }
 0x160   :  { %3067 = vmatpush2.bf16.msra.mxu1 %v9994_v61  ;;  %3093 = vmatprep.subr.bf16.mxu0 %v10002_v4  ;;  %v10606_v61 = vld [vmem:[%s16305_s1 + $0x4] ss:$8 sps:$4 sm:$0xff]   ;;  %v10608_v4 = vld [vmem:[%s16305_s1] ss:$8 sps:$4 sm:$0xff]  }
 0x161   :  { %v1619_v18 = vpop.f32.mrf.mxu1  ;;  %3068 = vmatprep.subr.bf16.mxu1 %v9999_v2  ;;  %v10607_v2 = vld [vmem:[%s16305_s1 + $0x200] ss:$8 sps:$4 sm:$0xff]  }
 0x162   :  { %2772 = vmatmul.mubr.bf16.vlgmr.msra.gmra.mxu0 %v11810_v62  ;;  %v10612_v18 = vld [vmem:[%s16305_s1 + $0xf0] ss:$8 sps:$4 sm:$0xff]  }
 0x163   :  { %3094 = vmatpush1.bf16.msra.mxu0 %v10000_v8  ;;  %3113 = vmatprep.mubr.bf16.mxu0 %v11292_v1  ;;  %v10610_v8 = vld [vmem:[%s16305_s1 + $0xf4] ss:$8 sps:$4 sm:$0xff]  }
 0x164   :  { %3069 = vmatpush2.bf16.msra.mxu1 %v9997_v7  ;;  %3095 = vmatprep.subr.bf16.mxu0 %v10008_v17  ;;  %v10609_v7 = vld [vmem:[%s16305_s1 + $0x1f4] ss:$8 sps:$4 sm:$0xff]   ;;  %v10611_v17 = vld [vmem:[%s16305_s1 + $0x1f0] ss:$8 sps:$4 sm:$0xff]  }
 0x165   :  { %3070 = vmatprep.subr.bf16.mxu1 %v10005_v13 }
 0x167   :  { %3096 = vmatpush1.bf16.msra.mxu0 %v10006_v21  ;;  %v10613_v21 = vld [vmem:[%s16305_s1 + $0x1e4] ss:$8 sps:$4 sm:$0xff]  }
 0x168   :  { %3071 = vmatpush2.bf16.msra.mxu1 %v10003_v20  ;;  %3124 = vmatprep.subr.bf16.mxu0 %v10569_v22 }
 0x169   :  { %3177 = vmatprep.subr.bf16.mxu1 %v10570_v25 }
 0x16a   :  { %8706 = vmatmul.mubr.msk.bf16.vlgmr.msra.gmra.mxu0 %vm284_vm0, %v11851_v14 }
 0x16b   :  { %3073 = vmatmul.mubr.bf16.vlgmr.msra.gmra.mxu1 %v12028_v24  ;;  %3125 = vmatpush1.bf16.msra.mxu0 %v10571_v26 }
 0x16c   :  { %3178 = vmatpush1.bf16.msra.mxu1 %v10572_v27  ;;  %3126 = vmatprep.subr.bf16.mxu0 %v10573_v28  ;;  %v10615_v28 = vld [vmem:[%s16305_s1 + $0x1e0] ss:$8 sps:$4 sm:$0xff]  }
 0x16d   :  { %3179 = vmatprep.subr.bf16.mxu1 %v10574_v30  ;;  %3197 = vmatprep.mubr.bf16.mxu1 %v11292_v1  ;;  %v10616_v30 = vld [vmem:[%s16305_s1 + $0xe0] ss:$8 sps:$4 sm:$0xff]  }
 0x16e   :  { %3156 = vmatprep.mubr.bf16.mxu0 %v11578_v29 }
 0x16f   :  { %3127 = vmatpush1.bf16.msra.mxu0 %v10575_v31 }
 0x170   :  { %3180 = vmatpush1.bf16.msra.mxu1 %v10576_v23  ;;  %3128 = vmatprep.subr.bf16.mxu0 %v10577_v32 }
 0x171   :  { %3206 = vmatprep.subr.bf16.mxu1 %v10578_v33  ;;  %v10619_v33 = vld [vmem:[%s16305_s1 + $0x1d0] ss:$8 sps:$4 sm:$0xff]  }
 0x173   :  { %8707 = vmatmul.mubr.msk.bf16.vlgmr.msra.gmra.mxu1 %vm284_vm0, %v11598_v39  ;;  %3129 = vmatpush1.bf16.msra.mxu0 %v10579_v34  ;;  %v10620_v34 = vld [vmem:[%s16305_s1 + $0xd0] ss:$8 sps:$4 sm:$0xff]  }
 0x174   :  { %3207 = vmatpush1.bf16.msra.mxu1 %v10580_v35  ;;  %3130 = vmatprep.subr.bf16.mxu0 %v10581_v36 }
 0x175   :  { %3208 = vmatprep.subr.bf16.mxu1 %v10582_v37  ;;  %3238 = vmatprep.mubr.bf16.mxu1 %v11471_v52  ;;  %v10621_v37 = vld [vmem:[%s16305_s1 + $0x1c4] ss:$8 sps:$4 sm:$0xff]  }
 0x177   :  { %3131 = vmatpush1.bf16.msra.mxu0 %v10583_v11  ;;  %v10622_v11 = vld [vmem:[%s16305_s1 + $0xc4] ss:$8 sps:$4 sm:$0xff]  }
 0x178   :  { %3209 = vmatpush1.bf16.msra.mxu1 %v10584_v38  ;;  %3132 = vmatprep.subr.bf16.mxu0 %v10585_v56 }
 0x179   :  { %3210 = vmatprep.subr.bf16.mxu1 %v10586_v15 }
 0x17b   :  { %3133 = vmatpush1.bf16.msra.mxu0 %v10587_v40  ;;  %v10623_v40 = vld [vmem:[%s16305_s1 + $0x1c0] ss:$8 sps:$4 sm:$0xff]  }
 0x17c   :  { %3211 = vmatpush1.bf16.msra.mxu1 %v10588_v41  ;;  %3134 = vmatprep.subr.bf16.mxu0 %v10589_v42  ;;  %v10624_v41 = vld [vmem:[%s16305_s1 + $0xc0] ss:$8 sps:$4 sm:$0xff]  }
 0x17d   :  { %3212 = vmatprep.subr.bf16.mxu1 %v10590_v43 }
 0x17f   :  { %3135 = vmatpush1.bf16.msra.mxu0 %v10591_v16  ;;  %v10625_v16 = vld [vmem:[%s16305_s1 + $0x1b4] ss:$8 sps:$4 sm:$0xff]  }
 0x180   :  { %3213 = vmatpush1.bf16.msra.mxu1 %v10592_v3  ;;  %3136 = vmatprep.subr.bf16.mxu0 %v10593_v45  ;;  %v10626_v3 = vld [vmem:[%s16305_s1 + $0xb4] ss:$8 sps:$4 sm:$0xff]  }
 0x181   :  { %3214 = vmatprep.subr.bf16.mxu1 %v10594_v19  ;;  %v10627_v19 = vld [vmem:[%s16305_s1 + $0x1b0] ss:$8 sps:$4 sm:$0xff]  }
 0x183   :  { %3137 = vmatpush1.bf16.msra.mxu0 %v10595_v47  ;;  %v10628_v47 = vld [vmem:[%s16305_s1 + $0xb0] ss:$8 sps:$4 sm:$0xff]  }
 0x184   :  { %3215 = vmatpush1.bf16.msra.mxu1 %v10596_v49  ;;  %3138 = vmatprep.subr.bf16.mxu0 %v10597_v59  ;;  %v10629_v59 = vld [vmem:[%s16305_s1 + $0x1a4] ss:$8 sps:$4 sm:$0xff]  }
 0x185   :  { %3216 = vmatprep.subr.bf16.mxu1 %v10598_v50  ;;  %v10630_v50 = vld [vmem:[%s16305_s1 + $0xa4] ss:$8 sps:$4 sm:$0xff]  }
 0x187   :  { %3139 = vmatpush1.bf16.msra.mxu0 %v10599_v51 }
 0x188   :  { %3217 = vmatpush1.bf16.msra.mxu1 %v10600_v53  ;;  %3140 = vmatprep.subr.bf16.mxu0 %v10601_v54  ;;  %v10631_v53 = vld [vmem:[%s16305_s1 + $0x1a0] ss:$8 sps:$4 sm:$0xff]  }
 0x189   :  { %3218 = vmatprep.subr.bf16.mxu1 %v10602_v55  ;;  %v10632_v54 = vld [vmem:[%s16305_s1 + $0xa0] ss:$8 sps:$4 sm:$0xff]  }
 0x18b   :  { %3141 = vmatpush2.bf16.msra.mxu0 %v10603_v58  ;;  %v10633_v58 = vld [vmem:[%s16305_s1 + $0x94] ss:$8 sps:$4 sm:$0xff]  }
 0x18c   :  { %3219 = vmatpush1.bf16.msra.mxu1 %v10604_v10  ;;  %3142 = vmatprep.subr.bf16.mxu0 %v10605_v60  ;;  %v10634_v10 = vld [vmem:[%s16305_s1 + $0x114] ss:$8 sps:$4 sm:$0xff]   ;;  %v10635_v60 = vld [vmem:[%s16305_s1 + $0x90] ss:$8 sps:$4 sm:$0xff]  }
 0x18d   :  { %3220 = vmatprep.subr.bf16.mxu1 %v10606_v61  ;;  %v10636_v61 = vld [vmem:[%s16305_s1 + $0x110] ss:$8 sps:$4 sm:$0xff]  }
 0x18f   :  { %3143 = vmatpush2.bf16.msra.mxu0 %v10607_v2  ;;  %v10637_v2 = vld [vmem:[%s16305_s1 + $0x84] ss:$8 sps:$4 sm:$0xff]  }
 0x190   :  { %3221 = vmatpush1.bf16.msra.mxu1 %v10608_v4  ;;  %3144 = vmatprep.subr.bf16.mxu0 %v10609_v7  ;;  %v10638_v4 = vld [vmem:[%s16305_s1 + $0x104] ss:$8 sps:$4 sm:$0xff]   ;;  %v10639_v7 = vld [vmem:[%s16305_s1 + $0x80] ss:$8 sps:$4 sm:$0xff]  }
 0x191   :  { %3222 = vmatprep.subr.bf16.mxu1 %v10610_v8  ;;  %v10640_v8 = vld [vmem:[%s16305_s1 + $0x100] ss:$8 sps:$4 sm:$0xff]  }
 0x192   :  { %v1573_v12 = vpop.f32.mrf.mxu0 }
 0x193   :  { %v1615_v13 = vadd.f32 %v12498_v0, %v1573_v12  ;;  %3145 = vmatpush2.bf16.msra.mxu0 %v10611_v17  ;;  %v10614_v0 = vld [vmem:[%s16305_s1 + $0xe4] ss:$8 sps:$4 sm:$0xff]   ;;  %v10641_v12 = vld [vmem:[%s16305_s1 + $0x2b4] ss:$8 sps:$4 sm:$0xff]   ;;  %v12780_v17 = vld [vmem:[%s16306_s0 + $0x20] ss:$0 sps:$4 sm:$0xff]  }
 0x194   :  { %3223 = vmatpush2.bf16.msra.mxu1 %v10612_v18  ;;  %v1575_v20 = vpop.f32.mrf.mxu0  ;;  %3146 = vmatprep.subr.bf16.mxu0 %v10613_v21  ;;  %v10644_v18 = vld [vmem:[%s16305_s1 + $0x2b0] ss:$8 sps:$4 sm:$0xff]   ;;  %v10646_v21 = vld [vmem:[%s16305_s1 + $0x2a4] ss:$8 sps:$4 sm:$0xff]  }
 0x195   :  { %3224 = vmatprep.subr.bf16.mxu1 %v10614_v0  ;;  %v12676_v22 = vadd.f32 %v1615_v13, %v12476_v48  ;;  %v1617_v25 = vadd.f32 %v12506_v5, %v1575_v20  ;;  %v10617_v48 = vld [vmem:[%s16305_s1 + $0x1d4] ss:$8 sps:$4 sm:$0xff]   ;;  %v10645_v20 = vld [vmem:[%s16305_s1 + $0x350] ss:$8 sps:$4 sm:$0xff]   ;;  %v10647_v0 = vld [vmem:[%s16305_s1 + $0x344] ss:$8 sps:$4 sm:$0xff]  }
 0x196   :  { %v1577_v26 = vpop.f32.mrf.mxu0  ;;  %v10642_v13 = vld [vmem:[%s16305_s1 + $0x354] ss:$8 sps:$4 sm:$0xff]  }
 0x197   :  { %v12680_v27 = vadd.f32 %v1617_v25, %v12490_v57  ;;  %3147 = vmatpush2.bf16.msra.mxu0 %v10615_v28  ;;  %v10618_v57 = vld [vmem:[%s16305_s1 + $0xd4] ss:$8 sps:$4 sm:$0xff]   ;;  %v10648_v25 = vld [vmem:[%s16305_s1 + $0x2a0] ss:$8 sps:$4 sm:$0xff]  }
 0x198   :  { %3225 = vmatpush2.bf16.msra.mxu1 %v10616_v30  ;;  %v1578_v31 = vpop.f32.mrf.mxu0  ;;  %3148 = vmatprep.subr.bf16.mxu0 %v10617_v48  ;;  %v10649_v26 = vld [vmem:[%s16305_s1 + $0x340] ss:$8 sps:$4 sm:$0xff]   ;;  %v10650_v28 = vld [vmem:[%s16305_s1 + $0x294] ss:$8 sps:$4 sm:$0xff]   ;;  %v10653_v48 = vld [vmem:[%s16305_s1 + $0x3d0] ss:$8 sps:$4 sm:$0xff]  }
 0x199   :  { %3226 = vmatprep.subr.bf16.mxu1 %v10618_v57  ;;  %v10651_v30 = vld [vmem:[%s16305_s1 + $0x3d4] ss:$8 sps:$4 sm:$0xff]   ;;  %v10652_v31 = vld [vmem:[%s16305_s1 + $0x290] ss:$8 sps:$4 sm:$0xff]   ;;  %v10654_v57 = vld [vmem:[%s16305_s1 + $0x284] ss:$8 sps:$4 sm:$0xff]  }
 0x19a   :  { %v1952_v23 = vpop.f32.mrf.mxu0 }
 0x19b   :  { %v1911_v5 = vpop.f32.mrf.mxu1  ;;  %3149 = vmatpush2.bf16.msra.mxu0 %v10619_v33  ;;  %v10657_v33 = vld [vmem:[%s16305_s1 + $0x3c0] ss:$8 sps:$4 sm:$0xff]  }
 0x19c   :  { %v12694_v32 = vadd.f32 %v1952_v23, %v1911_v5  ;;  %3227 = vmatpush2.bf16.msra.mxu1 %v10620_v34  ;;  %v1954_v36 = vpop.f32.mrf.mxu0  ;;  %3150 = vmatprep.subr.bf16.mxu0 %v10621_v37  ;;  %v10655_v5 = vld [vmem:[%s16305_s1 + $0x3c4] ss:$8 sps:$4 sm:$0xff]   ;;  %v10656_v23 = vld [vmem:[%s16305_s1 + $0x280] ss:$8 sps:$4 sm:$0xff]   ;;  %v10658_v34 = vld [vmem:[%s16305_s1 + $0x274] ss:$8 sps:$4 sm:$0xff]  }
 0x19d   :  { %v1913_v35 = vpop.f32.mrf.mxu1  ;;  %3228 = vmatprep.subr.bf16.mxu1 %v10622_v11  ;;  %v10661_v37 = vld [vmem:[%s16305_s1 + $0x3b0] ss:$8 sps:$4 sm:$0xff]   ;;  %v10662_v11 = vld [vmem:[%s16305_s1 + $0x264] ss:$8 sps:$4 sm:$0xff]  }
 0x19e   :  { %v12708_v38 = vadd.f32 %v1954_v36, %v1913_v35  ;;  %v1956_v15 = vpop.f32.mrf.mxu0  ;;  %v10659_v35 = vld [vmem:[%s16305_s1 + $0x3b4] ss:$8 sps:$4 sm:$0xff]   ;;  %v10660_v36 = vld [vmem:[%s16305_s1 + $0x270] ss:$8 sps:$4 sm:$0xff]  }
 0x19f   :  { %v1915_v56 = vpop.f32.mrf.mxu1  ;;  %3151 = vmatpush2.bf16.msra.mxu0 %v10623_v40  ;;  %v10664_v15 = vld [vmem:[%s16305_s1 + $0x260] ss:$8 sps:$4 sm:$0xff]  }
 0x1a0   :  { %3229 = vmatpush2.bf16.msra.mxu1 %v10624_v41  ;;  %v1957_v43 = vpop.f32.mrf.mxu0  ;;  %3152 = vmatprep.subr.bf16.mxu0 %v10625_v16  ;;  %v10663_v56 = vld [vmem:[%s16305_s1 + $0x3a4] ss:$8 sps:$4 sm:$0xff]   ;;  %v10665_v40 = vld [vmem:[%s16305_s1 + $0x3a0] ss:$8 sps:$4 sm:$0xff]   ;;  %v10666_v41 = vld [vmem:[%s16305_s1 + $0x254] ss:$8 sps:$4 sm:$0xff]  }
 0x1a1   :  { %v1916_v42 = vpop.f32.mrf.mxu1  ;;  %3230 = vmatprep.subr.bf16.mxu1 %v10626_v3  ;;  %v10668_v43 = vld [vmem:[%s16305_s1 + $0x250] ss:$8 sps:$4 sm:$0xff]   ;;  %v10670_v3 = vld [vmem:[%s16305_s1 + $0x244] ss:$8 sps:$4 sm:$0xff]  }
 0x1a2   :  { %v10667_v42 = vld [vmem:[%s16305_s1 + $0x394] ss:$8 sps:$4 sm:$0xff]   ;;  %v10669_v16 = vld [vmem:[%s16305_s1 + $0x390] ss:$8 sps:$4 sm:$0xff]  }
 0x1a3   :  { %v12722_v45 = vpop.f32.mrf.mxu1  ;;  %3153 = vmatpush2.bf16.msra.mxu0 %v10627_v19  ;;  %v10671_v19 = vld [vmem:[%s16305_s1 + $0x384] ss:$8 sps:$4 sm:$0xff]  }
 0x1a4   :  { %3231 = vmatpush2.bf16.msra.mxu1 %v10628_v47  ;;  %3154 = vmatprep.subr.bf16.mxu0 %v10629_v59  ;;  %v10672_v47 = vld [vmem:[%s16305_s1 + $0x240] ss:$8 sps:$4 sm:$0xff]  }
 0x1a5   :  { %v12730_v49 = vpop.f32.mrf.mxu1  ;;  %3232 = vmatprep.subr.bf16.mxu1 %v10630_v50  ;;  %v10673_v59 = vld [vmem:[%s16305_s1 + $0x380] ss:$8 sps:$4 sm:$0xff]   ;;  %v10674_v50 = vld [vmem:[%s16305_s1 + $0x334] ss:$8 sps:$4 sm:$0xff]  }
 0x1a7   :  { %v2218_v51 = vpop.f32.mrf.mxu1  ;;  %3155 = vmatpush2.bf16.msra.mxu0 %v10631_v53  ;;  %v10676_v53 = vld [vmem:[%s16305_s1 + $0x330] ss:$8 sps:$4 sm:$0xff]  }
 0x1a8   :  { %3233 = vmatpush2.bf16.msra.mxu1 %v10632_v54  ;;  %3259 = vmatprep.subr.bf16.mxu0 %v10634_v10  ;;  %v10675_v51 = vld [vmem:[%s16305_s1 + $0x374] ss:$8 sps:$4 sm:$0xff]   ;;  %v10677_v54 = vld [vmem:[%s16305_s1 + $0x370] ss:$8 sps:$4 sm:$0xff]   ;;  %v10680_v10 = vld [vmem:[%s16305_s1 + $0x320] ss:$8 sps:$4 sm:$0xff]  }
 0x1a9   :  { %v2219_v55 = vpop.f32.mrf.mxu1  ;;  %3234 = vmatprep.subr.bf16.mxu1 %v10633_v58  ;;  %v10679_v58 = vld [vmem:[%s16305_s1 + $0x364] ss:$8 sps:$4 sm:$0xff]  }
 0x1aa   :  { %3157 = vmatmul.mubr.bf16.vlgmr.msra.gmra.mxu0 %v11776_v46  ;;  %v10678_v55 = vld [vmem:[%s16305_s1 + $0x324] ss:$8 sps:$4 sm:$0xff]  }
 0x1ab   :  { %3260 = vmatpush1.bf16.msra.mxu0 %v10636_v61  ;;  %3279 = vmatprep.mubr.bf16.mxu0 %v11292_v1  ;;  %v10682_v61 = vld [vmem:[%s16305_s1 + $0x314] ss:$8 sps:$4 sm:$0xff]  }
 0x1ac   :  { %3235 = vmatpush2.bf16.msra.mxu1 %v10635_v60  ;;  %3261 = vmatprep.subr.bf16.mxu0 %v10638_v4  ;;  %v10681_v60 = vld [vmem:[%s16305_s1 + $0x360] ss:$8 sps:$4 sm:$0xff]  }
 0x1ad   :  { %3236 = vmatprep.subr.bf16.mxu1 %v10637_v2  ;;  %v10683_v2 = vld [vmem:[%s16305_s1 + $0x454] ss:$8 sps:$4 sm:$0xff]  }
 0x1af   :  { %3262 = vmatpush1.bf16.msra.mxu0 %v10640_v8  ;;  %v10684_v8 = vld [vmem:[%s16305_s1 + $0x310] ss:$8 sps:$4 sm:$0xff]  }
 0x1b0   :  { %3237 = vmatpush2.bf16.msra.mxu1 %v10639_v7  ;;  %3288 = vmatprep.subr.bf16.mxu0 %v10641_v12  ;;  %v10685_v12 = vld [vmem:[%s16305_s1 + $0x450] ss:$8 sps:$4 sm:$0xff]  }
 0x1b1   :  { %3341 = vmatprep.subr.bf16.mxu1 %v10642_v13 }
 0x1b2   :  { %8708 = vmatmul.mubr.msk.bf16.vlgmr.msra.gmra.mxu0 %vm284_vm0, %v12780_v17 }
 0x1b3   :  { %3239 = vmatmul.mubr.bf16.vlgmr.msra.gmra.mxu1 %v11531_v9  ;;  %3289 = vmatpush1.bf16.msra.mxu0 %v10644_v18  ;;  %v10686_v18 = vld [vmem:[%s16305_s1 + $0x304] ss:$8 sps:$4 sm:$0xff]  }
 0x1b4   :  { %3342 = vmatpush1.bf16.msra.mxu1 %v10645_v20  ;;  %3290 = vmatprep.subr.bf16.mxu0 %v10646_v21 }
 0x1b5   :  { %3343 = vmatprep.subr.bf16.mxu1 %v10647_v0  ;;  %3361 = vmatprep.mubr.bf16.mxu1 %v11292_v1 }
 0x1b6   :  { %3320 = vmatprep.mubr.bf16.mxu0 %v11612_v44 }
 0x1b7   :  { %3291 = vmatpush1.bf16.msra.mxu0 %v10648_v25 }
 0x1b8   :  { %3344 = vmatpush1.bf16.msra.mxu1 %v10649_v26  ;;  %3292 = vmatprep.subr.bf16.mxu0 %v10650_v28  ;;  %v10688_v26 = vld [vmem:[%s16305_s1 + $0x300] ss:$8 sps:$4 sm:$0xff]  }
 0x1b9   :  { %3372 = vmatprep.subr.bf16.mxu1 %v10651_v30  ;;  %v10689_v28 = vld [vmem:[%s16305_s1 + $0x440] ss:$8 sps:$4 sm:$0xff]  }
 0x1bb   :  { %8709 = vmatmul.mubr.msk.bf16.vlgmr.msra.gmra.mxu1 %vm284_vm0, %v11812_v63  ;;  %3293 = vmatpush1.bf16.msra.mxu0 %v10652_v31 }
 0x1bc   :  { %3373 = vmatpush1.bf16.msra.mxu1 %v10653_v48  ;;  %3294 = vmatprep.subr.bf16.mxu0 %v10654_v57  ;;  %v10692_v57 = vld [vmem:[%s16305_s1 + $0x2f0] ss:$8 sps:$4 sm:$0xff]  }
 0x1bd   :  { %3374 = vmatprep.subr.bf16.mxu1 %v10655_v5  ;;  %3404 = vmatprep.mubr.bf16.mxu1 %v11829_v6  ;;  %v10693_v5 = vld [vmem:[%s16305_s1 + $0x430] ss:$8 sps:$4 sm:$0xff]  }
 0x1bf   :  { %3295 = vmatpush1.bf16.msra.mxu0 %v10656_v23 }
 0x1c0   :  { %3375 = vmatpush1.bf16.msra.mxu1 %v10657_v33  ;;  %3296 = vmatprep.subr.bf16.mxu0 %v10658_v34  ;;  %v10694_v34 = vld [vmem:[%s16305_s1 + $0x2e4] ss:$8 sps:$4 sm:$0xff]  }
 0x1c1   :  { %3376 = vmatprep.subr.bf16.mxu1 %v10659_v35  ;;  %v10695_v35 = vld [vmem:[%s16305_s1 + $0x424] ss:$8 sps:$4 sm:$0xff]  }
 0x1c3   :  { %3297 = vmatpush1.bf16.msra.mxu0 %v10660_v36 }
 0x1c4   :  { %3377 = vmatpush1.bf16.msra.mxu1 %v10661_v37  ;;  %3298 = vmatprep.subr.bf16.mxu0 %v10662_v11 }
 0x1c5   :  { %3378 = vmatprep.subr.bf16.mxu1 %v10663_v56 }
 0x1c7   :  { %3299 = vmatpush1.bf16.msra.mxu0 %v10664_v15 }
 0x1c8   :  { %3379 = vmatpush1.bf16.msra.mxu1 %v10665_v40  ;;  %3300 = vmatprep.subr.bf16.mxu0 %v10666_v41  ;;  %v10696_v40 = vld [vmem:[%s16305_s1 + $0x2e0] ss:$8 sps:$4 sm:$0xff]  }
 0x1c9   :  { %3380 = vmatprep.subr.bf16.mxu1 %v10667_v42  ;;  %v10697_v41 = vld [vmem:[%s16305_s1 + $0x420] ss:$8 sps:$4 sm:$0xff]  }
 0x1cb   :  { %3301 = vmatpush1.bf16.msra.mxu0 %v10668_v43 }
 0x1cc   :  { %3381 = vmatpush1.bf16.msra.mxu1 %v10669_v16  ;;  %3302 = vmatprep.subr.bf16.mxu0 %v10670_v3  ;;  %v10698_v16 = vld [vmem:[%s16305_s1 + $0x2d4] ss:$8 sps:$4 sm:$0xff]  }
 0x1cd   :  { %3382 = vmatprep.subr.bf16.mxu1 %v10671_v19  ;;  %v10699_v3 = vld [vmem:[%s16305_s1 + $0x414] ss:$8 sps:$4 sm:$0xff]  }
 0x1cf   :  { %3303 = vmatpush1.bf16.msra.mxu0 %v10672_v47  ;;  %v10700_v47 = vld [vmem:[%s16305_s1 + $0x2d0] ss:$8 sps:$4 sm:$0xff]  }
 0x1d0   :  { %3383 = vmatpush1.bf16.msra.mxu1 %v10673_v59  ;;  %3304 = vmatprep.subr.bf16.mxu0 %v10674_v50  ;;  %v10701_v59 = vld [vmem:[%s16305_s1 + $0x410] ss:$8 sps:$4 sm:$0xff]  }
 0x1d1   :  { %3384 = vmatprep.subr.bf16.mxu1 %v10675_v51  ;;  %v10702_v51 = vld [vmem:[%s16305_s1 + $0x2c4] ss:$8 sps:$4 sm:$0xff]  }
 0x1d3   :  { %3305 = vmatpush2.bf16.msra.mxu0 %v10676_v53  ;;  %v10703_v53 = vld [vmem:[%s16305_s1 + $0x404] ss:$8 sps:$4 sm:$0xff]  }
 0x1d4   :  { %3385 = vmatpush1.bf16.msra.mxu1 %v10677_v54  ;;  %3306 = vmatprep.subr.bf16.mxu0 %v10678_v55  ;;  %v10704_v55 = vld [vmem:[%s16305_s1 + $0x2c0] ss:$8 sps:$4 sm:$0xff]  }
 0x1d5   :  { %3386 = vmatprep.subr.bf16.mxu1 %v10679_v58  ;;  %v10705_v58 = vld [vmem:[%s16305_s1 + $0x400] ss:$8 sps:$4 sm:$0xff]  }
 0x1d7   :  { %3307 = vmatpush2.bf16.msra.mxu0 %v10680_v10 }
 0x1d8   :  { %3387 = vmatpush1.bf16.msra.mxu1 %v10681_v60  ;;  %3308 = vmatprep.subr.bf16.mxu0 %v10682_v61  ;;  %v10706_v60 = vld [vmem:[%s16305_s1 + $0x3f4] ss:$8 sps:$4 sm:$0xff]  }
 0x1d9   :  { %3388 = vmatprep.subr.bf16.mxu1 %v10683_v2  ;;  %v10707_v61 = vld [vmem:[%s16305_s1 + $0x474] ss:$8 sps:$4 sm:$0xff]   ;;  %v10708_v2 = vld [vmem:[%s16305_s1 + $0x3f0] ss:$8 sps:$4 sm:$0xff]  }
 0x1da   :  { %v2173_v4 = vpop.f32.mrf.mxu0 }
 0x1db   :  { %v2174_v7 = vadd.f32 %v2173_v4, %v12694_v32  ;;  %3309 = vmatpush2.bf16.msra.mxu0 %v10684_v8  ;;  %v10687_v32 = vld [vmem:[%s16305_s1 + $0x444] ss:$8 sps:$4 sm:$0xff]   ;;  %v10709_v4 = vld [vmem:[%s16305_s1 + $0x470] ss:$8 sps:$4 sm:$0xff]  }
 0x1dc   :  { %3389 = vmatpush2.bf16.msra.mxu1 %v10685_v12  ;;  %v2175_v13 = vpop.f32.mrf.mxu0  ;;  %3310 = vmatprep.subr.bf16.mxu0 %v10686_v18  ;;  %v10711_v8 = vld [vmem:[%s16305_s1 + $0x464] ss:$8 sps:$4 sm:$0xff]   ;;  %v13010_v12 = vld [vmem:[%s16306_s0 + $0x1c] ss:$12 sps:$4 sm:$0x1e]  }
 0x1dd   :  { %3390 = vmatprep.subr.bf16.mxu1 %v10687_v32  ;;  %v2215_v20 = vadd.f32 %v12722_v45, %v2174_v7  ;;  %v2176_v21 = vadd.f32 %v2175_v13, %v12708_v38  ;;  %v10690_v45 = vld [vmem:[%s16305_s1 + $0x2f4] ss:$8 sps:$4 sm:$0xff]   ;;  %v10710_v7 = vld [vmem:[%s16305_s1 + $0x3e4] ss:$8 sps:$4 sm:$0xff]   ;;  %v10712_v13 = vld [vmem:[%s16305_s1 + $0x3e0] ss:$8 sps:$4 sm:$0xff]  }
 0x1de   :  { %v2177_v0 = vpop.f32.mrf.mxu0  ;;  %v10691_v38 = vld [vmem:[%s16305_s1 + $0x434] ss:$8 sps:$4 sm:$0xff]   ;;  %v10713_v18 = vld [vmem:[%s16305_s1 + $0x460] ss:$8 sps:$4 sm:$0xff]  }
 0x1df   :  { %v2217_v25 = vadd.f32 %v12730_v49, %v2176_v21  ;;  %3311 = vmatpush2.bf16.msra.mxu0 %v10688_v26  ;;  %v10714_v32 = vld [vmem:[%s16305_s1 + $0x4f4] ss:$8 sps:$4 sm:$0xff]   ;;  %v3474_v21 = vrot.slane %v13010_v12, 1  ;;  %v13031_v0 = vld [vmem:[%s16306_s0 + $0x20] ss:$12 sps:$4 sm:$0x1e]  }
 0x1e0   :  { %3391 = vmatpush2.bf16.msra.mxu1 %v10689_v28  ;;  %v2178_v30 = vpop.f32.mrf.mxu0  ;;  %3312 = vmatprep.subr.bf16.mxu0 %v10690_v45  ;;  %v10717_v26 = vld [vmem:[%s16305_s1 + $0x590] ss:$8 sps:$4 sm:$0xff]   ;;  %v10718_v28 = vld [vmem:[%s16305_s1 + $0x4e4] ss:$8 sps:$4 sm:$0xff]   ;;  %v3475_v45 = vrot.slane %v13031_v0, 1 }
 0x1e1   :  { %3392 = vmatprep.subr.bf16.mxu1 %v10691_v38  ;;  %v10719_v30 = vld [vmem:[%s16305_s1 + $0x584] ss:$8 sps:$4 sm:$0xff]   ;;  %v10720_v38 = vld [vmem:[%s16305_s1 + $0x4e0] ss:$8 sps:$4 sm:$0xff]   ;;  %v10875_v12 = vld [vmem:[%s16305_s1 + $0xa74] ss:$8 sps:$4 sm:$0xff]  }
 0x1e2   :  { %v2513_v31 = vpop.f32.mrf.mxu0  ;;  %v10031_v0 = vld [vmem:[%s16305_s1 + $0x74] ss:$8 sps:$4 sm:$0xff]  }
 0x1e3   :  { %v2472_v49 = vpop.f32.mrf.mxu1  ;;  %3313 = vmatpush2.bf16.msra.mxu0 %v10692_v57  ;;  %v10724_v57 = vld [vmem:[%s16305_s1 + $0x4d0] ss:$8 sps:$4 sm:$0xff]  }
 0x1e4   :  { %v2514_v48 = vadd.f32 %v2513_v31, %v2472_v49  ;;  %3393 = vmatpush2.bf16.msra.mxu1 %v10693_v5  ;;  %v2515_v33 = vpop.f32.mrf.mxu0  ;;  %3314 = vmatprep.subr.bf16.mxu0 %v10694_v34  ;;  %v10721_v49 = vld [vmem:[%s16305_s1 + $0x580] ss:$8 sps:$4 sm:$0xff]   ;;  %v10722_v31 = vld [vmem:[%s16305_s1 + $0x4d4] ss:$8 sps:$4 sm:$0xff]   ;;  %v10725_v5 = vld [vmem:[%s16305_s1 + $0x730] ss:$8 sps:$4 sm:$0xff]  }
 0x1e5   :  { %v2474_v23 = vpop.f32.mrf.mxu1  ;;  %3394 = vmatprep.subr.bf16.mxu1 %v10695_v35  ;;  %v10728_v34 = vld [vmem:[%s16305_s1 + $0x4c0] ss:$8 sps:$4 sm:$0xff]  }
 0x1e6   :  { %v12949_v36 = vadd.f32 %v2514_v48, %v2215_v20  ;;  %v2516_v37 = vadd.f32 %v2515_v33, %v2474_v23  ;;  %v2517_v56 = vpop.f32.mrf.mxu0  ;;  %v10715_v20 = vld [vmem:[%s16305_s1 + $0x594] ss:$8 sps:$4 sm:$0xff]   ;;  %v10726_v23 = vld [vmem:[%s16305_s1 + $0x4c4] ss:$8 sps:$4 sm:$0xff]   ;;  %v10729_v35 = vld [vmem:[%s16305_s1 + $0x720] ss:$8 sps:$4 sm:$0xff]  }
 0x1e7   :  { %v2476_v11 = vpop.f32.mrf.mxu1  ;;  %3315 = vmatpush2.bf16.msra.mxu0 %v10696_v40  ;;  %v10723_v48 = vld [vmem:[%s16305_s1 + $0x734] ss:$8 sps:$4 sm:$0xff]   ;;  %v10727_v33 = vld [vmem:[%s16305_s1 + $0x724] ss:$8 sps:$4 sm:$0xff]   ;;  %v10733_v56 = vld [vmem:[%s16305_s1 + $0x710] ss:$8 sps:$4 sm:$0xff]  }
 0x1e8   :  { %v12951_v15 = vadd.f32 %v2516_v37, %v2217_v25  ;;  %3395 = vmatpush2.bf16.msra.mxu1 %v10697_v41  ;;  %v2518_v43 = vpop.f32.mrf.mxu0  ;;  %3316 = vmatprep.subr.bf16.mxu0 %v10698_v16  ;;  %v10716_v25 = vld [vmem:[%s16305_s1 + $0x4f0] ss:$8 sps:$4 sm:$0xff]   ;;  %v10730_v37 = vld [vmem:[%s16305_s1 + $0x4b4] ss:$8 sps:$4 sm:$0xff]   ;;  %v10734_v40 = vld [vmem:[%s16305_s1 + $0x4a4] ss:$8 sps:$4 sm:$0xff]  }
 0x1e9   :  { %v2477_v42 = vpop.f32.mrf.mxu1  ;;  %3396 = vmatprep.subr.bf16.mxu1 %v10699_v3  ;;  %v10731_v11 = vld [vmem:[%s16305_s1 + $0x714] ss:$8 sps:$4 sm:$0xff]   ;;  %v10735_v41 = vld [vmem:[%s16305_s1 + $0x704] ss:$8 sps:$4 sm:$0xff]   ;;  %v10737_v43 = vld [vmem:[%s16305_s1 + $0x700] ss:$8 sps:$4 sm:$0xff]  }
 0x1ea   :  { %v10736_v42 = vld [vmem:[%s16305_s1 + $0x4a0] ss:$8 sps:$4 sm:$0xff]   ;;  %v10738_v16 = vld [vmem:[%s16305_s1 + $0x494] ss:$8 sps:$4 sm:$0xff]  }
 0x1eb   :  { %v12965_v19 = vpop.f32.mrf.mxu1  ;;  %3317 = vmatpush2.bf16.msra.mxu0 %v10700_v47  ;;  %v10739_v3 = vld [vmem:[%s16305_s1 + $0x6f4] ss:$8 sps:$4 sm:$0xff]   ;;  %v10740_v47 = vld [vmem:[%s16305_s1 + $0x490] ss:$8 sps:$4 sm:$0xff]  }
 0x1ec   :  { %3397 = vmatpush2.bf16.msra.mxu1 %v10701_v59  ;;  %3318 = vmatprep.subr.bf16.mxu0 %v10702_v51  ;;  %v10741_v59 = vld [vmem:[%s16305_s1 + $0x6f0] ss:$8 sps:$4 sm:$0xff]   ;;  %v10742_v51 = vld [vmem:[%s16305_s1 + $0x484] ss:$8 sps:$4 sm:$0xff]  }
 0x1ed   :  { %v12973_v50 = vpop.f32.mrf.mxu1  ;;  %3398 = vmatprep.subr.bf16.mxu1 %v10703_v53  ;;  %v10743_v53 = vld [vmem:[%s16305_s1 + $0x6e4] ss:$8 sps:$4 sm:$0xff]  }
 0x1ef   :  { %v2818_v54 = vpop.f32.mrf.mxu1  ;;  %3319 = vmatpush2.bf16.msra.mxu0 %v10704_v55  ;;  %v10745_v55 = vld [vmem:[%s16305_s1 + $0x6e0] ss:$8 sps:$4 sm:$0xff]  }
 0x1f0   :  { %3399 = vmatpush2.bf16.msra.mxu1 %v10705_v58  ;;  %3425 = vmatprep.subr.bf16.mxu0 %v10707_v61  ;;  %v10744_v54 = vld [vmem:[%s16305_s1 + $0x480] ss:$8 sps:$4 sm:$0xff]   ;;  %v10746_v58 = vld [vmem:[%s16305_s1 + $0x574] ss:$8 sps:$4 sm:$0xff]   ;;  %v10749_v61 = vld [vmem:[%s16305_s1 + $0x6d0] ss:$8 sps:$4 sm:$0xff]  }
 0x1f1   :  { %v2819_v10 = vpop.f32.mrf.mxu1  ;;  %3400 = vmatprep.subr.bf16.mxu1 %v10706_v60  ;;  %v10748_v60 = vld [vmem:[%s16305_s1 + $0x570] ss:$8 sps:$4 sm:$0xff]  }
 0x1f2   :  { %3321 = vmatmul.mubr.bf16.vlgmr.msra.gmra.mxu0 %v11810_v62  ;;  %v10747_v10 = vld [vmem:[%s16305_s1 + $0x6d4] ss:$8 sps:$4 sm:$0xff]  }
 0x1f3   :  { %3426 = vmatpush1.bf16.msra.mxu0 %v10709_v4  ;;  %3445 = vmatprep.mubr.bf16.mxu0 %v11292_v1  ;;  %v10751_v4 = vld [vmem:[%s16305_s1 + $0x6c4] ss:$8 sps:$4 sm:$0xff]  }
 0x1f4   :  { %3401 = vmatpush2.bf16.msra.mxu1 %v10708_v2  ;;  %3427 = vmatprep.subr.bf16.mxu0 %v10711_v8  ;;  %v10750_v2 = vld [vmem:[%s16305_s1 + $0x564] ss:$8 sps:$4 sm:$0xff]   ;;  %v10753_v8 = vld [vmem:[%s16305_s1 + $0x6c0] ss:$8 sps:$4 sm:$0xff]  }
 0x1f5   :  { %3402 = vmatprep.subr.bf16.mxu1 %v10710_v7  ;;  %v10752_v7 = vld [vmem:[%s16305_s1 + $0x560] ss:$8 sps:$4 sm:$0xff]  }
 0x1f7   :  { %3428 = vmatpush1.bf16.msra.mxu0 %v10713_v18  ;;  %v10755_v18 = vld [vmem:[%s16305_s1 + $0x7b4] ss:$8 sps:$4 sm:$0xff]  }
 0x1f8   :  { %3403 = vmatpush2.bf16.msra.mxu1 %v10712_v13  ;;  %3481 = vmatprep.subr.bf16.mxu0 %v10714_v32  ;;  %v10754_v13 = vld [vmem:[%s16305_s1 + $0x554] ss:$8 sps:$4 sm:$0xff]  }
 0x1f9   :  { %3534 = vmatprep.subr.bf16.mxu1 %v10715_v20 }
 0x1fa   :  { %8710 = vmatmul.mubr.msk.bf16.vlgmr.msra.gmra.mxu0 %vm284_vm0, %v11851_v14 }
 0x1fb   :  { %3405 = vmatmul.mubr.bf16.vlgmr.msra.gmra.mxu1 %v12028_v24  ;;  %3482 = vmatpush1.bf16.msra.mxu0 %v10716_v25  ;;  %v10756_v25 = vld [vmem:[%s16305_s1 + $0x550] ss:$8 sps:$4 sm:$0xff]  }
 0x1fc   :  { %3535 = vmatpush1.bf16.msra.mxu1 %v10717_v26  ;;  %3483 = vmatprep.subr.bf16.mxu0 %v10718_v28  ;;  %v10757_v26 = vld [vmem:[%s16305_s1 + $0x7b0] ss:$8 sps:$4 sm:$0xff]  }
 0x1fd   :  { %3536 = vmatprep.subr.bf16.mxu1 %v10719_v30  ;;  %3554 = vmatprep.mubr.bf16.mxu1 %v11292_v1  ;;  %v10758_v30 = vld [vmem:[%s16305_s1 + $0x544] ss:$8 sps:$4 sm:$0xff]  }
 0x1fe   :  { %3513 = vmatprep.mubr.bf16.mxu0 %v3474_v21 }
 0x1ff   :  { %3484 = vmatpush1.bf16.msra.mxu0 %v10720_v38 }
 0x200   :  { %3537 = vmatpush1.bf16.msra.mxu1 %v10721_v49  ;;  %3485 = vmatprep.subr.bf16.mxu0 %v10722_v31 }
 0x201   :  { %3565 = vmatprep.subr.bf16.mxu1 %v10723_v48 }
 0x203   :  { %8718 = vmatmul.mubr.msk.bf16.vlgmr.msra.gmra.mxu1 %vm284_vm0, %v3475_v45  ;;  %3486 = vmatpush1.bf16.msra.mxu0 %v10724_v57  ;;  %v10760_v57 = vld [vmem:[%s16305_s1 + $0x540] ss:$8 sps:$4 sm:$0xff]  }
 0x204   :  { %3566 = vmatpush1.bf16.msra.mxu1 %v10725_v5  ;;  %3487 = vmatprep.subr.bf16.mxu0 %v10726_v23  ;;  %v10761_v5 = vld [vmem:[%s16305_s1 + $0x7a0] ss:$8 sps:$4 sm:$0xff]  }
 0x205   :  { %3567 = vmatprep.subr.bf16.mxu1 %v10727_v33  ;;  %3597 = vmatprep.mubr.bf16.mxu1 %v11578_v29  ;;  %v10732_v29 = vld [vmem:[%s16305_s1 + $0x4b0] ss:$8 sps:$4 sm:$0xff]  }
 0x207   :  { %3488 = vmatpush1.bf16.msra.mxu0 %v10728_v34 }
 0x208   :  { %3568 = vmatpush1.bf16.msra.mxu1 %v10729_v35  ;;  %3489 = vmatprep.subr.bf16.mxu0 %v10730_v37  ;;  %v10764_v35 = vld [vmem:[%s16305_s1 + $0x530] ss:$8 sps:$4 sm:$0xff]  }
 0x209   :  { %3569 = vmatprep.subr.bf16.mxu1 %v10731_v11  ;;  %v10765_v37 = vld [vmem:[%s16305_s1 + $0x790] ss:$8 sps:$4 sm:$0xff]  }
 0x20b   :  { %3490 = vmatpush1.bf16.msra.mxu0 %v10732_v29 }
 0x20c   :  { %3570 = vmatpush1.bf16.msra.mxu1 %v10733_v56  ;;  %3491 = vmatprep.subr.bf16.mxu0 %v10734_v40  ;;  %v10766_v56 = vld [vmem:[%s16305_s1 + $0x524] ss:$8 sps:$4 sm:$0xff]  }
 0x20d   :  { %3571 = vmatprep.subr.bf16.mxu1 %v10735_v41  ;;  %v10767_v40 = vld [vmem:[%s16305_s1 + $0x784] ss:$8 sps:$4 sm:$0xff]  }
 0x20f   :  { %3492 = vmatpush1.bf16.msra.mxu0 %v10736_v42 }
 0x210   :  { %3572 = vmatpush1.bf16.msra.mxu1 %v10737_v43  ;;  %3493 = vmatprep.subr.bf16.mxu0 %v10738_v16 }
 0x211   :  { %3573 = vmatprep.subr.bf16.mxu1 %v10739_v3 }
 0x213   :  { %3494 = vmatpush1.bf16.msra.mxu0 %v10740_v47 }
 0x214   :  { %3574 = vmatpush1.bf16.msra.mxu1 %v10741_v59  ;;  %3495 = vmatprep.subr.bf16.mxu0 %v10742_v51  ;;  %v10768_v59 = vld [vmem:[%s16305_s1 + $0x520] ss:$8 sps:$4 sm:$0xff]  }
 0x215   :  { %3575 = vmatprep.subr.bf16.mxu1 %v10743_v53  ;;  %v10769_v51 = vld [vmem:[%s16305_s1 + $0x780] ss:$8 sps:$4 sm:$0xff]  }
 0x217   :  { %3496 = vmatpush1.bf16.msra.mxu0 %v10744_v54 }
 0x218   :  { %3576 = vmatpush1.bf16.msra.mxu1 %v10745_v55  ;;  %3497 = vmatprep.subr.bf16.mxu0 %v10746_v58  ;;  %v10770_v55 = vld [vmem:[%s16305_s1 + $0x514] ss:$8 sps:$4 sm:$0xff]  }
 0x219   :  { %3577 = vmatprep.subr.bf16.mxu1 %v10747_v10  ;;  %v10771_v58 = vld [vmem:[%s16305_s1 + $0x774] ss:$8 sps:$4 sm:$0xff]  }
 0x21b   :  { %3498 = vmatpush2.bf16.msra.mxu0 %v10748_v60 }
 0x21c   :  { %3578 = vmatpush1.bf16.msra.mxu1 %v10749_v61  ;;  %3499 = vmatprep.subr.bf16.mxu0 %v10750_v2  ;;  %v13226_v61 = vld [vmem:[%s16306_s0 + $0x18] ss:$12 sps:$4 sm:$0x1e]  }
 0x21d   :  { %3579 = vmatprep.subr.bf16.mxu1 %v10751_v4  ;;  %v10772_v2 = vld [vmem:[%s16305_s1 + $0x510] ss:$8 sps:$4 sm:$0xff]  }
 0x21e   :  { %v10773_v4 = vld [vmem:[%s16305_s1 + $0x770] ss:$8 sps:$4 sm:$0xff]  }
 0x21f   :  { %3500 = vmatpush2.bf16.msra.mxu0 %v10752_v7 }
 0x220   :  { %3580 = vmatpush1.bf16.msra.mxu1 %v10753_v8  ;;  %3501 = vmatprep.subr.bf16.mxu0 %v10754_v13  ;;  %v10774_v8 = vld [vmem:[%s16305_s1 + $0x504] ss:$8 sps:$4 sm:$0xff]  }
 0x221   :  { %3581 = vmatprep.subr.bf16.mxu1 %v10755_v18  ;;  %v10775_v13 = vld [vmem:[%s16305_s1 + $0x764] ss:$8 sps:$4 sm:$0xff]  }
 0x222   :  { %v2773_v32 = vpop.f32.mrf.mxu0 }
 0x223   :  { %v2815_v20 = vadd.f32 %v12965_v19, %v2773_v32  ;;  %3502 = vmatpush2.bf16.msra.mxu0 %v10756_v25  ;;  %v10759_v19 = vld [vmem:[%s16305_s1 + $0x7a4] ss:$8 sps:$4 sm:$0xff]   ;;  %v3473_v32 = vrot.slane %v13226_v61, 1  ;;  %v10777_v25 = vld [vmem:[%s16305_s1 + $0x760] ss:$8 sps:$4 sm:$0xff]  }
 0x224   :  { %3582 = vmatpush2.bf16.msra.mxu1 %v10757_v26  ;;  %v2775_v28 = vpop.f32.mrf.mxu0  ;;  %3503 = vmatprep.subr.bf16.mxu0 %v10758_v30  ;;  %v10779_v30 = vld [vmem:[%s16305_s1 + $0x7d4] ss:$8 sps:$4 sm:$0xff]  }
 0x225   :  { %3583 = vmatprep.subr.bf16.mxu1 %v10759_v19  ;;  %v2821_v38 = vadd.f32 %v2815_v20, %v12949_v36  ;;  %v2817_v49 = vadd.f32 %v12973_v50, %v2775_v28  ;;  %v10762_v36 = vld [vmem:[%s16305_s1 + $0x534] ss:$8 sps:$4 sm:$0xff]   ;;  %v10776_v20 = vld [vmem:[%s16305_s1 + $0x500] ss:$8 sps:$4 sm:$0xff]   ;;  %v10780_v19 = vld [vmem:[%s16305_s1 + $0x750] ss:$8 sps:$4 sm:$0xff]  }
 0x226   :  { %v2777_v31 = vpop.f32.mrf.mxu0  ;;  %v10778_v28 = vld [vmem:[%s16305_s1 + $0x754] ss:$8 sps:$4 sm:$0xff]  }
 0x227   :  { %v2822_v48 = vadd.f32 %v2817_v49, %v12951_v15  ;;  %3504 = vmatpush2.bf16.msra.mxu0 %v10760_v57  ;;  %v10763_v15 = vld [vmem:[%s16305_s1 + $0x794] ss:$8 sps:$4 sm:$0xff]   ;;  %v10782_v49 = vld [vmem:[%s16305_s1 + $0x744] ss:$8 sps:$4 sm:$0xff]   ;;  %v10785_v57 = vld [vmem:[%s16305_s1 + $0x7c0] ss:$8 sps:$4 sm:$0xff]  }
 0x228   :  { %3584 = vmatpush2.bf16.msra.mxu1 %v10761_v5  ;;  %v2778_v23 = vpop.f32.mrf.mxu0  ;;  %3505 = vmatprep.subr.bf16.mxu0 %v10762_v36  ;;  %v10783_v31 = vld [vmem:[%s16305_s1 + $0x7c4] ss:$8 sps:$4 sm:$0xff]   ;;  %v10786_v5 = vld [vmem:[%s16305_s1 + $0x614] ss:$8 sps:$4 sm:$0xff]   ;;  %v10788_v36 = vld [vmem:[%s16305_s1 + $0x610] ss:$8 sps:$4 sm:$0xff]  }
 0x229   :  { %3585 = vmatprep.subr.bf16.mxu1 %v10763_v15  ;;  %v10787_v23 = vld [vmem:[%s16305_s1 + $0x6b4] ss:$8 sps:$4 sm:$0xff]   ;;  %v10789_v15 = vld [vmem:[%s16305_s1 + $0x6b0] ss:$8 sps:$4 sm:$0xff]  }
 0x22a   :  { %v3115_v33 = vpop.f32.mrf.mxu0  ;;  %v10027_v61 = vld [vmem:[%s16305_s1 + $0x174] ss:$8 sps:$4 sm:$0xff]  }
 0x22b   :  { %v3074_v50 = vpop.f32.mrf.mxu1  ;;  %3506 = vmatpush2.bf16.msra.mxu0 %v10764_v35  ;;  %v10795_v35 = vld [vmem:[%s16305_s1 + $0x854] ss:$8 sps:$4 sm:$0xff]  }
 0x22c   :  { %v3116_v34 = vadd.f32 %v3115_v33, %v3074_v50  ;;  %3586 = vmatpush2.bf16.msra.mxu1 %v10765_v37  ;;  %v3117_v29 = vpop.f32.mrf.mxu0  ;;  %3507 = vmatprep.subr.bf16.mxu0 %v10766_v56  ;;  %v10790_v50 = vld [vmem:[%s16305_s1 + $0x604] ss:$8 sps:$4 sm:$0xff]   ;;  %v10793_v33 = vld [vmem:[%s16305_s1 + $0x6a0] ss:$8 sps:$4 sm:$0xff]   ;;  %v10797_v37 = vld [vmem:[%s16305_s1 + $0x850] ss:$8 sps:$4 sm:$0xff]  }
 0x22d   :  { %v3076_v11 = vpop.f32.mrf.mxu1  ;;  %3587 = vmatprep.subr.bf16.mxu1 %v10767_v40  ;;  %v10801_v56 = vld [vmem:[%s16305_s1 + $0x840] ss:$8 sps:$4 sm:$0xff]   ;;  %v10802_v40 = vld [vmem:[%s16305_s1 + $0x5d4] ss:$8 sps:$4 sm:$0xff]  }
 0x22e   :  { %v13201_v41 = vadd.f32 %v3116_v34, %v2821_v38  ;;  %v3118_v42 = vadd.f32 %v3117_v29, %v3076_v11  ;;  %v3119_v16 = vpop.f32.mrf.mxu0  ;;  %v10781_v38 = vld [vmem:[%s16305_s1 + $0x7d0] ss:$8 sps:$4 sm:$0xff]   ;;  %v10794_v34 = vld [vmem:[%s16305_s1 + $0x5f4] ss:$8 sps:$4 sm:$0xff]   ;;  %v10798_v11 = vld [vmem:[%s16305_s1 + $0x5e4] ss:$8 sps:$4 sm:$0xff]  }
 0x22f   :  { %v3078_v43 = vpop.f32.mrf.mxu1  ;;  %3508 = vmatpush2.bf16.msra.mxu0 %v10768_v59  ;;  %v10799_v29 = vld [vmem:[%s16305_s1 + $0x844] ss:$8 sps:$4 sm:$0xff]  }
 0x230   :  { %v3981_v3 = vmax.f32 %v12676_v22, %v13201_v41  ;;  %v13205_v47 = vadd.f32 %v3118_v42, %v2822_v48  ;;  %3588 = vmatpush2.bf16.msra.mxu1 %v10769_v51  ;;  %v3120_v54 = vpop.f32.mrf.mxu0  ;;  %3509 = vmatprep.subr.bf16.mxu0 %v10770_v55  ;;  %v10784_v48 = vld [vmem:[%s16305_s1 + $0x740] ss:$8 sps:$4 sm:$0xff]   ;;  %v10803_v42 = vld [vmem:[%s16305_s1 + $0x834] ss:$8 sps:$4 sm:$0xff]   ;;  %v10805_v43 = vld [vmem:[%s16305_s1 + $0x830] ss:$8 sps:$4 sm:$0xff]  }
 0x231   :  { %v3079_v53 = vpop.f32.mrf.mxu1  ;;  %3589 = vmatprep.subr.bf16.mxu1 %v10771_v58  ;;  %v10806_v16 = vld [vmem:[%s16305_s1 + $0x5c4] ss:$8 sps:$4 sm:$0xff]   ;;  %v10808_v51 = vld [vmem:[%s16305_s1 + $0x5c0] ss:$8 sps:$4 sm:$0xff]   ;;  %v10810_v54 = vld [vmem:[%s16305_s1 + $0x5b4] ss:$8 sps:$4 sm:$0xff]  }
 0x232   :  { %v3982_v10 = vmax.f32 %v12680_v27, %v13205_v47  ;;  %v10807_v59 = vld [vmem:[%s16305_s1 + $0x824] ss:$8 sps:$4 sm:$0xff]   ;;  %v10809_v53 = vld [vmem:[%s16305_s1 + $0x820] ss:$8 sps:$4 sm:$0xff]   ;;  %v10811_v55 = vld [vmem:[%s16305_s1 + $0x814] ss:$8 sps:$4 sm:$0xff]  }
 0x233   :  { %v13221_v60 = vpop.f32.mrf.mxu1  ;;  %3510 = vmatpush2.bf16.msra.mxu0 %v10772_v2  ;;  %v10812_v58 = vld [vmem:[%s16305_s1 + $0x5b0] ss:$8 sps:$4 sm:$0xff]   ;;  %v10326_v22 = vld [vmem:[%s16305_s1 + $0x500] ss:$8 sps:$4 sm:$0xff]   ;;  %v10337_v27 = vld [vmem:[%s16305_s1 + $0x754] ss:$8 sps:$4 sm:$0xff]  }
 0x234   :  { %3590 = vmatpush2.bf16.msra.mxu1 %v10773_v4  ;;  %3511 = vmatprep.subr.bf16.mxu0 %v10774_v8  ;;  %v10813_v2 = vld [vmem:[%s16305_s1 + $0x810] ss:$8 sps:$4 sm:$0xff]   ;;  %v10814_v4 = vld [vmem:[%s16305_s1 + $0x5a4] ss:$8 sps:$4 sm:$0xff]   ;;  %v10329_v41 = vld [vmem:[%s16305_s1 + $0x760] ss:$8 sps:$4 sm:$0xff]  }
 0x235   :  { %v13234_v7 = vpop.f32.mrf.mxu1  ;;  %3591 = vmatprep.subr.bf16.mxu1 %v10775_v13  ;;  %v10815_v8 = vld [vmem:[%s16305_s1 + $0x804] ss:$8 sps:$4 sm:$0xff]   ;;  %v10816_v13 = vld [vmem:[%s16305_s1 + $0x5a0] ss:$8 sps:$4 sm:$0xff]   ;;  %v10340_v47 = vld [vmem:[%s16305_s1 + $0x7d4] ss:$8 sps:$4 sm:$0xff]  }
 0x237   :  { %v3203_v18 = vpop.f32.mrf.mxu1  ;;  %3512 = vmatpush2.bf16.msra.mxu0 %v10776_v20  ;;  %v10818_v20 = vld [vmem:[%s16305_s1 + $0x694] ss:$8 sps:$4 sm:$0xff]  }
 0x238   :  { %3592 = vmatpush2.bf16.msra.mxu1 %v10777_v25  ;;  %3618 = vmatprep.subr.bf16.mxu0 %v10779_v30  ;;  %v10817_v18 = vld [vmem:[%s16305_s1 + $0x800] ss:$8 sps:$4 sm:$0xff]   ;;  %v10819_v25 = vld [vmem:[%s16305_s1 + $0x7f4] ss:$8 sps:$4 sm:$0xff]   ;;  %v10822_v30 = vld [vmem:[%s16305_s1 + $0x684] ss:$8 sps:$4 sm:$0xff]  }
 0x239   :  { %v3204_v26 = vpop.f32.mrf.mxu1  ;;  %3593 = vmatprep.subr.bf16.mxu1 %v10778_v28  ;;  %v10821_v28 = vld [vmem:[%s16305_s1 + $0x7f0] ss:$8 sps:$4 sm:$0xff]  }
 0x23a   :  { %3514 = vmatmul.mubr.bf16.vlgmr.msra.gmra.mxu0 %v3473_v32  ;;  %v10820_v26 = vld [vmem:[%s16305_s1 + $0x690] ss:$8 sps:$4 sm:$0xff]  }
 0x23b   :  { %3619 = vmatpush1.bf16.msra.mxu0 %v10781_v38  ;;  %3638 = vmatprep.mubr.bf16.mxu0 %v11292_v1  ;;  %v10824_v38 = vld [vmem:[%s16305_s1 + $0x680] ss:$8 sps:$4 sm:$0xff]  }
 0x23c   :  { %3594 = vmatpush2.bf16.msra.mxu1 %v10780_v19  ;;  %3620 = vmatprep.subr.bf16.mxu0 %v10783_v31  ;;  %v10823_v19 = vld [vmem:[%s16305_s1 + $0x7e4] ss:$8 sps:$4 sm:$0xff]   ;;  %v10826_v31 = vld [vmem:[%s16305_s1 + $0x674] ss:$8 sps:$4 sm:$0xff]  }
 0x23d   :  { %3595 = vmatprep.subr.bf16.mxu1 %v10782_v49  ;;  %v10825_v49 = vld [vmem:[%s16305_s1 + $0x7e0] ss:$8 sps:$4 sm:$0xff]  }
 0x23f   :  { %3621 = vmatpush1.bf16.msra.mxu0 %v10785_v57 }
 0x240   :  { %3596 = vmatpush2.bf16.msra.mxu1 %v10784_v48  ;;  %3647 = vmatprep.subr.bf16.mxu0 %v10786_v5  ;;  %v10827_v48 = vld [vmem:[%s16305_s1 + $0x8d4] ss:$8 sps:$4 sm:$0xff]  }
 0x241   :  { %3700 = vmatprep.subr.bf16.mxu1 %v10787_v23  ;;  %v10828_v23 = vld [vmem:[%s16305_s1 + $0x670] ss:$8 sps:$4 sm:$0xff]  }
 0x242   :  { %8719 = vmatmul.mubr.msk.bf16.vlgmr.msra.gmra.mxu0 %vm284_vm0, %v11598_v39  ;;  %v10792_v39 = vld [vmem:[%s16305_s1 + $0x600] ss:$8 sps:$4 sm:$0xff]  }
 0x243   :  { %3598 = vmatmul.mubr.bf16.vlgmr.msra.gmra.mxu1 %v11776_v46  ;;  %3648 = vmatpush1.bf16.msra.mxu0 %v10788_v36  ;;  %v10791_v46 = vld [vmem:[%s16305_s1 + $0x6a4] ss:$8 sps:$4 sm:$0xff]   ;;  %v10829_v36 = vld [vmem:[%s16305_s1 + $0x8d0] ss:$8 sps:$4 sm:$0xff]  }
 0x244   :  { %3701 = vmatpush1.bf16.msra.mxu1 %v10789_v15  ;;  %3649 = vmatprep.subr.bf16.mxu0 %v10790_v50  ;;  %v10830_v50 = vld [vmem:[%s16305_s1 + $0x664] ss:$8 sps:$4 sm:$0xff]  }
 0x245   :  { %3702 = vmatprep.subr.bf16.mxu1 %v10791_v46  ;;  %3720 = vmatprep.mubr.bf16.mxu1 %v11292_v1 }
 0x246   :  { %3679 = vmatprep.mubr.bf16.mxu0 %v11471_v52  ;;  %v10796_v52 = vld [vmem:[%s16305_s1 + $0x5f0] ss:$8 sps:$4 sm:$0xff]  }
 0x247   :  { %3650 = vmatpush1.bf16.msra.mxu0 %v10792_v39 }
 0x248   :  { %3703 = vmatpush1.bf16.msra.mxu1 %v10793_v33  ;;  %3651 = vmatprep.subr.bf16.mxu0 %v10794_v34  ;;  %v10832_v33 = vld [vmem:[%s16305_s1 + $0x660] ss:$8 sps:$4 sm:$0xff]  }
 0x249   :  { %3729 = vmatprep.subr.bf16.mxu1 %v10795_v35  ;;  %v10833_v34 = vld [vmem:[%s16305_s1 + $0x8c0] ss:$8 sps:$4 sm:$0xff]  }
 0x24b   :  { %8720 = vmatmul.mubr.msk.bf16.vlgmr.msra.gmra.mxu1 %vm284_vm0, %v12780_v17  ;;  %3652 = vmatpush1.bf16.msra.mxu0 %v10796_v52  ;;  %v10800_v17 = vld [vmem:[%s16305_s1 + $0x5e0] ss:$8 sps:$4 sm:$0xff]   ;;  %v10834_v52 = vld [vmem:[%s16305_s1 + $0x654] ss:$8 sps:$4 sm:$0xff]  }
 0x24c   :  { %3730 = vmatpush1.bf16.msra.mxu1 %v10797_v37  ;;  %3653 = vmatprep.subr.bf16.mxu0 %v10798_v11 }
 0x24d   :  { %3731 = vmatprep.subr.bf16.mxu1 %v10799_v29  ;;  %3761 = vmatprep.mubr.bf16.mxu1 %v11612_v44  ;;  %v10804_v44 = vld [vmem:[%s16305_s1 + $0x5d0] ss:$8 sps:$4 sm:$0xff]  }
 0x24f   :  { %3654 = vmatpush1.bf16.msra.mxu0 %v10800_v17  ;;  %v10836_v17 = vld [vmem:[%s16305_s1 + $0x650] ss:$8 sps:$4 sm:$0xff]  }
 0x250   :  { %3732 = vmatpush1.bf16.msra.mxu1 %v10801_v56  ;;  %3655 = vmatprep.subr.bf16.mxu0 %v10802_v40  ;;  %v10837_v56 = vld [vmem:[%s16305_s1 + $0x8b0] ss:$8 sps:$4 sm:$0xff]  }
 0x251   :  { %3733 = vmatprep.subr.bf16.mxu1 %v10803_v42 }
 0x253   :  { %3656 = vmatpush1.bf16.msra.mxu0 %v10804_v44  ;;  %v10838_v44 = vld [vmem:[%s16305_s1 + $0x644] ss:$8 sps:$4 sm:$0xff]  }
 0x254   :  { %3734 = vmatpush1.bf16.msra.mxu1 %v10805_v43  ;;  %3657 = vmatprep.subr.bf16.mxu0 %v10806_v16  ;;  %v10839_v43 = vld [vmem:[%s16305_s1 + $0x8a4] ss:$8 sps:$4 sm:$0xff]  }
 0x255   :  { %3735 = vmatprep.subr.bf16.mxu1 %v10807_v59 }
 0x257   :  { %3658 = vmatpush1.bf16.msra.mxu0 %v10808_v51 }
 0x258   :  { %3736 = vmatpush1.bf16.msra.mxu1 %v10809_v53  ;;  %3659 = vmatprep.subr.bf16.mxu0 %v10810_v54 }
 0x259   :  { %3737 = vmatprep.subr.bf16.mxu1 %v10811_v55  ;;  %v10840_v55 = vld [vmem:[%s16305_s1 + $0x640] ss:$8 sps:$4 sm:$0xff]  }
 0x25b   :  { %3660 = vmatpush1.bf16.msra.mxu0 %v10812_v58  ;;  %v10841_v58 = vld [vmem:[%s16305_s1 + $0x8a0] ss:$8 sps:$4 sm:$0xff]  }
 0x25c   :  { %3738 = vmatpush1.bf16.msra.mxu1 %v10813_v2  ;;  %3661 = vmatprep.subr.bf16.mxu0 %v10814_v4 }
 0x25d   :  { %3739 = vmatprep.subr.bf16.mxu1 %v10815_v8  ;;  %v10842_v8 = vld [vmem:[%s16305_s1 + $0x634] ss:$8 sps:$4 sm:$0xff]  }
 0x25f   :  { %3662 = vmatpush1.bf16.msra.mxu0 %v10816_v13  ;;  %v10843_v13 = vld [vmem:[%s16305_s1 + $0x894] ss:$8 sps:$4 sm:$0xff]  }
 0x260   :  { %3740 = vmatpush1.bf16.msra.mxu1 %v10817_v18  ;;  %3663 = vmatprep.subr.bf16.mxu0 %v10818_v20  ;;  %v10844_v20 = vld [vmem:[%s16305_s1 + $0x630] ss:$8 sps:$4 sm:$0xff]  }
 0x261   :  { %3741 = vmatprep.subr.bf16.mxu1 %v10819_v25  ;;  %v10845_v25 = vld [vmem:[%s16305_s1 + $0x890] ss:$8 sps:$4 sm:$0xff]  }
 0x263   :  { %3664 = vmatpush2.bf16.msra.mxu0 %v10820_v26 }
 0x264   :  { %3742 = vmatpush1.bf16.msra.mxu1 %v10821_v28  ;;  %3665 = vmatprep.subr.bf16.mxu0 %v10822_v30  ;;  %v10846_v28 = vld [vmem:[%s16305_s1 + $0x624] ss:$8 sps:$4 sm:$0xff]  }
 0x265   :  { %3743 = vmatprep.subr.bf16.mxu1 %v10823_v19  ;;  %v10847_v30 = vld [vmem:[%s16305_s1 + $0x884] ss:$8 sps:$4 sm:$0xff]  }
 0x267   :  { %3666 = vmatpush2.bf16.msra.mxu0 %v10824_v38  ;;  %v10848_v38 = vld [vmem:[%s16305_s1 + $0x620] ss:$8 sps:$4 sm:$0xff]  }
 0x268   :  { %3744 = vmatpush1.bf16.msra.mxu1 %v10825_v49  ;;  %3667 = vmatprep.subr.bf16.mxu0 %v10826_v31  ;;  %v10849_v49 = vld [vmem:[%s16305_s1 + $0x880] ss:$8 sps:$4 sm:$0xff]  }
 0x269   :  { %3745 = vmatprep.subr.bf16.mxu1 %v10827_v48  ;;  %v10850_v48 = vld [vmem:[%s16305_s1 + $0x874] ss:$8 sps:$4 sm:$0xff]  }
 0x26a   :  { %v3158_v57 = vpop.f32.mrf.mxu0 }
 0x26b   :  { %v3200_v5 = vadd.f32 %v13221_v60, %v3158_v57  ;;  %3668 = vmatpush2.bf16.msra.mxu0 %v10828_v23  ;;  %v10831_v60 = vld [vmem:[%s16305_s1 + $0x8c4] ss:$8 sps:$4 sm:$0xff]   ;;  %v10851_v57 = vld [vmem:[%s16305_s1 + $0x8f4] ss:$8 sps:$4 sm:$0xff]   ;;  %v10853_v23 = vld [vmem:[%s16305_s1 + $0x8f0] ss:$8 sps:$4 sm:$0xff]  }
 0x26c   :  { %3746 = vmatpush2.bf16.msra.mxu1 %v10829_v36  ;;  %v3160_v15 = vpop.f32.mrf.mxu0  ;;  %3669 = vmatprep.subr.bf16.mxu0 %v10830_v50  ;;  %v10854_v36 = vld [vmem:[%s16305_s1 + $0x864] ss:$8 sps:$4 sm:$0xff]   ;;  %v10857_v50 = vld [vmem:[%s16305_s1 + $0x8e0] ss:$8 sps:$4 sm:$0xff]  }
 0x26d   :  { %3747 = vmatprep.subr.bf16.mxu1 %v10831_v60  ;;  %v3202_v46 = vadd.f32 %v13234_v7, %v3160_v15  ;;  %v10835_v7 = vld [vmem:[%s16305_s1 + $0x8b4] ss:$8 sps:$4 sm:$0xff]   ;;  %v10855_v15 = vld [vmem:[%s16305_s1 + $0x8e4] ss:$8 sps:$4 sm:$0xff]  }
 0x26e   :  { %v3162_v39 = vpop.f32.mrf.mxu0  ;;  %v10858_v60 = vld [vmem:[%s16305_s1 + $0x974] ss:$8 sps:$4 sm:$0xff]  }
 0x26f   :  { %3670 = vmatpush2.bf16.msra.mxu0 %v10832_v33  ;;  %v10860_v39 = vld [vmem:[%s16305_s1 + $0x970] ss:$8 sps:$4 sm:$0xff]  }
 0x270   :  { %3748 = vmatpush2.bf16.msra.mxu1 %v10833_v34  ;;  %v3163_v35 = vpop.f32.mrf.mxu0  ;;  %3671 = vmatprep.subr.bf16.mxu0 %v10834_v52  ;;  %v10861_v33 = vld [vmem:[%s16305_s1 + $0xa10] ss:$8 sps:$4 sm:$0xff]   ;;  %v10862_v34 = vld [vmem:[%s16305_s1 + $0x964] ss:$8 sps:$4 sm:$0xff]   ;;  %v10866_v52 = vld [vmem:[%s16305_s1 + $0x954] ss:$8 sps:$4 sm:$0xff]  }
 0x271   :  { %3749 = vmatprep.subr.bf16.mxu1 %v10835_v7  ;;  %v10865_v35 = vld [vmem:[%s16305_s1 + $0xa00] ss:$8 sps:$4 sm:$0xff]   ;;  %v10867_v7 = vld [vmem:[%s16305_s1 + $0xa94] ss:$8 sps:$4 sm:$0xff]  }
 0x272   :  { %v3281_v11 = vpop.f32.mrf.mxu0 }
 0x273   :  { %v3240_v37 = vpop.f32.mrf.mxu1  ;;  %3672 = vmatpush2.bf16.msra.mxu0 %v10836_v17  ;;  %v10873_v17 = vld [vmem:[%s16305_s1 + $0xa80] ss:$8 sps:$4 sm:$0xff]  }
 0x274   :  { %v3241_v29 = vadd.f32 %v3240_v37, %v3200_v5  ;;  %3750 = vmatpush2.bf16.msra.mxu1 %v10837_v56  ;;  %v3283_v42 = vpop.f32.mrf.mxu0  ;;  %3673 = vmatprep.subr.bf16.mxu0 %v10838_v44  ;;  %v10852_v5 = vld [vmem:[%s16305_s1 + $0x870] ss:$8 sps:$4 sm:$0xff]   ;;  %v10874_v56 = vld [vmem:[%s16305_s1 + $0x934] ss:$8 sps:$4 sm:$0xff]   ;;  %v10879_v44 = vld [vmem:[%s16305_s1 + $0xa64] ss:$8 sps:$4 sm:$0xff]  }
 0x275   :  { %v3242_v40 = vpop.f32.mrf.mxu1  ;;  %3751 = vmatprep.subr.bf16.mxu1 %v10839_v43  ;;  %v10869_v37 = vld [vmem:[%s16305_s1 + $0xa90] ss:$8 sps:$4 sm:$0xff]   ;;  %v10880_v43 = vld [vmem:[%s16305_s1 + $0x920] ss:$8 sps:$4 sm:$0xff]  }
 0x276   :  { %v13448_v16 = vadd.f32 %v3281_v11, %v3241_v29  ;;  %v3243_v59 = vadd.f32 %v3242_v40, %v3202_v46  ;;  %v3285_v53 = vpop.f32.mrf.mxu0  ;;  %v10859_v46 = vld [vmem:[%s16305_s1 + $0xa14] ss:$8 sps:$4 sm:$0xff]   ;;  %v10870_v11 = vld [vmem:[%s16305_s1 + $0x944] ss:$8 sps:$4 sm:$0xff]   ;;  %v10877_v40 = vld [vmem:[%s16305_s1 + $0xa70] ss:$8 sps:$4 sm:$0xff]  }
 0x277   :  { %v3244_v51 = vpop.f32.mrf.mxu1  ;;  %3674 = vmatpush2.bf16.msra.mxu0 %v10840_v55  ;;  %v10871_v29 = vld [vmem:[%s16305_s1 + $0xa84] ss:$8 sps:$4 sm:$0xff]   ;;  %v10883_v53 = vld [vmem:[%s16305_s1 + $0xa54] ss:$8 sps:$4 sm:$0xff]   ;;  %v10884_v55 = vld [vmem:[%s16305_s1 + $0x910] ss:$8 sps:$4 sm:$0xff]  }
 0x278   :  { %v13450_v54 = vadd.f32 %v3283_v42, %v3243_v59  ;;  %3752 = vmatpush2.bf16.msra.mxu1 %v10841_v58  ;;  %v3286_v4 = vpop.f32.mrf.mxu0  ;;  %3675 = vmatprep.subr.bf16.mxu0 %v10842_v8  ;;  %v10878_v42 = vld [vmem:[%s16305_s1 + $0x924] ss:$8 sps:$4 sm:$0xff]   ;;  %v10881_v59 = vld [vmem:[%s16305_s1 + $0xa60] ss:$8 sps:$4 sm:$0xff]   ;;  %v10882_v51 = vld [vmem:[%s16305_s1 + $0x914] ss:$8 sps:$4 sm:$0xff]  }
 0x279   :  { %v3245_v2 = vpop.f32.mrf.mxu1  ;;  %3753 = vmatprep.subr.bf16.mxu1 %v10843_v13  ;;  %v10885_v58 = vld [vmem:[%s16305_s1 + $0xa50] ss:$8 sps:$4 sm:$0xff]   ;;  %v10887_v4 = vld [vmem:[%s16305_s1 + $0xa44] ss:$8 sps:$4 sm:$0xff]   ;;  %v10888_v8 = vld [vmem:[%s16305_s1 + $0x900] ss:$8 sps:$4 sm:$0xff]  }
 0x27a   :  { %v10886_v2 = vld [vmem:[%s16305_s1 + $0x904] ss:$8 sps:$4 sm:$0xff]   ;;  %v10889_v13 = vld [vmem:[%s16305_s1 + $0xa40] ss:$8 sps:$4 sm:$0xff]  }
 0x27b   :  { %v13464_v18 = vpop.f32.mrf.mxu1  ;;  %3676 = vmatpush2.bf16.msra.mxu0 %v10844_v20  ;;  %v10890_v20 = vld [vmem:[%s16305_s1 + $0x9f4] ss:$8 sps:$4 sm:$0xff]  }
 0x27c   :  { %3754 = vmatpush2.bf16.msra.mxu1 %v10845_v25  ;;  %3677 = vmatprep.subr.bf16.mxu0 %v10846_v28  ;;  %v10891_v25 = vld [vmem:[%s16305_s1 + $0xa34] ss:$8 sps:$4 sm:$0xff]   ;;  %v10892_v28 = vld [vmem:[%s16305_s1 + $0x9f0] ss:$8 sps:$4 sm:$0xff]  }
 0x27d   :  { %v13472_v26 = vpop.f32.mrf.mxu1  ;;  %3755 = vmatprep.subr.bf16.mxu1 %v10847_v30  ;;  %v10893_v30 = vld [vmem:[%s16305_s1 + $0xa30] ss:$8 sps:$4 sm:$0xff]  }
 0x27f   :  { %v3367_v19 = vpop.f32.mrf.mxu1  ;;  %3678 = vmatpush2.bf16.msra.mxu0 %v10848_v38  ;;  %v10895_v38 = vld [vmem:[%s16305_s1 + $0xa24] ss:$8 sps:$4 sm:$0xff]  }
 0x280   :  { %3756 = vmatpush2.bf16.msra.mxu1 %v10849_v49  ;;  %3782 = vmatprep.subr.bf16.mxu0 %v10851_v57  ;;  %v10894_v19 = vld [vmem:[%s16305_s1 + $0x9e4] ss:$8 sps:$4 sm:$0xff]   ;;  %v10896_v49 = vld [vmem:[%s16305_s1 + $0x9e0] ss:$8 sps:$4 sm:$0xff]   ;;  %v10899_v57 = vld [vmem:[%s16305_s1 + $0xb14] ss:$8 sps:$4 sm:$0xff]  }
 0x281   :  { %v3368_v31 = vpop.f32.mrf.mxu1  ;;  %3757 = vmatprep.subr.bf16.mxu1 %v10850_v48  ;;  %v10898_v48 = vld [vmem:[%s16305_s1 + $0x9d4] ss:$8 sps:$4 sm:$0xff]  }
 0x282   :  { %3680 = vmatmul.mubr.bf16.vlgmr.msra.gmra.mxu0 %v11531_v9  ;;  %v10856_v9 = vld [vmem:[%s16305_s1 + $0x860] ss:$8 sps:$4 sm:$0xff]  }
 0x283   :  { %3783 = vmatpush1.bf16.msra.mxu0 %v10853_v23  ;;  %3802 = vmatprep.mubr.bf16.mxu0 %v11292_v1  ;;  %v10897_v31 = vld [vmem:[%s16305_s1 + $0xa20] ss:$8 sps:$4 sm:$0xff]  }
 0x284   :  { %3758 = vmatpush2.bf16.msra.mxu1 %v10852_v5  ;;  %3784 = vmatprep.subr.bf16.mxu0 %v10855_v15  ;;  %v10901_v15 = vld [vmem:[%s16305_s1 + $0xb10] ss:$8 sps:$4 sm:$0xff]  }
 0x285   :  { %3759 = vmatprep.subr.bf16.mxu1 %v10854_v36  ;;  %v10900_v36 = vld [vmem:[%s16305_s1 + $0x9d0] ss:$8 sps:$4 sm:$0xff]  }
 0x287   :  { %3785 = vmatpush1.bf16.msra.mxu0 %v10857_v50  ;;  %v10902_v50 = vld [vmem:[%s16305_s1 + $0x9c4] ss:$8 sps:$4 sm:$0xff]  }
 0x288   :  { %3760 = vmatpush2.bf16.msra.mxu1 %v10856_v9  ;;  %3813 = vmatprep.subr.bf16.mxu0 %v10858_v60 }
 0x289   :  { %3866 = vmatprep.subr.bf16.mxu1 %v10859_v46 }
 0x28a   :  { %8721 = vmatmul.mubr.msk.bf16.vlgmr.msra.gmra.mxu0 %vm284_vm0, %v11812_v63  ;;  %v10864_v63 = vld [vmem:[%s16305_s1 + $0x960] ss:$8 sps:$4 sm:$0xff]  }
 0x28b   :  { %3762 = vmatmul.mubr.bf16.vlgmr.msra.gmra.mxu1 %v11810_v62  ;;  %3814 = vmatpush1.bf16.msra.mxu0 %v10860_v39  ;;  %v10863_v62 = vld [vmem:[%s16305_s1 + $0xa04] ss:$8 sps:$4 sm:$0xff]  }
 0x28c   :  { %3867 = vmatpush1.bf16.msra.mxu1 %v10861_v33  ;;  %3815 = vmatprep.subr.bf16.mxu0 %v10862_v34  ;;  %v10904_v34 = vld [vmem:[%s16305_s1 + $0x9c0] ss:$8 sps:$4 sm:$0xff]  }
 0x28d   :  { %3868 = vmatprep.subr.bf16.mxu1 %v10863_v62  ;;  %3886 = vmatprep.mubr.bf16.mxu1 %v11292_v1  ;;  %v10905_v62 = vld [vmem:[%s16305_s1 + $0xb00] ss:$8 sps:$4 sm:$0xff]  }
 0x28e   :  { %3845 = vmatprep.mubr.bf16.mxu0 %v11829_v6  ;;  %v10868_v6 = vld [vmem:[%s16305_s1 + $0x950] ss:$8 sps:$4 sm:$0xff]  }
 0x28f   :  { %3816 = vmatpush1.bf16.msra.mxu0 %v10864_v63 }
 0x290   :  { %3869 = vmatpush1.bf16.msra.mxu1 %v10865_v35  ;;  %3817 = vmatprep.subr.bf16.mxu0 %v10866_v52 }
 0x291   :  { %3897 = vmatprep.subr.bf16.mxu1 %v10867_v7  ;;  %v10908_v7 = vld [vmem:[%s16305_s1 + $0x9b0] ss:$8 sps:$4 sm:$0xff]  }
 0x293   :  { %8722 = vmatmul.mubr.msk.bf16.vlgmr.msra.gmra.mxu1 %vm284_vm0, %v11851_v14  ;;  %3818 = vmatpush1.bf16.msra.mxu0 %v10868_v6  ;;  %v10872_v14 = vld [vmem:[%s16305_s1 + $0x940] ss:$8 sps:$4 sm:$0xff]   ;;  %v10909_v6 = vld [vmem:[%s16305_s1 + $0xaf0] ss:$8 sps:$4 sm:$0xff]  }
 0x294   :  { %3898 = vmatpush1.bf16.msra.mxu1 %v10869_v37  ;;  %3819 = vmatprep.subr.bf16.mxu0 %v10870_v11 }
 0x295   :  { %3899 = vmatprep.subr.bf16.mxu1 %v10871_v29  ;;  %3929 = vmatprep.mubr.bf16.mxu1 %v3474_v21  ;;  %v10876_v21 = vld [vmem:[%s16305_s1 + $0x930] ss:$8 sps:$4 sm:$0xff]   ;;  %v10910_v29 = vld [vmem:[%s16305_s1 + $0x9a4] ss:$8 sps:$4 sm:$0xff]  }
 0x297   :  { %3820 = vmatpush1.bf16.msra.mxu0 %v10872_v14  ;;  %v10911_v14 = vld [vmem:[%s16305_s1 + $0xae4] ss:$8 sps:$4 sm:$0xff]  }
 0x298   :  { %3900 = vmatpush1.bf16.msra.mxu1 %v10873_v17  ;;  %3821 = vmatprep.subr.bf16.mxu0 %v10874_v56 }
 0x299   :  { %3901 = vmatprep.subr.bf16.mxu1 %v10875_v12 }
 0x29b   :  { %3822 = vmatpush1.bf16.msra.mxu0 %v10876_v21 }
 0x29c   :  { %3902 = vmatpush1.bf16.msra.mxu1 %v10877_v40  ;;  %3823 = vmatprep.subr.bf16.mxu0 %v10878_v42  ;;  %v10912_v42 = vld [vmem:[%s16305_s1 + $0x9a0] ss:$8 sps:$4 sm:$0xff]  }
 0x29d   :  { %3903 = vmatprep.subr.bf16.mxu1 %v10879_v44  ;;  %v10913_v44 = vld [vmem:[%s16305_s1 + $0xae0] ss:$8 sps:$4 sm:$0xff]  }
 0x29f   :  { %3824 = vmatpush1.bf16.msra.mxu0 %v10880_v43 }
 0x2a0   :  { %3904 = vmatpush1.bf16.msra.mxu1 %v10881_v59  ;;  %3825 = vmatprep.subr.bf16.mxu0 %v10882_v51  ;;  %v10914_v51 = vld [vmem:[%s16305_s1 + $0x994] ss:$8 sps:$4 sm:$0xff]  }
 0x2a1   :  { %3905 = vmatprep.subr.bf16.mxu1 %v10883_v53  ;;  %v10915_v53 = vld [vmem:[%s16305_s1 + $0xad4] ss:$8 sps:$4 sm:$0xff]  }
 0x2a3   :  { %3826 = vmatpush1.bf16.msra.mxu0 %v10884_v55 }
 0x2a4   :  { %3906 = vmatpush1.bf16.msra.mxu1 %v10885_v58  ;;  %3827 = vmatprep.subr.bf16.mxu0 %v10886_v2  ;;  %v10916_v58 = vld [vmem:[%s16305_s1 + $0x990] ss:$8 sps:$4 sm:$0xff]  }
 0x2a5   :  { %3907 = vmatprep.subr.bf16.mxu1 %v10887_v4  ;;  %v10917_v2 = vld [vmem:[%s16305_s1 + $0xad0] ss:$8 sps:$4 sm:$0xff]  }
 0x2a7   :  { %3828 = vmatpush1.bf16.msra.mxu0 %v10888_v8  ;;  %v10918_v8 = vld [vmem:[%s16305_s1 + $0x984] ss:$8 sps:$4 sm:$0xff]  }
 0x2a8   :  { %3908 = vmatpush1.bf16.msra.mxu1 %v10889_v13  ;;  %3829 = vmatprep.subr.bf16.mxu0 %v10890_v20  ;;  %v10919_v13 = vld [vmem:[%s16305_s1 + $0xac4] ss:$8 sps:$4 sm:$0xff]  }
 0x2a9   :  { %3909 = vmatprep.subr.bf16.mxu1 %v10891_v25  ;;  %v10920_v25 = vld [vmem:[%s16305_s1 + $0x980] ss:$8 sps:$4 sm:$0xff]  }
 0x2ab   :  { %3830 = vmatpush2.bf16.msra.mxu0 %v10892_v28  ;;  %v10921_v28 = vld [vmem:[%s16305_s1 + $0xac0] ss:$8 sps:$4 sm:$0xff]  }
 0x2ac   :  { %3910 = vmatpush1.bf16.msra.mxu1 %v10893_v30  ;;  %3831 = vmatprep.subr.bf16.mxu0 %v10894_v19  ;;  %v10922_v19 = vld [vmem:[%s16305_s1 + $0xab4] ss:$8 sps:$4 sm:$0xff]  }
 0x2ad   :  { %3911 = vmatprep.subr.bf16.mxu1 %v10895_v38  ;;  %v10923_v38 = vld [vmem:[%s16305_s1 + $0xb34] ss:$8 sps:$4 sm:$0xff]  }
 0x2af   :  { %3832 = vmatpush2.bf16.msra.mxu0 %v10896_v49  ;;  %v10924_v49 = vld [vmem:[%s16305_s1 + $0xab0] ss:$8 sps:$4 sm:$0xff]  }
 0x2b0   :  { %3912 = vmatpush1.bf16.msra.mxu1 %v10897_v31  ;;  %3833 = vmatprep.subr.bf16.mxu0 %v10898_v48  ;;  %v10925_v31 = vld [vmem:[%s16305_s1 + $0xb30] ss:$8 sps:$4 sm:$0xff]   ;;  %v10926_v48 = vld [vmem:[%s16305_s1 + $0xaa4] ss:$8 sps:$4 sm:$0xff]  }
 0x2b1   :  { %3913 = vmatprep.subr.bf16.mxu1 %v10899_v57  ;;  %v10927_v57 = vld [vmem:[%s16305_s1 + $0xb24] ss:$8 sps:$4 sm:$0xff]  }
 0x2b2   :  { %v3322_v5 = vpop.f32.mrf.mxu0 }
 0x2b3   :  { %v3364_v23 = vadd.f32 %v13464_v18, %v3322_v5  ;;  %3834 = vmatpush2.bf16.msra.mxu0 %v10900_v36  ;;  %v10903_v18 = vld [vmem:[%s16305_s1 + $0xb04] ss:$8 sps:$4 sm:$0xff]   ;;  %v10018_v5 = vld [vmem:[%s16305_s1 + $0x234] ss:$8 sps:$4 sm:$0xff]   ;;  %v10928_v36 = vld [vmem:[%s16305_s1 + $0xaa0] ss:$8 sps:$4 sm:$0xff]  }
 0x2b4   :  { %3914 = vmatpush2.bf16.msra.mxu1 %v10901_v15  ;;  %v3324_v9 = vpop.f32.mrf.mxu0  ;;  %3835 = vmatprep.subr.bf16.mxu0 %v10902_v50  ;;  %v10929_v15 = vld [vmem:[%s16305_s1 + $0xb20] ss:$8 sps:$4 sm:$0xff]   ;;  %v10016_v50 = vld [vmem:[%s16305_s1 + $0x230] ss:$8 sps:$4 sm:$0xff]  }
 0x2b5   :  { %3915 = vmatprep.subr.bf16.mxu1 %v10903_v18  ;;  %v3370_v60 = vadd.f32 %v3364_v23, %v13448_v16  ;;  %v3366_v46 = vadd.f32 %v13472_v26, %v3324_v9  ;;  %v10906_v16 = vld [vmem:[%s16305_s1 + $0x9b4] ss:$8 sps:$4 sm:$0xff]   ;;  %v13754_v23 = vld [vmem:[%s16306_s0 + $0x48] sm:$0xff]  ;;  %v10013_v9 = vld [vmem:[%s16305_s1 + $0x190] ss:$8 sps:$4 sm:$0xff]  }
 0x2b6   :  { %v3326_v39 = vpop.f32.mrf.mxu0  ;;  %v10021_v18 = vld [vmem:[%s16305_s1 + $0x184] ss:$8 sps:$4 sm:$0xff]  }
 0x2b7   :  { %v3371_v33 = vadd.f32 %v3366_v46, %v13450_v54  ;;  %3836 = vmatpush2.bf16.msra.mxu0 %v10904_v34  ;;  %v10907_v54 = vld [vmem:[%s16305_s1 + $0xaf4] ss:$8 sps:$4 sm:$0xff]   ;;  %v13776_v46 = vcombine.high %v13754_v23, %v13754_v23  ;;  %v10019_v39 = vld [vmem:[%s16305_s1 + $0x180] ss:$8 sps:$4 sm:$0xff]   ;;  %v10025_v34 = vld [vmem:[%s16305_s1 + $0x170] ss:$8 sps:$4 sm:$0xff]  }
 0x2b8   :  { %3916 = vmatpush2.bf16.msra.mxu1 %v10905_v62  ;;  %v3327_v63 = vpop.f32.mrf.mxu0  ;;  %3837 = vmatprep.subr.bf16.mxu0 %v10906_v16  ;;  %v10029_v62 = vld [vmem:[%s16305_s1 + $0x70] ss:$8 sps:$4 sm:$0xff]   ;;  %v10037_v16 = vld [vmem:[%s16305_s1 + $0x64] ss:$8 sps:$4 sm:$0xff]  }
 0x2b9   :  { %3917 = vmatprep.subr.bf16.mxu1 %v10907_v54  ;;  %v10034_v63 = vld [vmem:[%s16305_s1 + $0x164] ss:$8 sps:$4 sm:$0xff]  }
 0x2ba   :  { %v3447_v35 = vpop.f32.mrf.mxu0 }
 0x2bb   :  { %v3406_v26 = vpop.f32.mrf.mxu1  ;;  %3838 = vmatpush2.bf16.msra.mxu0 %v10908_v7  ;;  %v10043_v7 = vld [vmem:[%s16305_s1 + $0x54] ss:$8 sps:$4 sm:$0xff]  }
 0x2bc   :  { %v3448_v52 = vadd.f32 %v3447_v35, %v3406_v26  ;;  %3918 = vmatpush2.bf16.msra.mxu1 %v10909_v6  ;;  %v3449_v11 = vpop.f32.mrf.mxu0  ;;  %3839 = vmatprep.subr.bf16.mxu0 %v10910_v29  ;;  %v10032_v26 = vld [vmem:[%s16305_s1 + $0x160] ss:$8 sps:$4 sm:$0xff]   ;;  %v10038_v6 = vld [vmem:[%s16305_s1 + $0x150] ss:$8 sps:$4 sm:$0xff]   ;;  %v10049_v29 = vld [vmem:[%s16305_s1 + $0x44] ss:$8 sps:$4 sm:$0xff]  }
 0x2bd   :  { %v3408_v37 = vpop.f32.mrf.mxu1  ;;  %3919 = vmatprep.subr.bf16.mxu1 %v10911_v14  ;;  %v10035_v35 = vld [vmem:[%s16305_s1 + $0x60] ss:$8 sps:$4 sm:$0xff]  }
 0x2be   :  { %v13687_v17 = vadd.f32 %v3448_v52, %v3370_v60  ;;  %v3450_v56 = vadd.f32 %v3449_v11, %v3408_v37  ;;  %v3451_v21 = vpop.f32.mrf.mxu0  ;;  %v10024_v60 = vld [vmem:[%s16305_s1 + $0x224] ss:$8 sps:$4 sm:$0xff]   ;;  %v10040_v52 = vld [vmem:[%s16305_s1 + $0x154] ss:$8 sps:$4 sm:$0xff]   ;;  %v10041_v37 = vld [vmem:[%s16305_s1 + $0x50] ss:$8 sps:$4 sm:$0xff]  }
 0x2bf   :  { %v3410_v12 = vpop.f32.mrf.mxu1  ;;  %3840 = vmatpush2.bf16.msra.mxu0 %v10912_v42  ;;  %v10046_v11 = vld [vmem:[%s16305_s1 + $0x144] ss:$8 sps:$4 sm:$0xff]   ;;  %v10044_v14 = vld [vmem:[%s16305_s1 + $0x140] ss:$8 sps:$4 sm:$0xff]   ;;  %v10055_v21 = vld [vmem:[%s16305_s1 + $0x34] ss:$8 sps:$4 sm:$0xff]  }
 0x2c0   :  { %v13689_v40 = vadd.f32 %v3450_v56, %v3371_v33  ;;  %3920 = vmatpush2.bf16.msra.mxu1 %v10913_v44  ;;  %v3452_v59 = vpop.f32.mrf.mxu0  ;;  %3841 = vmatprep.subr.bf16.mxu0 %v10914_v51  ;;  %v10022_v33 = vld [vmem:[%s16305_s1 + $0x220] ss:$8 sps:$4 sm:$0xff]   ;;  %v10052_v12 = vld [vmem:[%s16305_s1 + $0x134] ss:$8 sps:$4 sm:$0xff]   ;;  %v10050_v42 = vld [vmem:[%s16305_s1 + $0x130] ss:$8 sps:$4 sm:$0xff]  }
 0x2c1   :  { %v3411_v43 = vpop.f32.mrf.mxu1  ;;  %3921 = vmatprep.subr.bf16.mxu1 %v10915_v53  ;;  %v10047_v56 = vld [vmem:[%s16305_s1 + $0x40] ss:$8 sps:$4 sm:$0xff]   ;;  %v10053_v44 = vld [vmem:[%s16305_s1 + $0x30] ss:$8 sps:$4 sm:$0xff]   ;;  %v10061_v59 = vld [vmem:[%s16305_s1 + $0x24] ss:$8 sps:$4 sm:$0xff]  }
 0x2c2   :  { %v10058_v43 = vld [vmem:[%s16305_s1 + $0x124] ss:$8 sps:$4 sm:$0xff]   ;;  %v10056_v51 = vld [vmem:[%s16305_s1 + $0x120] ss:$8 sps:$4 sm:$0xff]  }
 0x2c3   :  { %v13703_v55 = vpop.f32.mrf.mxu1  ;;  %3842 = vmatpush2.bf16.msra.mxu0 %v10916_v58  ;;  %v10059_v53 = vld [vmem:[%s16305_s1 + $0x20] ss:$8 sps:$4 sm:$0xff]   ;;  %v10064_v58 = vld [vmem:[%s16305_s1 + $0x214] ss:$8 sps:$4 sm:$0xff]  }
 0x2c4   :  { %3922 = vmatpush2.bf16.msra.mxu1 %v10917_v2  ;;  %3843 = vmatprep.subr.bf16.mxu0 %v10918_v8  ;;  %v10067_v2 = vld [vmem:[%s16305_s1 + $0x14] ss:$8 sps:$4 sm:$0xff]   ;;  %v10062_v8 = vld [vmem:[%s16305_s1 + $0x210] ss:$8 sps:$4 sm:$0xff]  }
 0x2c5   :  { %v13711_v4 = vpop.f32.mrf.mxu1  ;;  %3923 = vmatprep.subr.bf16.mxu1 %v10919_v13  ;;  %v10065_v13 = vld [vmem:[%s16305_s1 + $0x10] ss:$8 sps:$4 sm:$0xff]  }
 0x2c7   :  { %v3560_v20 = vpop.f32.mrf.mxu1  ;;  %3844 = vmatpush2.bf16.msra.mxu0 %v10920_v25  ;;  %v10073_v25 = vld [vmem:[%s16305_s1 + $0x4] ss:$8 sps:$4 sm:$0xff]  }
 0x2c8   :  { %3924 = vmatpush2.bf16.msra.mxu1 %v10921_v28  ;;  %3950 = vmatprep.subr.bf16.mxu0 %v10923_v38  ;;  %v10070_v20 = vld [vmem:[%s16305_s1 + $0x204] ss:$8 sps:$4 sm:$0xff]   ;;  %v10068_v28 = vld [vmem:[%s16305_s1 + $0x200] ss:$8 sps:$4 sm:$0xff]   ;;  %v10079_v38 = vld [vmem:[%s16305_s1 + $0xf4] ss:$8 sps:$4 sm:$0xff]  }
 0x2c9   :  { %v3561_v30 = vpop.f32.mrf.mxu1  ;;  %3925 = vmatprep.subr.bf16.mxu1 %v10922_v19  ;;  %v10076_v19 = vld [vmem:[%s16305_s1 + $0x1f4] ss:$8 sps:$4 sm:$0xff]  }
 0x2ca   :  { %3846 = vmatmul.mubr.bf16.vlgmr.msra.gmra.mxu0 %v12028_v24  ;;  %v10015_v24 = vld [vmem:[%s16305_s1 + $0x194] ss:$8 sps:$4 sm:$0xff]   ;;  %v10071_v30 = vld [vmem:[%s16305_s1] ss:$8 sps:$4 sm:$0xff]  }
 0x2cb   :  { %3951 = vmatpush1.bf16.msra.mxu0 %v10925_v31  ;;  %3970 = vmatprep.mubr.bf16.mxu0 %v11292_v1  ;;  %v10077_v31 = vld [vmem:[%s16305_s1 + $0xf0] ss:$8 sps:$4 sm:$0xff]  }
 0x2cc   :  { %3926 = vmatpush2.bf16.msra.mxu1 %v10924_v49  ;;  %3952 = vmatprep.subr.bf16.mxu0 %v10927_v57  ;;  %v10074_v49 = vld [vmem:[%s16305_s1 + $0x1f0] ss:$8 sps:$4 sm:$0xff]   ;;  %v10085_v57 = vld [vmem:[%s16305_s1 + $0xe4] ss:$8 sps:$4 sm:$0xff]  }
 0x2cd   :  { %3927 = vmatprep.subr.bf16.mxu1 %v10926_v48  ;;  %v10082_v48 = vld [vmem:[%s16305_s1 + $0x1e4] ss:$8 sps:$4 sm:$0xff]  }
 0x2cf   :  { %3953 = vmatpush1.bf16.msra.mxu0 %v10929_v15  ;;  %v10083_v15 = vld [vmem:[%s16305_s1 + $0xe0] ss:$8 sps:$4 sm:$0xff]  }
 0x2d0   :  { %3928 = vmatpush2.bf16.msra.mxu1 %v10928_v36  ;;  %4291 = vmatprep.subr.bf16.mxu0 %v10015_v24  ;;  %v10080_v36 = vld [vmem:[%s16305_s1 + $0x1e0] ss:$8 sps:$4 sm:$0xff]  }
 0x2d1   :  { %4344 = vmatprep.subr.bf16.mxu1 %v10018_v5 }
 0x2d2   :  { %8723 = vmatmul.mubr.msk.bf16.vlgmr.msra.gmra.mxu0 %vm284_vm0, %v3475_v45  ;;  %v13800_v45 = vld [vmem:[%s16306_s0 + $0x50] ss:$0 sps:$4 sm:$0xff]  }
 0x2d3   :  { %3930 = vmatmul.mubr.bf16.vlgmr.msra.gmra.mxu1 %v3473_v32  ;;  %4292 = vmatpush1.bf16.msra.mxu0 %v10013_v9  ;;  %v13805_v32 = vld [vmem:[%s16306_s0 + $0x30] sm:$0xff] }
 0x2d4   :  { %4345 = vmatpush1.bf16.msra.mxu1 %v10016_v50  ;;  %4293 = vmatprep.subr.bf16.mxu0 %v10021_v18  ;;  %v13821_v54 = vcombine.high %v13805_v32, %v13805_v32  ;;  %v10088_v50 = vld [vmem:[%s16305_s1 + $0x1d4] ss:$8 sps:$4 sm:$0xff]  }
 0x2d5   :  { %4346 = vmatprep.subr.bf16.mxu1 %v10024_v60  ;;  %4364 = vmatprep.mubr.bf16.mxu1 %v11292_v1 }
 0x2d6   :  { %4323 = vmatprep.mubr.bf16.mxu0 %v13776_v46 }
 0x2d7   :  { %4294 = vmatpush1.bf16.msra.mxu0 %v10019_v39 }
 0x2d8   :  { %4347 = vmatpush1.bf16.msra.mxu1 %v10022_v33  ;;  %4295 = vmatprep.subr.bf16.mxu0 %v10027_v61  ;;  %v10086_v61 = vld [vmem:[%s16305_s1 + $0x1d0] ss:$8 sps:$4 sm:$0xff]  }
 0x2d9   :  { %4566 = vmatprep.subr.bf16.mxu1 %v10031_v0  ;;  %v10089_v0 = vld [vmem:[%s16305_s1 + $0xd0] ss:$8 sps:$4 sm:$0xff]  }
 0x2db   :  { %8804 = vmatmul.mubr.msk.bf16.vlgmr.msra.gmra.mxu1 %vm284_vm0, %v13800_v45  ;;  %4296 = vmatpush1.bf16.msra.mxu0 %v10025_v34 }
 0x2dc   :  { %4567 = vmatpush1.bf16.msra.mxu1 %v10029_v62  ;;  %4297 = vmatprep.subr.bf16.mxu0 %v10034_v63 }
 0x2dd   :  { %4568 = vmatprep.subr.bf16.mxu1 %v10037_v16  ;;  %4598 = vmatprep.mubr.bf16.mxu1 %v13821_v54  ;;  %v10092_v16 = vld [vmem:[%s16305_s1 + $0x1c0] ss:$8 sps:$4 sm:$0xff]  }
 0x2df   :  { %4298 = vmatpush1.bf16.msra.mxu0 %v10032_v26  ;;  %v10095_v26 = vld [vmem:[%s16305_s1 + $0xc0] ss:$8 sps:$4 sm:$0xff]  }
 0x2e0   :  { %4569 = vmatpush1.bf16.msra.mxu1 %v10035_v35  ;;  %4299 = vmatprep.subr.bf16.mxu0 %v10040_v52 }
 0x2e1   :  { %4570 = vmatprep.subr.bf16.mxu1 %v10043_v7  ;;  %v10100_v7 = vld [vmem:[%s16305_s1 + $0x1b4] ss:$8 sps:$4 sm:$0xff]  }
 0x2e3   :  { %4300 = vmatpush1.bf16.msra.mxu0 %v10038_v6  ;;  %v10103_v6 = vld [vmem:[%s16305_s1 + $0xb4] ss:$8 sps:$4 sm:$0xff]  }
 0x2e4   :  { %4571 = vmatpush1.bf16.msra.mxu1 %v10041_v37  ;;  %4301 = vmatprep.subr.bf16.mxu0 %v10046_v11 }
 0x2e5   :  { %4572 = vmatprep.subr.bf16.mxu1 %v10049_v29 }
 0x2e7   :  { %4302 = vmatpush1.bf16.msra.mxu0 %v10044_v14  ;;  %v10098_v14 = vld [vmem:[%s16305_s1 + $0x1b0] ss:$8 sps:$4 sm:$0xff]  }
 0x2e8   :  { %4573 = vmatpush1.bf16.msra.mxu1 %v10047_v56  ;;  %4303 = vmatprep.subr.bf16.mxu0 %v10052_v12  ;;  %v10101_v56 = vld [vmem:[%s16305_s1 + $0xb0] ss:$8 sps:$4 sm:$0xff]  }
 0x2e9   :  { %4574 = vmatprep.subr.bf16.mxu1 %v10055_v21 }
 0x2eb   :  { %4304 = vmatpush1.bf16.msra.mxu0 %v10050_v42  ;;  %v10106_v42 = vld [vmem:[%s16305_s1 + $0x1a4] ss:$8 sps:$4 sm:$0xff]  }
 0x2ec   :  { %4575 = vmatpush1.bf16.msra.mxu1 %v10053_v44  ;;  %4305 = vmatprep.subr.bf16.mxu0 %v10058_v43  ;;  %v10109_v44 = vld [vmem:[%s16305_s1 + $0xa4] ss:$8 sps:$4 sm:$0xff]  }
 0x2ed   :  { %4576 = vmatprep.subr.bf16.mxu1 %v10061_v59  ;;  %v10104_v59 = vld [vmem:[%s16305_s1 + $0x1a0] ss:$8 sps:$4 sm:$0xff]  }
 0x2ef   :  { %4306 = vmatpush1.bf16.msra.mxu0 %v10056_v51  ;;  %v10107_v51 = vld [vmem:[%s16305_s1 + $0xa0] ss:$8 sps:$4 sm:$0xff]  }
 0x2f0   :  { %4577 = vmatpush1.bf16.msra.mxu1 %v10059_v53  ;;  %4307 = vmatprep.subr.bf16.mxu0 %v10064_v58  ;;  %v10114_v58 = vld [vmem:[%s16305_s1 + $0x94] ss:$8 sps:$4 sm:$0xff]  }
 0x2f1   :  { %4578 = vmatprep.subr.bf16.mxu1 %v10067_v2  ;;  %v10117_v2 = vld [vmem:[%s16305_s1 + $0x114] ss:$8 sps:$4 sm:$0xff]  }
 0x2f3   :  { %4308 = vmatpush2.bf16.msra.mxu0 %v10062_v8 }
 0x2f4   :  { %4579 = vmatpush1.bf16.msra.mxu1 %v10065_v13  ;;  %4309 = vmatprep.subr.bf16.mxu0 %v10070_v20  ;;  %v14000_v13 = vcombine.low %v13754_v23, %v13754_v23  ;;  %v10112_v20 = vld [vmem:[%s16305_s1 + $0x90] ss:$8 sps:$4 sm:$0xff]   ;;  %v10123_v23 = vld [vmem:[%s16305_s1 + $0x104] ss:$8 sps:$4 sm:$0xff]  }
 0x2f5   :  { %4580 = vmatprep.subr.bf16.mxu1 %v10073_v25  ;;  %v10115_v25 = vld [vmem:[%s16305_s1 + $0x110] ss:$8 sps:$4 sm:$0xff]  }
 0x2f7   :  { %4310 = vmatpush2.bf16.msra.mxu0 %v10068_v28 }
 0x2f8   :  { %4581 = vmatpush1.bf16.msra.mxu1 %v10071_v30  ;;  %4311 = vmatprep.subr.bf16.mxu0 %v10076_v19  ;;  %v10120_v30 = vld [vmem:[%s16305_s1 + $0x84] ss:$8 sps:$4 sm:$0xff]   ;;  %v4694_v19 = vshll.u32 %v13821_v54, 16 }
 0x2f9   :  { %4582 = vmatprep.subr.bf16.mxu1 %v10079_v38  ;;  %v10118_v38 = vld [vmem:[%s16305_s1 + $0x80] ss:$8 sps:$4 sm:$0xff]  }
 0x2fa   :  { %v3515_v24 = vpop.f32.mrf.mxu0 }
 0x2fb   :  { %v3557_v5 = vadd.f32 %v13703_v55, %v3515_v24  ;;  %4312 = vmatpush2.bf16.msra.mxu0 %v10074_v49  ;;  %v10091_v55 = vld [vmem:[%s16305_s1 + $0xd4] ss:$8 sps:$4 sm:$0xff]   ;;  %v10121_v49 = vld [vmem:[%s16305_s1 + $0x100] ss:$8 sps:$4 sm:$0xff]   ;;  %v4692_v24 = vshrl.u32 %v13821_v54, 16 }
 0x2fc   :  { %4583 = vmatpush2.bf16.msra.mxu1 %v10077_v31  ;;  %v3517_v9 = vpop.f32.mrf.mxu0  ;;  %4313 = vmatprep.subr.bf16.mxu0 %v10082_v48  ;;  %v14025_v31 = vld [vmem:[%s16306_s0 + $0x38] ss:$0 sps:$4 sm:$0xff]   ;;  %v10129_v48 = vld [vmem:[%s16305_s1 + $0x2b4] ss:$8 sps:$4 sm:$0xff]  }
 0x2fd   :  { %4584 = vmatprep.subr.bf16.mxu1 %v10085_v57  ;;  %v13936_v18 = vadd.f32 %v3557_v5, %v13687_v17  ;;  %v3559_v60 = vadd.f32 %v13711_v4, %v3517_v9  ;;  %v10094_v17 = vld [vmem:[%s16305_s1 + $0x1c4] ss:$8 sps:$4 sm:$0xff]   ;;  %v10132_v57 = vld [vmem:[%s16305_s1 + $0x354] ss:$8 sps:$4 sm:$0xff]   ;;  %v4696_v5 = vrot.slane %v4694_v19, 1 }
 0x2fe   :  { %v3519_v39 = vpop.f32.mrf.mxu0  ;;  %v10127_v9 = vld [vmem:[%s16305_s1 + $0x2b0] ss:$8 sps:$4 sm:$0xff]   ;;  %v10172_v19 = vld [vmem:[%s16305_s1 + $0x380] ss:$8 sps:$4 sm:$0xff]  }
 0x2ff   :  { %v13940_v33 = vadd.f32 %v3559_v60, %v13689_v40  ;;  %4314 = vmatpush2.bf16.msra.mxu0 %v10080_v36  ;;  %v10097_v40 = vld [vmem:[%s16305_s1 + $0xc4] ss:$8 sps:$4 sm:$0xff]   ;;  %v14037_v36 = vcombine.low %v13805_v32, %v13805_v32  ;;  %v14052_v60 = vor.u32 %v4696_v5, %v4692_v24  ;;  %v5019_v39 = vshll.u32 %v13776_v46, 16 }
 0x300   :  { %4585 = vmatpush2.bf16.msra.mxu1 %v10083_v15  ;;  %v3520_v34 = vpop.f32.mrf.mxu0  ;;  %4315 = vmatprep.subr.bf16.mxu0 %v10088_v50  ;;  %v4700_v15 = vshll.u32 %v14025_v31, 16  ;;  %v10130_v50 = vld [vmem:[%s16305_s1 + $0x350] ss:$8 sps:$4 sm:$0xff]   ;;  %v10138_v32 = vld [vmem:[%s16305_s1 + $0x344] ss:$8 sps:$4 sm:$0xff]  }
 0x301   :  { %4586 = vmatprep.subr.bf16.mxu1 %v10091_v55  ;;  %v10135_v55 = vld [vmem:[%s16305_s1 + $0x2a4] ss:$8 sps:$4 sm:$0xff]   ;;  %v10133_v34 = vld [vmem:[%s16305_s1 + $0x2a0] ss:$8 sps:$4 sm:$0xff]  }
 0x302   :  { %v3640_v62 = vpop.f32.mrf.mxu0  ;;  %v10183_v24 = vld [vmem:[%s16305_s1 + $0x324] ss:$8 sps:$4 sm:$0xff]  }
 0x303   :  { %v3599_v4 = vpop.f32.mrf.mxu1  ;;  %4316 = vmatpush2.bf16.msra.mxu0 %v10086_v61  ;;  %v4698_v61 = vshrl.u32 %v14025_v31, 16  ;;  %v10186_v5 = vld [vmem:[%s16305_s1 + $0x364] ss:$8 sps:$4 sm:$0xff]  }
 0x304   :  { %v13954_v63 = vadd.f32 %v3640_v62, %v3599_v4  ;;  %4587 = vmatpush2.bf16.msra.mxu1 %v10089_v0  ;;  %v3642_v52 = vpop.f32.mrf.mxu0  ;;  %4317 = vmatprep.subr.bf16.mxu0 %v10094_v17  ;;  %v4702_v0 = vrot.slane %v4700_v15, 1  ;;  %v10136_v17 = vld [vmem:[%s16305_s1 + $0x340] ss:$8 sps:$4 sm:$0xff]   ;;  %v10144_v4 = vld [vmem:[%s16305_s1 + $0x3d4] ss:$8 sps:$4 sm:$0xff]   ;;  %v5017_v62 = vshrl.u32 %v13776_v46, 16 }
 0x305   :  { %v3601_v35 = vpop.f32.mrf.mxu1  ;;  %4588 = vmatprep.subr.bf16.mxu1 %v10097_v40  ;;  %v10141_v40 = vld [vmem:[%s16305_s1 + $0x294] ss:$8 sps:$4 sm:$0xff]   ;;  %v10181_v15 = vld [vmem:[%s16305_s1 + $0x320] ss:$8 sps:$4 sm:$0xff]  }
 0x306   :  { %v13968_v37 = vadd.f32 %v3642_v52, %v3601_v35  ;;  %v3644_v29 = vpop.f32.mrf.mxu0  ;;  %v10139_v35 = vld [vmem:[%s16305_s1 + $0x290] ss:$8 sps:$4 sm:$0xff]  }
 0x307   :  { %v3603_v11 = vpop.f32.mrf.mxu1  ;;  %4318 = vmatpush2.bf16.msra.mxu0 %v10092_v16  ;;  %v5021_v16 = vrot.slane %v5019_v39, 1  ;;  %v10142_v52 = vld [vmem:[%s16305_s1 + $0x3d0] ss:$8 sps:$4 sm:$0xff]   ;;  %v10145_v29 = vld [vmem:[%s16305_s1 + $0x280] ss:$8 sps:$4 sm:$0xff]  }
 0x308   :  { %4589 = vmatpush2.bf16.msra.mxu1 %v10095_v26  ;;  %v3645_v21 = vpop.f32.mrf.mxu0  ;;  %4319 = vmatprep.subr.bf16.mxu0 %v10100_v7  ;;  %v14074_v26 = vor.u32 %v4702_v0, %v4698_v61  ;;  %v10147_v7 = vld [vmem:[%s16305_s1 + $0x284] ss:$8 sps:$4 sm:$0xff]   ;;  %v10190_v39 = vld [vmem:[%s16305_s1 + $0x450] ss:$8 sps:$4 sm:$0xff]  }
 0x309   :  { %v3604_v12 = vpop.f32.mrf.mxu1  ;;  %4590 = vmatprep.subr.bf16.mxu1 %v10103_v6  ;;  %v10150_v6 = vld [vmem:[%s16305_s1 + $0x3c4] ss:$8 sps:$4 sm:$0xff]   ;;  %v14088_v11 = vor.u32 %v5021_v16, %v5017_v62  ;;  %v10151_v21 = vld [vmem:[%s16305_s1 + $0x270] ss:$8 sps:$4 sm:$0xff]   ;;  %v10201_v16 = vld [vmem:[%s16305_s1 + $0x2f4] ss:$8 sps:$4 sm:$0xff]  }
 0x30a   :  { %v10156_v12 = vld [vmem:[%s16305_s1 + $0x3b4] ss:$8 sps:$4 sm:$0xff]   ;;  %v10195_v61 = vld [vmem:[%s16305_s1 + $0x304] ss:$8 sps:$4 sm:$0xff]  }
 0x30b   :  { %v13982_v43 = vpop.f32.mrf.mxu1  ;;  %4320 = vmatpush2.bf16.msra.mxu0 %v10098_v14  ;;  %v10148_v14 = vld [vmem:[%s16305_s1 + $0x3c0] ss:$8 sps:$4 sm:$0xff]   ;;  %v10198_v0 = vld [vmem:[%s16305_s1 + $0x444] ss:$8 sps:$4 sm:$0xff]  }
 0x30c   :  { %4591 = vmatpush2.bf16.msra.mxu1 %v10101_v56  ;;  %4321 = vmatprep.subr.bf16.mxu0 %v10106_v42  ;;  %v10153_v56 = vld [vmem:[%s16305_s1 + $0x274] ss:$8 sps:$4 sm:$0xff]   ;;  %v10154_v42 = vld [vmem:[%s16305_s1 + $0x3b0] ss:$8 sps:$4 sm:$0xff]  }
 0x30d   :  { %v13990_v53 = vpop.f32.mrf.mxu1  ;;  %4592 = vmatprep.subr.bf16.mxu1 %v10109_v44  ;;  %v10159_v44 = vld [vmem:[%s16305_s1 + $0x264] ss:$8 sps:$4 sm:$0xff]  }
 0x30f   :  { %v3726_v8 = vpop.f32.mrf.mxu1  ;;  %4322 = vmatpush2.bf16.msra.mxu0 %v10104_v59  ;;  %v10162_v59 = vld [vmem:[%s16305_s1 + $0x3a4] ss:$8 sps:$4 sm:$0xff]  }
 0x310   :  { %4593 = vmatpush2.bf16.msra.mxu1 %v10107_v51  ;;  %4619 = vmatprep.subr.bf16.mxu0 %v10117_v2  ;;  %v10157_v51 = vld [vmem:[%s16305_s1 + $0x260] ss:$8 sps:$4 sm:$0xff]   ;;  %v10165_v2 = vld [vmem:[%s16305_s1 + $0x254] ss:$8 sps:$4 sm:$0xff]  }
 0x311   :  { %v3727_v28 = vpop.f32.mrf.mxu1  ;;  %4594 = vmatprep.subr.bf16.mxu1 %v10114_v58  ;;  %v10160_v58 = vld [vmem:[%s16305_s1 + $0x3a0] ss:$8 sps:$4 sm:$0xff]   ;;  %v10168_v8 = vld [vmem:[%s16305_s1 + $0x394] ss:$8 sps:$4 sm:$0xff]  }
 0x312   :  { %4324 = vmatmul.mubr.bf16.vlgmr.msra.gmra.mxu0 %v14000_v13  ;;  %v10171_v28 = vld [vmem:[%s16305_s1 + $0x244] ss:$8 sps:$4 sm:$0xff]  }
 0x313   :  { %4620 = vmatpush1.bf16.msra.mxu0 %v10115_v25  ;;  %4639 = vmatprep.mubr.bf16.mxu0 %v11292_v1  ;;  %v10166_v25 = vld [vmem:[%s16305_s1 + $0x390] ss:$8 sps:$4 sm:$0xff]  }
 0x314   :  { %4595 = vmatpush2.bf16.msra.mxu1 %v10112_v20  ;;  %4621 = vmatprep.subr.bf16.mxu0 %v10123_v23  ;;  %v10163_v20 = vld [vmem:[%s16305_s1 + $0x250] ss:$8 sps:$4 sm:$0xff]   ;;  %v10169_v23 = vld [vmem:[%s16305_s1 + $0x240] ss:$8 sps:$4 sm:$0xff]  }
 0x315   :  { %4596 = vmatprep.subr.bf16.mxu1 %v10120_v30  ;;  %v10174_v30 = vld [vmem:[%s16305_s1 + $0x384] ss:$8 sps:$4 sm:$0xff]  }
 0x317   :  { %4622 = vmatpush1.bf16.msra.mxu0 %v10121_v49  ;;  %v10180_v49 = vld [vmem:[%s16305_s1 + $0x374] ss:$8 sps:$4 sm:$0xff]  }
 0x318   :  { %4597 = vmatpush2.bf16.msra.mxu1 %v10118_v38  ;;  %4889 = vmatprep.subr.bf16.mxu0 %v10129_v48  ;;  %v10177_v38 = vld [vmem:[%s16305_s1 + $0x334] ss:$8 sps:$4 sm:$0xff]   ;;  %v10175_v48 = vld [vmem:[%s16305_s1 + $0x330] ss:$8 sps:$4 sm:$0xff]  }
 0x319   :  { %4942 = vmatprep.subr.bf16.mxu1 %v10132_v57  ;;  %v10178_v57 = vld [vmem:[%s16305_s1 + $0x370] ss:$8 sps:$4 sm:$0xff]  }
 0x31a   :  { %8844 = vmatmul.mubr.msk.bf16.vlgmr.msra.gmra.mxu0 %vm284_vm0, %v14025_v31 }
 0x31b   :  { %4599 = vmatmul.mubr.bf16.vlgmr.msra.gmra.mxu1 %v14037_v36  ;;  %4890 = vmatpush1.bf16.msra.mxu0 %v10127_v9  ;;  %v10184_v9 = vld [vmem:[%s16305_s1 + $0x360] ss:$8 sps:$4 sm:$0xff]  }
 0x31c   :  { %4943 = vmatpush1.bf16.msra.mxu1 %v10130_v50  ;;  %4891 = vmatprep.subr.bf16.mxu0 %v10135_v55  ;;  %v10189_v50 = vld [vmem:[%s16305_s1 + $0x314] ss:$8 sps:$4 sm:$0xff]  }
 0x31d   :  { %4944 = vmatprep.subr.bf16.mxu1 %v10138_v32  ;;  %4962 = vmatprep.mubr.bf16.mxu1 %v11292_v1  ;;  %v10192_v55 = vld [vmem:[%s16305_s1 + $0x454] ss:$8 sps:$4 sm:$0xff]   ;;  %v10187_v32 = vld [vmem:[%s16305_s1 + $0x310] ss:$8 sps:$4 sm:$0xff]  }
 0x31e   :  { %4921 = vmatprep.mubr.bf16.mxu0 %v14052_v60 }
 0x31f   :  { %4892 = vmatpush1.bf16.msra.mxu0 %v10133_v34 }
 0x320   :  { %4945 = vmatpush1.bf16.msra.mxu1 %v10136_v17  ;;  %4893 = vmatprep.subr.bf16.mxu0 %v10141_v40  ;;  %v10193_v40 = vld [vmem:[%s16305_s1 + $0x300] ss:$8 sps:$4 sm:$0xff]  }
 0x321   :  { %5214 = vmatprep.subr.bf16.mxu1 %v10144_v4  ;;  %v10196_v4 = vld [vmem:[%s16305_s1 + $0x440] ss:$8 sps:$4 sm:$0xff]  }
 0x323   :  { %8917 = vmatmul.mubr.msk.bf16.vlgmr.msra.gmra.mxu1 %vm284_vm0, %v14074_v26  ;;  %4894 = vmatpush1.bf16.msra.mxu0 %v10139_v35 }
 0x324   :  { %5215 = vmatpush1.bf16.msra.mxu1 %v10142_v52  ;;  %4895 = vmatprep.subr.bf16.mxu0 %v10147_v7 }
 0x325   :  { %5216 = vmatprep.subr.bf16.mxu1 %v10150_v6  ;;  %5246 = vmatprep.mubr.bf16.mxu1 %v14088_v11 }
 0x327   :  { %4896 = vmatpush1.bf16.msra.mxu0 %v10145_v29  ;;  %v10199_v29 = vld [vmem:[%s16305_s1 + $0x2f0] ss:$8 sps:$4 sm:$0xff]  }
 0x328   :  { %5217 = vmatpush1.bf16.msra.mxu1 %v10148_v14  ;;  %4897 = vmatprep.subr.bf16.mxu0 %v10153_v56  ;;  %v10202_v14 = vld [vmem:[%s16305_s1 + $0x430] ss:$8 sps:$4 sm:$0xff]  }
 0x329   :  { %5218 = vmatprep.subr.bf16.mxu1 %v10156_v12 }
 0x32b   :  { %4898 = vmatpush1.bf16.msra.mxu0 %v10151_v21 }
 0x32c   :  { %5219 = vmatpush1.bf16.msra.mxu1 %v10154_v42  ;;  %4899 = vmatprep.subr.bf16.mxu0 %v10159_v44  ;;  %v10205_v42 = vld [vmem:[%s16305_s1 + $0x2e0] ss:$8 sps:$4 sm:$0xff]  }
 0x32d   :  { %5220 = vmatprep.subr.bf16.mxu1 %v10162_v59  ;;  %v10208_v44 = vld [vmem:[%s16305_s1 + $0x420] ss:$8 sps:$4 sm:$0xff]  }
 0x32f   :  { %4900 = vmatpush1.bf16.msra.mxu0 %v10157_v51 }
 0x330   :  { %5221 = vmatpush1.bf16.msra.mxu1 %v10160_v58  ;;  %4901 = vmatprep.subr.bf16.mxu0 %v10165_v2  ;;  %v10213_v58 = vld [vmem:[%s16305_s1 + $0x2d4] ss:$8 sps:$4 sm:$0xff]  }
 0x331   :  { %5222 = vmatprep.subr.bf16.mxu1 %v10168_v8  ;;  %v10216_v2 = vld [vmem:[%s16305_s1 + $0x414] ss:$8 sps:$4 sm:$0xff]  }
 0x333   :  { %4902 = vmatpush1.bf16.msra.mxu0 %v10163_v20 }
 0x334   :  { %5223 = vmatpush1.bf16.msra.mxu1 %v10166_v25  ;;  %4903 = vmatprep.subr.bf16.mxu0 %v10171_v28 }
 0x335   :  { %5224 = vmatprep.subr.bf16.mxu1 %v10174_v30  ;;  %v4687_v30 = vshll.u32 %v14037_v36, 16 }
 0x337   :  { %4904 = vmatpush1.bf16.msra.mxu0 %v10169_v23 }
 0x338   :  { %5225 = vmatpush1.bf16.msra.mxu1 %v10172_v19  ;;  %4905 = vmatprep.subr.bf16.mxu0 %v10177_v38  ;;  %v10211_v19 = vld [vmem:[%s16305_s1 + $0x2d0] ss:$8 sps:$4 sm:$0xff]  }
 0x339   :  { %5226 = vmatprep.subr.bf16.mxu1 %v10180_v49  ;;  %v10214_v38 = vld [vmem:[%s16305_s1 + $0x410] ss:$8 sps:$4 sm:$0xff]  }
 0x33b   :  { %4906 = vmatpush2.bf16.msra.mxu0 %v10175_v48 }
 0x33c   :  { %5227 = vmatpush1.bf16.msra.mxu1 %v10178_v57  ;;  %4907 = vmatprep.subr.bf16.mxu0 %v10183_v24  ;;  %v10219_v57 = vld [vmem:[%s16305_s1 + $0x2c4] ss:$8 sps:$4 sm:$0xff]  }
 0x33d   :  { %5228 = vmatprep.subr.bf16.mxu1 %v10186_v5  ;;  %v10222_v24 = vld [vmem:[%s16305_s1 + $0x404] ss:$8 sps:$4 sm:$0xff]  }
 0x33f   :  { %4908 = vmatpush2.bf16.msra.mxu0 %v10181_v15  ;;  %v4685_v15 = vshrl.u32 %v14037_v36, 16 }
 0x340   :  { %5229 = vmatpush1.bf16.msra.mxu1 %v10184_v9  ;;  %4909 = vmatprep.subr.bf16.mxu0 %v10189_v50  ;;  %v4689_v9 = vrot.slane %v4687_v30, 1  ;;  %v10217_v50 = vld [vmem:[%s16305_s1 + $0x2c0] ss:$8 sps:$4 sm:$0xff]  }
 0x341   :  { %5230 = vmatprep.subr.bf16.mxu1 %v10192_v55  ;;  %v10220_v55 = vld [vmem:[%s16305_s1 + $0x400] ss:$8 sps:$4 sm:$0xff]  }
 0x342   :  { %v3681_v34 = vpop.f32.mrf.mxu0 }
 0x343   :  { %v3682_v17 = vadd.f32 %v3681_v34, %v13954_v63  ;;  %4910 = vmatpush2.bf16.msra.mxu0 %v10187_v32  ;;  %v10204_v63 = vld [vmem:[%s16305_s1 + $0x434] ss:$8 sps:$4 sm:$0xff]   ;;  %v14263_v34 = vor.u32 %v4689_v9, %v4685_v15 }
 0x344   :  { %5231 = vmatpush2.bf16.msra.mxu1 %v10190_v39  ;;  %v3683_v62 = vpop.f32.mrf.mxu0  ;;  %4911 = vmatprep.subr.bf16.mxu0 %v10195_v61  ;;  %v10225_v39 = vld [vmem:[%s16305_s1 + $0x3f4] ss:$8 sps:$4 sm:$0xff]  }
 0x345   :  { %5232 = vmatprep.subr.bf16.mxu1 %v10198_v0  ;;  %v3723_v35 = vadd.f32 %v13982_v43, %v3682_v17  ;;  %v3684_v52 = vadd.f32 %v3683_v62, %v13968_v37  ;;  %v10207_v37 = vld [vmem:[%s16305_s1 + $0x2e4] ss:$8 sps:$4 sm:$0xff]   ;;  %v10228_v61 = vld [vmem:[%s16305_s1 + $0x474] ss:$8 sps:$4 sm:$0xff]   ;;  %v5012_v17 = vshll.u32 %v14000_v13, 16 }
 0x346   :  { %v3685_v7 = vpop.f32.mrf.mxu0  ;;  %v10210_v43 = vld [vmem:[%s16305_s1 + $0x424] ss:$8 sps:$4 sm:$0xff]   ;;  %v10226_v62 = vld [vmem:[%s16305_s1 + $0x470] ss:$8 sps:$4 sm:$0xff]   ;;  %v10262_v15 = vld [vmem:[%s16305_s1 + $0x4b4] ss:$8 sps:$4 sm:$0xff]  }
 0x347   :  { %v3725_v6 = vadd.f32 %v13990_v53, %v3684_v52  ;;  %4912 = vmatpush2.bf16.msra.mxu0 %v10193_v40  ;;  %v5025_v40 = vshll.u32 %v13800_v45, 16  ;;  %v5010_v52 = vshrl.u32 %v14000_v13, 16  ;;  %v5014_v7 = vrot.slane %v5012_v17, 1  ;;  %v10265_v9 = vld [vmem:[%s16305_s1 + $0x714] ss:$8 sps:$4 sm:$0xff]  }
 0x348   :  { %5233 = vmatpush2.bf16.msra.mxu1 %v10196_v4  ;;  %v3686_v56 = vpop.f32.mrf.mxu0  ;;  %4913 = vmatprep.subr.bf16.mxu0 %v10201_v16  ;;  %v10223_v4 = vld [vmem:[%s16305_s1 + $0x3f0] ss:$8 sps:$4 sm:$0xff]   ;;  %v10269_v17 = vld [vmem:[%s16305_s1 + $0x700] ss:$8 sps:$4 sm:$0xff]  }
 0x349   :  { %5234 = vmatprep.subr.bf16.mxu1 %v10204_v63  ;;  %v10231_v63 = vld [vmem:[%s16305_s1 + $0x3e4] ss:$8 sps:$4 sm:$0xff]   ;;  %v10232_v56 = vld [vmem:[%s16305_s1 + $0x460] ss:$8 sps:$4 sm:$0xff]  }
 0x34a   :  { %v3804_v12 = vpop.f32.mrf.mxu0 }
 0x34b   :  { %v3763_v53 = vpop.f32.mrf.mxu1  ;;  %4914 = vmatpush2.bf16.msra.mxu0 %v10199_v29  ;;  %v5027_v29 = vrot.slane %v5025_v40, 1  ;;  %v10274_v40 = vld [vmem:[%s16305_s1 + $0x494] ss:$8 sps:$4 sm:$0xff]  }
 0x34c   :  { %v3805_v21 = vadd.f32 %v3804_v12, %v3763_v53  ;;  %5235 = vmatpush2.bf16.msra.mxu1 %v10202_v14  ;;  %v3806_v51 = vpop.f32.mrf.mxu0  ;;  %4915 = vmatprep.subr.bf16.mxu0 %v10207_v37  ;;  %v10229_v14 = vld [vmem:[%s16305_s1 + $0x3e0] ss:$8 sps:$4 sm:$0xff]   ;;  %v10237_v37 = vld [vmem:[%s16305_s1 + $0x4f4] ss:$8 sps:$4 sm:$0xff]   ;;  %v14298_v53 = vor.u32 %v5014_v7, %v5010_v52 }
 0x34d   :  { %v3765_v59 = vpop.f32.mrf.mxu1  ;;  %5236 = vmatprep.subr.bf16.mxu1 %v10210_v43  ;;  %v10332_v43 = vld [vmem:[%s16306_s0 + $0x34] ss:$12 sps:$4 sm:$0x1e]  }
 0x34e   :  { %v14229_v8 = vadd.f32 %v3805_v21, %v3723_v35  ;;  %v3807_v20 = vadd.f32 %v3806_v51, %v3765_v59  ;;  %v3808_v28 = vpop.f32.mrf.mxu0  ;;  %v10234_v35 = vld [vmem:[%s16305_s1 + $0x464] ss:$8 sps:$4 sm:$0xff]   ;;  %v10235_v21 = vld [vmem:[%s16305_s1 + $0x4f0] ss:$8 sps:$4 sm:$0xff]   ;;  %v14314_v51 = vrot.slane %v10332_v43, 1 }
 0x34f   :  { %v3767_v25 = vpop.f32.mrf.mxu1  ;;  %4916 = vmatpush2.bf16.msra.mxu0 %v10205_v42  ;;  %v10238_v42 = vld [vmem:[%s16305_s1 + $0x590] ss:$8 sps:$4 sm:$0xff]   ;;  %v10246_v59 = vld [vmem:[%s16305_s1 + $0x584] ss:$8 sps:$4 sm:$0xff]   ;;  %v10253_v28 = vld [vmem:[%s16305_s1 + $0x734] ss:$8 sps:$4 sm:$0xff]  }
 0x350   :  { %v14232_v23 = vadd.f32 %v3807_v20, %v3725_v6  ;;  %5237 = vmatpush2.bf16.msra.mxu1 %v10208_v44  ;;  %v3809_v48 = vpop.f32.mrf.mxu0  ;;  %4917 = vmatprep.subr.bf16.mxu0 %v10213_v58  ;;  %v5023_v6 = vshrl.u32 %v13800_v45, 16  ;;  %v10240_v45 = vld [vmem:[%s16305_s1 + $0x594] ss:$8 sps:$4 sm:$0xff]   ;;  %v10243_v44 = vld [vmem:[%s16305_s1 + $0x4e4] ss:$8 sps:$4 sm:$0xff]  }
 0x351   :  { %v3768_v49 = vpop.f32.mrf.mxu1  ;;  %5238 = vmatprep.subr.bf16.mxu1 %v10216_v2  ;;  %v10250_v58 = vld [vmem:[%s16306_s0 + $0x38] ss:$12 sps:$4 sm:$0x1e]   ;;  %v10241_v2 = vld [vmem:[%s16305_s1 + $0x4e0] ss:$8 sps:$4 sm:$0xff]  }
 0x352   :  { %v14300_v12 = vor.u32 %v5027_v29, %v5023_v6  ;;  %v10244_v20 = vld [vmem:[%s16305_s1 + $0x580] ss:$8 sps:$4 sm:$0xff]   ;;  %v10249_v25 = vld [vmem:[%s16305_s1 + $0x4d4] ss:$8 sps:$4 sm:$0xff]   ;;  %v14336_v30 = vrot.slane %v10250_v58, 1 }
 0x353   :  { %v14246_v5 = vpop.f32.mrf.mxu1  ;;  %4918 = vmatpush2.bf16.msra.mxu0 %v10211_v19  ;;  %v10247_v19 = vld [vmem:[%s16305_s1 + $0x4d0] ss:$8 sps:$4 sm:$0xff]   ;;  %v10256_v49 = vld [vmem:[%s16305_s1 + $0x4c4] ss:$8 sps:$4 sm:$0xff]   ;;  %v10278_v52 = vld [vmem:[%s16305_s1 + $0x480] ss:$8 sps:$4 sm:$0xff]  }
 0x354   :  { %5239 = vmatpush2.bf16.msra.mxu1 %v10214_v38  ;;  %4919 = vmatprep.subr.bf16.mxu0 %v10219_v57  ;;  %v10251_v38 = vld [vmem:[%s16305_s1 + $0x730] ss:$8 sps:$4 sm:$0xff]   ;;  %v10259_v48 = vld [vmem:[%s16305_s1 + $0x724] ss:$8 sps:$4 sm:$0xff]   ;;  %v10254_v57 = vld [vmem:[%s16305_s1 + $0x4c0] ss:$8 sps:$4 sm:$0xff]  }
 0x355   :  { %v14255_v32 = vpop.f32.mrf.mxu1  ;;  %5240 = vmatprep.subr.bf16.mxu1 %v10222_v24  ;;  %v10257_v24 = vld [vmem:[%s16305_s1 + $0x720] ss:$8 sps:$4 sm:$0xff]   ;;  %v10286_v6 = vld [vmem:[%s16305_s1 + $0x574] ss:$8 sps:$4 sm:$0xff]   ;;  %v10299_v58 = vld [vmem:[%s16305_s1 + $0x7b0] ss:$8 sps:$4 sm:$0xff]  }
 0x356   :  { %v10281_v7 = vld [vmem:[%s16305_s1 + $0x6e0] ss:$8 sps:$4 sm:$0xff]   ;;  %v10289_v29 = vld [vmem:[%s16305_s1 + $0x6d4] ss:$8 sps:$4 sm:$0xff]  }
 0x357   :  { %v3892_v0 = vpop.f32.mrf.mxu1  ;;  %4920 = vmatpush2.bf16.msra.mxu0 %v10217_v50  ;;  %v10260_v50 = vld [vmem:[%s16305_s1 + $0x4b0] ss:$8 sps:$4 sm:$0xff]   ;;  %v10290_v43 = vld [vmem:[%s16305_s1 + $0x560] ss:$8 sps:$4 sm:$0xff]  }
 0x358   :  { %5241 = vmatpush2.bf16.msra.mxu1 %v10220_v55  ;;  %5267 = vmatprep.subr.bf16.mxu0 %v10228_v61  ;;  %v10263_v55 = vld [vmem:[%s16305_s1 + $0x710] ss:$8 sps:$4 sm:$0xff]   ;;  %v10271_v61 = vld [vmem:[%s16305_s1 + $0x704] ss:$8 sps:$4 sm:$0xff]   ;;  %v10266_v0 = vld [vmem:[%s16305_s1 + $0x4a0] ss:$8 sps:$4 sm:$0xff]  }
 0x359   :  { %v3893_v16 = vpop.f32.mrf.mxu1  ;;  %5242 = vmatprep.subr.bf16.mxu1 %v10225_v39  ;;  %v10268_v39 = vld [vmem:[%s16305_s1 + $0x4a4] ss:$8 sps:$4 sm:$0xff]  }
 0x35a   :  { %4922 = vmatmul.mubr.bf16.vlgmr.msra.gmra.mxu0 %v14263_v34  ;;  %v10275_v16 = vld [vmem:[%s16305_s1 + $0x6f0] ss:$8 sps:$4 sm:$0xff]  }
 0x35b   :  { %5268 = vmatpush1.bf16.msra.mxu0 %v10226_v62  ;;  %5287 = vmatprep.mubr.bf16.mxu0 %v11292_v1  ;;  %v10272_v62 = vld [vmem:[%s16305_s1 + $0x490] ss:$8 sps:$4 sm:$0xff]  }
 0x35c   :  { %5243 = vmatpush2.bf16.msra.mxu1 %v10223_v4  ;;  %5269 = vmatprep.subr.bf16.mxu0 %v10234_v35  ;;  %v10277_v4 = vld [vmem:[%s16305_s1 + $0x6f4] ss:$8 sps:$4 sm:$0xff]   ;;  %v10283_v35 = vld [vmem:[%s16305_s1 + $0x6e4] ss:$8 sps:$4 sm:$0xff]  }
 0x35d   :  { %5244 = vmatprep.subr.bf16.mxu1 %v10231_v63  ;;  %v10280_v63 = vld [vmem:[%s16305_s1 + $0x484] ss:$8 sps:$4 sm:$0xff]  }
 0x35f   :  { %5270 = vmatpush1.bf16.msra.mxu0 %v10232_v56  ;;  %v10287_v56 = vld [vmem:[%s16305_s1 + $0x6d0] ss:$8 sps:$4 sm:$0xff]  }
 0x360   :  { %5245 = vmatpush2.bf16.msra.mxu1 %v10229_v14  ;;  %5539 = vmatprep.subr.bf16.mxu0 %v10237_v37  ;;  %v10284_v14 = vld [vmem:[%s16305_s1 + $0x570] ss:$8 sps:$4 sm:$0xff]   ;;  %v10292_v37 = vld [vmem:[%s16305_s1 + $0x564] ss:$8 sps:$4 sm:$0xff]  }
 0x361   :  { %5592 = vmatprep.subr.bf16.mxu1 %v10240_v45  ;;  %v10295_v45 = vld [vmem:[%s16305_s1 + $0x6c4] ss:$8 sps:$4 sm:$0xff]  }
 0x362   :  { %8990 = vmatmul.mubr.msk.bf16.vlgmr.msra.gmra.mxu0 %vm284_vm0, %v14300_v12 }
 0x363   :  { %5247 = vmatmul.mubr.bf16.vlgmr.msra.gmra.mxu1 %v14298_v53  ;;  %5540 = vmatpush1.bf16.msra.mxu0 %v10235_v21  ;;  %v10293_v21 = vld [vmem:[%s16305_s1 + $0x6c0] ss:$8 sps:$4 sm:$0xff]  }
 0x364   :  { %5593 = vmatpush1.bf16.msra.mxu1 %v10238_v42  ;;  %5541 = vmatprep.subr.bf16.mxu0 %v10243_v44  ;;  %v10298_v42 = vld [vmem:[%s16305_s1 + $0x554] ss:$8 sps:$4 sm:$0xff]  }
 0x365   :  { %5594 = vmatprep.subr.bf16.mxu1 %v10246_v59  ;;  %5612 = vmatprep.mubr.bf16.mxu1 %v11292_v1  ;;  %v10301_v44 = vld [vmem:[%s16305_s1 + $0x7b4] ss:$8 sps:$4 sm:$0xff]   ;;  %v10296_v59 = vld [vmem:[%s16305_s1 + $0x550] ss:$8 sps:$4 sm:$0xff]  }
 0x366   :  { %5571 = vmatprep.mubr.bf16.mxu0 %v14314_v51 }
 0x367   :  { %5542 = vmatpush1.bf16.msra.mxu0 %v10241_v2  ;;  %v10304_v2 = vld [vmem:[%s16305_s1 + $0x544] ss:$8 sps:$4 sm:$0xff]  }
 0x368   :  { %5595 = vmatpush1.bf16.msra.mxu1 %v10244_v20  ;;  %5543 = vmatprep.subr.bf16.mxu0 %v10249_v25  ;;  %v10307_v20 = vld [vmem:[%s16305_s1 + $0x7a4] ss:$8 sps:$4 sm:$0xff]  }
 0x369   :  { %5875 = vmatprep.subr.bf16.mxu1 %v10253_v28 }
 0x36b   :  { %9070 = vmatmul.mubr.msk.bf16.vlgmr.msra.gmra.mxu1 %vm284_vm0, %v14336_v30  ;;  %5544 = vmatpush1.bf16.msra.mxu0 %v10247_v19  ;;  %v10302_v19 = vld [vmem:[%s16305_s1 + $0x540] ss:$8 sps:$4 sm:$0xff]  }
 0x36c   :  { %5876 = vmatpush1.bf16.msra.mxu1 %v10251_v38  ;;  %5545 = vmatprep.subr.bf16.mxu0 %v10256_v49  ;;  %v10305_v38 = vld [vmem:[%s16305_s1 + $0x7a0] ss:$8 sps:$4 sm:$0xff]   ;;  %v3988_v49 = vlaneseq }
 0x36d   :  { %5877 = vmatprep.subr.bf16.mxu1 %v10259_v48  ;;  %5907 = vmatprep.mubr.bf16.mxu1 %v13776_v46 }
 0x36f   :  { %5546 = vmatpush1.bf16.msra.mxu0 %v10254_v57  ;;  %v10310_v57 = vld [vmem:[%s16305_s1 + $0x534] ss:$8 sps:$4 sm:$0xff]  }
 0x370   :  { %5878 = vmatpush1.bf16.msra.mxu1 %v10257_v24  ;;  %5547 = vmatprep.subr.bf16.mxu0 %v10262_v15 }
 0x371   :  { %5879 = vmatprep.subr.bf16.mxu1 %v10265_v9  ;;  %v3989_v9 = vshrl.u32 %v3988_v49, 7  ;;  %v10334_v49 = vld [vmem:[%s16306_s0 + $0x30] ss:$12 sps:$4 sm:$0x1e]  }
 0x373   :  { %5548 = vmatpush1.bf16.msra.mxu0 %v10260_v50  ;;  %v10308_v50 = vld [vmem:[%s16305_s1 + $0x530] ss:$8 sps:$4 sm:$0xff]  }
 0x374   :  { %5880 = vmatpush1.bf16.msra.mxu1 %v10263_v55  ;;  %5549 = vmatprep.subr.bf16.mxu0 %v10268_v39  ;;  %v10311_v55 = vld [vmem:[%s16305_s1 + $0x790] ss:$8 sps:$4 sm:$0xff]  }
 0x375   :  { %5881 = vmatprep.subr.bf16.mxu1 %v10271_v61  ;;  %v10316_v61 = vld [vmem:[%s16305_s1 + $0x524] ss:$8 sps:$4 sm:$0xff]  }
 0x377   :  { %5550 = vmatpush1.bf16.msra.mxu0 %v10266_v0 }
 0x378   :  { %5882 = vmatpush1.bf16.msra.mxu1 %v10269_v17  ;;  %5551 = vmatprep.subr.bf16.mxu0 %v10274_v40  ;;  %v15_v40 = vld [vmem:[%s16307_s2] sm:$0x3] }
 0x379   :  { %5883 = vmatprep.subr.bf16.mxu1 %v10277_v4 }
 0x37b   :  { %5552 = vmatpush1.bf16.msra.mxu0 %v10272_v62 }
 0x37c   :  { %5884 = vmatpush1.bf16.msra.mxu1 %v10275_v16  ;;  %5553 = vmatprep.subr.bf16.mxu0 %v10280_v63  ;;  %v3990_v16 = vsub.s32 0, %v3989_v9  ;;  %v10314_v63 = vld [vmem:[%s16305_s1 + $0x520] ss:$8 sps:$4 sm:$0xff]  }
 0x37d   :  { %5885 = vmatprep.subr.bf16.mxu1 %v10283_v35  ;;  %v10317_v35 = vld [vmem:[%s16305_s1 + $0x780] ss:$8 sps:$4 sm:$0xff]  }
 0x37f   :  { %5554 = vmatpush1.bf16.msra.mxu0 %v10278_v52 }
 0x380   :  { %5886 = vmatpush1.bf16.msra.mxu1 %v10281_v7  ;;  %5555 = vmatprep.subr.bf16.mxu0 %v10286_v6  ;;  %v3994_v7 = vsub.s32 1, %v3989_v9  ;;  %v10322_v6 = vld [vmem:[%s16305_s1 + $0x514] ss:$8 sps:$4 sm:$0xff]   ;;  %v14550_v9 = vrot.slane %v10334_v49, 1  ;;  %v10380_v49 = vld [vmem:[%s16305_s1 + $0x820] ss:$8 sps:$4 sm:$0xff]  }
 0x381   :  { %5887 = vmatprep.subr.bf16.mxu1 %v10289_v29  ;;  %v10325_v29 = vld [vmem:[%s16305_s1 + $0x774] ss:$8 sps:$4 sm:$0xff]  }
 0x383   :  { %5556 = vmatpush2.bf16.msra.mxu0 %v10284_v14 }
 0x384   :  { %5888 = vmatpush1.bf16.msra.mxu1 %v10287_v56  ;;  %5557 = vmatprep.subr.bf16.mxu0 %v10292_v37 }
 0x385   :  { %5889 = vmatprep.subr.bf16.mxu1 %v10295_v45 }
 0x387   :  { %5558 = vmatpush2.bf16.msra.mxu0 %v10290_v43 }
 0x388   :  { %5890 = vmatpush1.bf16.msra.mxu1 %v10293_v21  ;;  %5559 = vmatprep.subr.bf16.mxu0 %v10298_v42  ;;  %v14493_v42 = vrot.slane %v15_v40, %v3990_v16  ;;  %v10344_v16 = vld [vmem:[%s16305_s1 + $0x7c0] ss:$8 sps:$4 sm:$0xff]  }
 0x389   :  { %5891 = vmatprep.subr.bf16.mxu1 %v10301_v44 }
 0x38a   :  { %v3847_v25 = vpop.f32.mrf.mxu0 }
 0x38b   :  { %v3889_v28 = vadd.f32 %v14246_v5, %v3847_v25  ;;  %5560 = vmatpush2.bf16.msra.mxu0 %v10296_v59  ;;  %v10313_v5 = vld [vmem:[%s16305_s1 + $0x794] ss:$8 sps:$4 sm:$0xff]   ;;  %v10320_v59 = vld [vmem:[%s16305_s1 + $0x510] ss:$8 sps:$4 sm:$0xff]   ;;  %v10331_v25 = vld [vmem:[%s16305_s1 + $0x764] ss:$8 sps:$4 sm:$0xff]  }
 0x38c   :  { %5892 = vmatpush2.bf16.msra.mxu1 %v10299_v58  ;;  %v3849_v48 = vpop.f32.mrf.mxu0  ;;  %5561 = vmatprep.subr.bf16.mxu0 %v10304_v2  ;;  %v10323_v58 = vld [vmem:[%s16305_s1 + $0x770] ss:$8 sps:$4 sm:$0xff]  }
 0x38d   :  { %5893 = vmatprep.subr.bf16.mxu1 %v10307_v20  ;;  %v3895_v24 = vadd.f32 %v3889_v28, %v14229_v8  ;;  %v10319_v8 = vld [vmem:[%s16305_s1 + $0x784] ss:$8 sps:$4 sm:$0xff]   ;;  %v3891_v0 = vadd.f32 %v14255_v32, %v3849_v48 }
 0x38e   :  { %v3851_v15 = vpop.f32.mrf.mxu0 }
 0x38f   :  { %5562 = vmatpush2.bf16.msra.mxu0 %v10302_v19  ;;  %v3896_v14 = vadd.f32 %v3891_v0, %v14232_v23  ;;  %v14501_v23 = vrot.slane %v15_v40, %v3994_v7  ;;  %v10343_v0 = vld [vmem:[%s16305_s1 + $0x744] ss:$8 sps:$4 sm:$0xff]  }
 0x390   :  { %5894 = vmatpush2.bf16.msra.mxu1 %v10305_v38  ;;  %v3852_v39 = vpop.f32.mrf.mxu0  ;;  %5563 = vmatprep.subr.bf16.mxu0 %v10310_v57  ;;  %v10355_v7 = vld [vmem:[%s16305_s1 + $0x604] ss:$8 sps:$4 sm:$0xff]  }
 0x391   :  { %5895 = vmatprep.subr.bf16.mxu1 %v10313_v5  ;;  %v10335_v39 = vld [vmem:[%s16305_s1 + $0x750] ss:$8 sps:$4 sm:$0xff]  }
 0x392   :  { %v3972_v4 = vpop.f32.mrf.mxu0 }
 0x393   :  { %v3931_v17 = vpop.f32.mrf.mxu1  ;;  %5564 = vmatpush2.bf16.msra.mxu0 %v10308_v50 }
 0x394   :  { %v3973_v62 = vadd.f32 %v3972_v4, %v3931_v17  ;;  %5896 = vmatpush2.bf16.msra.mxu1 %v10311_v55  ;;  %v3974_v32 = vpop.f32.mrf.mxu0  ;;  %5565 = vmatprep.subr.bf16.mxu0 %v10316_v61  ;;  %v10338_v61 = vld [vmem:[%s16305_s1 + $0x7d0] ss:$8 sps:$4 sm:$0xff]   ;;  %v10346_v17 = vld [vmem:[%s16305_s1 + $0x7c4] ss:$8 sps:$4 sm:$0xff]  }
 0x395   :  { %v3933_v52 = vpop.f32.mrf.mxu1  ;;  %5897 = vmatprep.subr.bf16.mxu1 %v10319_v8 }
 0x396   :  { %v3979_v56 = vadd.f32 %v3973_v62, %v3895_v24  ;;  %v3975_v37 = vadd.f32 %v3974_v32, %v3933_v52  ;;  %v3976_v43 = vpop.f32.mrf.mxu0  ;;  %v4017_v24 = vld [vmem:[%s16308_s3] sm:$0xff]  ;;  %v10347_v52 = vld [vmem:[%s16305_s1 + $0x610] ss:$8 sps:$4 sm:$0xff]  }
 0x397   :  { %v3935_v45 = vpop.f32.mrf.mxu1  ;;  %5566 = vmatpush2.bf16.msra.mxu0 %v10314_v63  ;;  %v10341_v62 = vld [vmem:[%s16305_s1 + $0x740] ss:$8 sps:$4 sm:$0xff]   ;;  %v10349_v63 = vld [vmem:[%s16305_s1 + $0x614] ss:$8 sps:$4 sm:$0xff]   ;;  %v10350_v32 = vld [vmem:[%s16305_s1 + $0x6b0] ss:$8 sps:$4 sm:$0xff]  }
 0x398   :  { %v3983_v21 = vmax.f32 %v13936_v18, %v3979_v56  ;;  %v3980_v44 = vadd.f32 %v3975_v37, %v3896_v14  ;;  %5898 = vmatpush2.bf16.msra.mxu1 %v10317_v35  ;;  %v3977_v20 = vpop.f32.mrf.mxu0  ;;  %5567 = vmatprep.subr.bf16.mxu0 %v10322_v6  ;;  %v10328_v18 = vld [vmem:[%s16305_s1 + $0x504] ss:$8 sps:$4 sm:$0xff]   ;;  %v10352_v35 = vld [vmem:[%s16305_s1 + $0x6b4] ss:$8 sps:$4 sm:$0xff]   ;;  %v10353_v14 = vld [vmem:[%s16305_s1 + $0x600] ss:$8 sps:$4 sm:$0xff]  }
 0x399   :  { %v3936_v2 = vpop.f32.mrf.mxu1  ;;  %5899 = vmatprep.subr.bf16.mxu1 %v10325_v29  ;;  %v10358_v6 = vld [vmem:[%s16305_s1 + $0x6a4] ss:$8 sps:$4 sm:$0xff]   ;;  %v14606_v29 = vld [vmem:[%s16306_s0 + $0x50] ss:$0 sps:$4 sm:$0xff]   ;;  %v10356_v56 = vld [vmem:[%s16305_s1 + $0x6a0] ss:$8 sps:$4 sm:$0xff]  }
 0x39a   :  { %v3985_v28 = vmax.f32 %v3981_v3, %v3983_v21  ;;  %v3984_v19 = vmax.f32 %v13940_v33, %v3980_v44  ;;  %v10361_v37 = vld [vmem:[%s16305_s1 + $0x5f4] ss:$8 sps:$4 sm:$0xff]   ;;  %v10359_v43 = vld [vmem:[%s16305_s1 + $0x5f0] ss:$8 sps:$4 sm:$0xff]   ;;  %v10367_v44 = vld [vmem:[%s16305_s1 + $0x5e4] ss:$8 sps:$4 sm:$0xff]  }
 0x39b   :  { %v14513_v38 = vpop.f32.mrf.mxu1  ;;  %5568 = vmatpush2.bf16.msra.mxu0 %v10320_v59  ;;  %v10364_v45 = vld [vmem:[%s16305_s1 + $0x854] ss:$8 sps:$4 sm:$0xff]   ;;  %v10362_v21 = vld [vmem:[%s16305_s1 + $0x850] ss:$8 sps:$4 sm:$0xff]   ;;  %v10365_v59 = vld [vmem:[%s16305_s1 + $0x5e0] ss:$8 sps:$4 sm:$0xff]  }
 0x39c   :  { %v3998_v48 = vadd.f32 %v14493_v42, %v3985_v28  ;;  %v3986_v57 = vmax.f32 %v3982_v10, %v3984_v19  ;;  %5900 = vmatpush2.bf16.msra.mxu1 %v10323_v58  ;;  %5569 = vmatprep.subr.bf16.mxu0 %v10328_v18  ;;  %v10368_v58 = vld [vmem:[%s16305_s1 + $0x840] ss:$8 sps:$4 sm:$0xff]   ;;  %v10373_v2 = vld [vmem:[%s16305_s1 + $0x5d4] ss:$8 sps:$4 sm:$0xff]   ;;  %v10371_v20 = vld [vmem:[%s16305_s1 + $0x5d0] ss:$8 sps:$4 sm:$0xff]  }
 0x39d   :  { %v14532_v33 = vpop.f32.mrf.mxu1  ;;  %5901 = vmatprep.subr.bf16.mxu1 %v10331_v25  ;;  %v10374_v18 = vld [vmem:[%s16305_s1 + $0x830] ss:$8 sps:$4 sm:$0xff]   ;;  %v10379_v25 = vld [vmem:[%s16305_s1 + $0x5c4] ss:$8 sps:$4 sm:$0xff]   ;;  %v10377_v19 = vld [vmem:[%s16305_s1 + $0x5c0] ss:$8 sps:$4 sm:$0xff]  }
 0x39e   :  { %v3999_v10 = vadd.f32 %v14501_v23, %v3986_v57  ;;  %v4000_v50 = vmax.f32 %v3998_v48, 0.0  ;;  %v10382_v28 = vld [vmem:[%s16305_s1 + $0x824] ss:$8 sps:$4 sm:$0xff]   ;;  %v10385_v48 = vld [vmem:[%s16305_s1 + $0x5b4] ss:$8 sps:$4 sm:$0xff]  }
 0x39f   :  { %v4370_v15 = vpop.f32.mrf.mxu1  ;;  %5570 = vmatpush2.bf16.msra.mxu0 %v10326_v22  ;;  %v10388_v57 = vld [vmem:[%s16305_s1 + $0x814] ss:$8 sps:$4 sm:$0xff]   ;;  %v10383_v22 = vld [vmem:[%s16305_s1 + $0x5b0] ss:$8 sps:$4 sm:$0xff]  }
 0x3a0   :  { %v4001_v55 = vmax.f32 %v3999_v10, 0.0  ;;  %5902 = vmatpush2.bf16.msra.mxu1 %v10329_v41  ;;  %5928 = vmatprep.subr.bf16.mxu0 %v10340_v47  ;;  %v10386_v41 = vld [vmem:[%s16305_s1 + $0x810] ss:$8 sps:$4 sm:$0xff]   ;;  %v10394_v47 = vld [vmem:[%s16305_s1 + $0x804] ss:$8 sps:$4 sm:$0xff]  }
 0x3a1   :  { %v4371_v8 = vpop.f32.mrf.mxu1  ;;  %5903 = vmatprep.subr.bf16.mxu1 %v10337_v27  ;;  %v10391_v27 = vld [vmem:[%s16305_s1 + $0x5a4] ss:$8 sps:$4 sm:$0xff]   ;;  %v10389_v10 = vld [vmem:[%s16305_s1 + $0x5a0] ss:$8 sps:$4 sm:$0xff]   ;;  %v10397_v15 = vld [vmem:[%s16305_s1 + $0x694] ss:$8 sps:$4 sm:$0xff]  }
 0x3a2   :  { %v9456_v40 = vpack.c.bf16 %v4001_v55, %v4000_v50  ;;  %5572 = vmatmul.mubr.bf16.vlgmr.msra.gmra.mxu0 %v14550_v9  ;;  %v10400_v50 = vld [vmem:[%s16305_s1 + $0x7f4] ss:$8 sps:$4 sm:$0xff]   ;;  %v10395_v55 = vld [vmem:[%s16305_s1 + $0x690] ss:$8 sps:$4 sm:$0xff]   ;;  %v10406_v8 = vld [vmem:[%s16305_s1 + $0x7e4] ss:$8 sps:$4 sm:$0xff]  }
 0x3a3   :  { %5929 = vmatpush1.bf16.msra.mxu0 %v10338_v61  ;;  %5948 = vmatprep.mubr.bf16.mxu0 %v11292_v1  ;;  %v10403_v61 = vld [vmem:[%s16305_s1 + $0x684] ss:$8 sps:$4 sm:$0xff]  }
 0x3a4   :  { %v4018_v4 = vsel %vm4016_vm7, %v9456_v40, %v4017_v24  ;;  %5904 = vmatpush2.bf16.msra.mxu1 %v10335_v39  ;;  %5930 = vmatprep.subr.bf16.mxu0 %v10346_v17  ;;  %v10392_v24 = vld [vmem:[%s16305_s1 + $0x800] ss:$8 sps:$4 sm:$0xff]   ;;  %v10398_v39 = vld [vmem:[%s16305_s1 + $0x7f0] ss:$8 sps:$4 sm:$0xff]   ;;  %v10409_v40 = vld [vmem:[%s16305_s1 + $0x674] ss:$8 sps:$4 sm:$0xff]  }
 0x3a5   :  { %4019 = vst [vmem:[%s16308_s3] sm:$0xff] %v4018_v4  ;;  %5905 = vmatprep.subr.bf16.mxu1 %v10343_v0  ;;  %v10401_v0 = vld [vmem:[%s16305_s1 + $0x680] ss:$8 sps:$4 sm:$0xff]   ;;  %v10412_v4 = vld [vmem:[%s16305_s1 + $0x8d4] ss:$8 sps:$4 sm:$0xff]  }
 0x3a6   :  { %v10404_v17 = vld [vmem:[%s16305_s1 + $0x7e0] ss:$8 sps:$4 sm:$0xff]  }
 0x3a7   :  { %5931 = vmatpush1.bf16.msra.mxu0 %v10344_v16  ;;  %v10410_v16 = vld [vmem:[%s16305_s1 + $0x8d0] ss:$8 sps:$4 sm:$0xff]  }
 0x3a8   :  { %5906 = vmatpush2.bf16.msra.mxu1 %v10341_v62  ;;  %6137 = vmatprep.subr.bf16.mxu0 %v10349_v63  ;;  %v10407_v62 = vld [vmem:[%s16305_s1 + $0x670] ss:$8 sps:$4 sm:$0xff]   ;;  %v10415_v63 = vld [vmem:[%s16305_s1 + $0x664] ss:$8 sps:$4 sm:$0xff]  }
 0x3a9   :  { %6190 = vmatprep.subr.bf16.mxu1 %v10352_v35  ;;  %v10418_v35 = vld [vmem:[%s16305_s1 + $0x8c4] ss:$8 sps:$4 sm:$0xff]  }
 0x3aa   :  { %9179 = vmatmul.mubr.msk.bf16.vlgmr.msra.gmra.mxu0 %vm284_vm0, %v14606_v29 }
 0x3ab   :  { %5908 = vmatmul.mubr.bf16.vlgmr.msra.gmra.mxu1 %v14000_v13  ;;  %6138 = vmatpush1.bf16.msra.mxu0 %v10347_v52 }
 0x3ac   :  { %6191 = vmatpush1.bf16.msra.mxu1 %v10350_v32  ;;  %6139 = vmatprep.subr.bf16.mxu0 %v10355_v7  ;;  %v10413_v7 = vld [vmem:[%s16305_s1 + $0x660] ss:$8 sps:$4 sm:$0xff]  }
 0x3ad   :  { %6192 = vmatprep.subr.bf16.mxu1 %v10358_v6  ;;  %6210 = vmatprep.mubr.bf16.mxu1 %v11292_v1  ;;  %v10416_v6 = vld [vmem:[%s16305_s1 + $0x8c0] ss:$8 sps:$4 sm:$0xff]  }
 0x3ae   :  { %6169 = vmatprep.mubr.bf16.mxu0 %v13821_v54  ;;  %v10370_v54 = vld [vmem:[%s16305_s1 + $0x844] ss:$8 sps:$4 sm:$0xff]  }
 0x3af   :  { %6140 = vmatpush1.bf16.msra.mxu0 %v10353_v14 }
 0x3b0   :  { %6193 = vmatpush1.bf16.msra.mxu1 %v10356_v56  ;;  %6141 = vmatprep.subr.bf16.mxu0 %v10361_v37  ;;  %v10421_v56 = vld [vmem:[%s16305_s1 + $0x654] ss:$8 sps:$4 sm:$0xff]  }
 0x3b1   :  { %6435 = vmatprep.subr.bf16.mxu1 %v10364_v45 }
 0x3b3   :  { %9216 = vmatmul.mubr.msk.bf16.vlgmr.msra.gmra.mxu1 %vm284_vm0, %v14025_v31  ;;  %6142 = vmatpush1.bf16.msra.mxu0 %v10359_v43  ;;  %v10376_v31 = vld [vmem:[%s16305_s1 + $0x834] ss:$8 sps:$4 sm:$0xff]   ;;  %v10419_v43 = vld [vmem:[%s16305_s1 + $0x650] ss:$8 sps:$4 sm:$0xff]  }
 0x3b4   :  { %6436 = vmatpush1.bf16.msra.mxu1 %v10362_v21  ;;  %6143 = vmatprep.subr.bf16.mxu0 %v10367_v44  ;;  %v10422_v21 = vld [vmem:[%s16305_s1 + $0x8b0] ss:$8 sps:$4 sm:$0xff]  }
 0x3b5   :  { %6437 = vmatprep.subr.bf16.mxu1 %v10370_v54  ;;  %6467 = vmatprep.mubr.bf16.mxu1 %v14052_v60  ;;  %v10427_v54 = vld [vmem:[%s16305_s1 + $0x644] ss:$8 sps:$4 sm:$0xff]  }
 0x3b7   :  { %6144 = vmatpush1.bf16.msra.mxu0 %v10365_v59 }
 0x3b8   :  { %6438 = vmatpush1.bf16.msra.mxu1 %v10368_v58  ;;  %6145 = vmatprep.subr.bf16.mxu0 %v10373_v2 }
 0x3b9   :  { %6439 = vmatprep.subr.bf16.mxu1 %v10376_v31  ;;  %v10425_v31 = vld [vmem:[%s16305_s1 + $0x640] ss:$8 sps:$4 sm:$0xff]  }
 0x3bb   :  { %6146 = vmatpush1.bf16.msra.mxu0 %v10371_v20  ;;  %v10428_v20 = vld [vmem:[%s16305_s1 + $0x8a0] ss:$8 sps:$4 sm:$0xff]  }
 0x3bc   :  { %6440 = vmatpush1.bf16.msra.mxu1 %v10374_v18  ;;  %6147 = vmatprep.subr.bf16.mxu0 %v10379_v25 }
 0x3bd   :  { %6441 = vmatprep.subr.bf16.mxu1 %v10382_v28  ;;  %v10433_v28 = vld [vmem:[%s16305_s1 + $0x634] ss:$8 sps:$4 sm:$0xff]  }
 0x3bf   :  { %6148 = vmatpush1.bf16.msra.mxu0 %v10377_v19  ;;  %v10436_v19 = vld [vmem:[%s16305_s1 + $0x894] ss:$8 sps:$4 sm:$0xff]  }
 0x3c0   :  { %6442 = vmatpush1.bf16.msra.mxu1 %v10380_v49  ;;  %6149 = vmatprep.subr.bf16.mxu0 %v10385_v48 }
 0x3c1   :  { %6443 = vmatprep.subr.bf16.mxu1 %v10388_v57 }
 0x3c3   :  { %6150 = vmatpush1.bf16.msra.mxu0 %v10383_v22 }
 0x3c4   :  { %6444 = vmatpush1.bf16.msra.mxu1 %v10386_v41  ;;  %6151 = vmatprep.subr.bf16.mxu0 %v10391_v27  ;;  %v10431_v27 = vld [vmem:[%s16305_s1 + $0x630] ss:$8 sps:$4 sm:$0xff]  }
 0x3c5   :  { %6445 = vmatprep.subr.bf16.mxu1 %v10394_v47  ;;  %v10434_v47 = vld [vmem:[%s16305_s1 + $0x890] ss:$8 sps:$4 sm:$0xff]  }
 0x3c7   :  { %6152 = vmatpush1.bf16.msra.mxu0 %v10389_v10 }
 0x3c8   :  { %6446 = vmatpush1.bf16.msra.mxu1 %v10392_v24  ;;  %6153 = vmatprep.subr.bf16.mxu0 %v10397_v15  ;;  %v10439_v15 = vld [vmem:[%s16305_s1 + $0x624] ss:$8 sps:$4 sm:$0xff]  }
 0x3c9   :  { %6447 = vmatprep.subr.bf16.mxu1 %v10400_v50  ;;  %v10442_v50 = vld [vmem:[%s16305_s1 + $0x884] ss:$8 sps:$4 sm:$0xff]  }
 0x3cb   :  { %6154 = vmatpush2.bf16.msra.mxu0 %v10395_v55 }
 0x3cc   :  { %6448 = vmatpush1.bf16.msra.mxu1 %v10398_v39  ;;  %6155 = vmatprep.subr.bf16.mxu0 %v10403_v61  ;;  %v10437_v39 = vld [vmem:[%s16305_s1 + $0x620] ss:$8 sps:$4 sm:$0xff]  }
 0x3cd   :  { %6449 = vmatprep.subr.bf16.mxu1 %v10406_v8  ;;  %v10440_v61 = vld [vmem:[%s16305_s1 + $0x880] ss:$8 sps:$4 sm:$0xff]  }
 0x3cf   :  { %6156 = vmatpush2.bf16.msra.mxu0 %v10401_v0  ;;  %v10445_v0 = vld [vmem:[%s16305_s1 + $0x874] ss:$8 sps:$4 sm:$0xff]  }
 0x3d0   :  { %6450 = vmatpush1.bf16.msra.mxu1 %v10404_v17  ;;  %6157 = vmatprep.subr.bf16.mxu0 %v10409_v40  ;;  %v10448_v17 = vld [vmem:[%s16305_s1 + $0x8f4] ss:$8 sps:$4 sm:$0xff]  }
 0x3d1   :  { %6451 = vmatprep.subr.bf16.mxu1 %v10412_v4  ;;  %v10443_v4 = vld [vmem:[%s16305_s1 + $0x870] ss:$8 sps:$4 sm:$0xff]  }
 0x3d2   :  { %v4325_v52 = vpop.f32.mrf.mxu0 }
 0x3d3   :  { %v4367_v32 = vadd.f32 %v14513_v38, %v4325_v52  ;;  %6158 = vmatpush2.bf16.msra.mxu0 %v10407_v62  ;;  %v10424_v38 = vld [vmem:[%s16305_s1 + $0x8b4] ss:$8 sps:$4 sm:$0xff]   ;;  %v10446_v62 = vld [vmem:[%s16305_s1 + $0x8f0] ss:$8 sps:$4 sm:$0xff]   ;;  %v10449_v52 = vld [vmem:[%s16305_s1 + $0x860] ss:$8 sps:$4 sm:$0xff]  }
 0x3d4   :  { %6452 = vmatpush2.bf16.msra.mxu1 %v10410_v16  ;;  %v4327_v14 = vpop.f32.mrf.mxu0  ;;  %6159 = vmatprep.subr.bf16.mxu0 %v10415_v63  ;;  %v10451_v63 = vld [vmem:[%s16305_s1 + $0x864] ss:$8 sps:$4 sm:$0xff]  }
 0x3d5   :  { %6453 = vmatprep.subr.bf16.mxu1 %v10418_v35  ;;  %v4369_v37 = vadd.f32 %v14532_v33, %v4327_v14  ;;  %v10430_v33 = vld [vmem:[%s16305_s1 + $0x8a4] ss:$8 sps:$4 sm:$0xff]   ;;  %v10458_v14 = vld [vmem:[%s16305_s1 + $0xa10] ss:$8 sps:$4 sm:$0xff]  }
 0x3d6   :  { %v4329_v45 = vpop.f32.mrf.mxu0  ;;  %v10454_v35 = vld [vmem:[%s16305_s1 + $0x8e4] ss:$8 sps:$4 sm:$0xff]  }
 0x3d7   :  { %6160 = vmatpush2.bf16.msra.mxu0 %v10413_v7  ;;  %v10457_v7 = vld [vmem:[%s16305_s1 + $0x974] ss:$8 sps:$4 sm:$0xff]   ;;  %v10464_v45 = vld [vmem:[%s16305_s1 + $0xa00] ss:$8 sps:$4 sm:$0xff]  }
 0x3d8   :  { %6454 = vmatpush2.bf16.msra.mxu1 %v10416_v6  ;;  %v4330_v44 = vpop.f32.mrf.mxu0  ;;  %6161 = vmatprep.subr.bf16.mxu0 %v10421_v56  ;;  %v10455_v6 = vld [vmem:[%s16305_s1 + $0x970] ss:$8 sps:$4 sm:$0xff]   ;;  %v10463_v56 = vld [vmem:[%s16305_s1 + $0x964] ss:$8 sps:$4 sm:$0xff]  }
 0x3d9   :  { %6455 = vmatprep.subr.bf16.mxu1 %v10424_v38  ;;  %v10466_v38 = vld [vmem:[%s16305_s1 + $0xa04] ss:$8 sps:$4 sm:$0xff]   ;;  %v10467_v44 = vld [vmem:[%s16305_s1 + $0x950] ss:$8 sps:$4 sm:$0xff]  }
 0x3da   :  { %v4641_v58 = vpop.f32.mrf.mxu0 }
 0x3db   :  { %v4600_v59 = vpop.f32.mrf.mxu1  ;;  %6162 = vmatpush2.bf16.msra.mxu0 %v10419_v43  ;;  %v10469_v43 = vld [vmem:[%s16305_s1 + $0x954] ss:$8 sps:$4 sm:$0xff]  }
 0x3dc   :  { %v4601_v2 = vadd.f32 %v4600_v59, %v4367_v32  ;;  %6456 = vmatpush2.bf16.msra.mxu1 %v10422_v21  ;;  %v4643_v25 = vpop.f32.mrf.mxu0  ;;  %6163 = vmatprep.subr.bf16.mxu0 %v10427_v54  ;;  %v10452_v32 = vld [vmem:[%s16305_s1 + $0x8e0] ss:$8 sps:$4 sm:$0xff]   ;;  %v10472_v21 = vld [vmem:[%s16305_s1 + $0xa94] ss:$8 sps:$4 sm:$0xff]   ;;  %v10470_v54 = vld [vmem:[%s16305_s1 + $0xa90] ss:$8 sps:$4 sm:$0xff]  }
 0x3dd   :  { %v4602_v18 = vpop.f32.mrf.mxu1  ;;  %6457 = vmatprep.subr.bf16.mxu1 %v10430_v33  ;;  %v10475_v33 = vld [vmem:[%s16305_s1 + $0x944] ss:$8 sps:$4 sm:$0xff]  }
 0x3de   :  { %v14773_v49 = vadd.f32 %v4641_v58, %v4601_v2  ;;  %v4603_v48 = vadd.f32 %v4602_v18, %v4369_v37  ;;  %v4645_v22 = vpop.f32.mrf.mxu0  ;;  %v10461_v37 = vld [vmem:[%s16305_s1 + $0x960] ss:$8 sps:$4 sm:$0xff]   ;;  %v10478_v59 = vld [vmem:[%s16305_s1 + $0xa84] ss:$8 sps:$4 sm:$0xff]   ;;  %v10479_v18 = vld [vmem:[%s16305_s1 + $0x930] ss:$8 sps:$4 sm:$0xff]  }
 0x3df   :  { %v4604_v57 = vpop.f32.mrf.mxu1  ;;  %6164 = vmatpush2.bf16.msra.mxu0 %v10425_v31  ;;  %v10473_v58 = vld [vmem:[%s16305_s1 + $0x940] ss:$8 sps:$4 sm:$0xff]   ;;  %v10481_v31 = vld [vmem:[%s16305_s1 + $0x934] ss:$8 sps:$4 sm:$0xff]  }
 0x3e0   :  { %v14775_v41 = vadd.f32 %v4643_v25, %v4603_v48  ;;  %6458 = vmatpush2.bf16.msra.mxu1 %v10428_v20  ;;  %v4646_v24 = vpop.f32.mrf.mxu0  ;;  %6165 = vmatprep.subr.bf16.mxu0 %v10433_v28  ;;  %v10476_v2 = vld [vmem:[%s16305_s1 + $0xa80] ss:$8 sps:$4 sm:$0xff]   ;;  %v10484_v20 = vld [vmem:[%s16305_s1 + $0xa74] ss:$8 sps:$4 sm:$0xff]   ;;  %v10482_v25 = vld [vmem:[%s16305_s1 + $0xa70] ss:$8 sps:$4 sm:$0xff]  }
 0x3e1   :  { %v4605_v10 = vpop.f32.mrf.mxu1  ;;  %6459 = vmatprep.subr.bf16.mxu1 %v10436_v19  ;;  %v10487_v28 = vld [vmem:[%s16305_s1 + $0x924] ss:$8 sps:$4 sm:$0xff]   ;;  %v10485_v48 = vld [vmem:[%s16305_s1 + $0x920] ss:$8 sps:$4 sm:$0xff]   ;;  %v10493_v22 = vld [vmem:[%s16305_s1 + $0x914] ss:$8 sps:$4 sm:$0xff]  }
 0x3e2   :  { %v10490_v19 = vld [vmem:[%s16305_s1 + $0xa64] ss:$8 sps:$4 sm:$0xff]   ;;  %v10488_v57 = vld [vmem:[%s16305_s1 + $0xa60] ss:$8 sps:$4 sm:$0xff]   ;;  %v10494_v10 = vld [vmem:[%s16305_s1 + $0xa50] ss:$8 sps:$4 sm:$0xff]  }
 0x3e3   :  { %v14789_v55 = vpop.f32.mrf.mxu1  ;;  %6166 = vmatpush2.bf16.msra.mxu0 %v10431_v27  ;;  %v10496_v27 = vld [vmem:[%s16305_s1 + $0xa54] ss:$8 sps:$4 sm:$0xff]   ;;  %v10499_v24 = vld [vmem:[%s16305_s1 + $0x904] ss:$8 sps:$4 sm:$0xff]  }
 0x3e4   :  { %6460 = vmatpush2.bf16.msra.mxu1 %v10434_v47  ;;  %6167 = vmatprep.subr.bf16.mxu0 %v10439_v15  ;;  %v10491_v47 = vld [vmem:[%s16305_s1 + $0x910] ss:$8 sps:$4 sm:$0xff]   ;;  %v10502_v15 = vld [vmem:[%s16305_s1 + $0xa44] ss:$8 sps:$4 sm:$0xff]  }
 0x3e5   :  { %v14797_v8 = vpop.f32.mrf.mxu1  ;;  %6461 = vmatprep.subr.bf16.mxu1 %v10442_v50  ;;  %v10497_v50 = vld [vmem:[%s16305_s1 + $0x900] ss:$8 sps:$4 sm:$0xff]  }
 0x3e7   :  { %v4968_v40 = vpop.f32.mrf.mxu1  ;;  %6168 = vmatpush2.bf16.msra.mxu0 %v10437_v39  ;;  %v10500_v39 = vld [vmem:[%s16305_s1 + $0xa40] ss:$8 sps:$4 sm:$0xff]  }
 0x3e8   :  { %6462 = vmatpush2.bf16.msra.mxu1 %v10440_v61  ;;  %6488 = vmatprep.subr.bf16.mxu0 %v10448_v17  ;;  %v10505_v61 = vld [vmem:[%s16305_s1 + $0x9f4] ss:$8 sps:$4 sm:$0xff]   ;;  %v10503_v17 = vld [vmem:[%s16305_s1 + $0x9f0] ss:$8 sps:$4 sm:$0xff]  }
 0x3e9   :  { %v4969_v16 = vpop.f32.mrf.mxu1  ;;  %6463 = vmatprep.subr.bf16.mxu1 %v10445_v0  ;;  %v10508_v0 = vld [vmem:[%s16305_s1 + $0xa34] ss:$8 sps:$4 sm:$0xff]   ;;  %v10506_v40 = vld [vmem:[%s16305_s1 + $0xa30] ss:$8 sps:$4 sm:$0xff]  }
 0x3ea   :  { %6170 = vmatmul.mubr.bf16.vlgmr.msra.gmra.mxu0 %v14037_v36  ;;  %v10460_v36 = vld [vmem:[%s16305_s1 + $0xa14] ss:$8 sps:$4 sm:$0xff]   ;;  %v10509_v16 = vld [vmem:[%s16305_s1 + $0x9e0] ss:$8 sps:$4 sm:$0xff]  }
 0x3eb   :  { %6489 = vmatpush1.bf16.msra.mxu0 %v10446_v62  ;;  %6508 = vmatprep.mubr.bf16.mxu0 %v11292_v1  ;;  %v10514_v62 = vld [vmem:[%s16305_s1 + $0xa24] ss:$8 sps:$4 sm:$0xff]  }
 0x3ec   :  { %6464 = vmatpush2.bf16.msra.mxu1 %v10443_v4  ;;  %6490 = vmatprep.subr.bf16.mxu0 %v10454_v35  ;;  %v10511_v4 = vld [vmem:[%s16305_s1 + $0x9e4] ss:$8 sps:$4 sm:$0xff]   ;;  %v10517_v35 = vld [vmem:[%s16305_s1 + $0x9d4] ss:$8 sps:$4 sm:$0xff]  }
 0x3ed   :  { %6465 = vmatprep.subr.bf16.mxu1 %v10451_v63  ;;  %v10512_v63 = vld [vmem:[%s16305_s1 + $0xa20] ss:$8 sps:$4 sm:$0xff]  }
 0x3ef   :  { %6491 = vmatpush1.bf16.msra.mxu0 %v10452_v32  ;;  %v10515_v32 = vld [vmem:[%s16305_s1 + $0x9d0] ss:$8 sps:$4 sm:$0xff]  }
 0x3f0   :  { %6466 = vmatpush2.bf16.msra.mxu1 %v10449_v52  ;;  %6735 = vmatprep.subr.bf16.mxu0 %v10457_v7  ;;  %v10520_v52 = vld [vmem:[%s16305_s1 + $0xb14] ss:$8 sps:$4 sm:$0xff]   ;;  %v10518_v7 = vld [vmem:[%s16305_s1 + $0xb10] ss:$8 sps:$4 sm:$0xff]  }
 0x3f1   :  { %6788 = vmatprep.subr.bf16.mxu1 %v10460_v36  ;;  %v10523_v36 = vld [vmem:[%s16305_s1 + $0x9c4] ss:$8 sps:$4 sm:$0xff]  }
 0x3f2   :  { %9289 = vmatmul.mubr.msk.bf16.vlgmr.msra.gmra.mxu0 %vm284_vm0, %v14074_v26 }
 0x3f3   :  { %6468 = vmatmul.mubr.bf16.vlgmr.msra.gmra.mxu1 %v14263_v34  ;;  %6736 = vmatpush1.bf16.msra.mxu0 %v10455_v6  ;;  %v10526_v6 = vld [vmem:[%s16305_s1 + $0xb04] ss:$8 sps:$4 sm:$0xff]  }
 0x3f4   :  { %6789 = vmatpush1.bf16.msra.mxu1 %v10458_v14  ;;  %6737 = vmatprep.subr.bf16.mxu0 %v10463_v56 }
 0x3f5   :  { %6790 = vmatprep.subr.bf16.mxu1 %v10466_v38  ;;  %6808 = vmatprep.mubr.bf16.mxu1 %v11292_v1  ;;  %v10521_v38 = vld [vmem:[%s16305_s1 + $0x9c0] ss:$8 sps:$4 sm:$0xff]  }
 0x3f6   :  { %6767 = vmatprep.mubr.bf16.mxu0 %v14088_v11 }
 0x3f7   :  { %6738 = vmatpush1.bf16.msra.mxu0 %v10461_v37  ;;  %v10524_v37 = vld [vmem:[%s16305_s1 + $0xb00] ss:$8 sps:$4 sm:$0xff]  }
 0x3f8   :  { %6791 = vmatpush1.bf16.msra.mxu1 %v10464_v45  ;;  %6739 = vmatprep.subr.bf16.mxu0 %v10469_v43  ;;  %v10529_v43 = vld [vmem:[%s16305_s1 + $0x9b4] ss:$8 sps:$4 sm:$0xff]  }
 0x3f9   :  { %7035 = vmatprep.subr.bf16.mxu1 %v10472_v21 }
 0x3fb   :  { %9362 = vmatmul.mubr.msk.bf16.vlgmr.msra.gmra.mxu1 %vm284_vm0, %v14300_v12  ;;  %6740 = vmatpush1.bf16.msra.mxu0 %v10467_v44 }
 0x3fc   :  { %7036 = vmatpush1.bf16.msra.mxu1 %v10470_v54  ;;  %6741 = vmatprep.subr.bf16.mxu0 %v10475_v33 }
 0x3fd   :  { %7037 = vmatprep.subr.bf16.mxu1 %v10478_v59  ;;  %7067 = vmatprep.mubr.bf16.mxu1 %v14314_v51  ;;  %v10527_v59 = vld [vmem:[%s16305_s1 + $0x9b0] ss:$8 sps:$4 sm:$0xff]  }
 0x3ff   :  { %6742 = vmatpush1.bf16.msra.mxu0 %v10473_v58  ;;  %v10530_v58 = vld [vmem:[%s16305_s1 + $0xaf0] ss:$8 sps:$4 sm:$0xff]  }
 0x400   :  { %7038 = vmatpush1.bf16.msra.mxu1 %v10476_v2  ;;  %6743 = vmatprep.subr.bf16.mxu0 %v10481_v31 }
 0x401   :  { %7039 = vmatprep.subr.bf16.mxu1 %v10484_v20 }
 0x403   :  { %6744 = vmatpush1.bf16.msra.mxu0 %v10479_v18  ;;  %v10533_v18 = vld [vmem:[%s16305_s1 + $0x9a0] ss:$8 sps:$4 sm:$0xff]  }
 0x404   :  { %7040 = vmatpush1.bf16.msra.mxu1 %v10482_v25  ;;  %6745 = vmatprep.subr.bf16.mxu0 %v10487_v28  ;;  %v10536_v25 = vld [vmem:[%s16305_s1 + $0xae0] ss:$8 sps:$4 sm:$0xff]  }
 0x405   :  { %7041 = vmatprep.subr.bf16.mxu1 %v10490_v19 }
 0x407   :  { %6746 = vmatpush1.bf16.msra.mxu0 %v10485_v48  ;;  %v10541_v48 = vld [vmem:[%s16305_s1 + $0x994] ss:$8 sps:$4 sm:$0xff]  }
 0x408   :  { %7042 = vmatpush1.bf16.msra.mxu1 %v10488_v57  ;;  %6747 = vmatprep.subr.bf16.mxu0 %v10493_v22  ;;  %v10544_v57 = vld [vmem:[%s16305_s1 + $0xad4] ss:$8 sps:$4 sm:$0xff]  }
 0x409   :  { %7043 = vmatprep.subr.bf16.mxu1 %v10496_v27 }
 0x40b   :  { %6748 = vmatpush1.bf16.msra.mxu0 %v10491_v47 }
 0x40c   :  { %7044 = vmatpush1.bf16.msra.mxu1 %v10494_v10  ;;  %6749 = vmatprep.subr.bf16.mxu0 %v10499_v24 }
 0x40d   :  { %7045 = vmatprep.subr.bf16.mxu1 %v10502_v15  ;;  %v10539_v15 = vld [vmem:[%s16305_s1 + $0x990] ss:$8 sps:$4 sm:$0xff]  }
 0x40f   :  { %6750 = vmatpush1.bf16.msra.mxu0 %v10497_v50  ;;  %v10542_v50 = vld [vmem:[%s16305_s1 + $0xad0] ss:$8 sps:$4 sm:$0xff]  }
 0x410   :  { %7046 = vmatpush1.bf16.msra.mxu1 %v10500_v39  ;;  %6751 = vmatprep.subr.bf16.mxu0 %v10505_v61 }
 0x411   :  { %7047 = vmatprep.subr.bf16.mxu1 %v10508_v0  ;;  %v10547_v0 = vld [vmem:[%s16305_s1 + $0x984] ss:$8 sps:$4 sm:$0xff]  }
 0x413   :  { %6752 = vmatpush2.bf16.msra.mxu0 %v10503_v17  ;;  %v10550_v17 = vld [vmem:[%s16305_s1 + $0xac4] ss:$8 sps:$4 sm:$0xff]  }
 0x414   :  { %7048 = vmatpush1.bf16.msra.mxu1 %v10506_v40  ;;  %6753 = vmatprep.subr.bf16.mxu0 %v10511_v4  ;;  %v10545_v4 = vld [vmem:[%s16305_s1 + $0x980] ss:$8 sps:$4 sm:$0xff]  }
 0x415   :  { %7049 = vmatprep.subr.bf16.mxu1 %v10514_v62  ;;  %v10548_v62 = vld [vmem:[%s16305_s1 + $0xac0] ss:$8 sps:$4 sm:$0xff]  }
 0x417   :  { %6754 = vmatpush2.bf16.msra.mxu0 %v10509_v16 }
 0x418   :  { %7050 = vmatpush1.bf16.msra.mxu1 %v10512_v63  ;;  %6755 = vmatprep.subr.bf16.mxu0 %v10517_v35  ;;  %v10553_v63 = vld [vmem:[%s16305_s1 + $0xab4] ss:$8 sps:$4 sm:$0xff]  }
 0x419   :  { %7051 = vmatprep.subr.bf16.mxu1 %v10520_v52  ;;  %v10556_v35 = vld [vmem:[%s16305_s1 + $0xb34] ss:$8 sps:$4 sm:$0xff]  }
 0x41a   :  { %v4923_v14 = vpop.f32.mrf.mxu0 }
 0x41b   :  { %v4965_v56 = vadd.f32 %v14789_v55, %v4923_v14  ;;  %6756 = vmatpush2.bf16.msra.mxu0 %v10515_v32  ;;  %v10532_v55 = vld [vmem:[%s16305_s1 + $0xaf4] ss:$8 sps:$4 sm:$0xff]   ;;  %v10551_v32 = vld [vmem:[%s16305_s1 + $0xab0] ss:$8 sps:$4 sm:$0xff]   ;;  %v10562_v14 = vld [vmem:[%s16305_s1 + $0xb24] ss:$8 sps:$4 sm:$0xff]  }
 0x41c   :  { %7052 = vmatpush2.bf16.msra.mxu1 %v10518_v7  ;;  %v4925_v45 = vpop.f32.mrf.mxu0  ;;  %6757 = vmatprep.subr.bf16.mxu0 %v10523_v36  ;;  %v10554_v7 = vld [vmem:[%s16305_s1 + $0xb30] ss:$8 sps:$4 sm:$0xff]  }
 0x41d   :  { %7053 = vmatprep.subr.bf16.mxu1 %v10526_v6  ;;  %v4971_v21 = vadd.f32 %v4965_v56, %v14773_v49  ;;  %v4967_v44 = vadd.f32 %v14797_v8, %v4925_v45  ;;  %v10535_v49 = vld [vmem:[%s16305_s1 + $0x9a4] ss:$8 sps:$4 sm:$0xff]   ;;  %v10557_v56 = vld [vmem:[%s16305_s1 + $0xaa0] ss:$8 sps:$4 sm:$0xff]   ;;  %v10932_v45 = vld [vmem:[%s16305_s1 + $0x234] ss:$8 sps:$4 sm:$0xff]  }
 0x41e   :  { %v4927_v54 = vpop.f32.mrf.mxu0  ;;  %v10559_v6 = vld [vmem:[%s16305_s1 + $0xaa4] ss:$8 sps:$4 sm:$0xff]  }
 0x41f   :  { %v4972_v33 = vadd.f32 %v4967_v44, %v14775_v41  ;;  %6758 = vmatpush2.bf16.msra.mxu0 %v10521_v38  ;;  %v10538_v41 = vld [vmem:[%s16305_s1 + $0xae4] ss:$8 sps:$4 sm:$0xff]   ;;  %v10560_v38 = vld [vmem:[%s16305_s1 + $0xb20] ss:$8 sps:$4 sm:$0xff]  }
 0x420   :  { %7054 = vmatpush2.bf16.msra.mxu1 %v10524_v37  ;;  %v4928_v2 = vpop.f32.mrf.mxu0  ;;  %6759 = vmatprep.subr.bf16.mxu0 %v10529_v43  ;;  %v10931_v37 = vld [vmem:[%s16305_s1 + $0x194] ss:$8 sps:$4 sm:$0xff]   ;;  %v10933_v43 = vld [vmem:[%s16305_s1 + $0x190] ss:$8 sps:$4 sm:$0xff]   ;;  %v10936_v44 = vld [vmem:[%s16305_s1 + $0x224] ss:$8 sps:$4 sm:$0xff]  }
 0x421   :  { %7055 = vmatprep.subr.bf16.mxu1 %v10532_v55  ;;  %v10934_v55 = vld [vmem:[%s16305_s1 + $0x230] ss:$8 sps:$4 sm:$0xff]   ;;  %v10937_v54 = vld [vmem:[%s16305_s1 + $0x180] ss:$8 sps:$4 sm:$0xff]  }
 0x422   :  { %v5289_v31 = vpop.f32.mrf.mxu0  ;;  %v10941_v2 = vld [vmem:[%s16305_s1 + $0x170] ss:$8 sps:$4 sm:$0xff]  }
 0x423   :  { %v5248_v8 = vpop.f32.mrf.mxu1  ;;  %6760 = vmatpush2.bf16.msra.mxu0 %v10527_v59  ;;  %v10939_v59 = vld [vmem:[%s16305_s1 + $0x174] ss:$8 sps:$4 sm:$0xff]  }
 0x424   :  { %v5290_v20 = vadd.f32 %v5289_v31, %v5248_v8  ;;  %7056 = vmatpush2.bf16.msra.mxu1 %v10530_v58  ;;  %v5291_v19 = vpop.f32.mrf.mxu0  ;;  %6761 = vmatprep.subr.bf16.mxu0 %v10535_v49  ;;  %v10940_v58 = vld [vmem:[%s16305_s1 + $0x74] ss:$8 sps:$4 sm:$0xff]   ;;  %v10942_v49 = vld [vmem:[%s16305_s1 + $0x70] ss:$8 sps:$4 sm:$0xff]   ;;  %v10944_v8 = vld [vmem:[%s16305_s1 + $0x64] ss:$8 sps:$4 sm:$0xff]  }
 0x425   :  { %v5250_v28 = vpop.f32.mrf.mxu1  ;;  %7057 = vmatprep.subr.bf16.mxu1 %v10538_v41  ;;  %v10943_v41 = vld [vmem:[%s16305_s1 + $0x164] ss:$8 sps:$4 sm:$0xff]   ;;  %v10945_v31 = vld [vmem:[%s16305_s1 + $0x160] ss:$8 sps:$4 sm:$0xff]  }
 0x426   :  { %v15011_v22 = vadd.f32 %v5290_v20, %v4971_v21  ;;  %v5292_v27 = vadd.f32 %v5291_v19, %v5250_v28  ;;  %v5293_v10 = vpop.f32.mrf.mxu0  ;;  %v10935_v21 = vld [vmem:[%s16305_s1 + $0x184] ss:$8 sps:$4 sm:$0xff]   ;;  %v10946_v20 = vld [vmem:[%s16305_s1 + $0x60] ss:$8 sps:$4 sm:$0xff]   ;;  %v10949_v28 = vld [vmem:[%s16305_s1 + $0x150] ss:$8 sps:$4 sm:$0xff]  }
 0x427   :  { %v5252_v47 = vpop.f32.mrf.mxu1  ;;  %6762 = vmatpush2.bf16.msra.mxu0 %v10533_v18  ;;  %v10947_v18 = vld [vmem:[%s16305_s1 + $0x154] ss:$8 sps:$4 sm:$0xff]   ;;  %v10950_v19 = vld [vmem:[%s16305_s1 + $0x50] ss:$8 sps:$4 sm:$0xff]  }
 0x428   :  { %v15013_v24 = vadd.f32 %v5292_v27, %v4972_v33  ;;  %7058 = vmatpush2.bf16.msra.mxu1 %v10536_v25  ;;  %v5294_v61 = vpop.f32.mrf.mxu0  ;;  %6763 = vmatprep.subr.bf16.mxu0 %v10541_v48  ;;  %v10938_v33 = vld [vmem:[%s16305_s1 + $0x220] ss:$8 sps:$4 sm:$0xff]   ;;  %v10948_v25 = vld [vmem:[%s16305_s1 + $0x54] ss:$8 sps:$4 sm:$0xff]   ;;  %v10951_v48 = vld [vmem:[%s16305_s1 + $0x144] ss:$8 sps:$4 sm:$0xff]  }
 0x429   :  { %v5253_v39 = vpop.f32.mrf.mxu1  ;;  %7059 = vmatprep.subr.bf16.mxu1 %v10544_v57  ;;  %v10952_v57 = vld [vmem:[%s16305_s1 + $0x44] ss:$8 sps:$4 sm:$0xff]   ;;  %v10953_v27 = vld [vmem:[%s16305_s1 + $0x140] ss:$8 sps:$4 sm:$0xff]   ;;  %v10955_v10 = vld [vmem:[%s16305_s1 + $0x134] ss:$8 sps:$4 sm:$0xff]  }
 0x42a   :  { %v10954_v47 = vld [vmem:[%s16305_s1 + $0x40] ss:$8 sps:$4 sm:$0xff]   ;;  %v10958_v39 = vld [vmem:[%s16305_s1 + $0x30] ss:$8 sps:$4 sm:$0xff]   ;;  %v10959_v61 = vld [vmem:[%s16305_s1 + $0x124] ss:$8 sps:$4 sm:$0xff]  }
 0x42b   :  { %v15027_v40 = vpop.f32.mrf.mxu1  ;;  %6764 = vmatpush2.bf16.msra.mxu0 %v10539_v15  ;;  %v10956_v15 = vld [vmem:[%s16305_s1 + $0x34] ss:$8 sps:$4 sm:$0xff]  }
 0x42c   :  { %7060 = vmatpush2.bf16.msra.mxu1 %v10542_v50  ;;  %6765 = vmatprep.subr.bf16.mxu0 %v10547_v0  ;;  %v10957_v50 = vld [vmem:[%s16305_s1 + $0x130] ss:$8 sps:$4 sm:$0xff]   ;;  %v10960_v0 = vld [vmem:[%s16305_s1 + $0x24] ss:$8 sps:$4 sm:$0xff]  }
 0x42d   :  { %v15035_v16 = vpop.f32.mrf.mxu1  ;;  %7061 = vmatprep.subr.bf16.mxu1 %v10550_v17  ;;  %v10961_v17 = vld [vmem:[%s16305_s1 + $0x120] ss:$8 sps:$4 sm:$0xff]  }
 0x42f   :  { %v5618_v52 = vpop.f32.mrf.mxu1  ;;  %6766 = vmatpush2.bf16.msra.mxu0 %v10545_v4  ;;  %v10962_v4 = vld [vmem:[%s16305_s1 + $0x20] ss:$8 sps:$4 sm:$0xff]  }
 0x430   :  { %7062 = vmatpush2.bf16.msra.mxu1 %v10548_v62  ;;  %7088 = vmatprep.subr.bf16.mxu0 %v10556_v35  ;;  %v10963_v62 = vld [vmem:[%s16305_s1 + $0x214] ss:$8 sps:$4 sm:$0xff]   ;;  %v10965_v35 = vld [vmem:[%s16305_s1 + $0x210] ss:$8 sps:$4 sm:$0xff]  }
 0x431   :  { %v5619_v36 = vpop.f32.mrf.mxu1  ;;  %7063 = vmatprep.subr.bf16.mxu1 %v10553_v63  ;;  %v10964_v63 = vld [vmem:[%s16305_s1 + $0x14] ss:$8 sps:$4 sm:$0xff]   ;;  %v10966_v52 = vld [vmem:[%s16305_s1 + $0x10] ss:$8 sps:$4 sm:$0xff]  }
 0x432   :  { %6768 = vmatmul.mubr.bf16.vlgmr.msra.gmra.mxu0 %v14298_v53  ;;  %v10969_v36 = vld [vmem:[%s16305_s1 + $0x200] ss:$8 sps:$4 sm:$0xff]  }
 0x433   :  { %7089 = vmatpush1.bf16.msra.mxu0 %v10554_v7  ;;  %7108 = vmatprep.mubr.bf16.mxu0 %v11292_v1  ;;  %v10968_v7 = vld [vmem:[%s16305_s1 + $0x4] ss:$8 sps:$4 sm:$0xff]  }
 0x434   :  { %7064 = vmatpush2.bf16.msra.mxu1 %v10551_v32  ;;  %7090 = vmatprep.subr.bf16.mxu0 %v10562_v14  ;;  %v10967_v32 = vld [vmem:[%s16305_s1 + $0x204] ss:$8 sps:$4 sm:$0xff]   ;;  %v10971_v14 = vld [vmem:[%s16305_s1 + $0x1f4] ss:$8 sps:$4 sm:$0xff]  }
 0x435   :  { %7065 = vmatprep.subr.bf16.mxu1 %v10559_v6  ;;  %v10970_v6 = vld [vmem:[%s16305_s1] ss:$8 sps:$4 sm:$0xff]  }
 0x437   :  { %7091 = vmatpush1.bf16.msra.mxu0 %v10560_v38 }
 0x438   :  { %7066 = vmatpush2.bf16.msra.mxu1 %v10557_v56  ;;  %7119 = vmatprep.subr.bf16.mxu0 %v10931_v37  ;;  %v10972_v56 = vld [vmem:[%s16305_s1 + $0xf4] ss:$8 sps:$4 sm:$0xff]  }
 0x439   :  { %7172 = vmatprep.subr.bf16.mxu1 %v10932_v45  ;;  %v10973_v45 = vld [vmem:[%s16305_s1 + $0x1f0] ss:$8 sps:$4 sm:$0xff]  }
 0x43a   :  { %9435 = vmatmul.mubr.msk.bf16.vlgmr.msra.gmra.mxu0 %vm284_vm0, %v14336_v30 }
 0x43b   :  { %7068 = vmatmul.mubr.bf16.vlgmr.msra.gmra.mxu1 %v14550_v9  ;;  %7120 = vmatpush1.bf16.msra.mxu0 %v10933_v43  ;;  %v10974_v43 = vld [vmem:[%s16305_s1 + $0xf0] ss:$8 sps:$4 sm:$0xff]  }
 0x43c   :  { %7173 = vmatpush1.bf16.msra.mxu1 %v10934_v55  ;;  %7121 = vmatprep.subr.bf16.mxu0 %v10935_v21  ;;  %v10975_v21 = vld [vmem:[%s16305_s1 + $0x1e4] ss:$8 sps:$4 sm:$0xff]  }
 0x43d   :  { %7174 = vmatprep.subr.bf16.mxu1 %v10936_v44  ;;  %7192 = vmatprep.mubr.bf16.mxu1 %v11292_v1 }
 0x43e   :  { %7151 = vmatprep.mubr.bf16.mxu0 %v14052_v60 }
 0x43f   :  { %7122 = vmatpush1.bf16.msra.mxu0 %v10937_v54 }
 0x440   :  { %7175 = vmatpush1.bf16.msra.mxu1 %v10938_v33  ;;  %7123 = vmatprep.subr.bf16.mxu0 %v10939_v59 }
 0x441   :  { %7201 = vmatprep.subr.bf16.mxu1 %v10940_v58  ;;  %v10977_v58 = vld [vmem:[%s16305_s1 + $0x1e0] ss:$8 sps:$4 sm:$0xff]  }
 0x443   :  { %9436 = vmatmul.mubr.msk.bf16.vlgmr.msra.gmra.mxu1 %vm284_vm0, %v14074_v26  ;;  %7124 = vmatpush1.bf16.msra.mxu0 %v10941_v2  ;;  %v10978_v2 = vld [vmem:[%s16305_s1 + $0xe0] ss:$8 sps:$4 sm:$0xff]  }
 0x444   :  { %7202 = vmatpush1.bf16.msra.mxu1 %v10942_v49  ;;  %7125 = vmatprep.subr.bf16.mxu0 %v10943_v41 }
 0x445   :  { %7203 = vmatprep.subr.bf16.mxu1 %v10944_v8  ;;  %7233 = vmatprep.mubr.bf16.mxu1 %v13776_v46 }
 0x447   :  { %7126 = vmatpush1.bf16.msra.mxu0 %v10945_v31  ;;  %v10981_v31 = vld [vmem:[%s16305_s1 + $0x1d0] ss:$8 sps:$4 sm:$0xff]  }
 0x448   :  { %7204 = vmatpush1.bf16.msra.mxu1 %v10946_v20  ;;  %7127 = vmatprep.subr.bf16.mxu0 %v10947_v18  ;;  %v10982_v20 = vld [vmem:[%s16305_s1 + $0xd0] ss:$8 sps:$4 sm:$0xff]  }
 0x449   :  { %7205 = vmatprep.subr.bf16.mxu1 %v10948_v25 }
 0x44b   :  { %7128 = vmatpush1.bf16.msra.mxu0 %v10949_v28  ;;  %v10983_v28 = vld [vmem:[%s16305_s1 + $0x1c4] ss:$8 sps:$4 sm:$0xff]  }
 0x44c   :  { %7206 = vmatpush1.bf16.msra.mxu1 %v10950_v19  ;;  %7129 = vmatprep.subr.bf16.mxu0 %v10951_v48  ;;  %v10984_v19 = vld [vmem:[%s16305_s1 + $0xc4] ss:$8 sps:$4 sm:$0xff]  }
 0x44d   :  { %7207 = vmatprep.subr.bf16.mxu1 %v10952_v57 }
 0x44f   :  { %7130 = vmatpush1.bf16.msra.mxu0 %v10953_v27 }
 0x450   :  { %7208 = vmatpush1.bf16.msra.mxu1 %v10954_v47  ;;  %7131 = vmatprep.subr.bf16.mxu0 %v10955_v10  ;;  %v10985_v47 = vld [vmem:[%s16305_s1 + $0x1c0] ss:$8 sps:$4 sm:$0xff]  }
 0x451   :  { %7209 = vmatprep.subr.bf16.mxu1 %v10956_v15  ;;  %v10986_v10 = vld [vmem:[%s16305_s1 + $0xc0] ss:$8 sps:$4 sm:$0xff]  }
 0x453   :  { %7132 = vmatpush1.bf16.msra.mxu0 %v10957_v50 }
 0x454   :  { %7210 = vmatpush1.bf16.msra.mxu1 %v10958_v39  ;;  %7133 = vmatprep.subr.bf16.mxu0 %v10959_v61  ;;  %v10987_v39 = vld [vmem:[%s16305_s1 + $0x1b4] ss:$8 sps:$4 sm:$0xff]  }
 0x455   :  { %7211 = vmatprep.subr.bf16.mxu1 %v10960_v0  ;;  %v10988_v61 = vld [vmem:[%s16305_s1 + $0xb4] ss:$8 sps:$4 sm:$0xff]  }
 0x457   :  { %7134 = vmatpush1.bf16.msra.mxu0 %v10961_v17  ;;  %v10989_v17 = vld [vmem:[%s16305_s1 + $0x1b0] ss:$8 sps:$4 sm:$0xff]  }
 0x458   :  { %7212 = vmatpush1.bf16.msra.mxu1 %v10962_v4  ;;  %7135 = vmatprep.subr.bf16.mxu0 %v10963_v62  ;;  %v10990_v4 = vld [vmem:[%s16305_s1 + $0xb0] ss:$8 sps:$4 sm:$0xff]  }
 0x459   :  { %7213 = vmatprep.subr.bf16.mxu1 %v10964_v63  ;;  %v10991_v63 = vld [vmem:[%s16305_s1 + $0x1a4] ss:$8 sps:$4 sm:$0xff]  }
 0x45b   :  { %7136 = vmatpush2.bf16.msra.mxu0 %v10965_v35  ;;  %v10992_v35 = vld [vmem:[%s16305_s1 + $0xa4] ss:$8 sps:$4 sm:$0xff]  }
 0x45c   :  { %7214 = vmatpush1.bf16.msra.mxu1 %v10966_v52  ;;  %7137 = vmatprep.subr.bf16.mxu0 %v10967_v32  ;;  %v10993_v32 = vld [vmem:[%s16305_s1 + $0x1a0] ss:$8 sps:$4 sm:$0xff]  }
 0x45d   :  { %7215 = vmatprep.subr.bf16.mxu1 %v10968_v7  ;;  %v10994_v7 = vld [vmem:[%s16305_s1 + $0xa0] ss:$8 sps:$4 sm:$0xff]  }
 0x45f   :  { %7138 = vmatpush2.bf16.msra.mxu0 %v10969_v36 }
 0x460   :  { %7216 = vmatpush1.bf16.msra.mxu1 %v10970_v6  ;;  %7139 = vmatprep.subr.bf16.mxu0 %v10971_v14  ;;  %v10995_v6 = vld [vmem:[%s16305_s1 + $0x94] ss:$8 sps:$4 sm:$0xff]  }
 0x461   :  { %7217 = vmatprep.subr.bf16.mxu1 %v10972_v56  ;;  %v10996_v14 = vld [vmem:[%s16305_s1 + $0x114] ss:$8 sps:$4 sm:$0xff]   ;;  %v10997_v56 = vld [vmem:[%s16305_s1 + $0x90] ss:$8 sps:$4 sm:$0xff]  }
 0x462   :  { %v5573_v38 = vpop.f32.mrf.mxu0 }
 0x463   :  { %v5615_v37 = vadd.f32 %v15027_v40, %v5573_v38  ;;  %7140 = vmatpush2.bf16.msra.mxu0 %v10973_v45  ;;  %v10976_v40 = vld [vmem:[%s16305_s1 + $0xe4] ss:$8 sps:$4 sm:$0xff]   ;;  %v10998_v38 = vld [vmem:[%s16305_s1 + $0x110] ss:$8 sps:$4 sm:$0xff]  }
 0x464   :  { %7218 = vmatpush2.bf16.msra.mxu1 %v10974_v43  ;;  %v5575_v55 = vpop.f32.mrf.mxu0  ;;  %7141 = vmatprep.subr.bf16.mxu0 %v10975_v21  ;;  %v11000_v45 = vld [vmem:[%s16305_s1 + $0x104] ss:$8 sps:$4 sm:$0xff]   ;;  %v11001_v43 = vld [vmem:[%s16305_s1 + $0x80] ss:$8 sps:$4 sm:$0xff]   ;;  %v11003_v21 = vld [vmem:[%s16305_s1 + $0x2b4] ss:$8 sps:$4 sm:$0xff]  }
 0x465   :  { %7219 = vmatprep.subr.bf16.mxu1 %v10976_v40  ;;  %v15211_v44 = vadd.f32 %v5615_v37, %v15011_v22  ;;  %v5617_v54 = vadd.f32 %v15035_v16, %v5575_v55  ;;  %v10979_v22 = vld [vmem:[%s16305_s1 + $0x1d4] ss:$8 sps:$4 sm:$0xff]   ;;  %v10999_v37 = vld [vmem:[%s16305_s1 + $0x84] ss:$8 sps:$4 sm:$0xff]   ;;  %v11002_v55 = vld [vmem:[%s16305_s1 + $0x100] ss:$8 sps:$4 sm:$0xff]  }
 0x466   :  { %v5577_v33 = vpop.f32.mrf.mxu0  ;;  %v11004_v40 = vld [vmem:[%s16305_s1 + $0x354] ss:$8 sps:$4 sm:$0xff]  }
 0x467   :  { %v15215_v59 = vadd.f32 %v5617_v54, %v15013_v24  ;;  %7142 = vmatpush2.bf16.msra.mxu0 %v10977_v58  ;;  %v10980_v24 = vld [vmem:[%s16305_s1 + $0xd4] ss:$8 sps:$4 sm:$0xff]   ;;  %v11005_v54 = vld [vmem:[%s16305_s1 + $0x2b0] ss:$8 sps:$4 sm:$0xff]   ;;  %v11007_v58 = vld [vmem:[%s16305_s1 + $0x2a4] ss:$8 sps:$4 sm:$0xff]  }
 0x468   :  { %7220 = vmatpush2.bf16.msra.mxu1 %v10978_v2  ;;  %v5578_v49 = vpop.f32.mrf.mxu0  ;;  %7143 = vmatprep.subr.bf16.mxu0 %v10979_v22  ;;  %v11006_v33 = vld [vmem:[%s16305_s1 + $0x350] ss:$8 sps:$4 sm:$0xff]   ;;  %v11008_v2 = vld [vmem:[%s16305_s1 + $0x344] ss:$8 sps:$4 sm:$0xff]   ;;  %v11011_v22 = vld [vmem:[%s16305_s1 + $0x294] ss:$8 sps:$4 sm:$0xff]  }
 0x469   :  { %7221 = vmatprep.subr.bf16.mxu1 %v10980_v24  ;;  %v11010_v49 = vld [vmem:[%s16305_s1 + $0x340] ss:$8 sps:$4 sm:$0xff]   ;;  %v11012_v24 = vld [vmem:[%s16305_s1 + $0x3d4] ss:$8 sps:$4 sm:$0xff]  }
 0x46a   :  { %v5950_v41 = vpop.f32.mrf.mxu0 }
 0x46b   :  { %v5909_v16 = vpop.f32.mrf.mxu1  ;;  %7144 = vmatpush2.bf16.msra.mxu0 %v10981_v31  ;;  %v11015_v31 = vld [vmem:[%s16305_s1 + $0x284] ss:$8 sps:$4 sm:$0xff]  }
 0x46c   :  { %v15229_v8 = vadd.f32 %v5950_v41, %v5909_v16  ;;  %7222 = vmatpush2.bf16.msra.mxu1 %v10982_v20  ;;  %v5952_v25 = vpop.f32.mrf.mxu0  ;;  %7145 = vmatprep.subr.bf16.mxu0 %v10983_v28  ;;  %v11013_v16 = vld [vmem:[%s16305_s1 + $0x290] ss:$8 sps:$4 sm:$0xff]   ;;  %v11016_v20 = vld [vmem:[%s16305_s1 + $0x3c4] ss:$8 sps:$4 sm:$0xff]   ;;  %v11019_v28 = vld [vmem:[%s16305_s1 + $0x274] ss:$8 sps:$4 sm:$0xff]  }
 0x46d   :  { %v5911_v18 = vpop.f32.mrf.mxu1  ;;  %7223 = vmatprep.subr.bf16.mxu1 %v10984_v19  ;;  %v11014_v41 = vld [vmem:[%s16305_s1 + $0x3d0] ss:$8 sps:$4 sm:$0xff]   ;;  %v11020_v19 = vld [vmem:[%s16305_s1 + $0x3b4] ss:$8 sps:$4 sm:$0xff]  }
 0x46e   :  { %v15243_v48 = vadd.f32 %v5952_v25, %v5911_v18  ;;  %v5954_v27 = vpop.f32.mrf.mxu0  ;;  %v11017_v18 = vld [vmem:[%s16305_s1 + $0x280] ss:$8 sps:$4 sm:$0xff]  }
 0x46f   :  { %v5913_v57 = vpop.f32.mrf.mxu1  ;;  %7146 = vmatpush2.bf16.msra.mxu0 %v10985_v47  ;;  %v11018_v25 = vld [vmem:[%s16305_s1 + $0x3c0] ss:$8 sps:$4 sm:$0xff]   ;;  %v11022_v27 = vld [vmem:[%s16305_s1 + $0x3b0] ss:$8 sps:$4 sm:$0xff]   ;;  %v11023_v47 = vld [vmem:[%s16305_s1 + $0x264] ss:$8 sps:$4 sm:$0xff]  }
 0x470   :  { %7224 = vmatpush2.bf16.msra.mxu1 %v10986_v10  ;;  %v5955_v50 = vpop.f32.mrf.mxu0  ;;  %7147 = vmatprep.subr.bf16.mxu0 %v10987_v39  ;;  %v11021_v57 = vld [vmem:[%s16305_s1 + $0x270] ss:$8 sps:$4 sm:$0xff]   ;;  %v11024_v10 = vld [vmem:[%s16305_s1 + $0x3a4] ss:$8 sps:$4 sm:$0xff]   ;;  %v11027_v39 = vld [vmem:[%s16305_s1 + $0x254] ss:$8 sps:$4 sm:$0xff]  }
 0x471   :  { %v5914_v15 = vpop.f32.mrf.mxu1  ;;  %7225 = vmatprep.subr.bf16.mxu1 %v10988_v61  ;;  %v11026_v50 = vld [vmem:[%s16305_s1 + $0x3a0] ss:$8 sps:$4 sm:$0xff]   ;;  %v11028_v61 = vld [vmem:[%s16305_s1 + $0x394] ss:$8 sps:$4 sm:$0xff]  }
 0x472   :  { %v11025_v15 = vld [vmem:[%s16305_s1 + $0x260] ss:$8 sps:$4 sm:$0xff]  }
 0x473   :  { %v15257_v0 = vpop.f32.mrf.mxu1  ;;  %7148 = vmatpush2.bf16.msra.mxu0 %v10989_v17  ;;  %v11029_v17 = vld [vmem:[%s16305_s1 + $0x250] ss:$8 sps:$4 sm:$0xff]  }
 0x474   :  { %7226 = vmatpush2.bf16.msra.mxu1 %v10990_v4  ;;  %7149 = vmatprep.subr.bf16.mxu0 %v10991_v63  ;;  %v11030_v4 = vld [vmem:[%s16305_s1 + $0x390] ss:$8 sps:$4 sm:$0xff]   ;;  %v11031_v63 = vld [vmem:[%s16305_s1 + $0x244] ss:$8 sps:$4 sm:$0xff]  }
 0x475   :  { %v15265_v62 = vpop.f32.mrf.mxu1  ;;  %7227 = vmatprep.subr.bf16.mxu1 %v10992_v35  ;;  %v11032_v35 = vld [vmem:[%s16305_s1 + $0x384] ss:$8 sps:$4 sm:$0xff]  }
 0x477   :  { %v6216_v52 = vpop.f32.mrf.mxu1  ;;  %7150 = vmatpush2.bf16.msra.mxu0 %v10993_v32  ;;  %v11034_v32 = vld [vmem:[%s16305_s1 + $0x380] ss:$8 sps:$4 sm:$0xff]  }
 0x478   :  { %7228 = vmatpush2.bf16.msra.mxu1 %v10994_v7  ;;  %7254 = vmatprep.subr.bf16.mxu0 %v10996_v14  ;;  %v11033_v52 = vld [vmem:[%s16305_s1 + $0x240] ss:$8 sps:$4 sm:$0xff]   ;;  %v11035_v7 = vld [vmem:[%s16305_s1 + $0x334] ss:$8 sps:$4 sm:$0xff]   ;;  %v11038_v14 = vld [vmem:[%s16305_s1 + $0x370] ss:$8 sps:$4 sm:$0xff]  }
 0x479   :  { %v6217_v36 = vpop.f32.mrf.mxu1  ;;  %7229 = vmatprep.subr.bf16.mxu1 %v10995_v6  ;;  %v11037_v6 = vld [vmem:[%s16305_s1 + $0x330] ss:$8 sps:$4 sm:$0xff]  }
 0x47a   :  { %7152 = vmatmul.mubr.bf16.vlgmr.msra.gmra.mxu0 %v14263_v34  ;;  %v11036_v36 = vld [vmem:[%s16305_s1 + $0x374] ss:$8 sps:$4 sm:$0xff]  }
 0x47b   :  { %7255 = vmatpush1.bf16.msra.mxu0 %v10998_v38  ;;  %7274 = vmatprep.mubr.bf16.mxu0 %v11292_v1  ;;  %v11040_v38 = vld [vmem:[%s16305_s1 + $0x364] ss:$8 sps:$4 sm:$0xff]  }
 0x47c   :  { %7230 = vmatpush2.bf16.msra.mxu1 %v10997_v56  ;;  %7256 = vmatprep.subr.bf16.mxu0 %v11000_v45  ;;  %v11039_v56 = vld [vmem:[%s16305_s1 + $0x324] ss:$8 sps:$4 sm:$0xff]   ;;  %v11042_v45 = vld [vmem:[%s16305_s1 + $0x360] ss:$8 sps:$4 sm:$0xff]  }
 0x47d   :  { %7231 = vmatprep.subr.bf16.mxu1 %v10999_v37  ;;  %v11041_v37 = vld [vmem:[%s16305_s1 + $0x320] ss:$8 sps:$4 sm:$0xff]  }
 0x47f   :  { %7257 = vmatpush1.bf16.msra.mxu0 %v11002_v55  ;;  %v11044_v55 = vld [vmem:[%s16305_s1 + $0x454] ss:$8 sps:$4 sm:$0xff]  }
 0x480   :  { %7232 = vmatpush2.bf16.msra.mxu1 %v11001_v43  ;;  %7283 = vmatprep.subr.bf16.mxu0 %v11003_v21  ;;  %v11043_v43 = vld [vmem:[%s16305_s1 + $0x314] ss:$8 sps:$4 sm:$0xff]  }
 0x481   :  { %7336 = vmatprep.subr.bf16.mxu1 %v11004_v40 }
 0x482   :  { %9437 = vmatmul.mubr.msk.bf16.vlgmr.msra.gmra.mxu0 %vm284_vm0, %v14606_v29  ;;  %v11009_v29 = vld [vmem:[%s16305_s1 + $0x2a0] ss:$8 sps:$4 sm:$0xff]  }
 0x483   :  { %7234 = vmatmul.mubr.bf16.vlgmr.msra.gmra.mxu1 %v14000_v13  ;;  %7284 = vmatpush1.bf16.msra.mxu0 %v11005_v54  ;;  %v11045_v54 = vld [vmem:[%s16305_s1 + $0x310] ss:$8 sps:$4 sm:$0xff]  }
 0x484   :  { %7337 = vmatpush1.bf16.msra.mxu1 %v11006_v33  ;;  %7285 = vmatprep.subr.bf16.mxu0 %v11007_v58  ;;  %v11046_v33 = vld [vmem:[%s16305_s1 + $0x450] ss:$8 sps:$4 sm:$0xff]  }
 0x485   :  { %7338 = vmatprep.subr.bf16.mxu1 %v11008_v2  ;;  %7356 = vmatprep.mubr.bf16.mxu1 %v11292_v1  ;;  %v11047_v2 = vld [vmem:[%s16305_s1 + $0x304] ss:$8 sps:$4 sm:$0xff]  }
 0x486   :  { %7315 = vmatprep.mubr.bf16.mxu0 %v14088_v11 }
 0x487   :  { %7286 = vmatpush1.bf16.msra.mxu0 %v11009_v29 }
 0x488   :  { %7339 = vmatpush1.bf16.msra.mxu1 %v11010_v49  ;;  %7287 = vmatprep.subr.bf16.mxu0 %v11011_v22 }
 0x489   :  { %7367 = vmatprep.subr.bf16.mxu1 %v11012_v24 }
 0x48b   :  { %9438 = vmatmul.mubr.msk.bf16.vlgmr.msra.gmra.mxu1 %vm284_vm0, %v14300_v12  ;;  %7288 = vmatpush1.bf16.msra.mxu0 %v11013_v16  ;;  %v11049_v16 = vld [vmem:[%s16305_s1 + $0x300] ss:$8 sps:$4 sm:$0xff]  }
 0x48c   :  { %7368 = vmatpush1.bf16.msra.mxu1 %v11014_v41  ;;  %7289 = vmatprep.subr.bf16.mxu0 %v11015_v31  ;;  %v11050_v41 = vld [vmem:[%s16305_s1 + $0x440] ss:$8 sps:$4 sm:$0xff]  }
 0x48d   :  { %7369 = vmatprep.subr.bf16.mxu1 %v11016_v20  ;;  %7399 = vmatprep.mubr.bf16.mxu1 %v14314_v51 }
 0x48f   :  { %7290 = vmatpush1.bf16.msra.mxu0 %v11017_v18 }
 0x490   :  { %7370 = vmatpush1.bf16.msra.mxu1 %v11018_v25  ;;  %7291 = vmatprep.subr.bf16.mxu0 %v11019_v28  ;;  %v11053_v25 = vld [vmem:[%s16305_s1 + $0x2f0] ss:$8 sps:$4 sm:$0xff]  }
 0x491   :  { %7371 = vmatprep.subr.bf16.mxu1 %v11020_v19  ;;  %v11054_v28 = vld [vmem:[%s16305_s1 + $0x430] ss:$8 sps:$4 sm:$0xff]  }
 0x493   :  { %7292 = vmatpush1.bf16.msra.mxu0 %v11021_v57 }
 0x494   :  { %7372 = vmatpush1.bf16.msra.mxu1 %v11022_v27  ;;  %7293 = vmatprep.subr.bf16.mxu0 %v11023_v47  ;;  %v11055_v27 = vld [vmem:[%s16305_s1 + $0x2e4] ss:$8 sps:$4 sm:$0xff]  }
 0x495   :  { %7373 = vmatprep.subr.bf16.mxu1 %v11024_v10  ;;  %v11056_v47 = vld [vmem:[%s16305_s1 + $0x424] ss:$8 sps:$4 sm:$0xff]  }
 0x497   :  { %7294 = vmatpush1.bf16.msra.mxu0 %v11025_v15 }
 0x498   :  { %7374 = vmatpush1.bf16.msra.mxu1 %v11026_v50  ;;  %7295 = vmatprep.subr.bf16.mxu0 %v11027_v39 }
 0x499   :  { %7375 = vmatprep.subr.bf16.mxu1 %v11028_v61 }
 0x49b   :  { %7296 = vmatpush1.bf16.msra.mxu0 %v11029_v17  ;;  %v11057_v17 = vld [vmem:[%s16305_s1 + $0x2e0] ss:$8 sps:$4 sm:$0xff]  }
 0x49c   :  { %7376 = vmatpush1.bf16.msra.mxu1 %v11030_v4  ;;  %7297 = vmatprep.subr.bf16.mxu0 %v11031_v63  ;;  %v11058_v4 = vld [vmem:[%s16305_s1 + $0x420] ss:$8 sps:$4 sm:$0xff]  }
 0x49d   :  { %7377 = vmatprep.subr.bf16.mxu1 %v11032_v35 }
 0x49f   :  { %7298 = vmatpush1.bf16.msra.mxu0 %v11033_v52  ;;  %v11059_v52 = vld [vmem:[%s16305_s1 + $0x2d4] ss:$8 sps:$4 sm:$0xff]  }
 0x4a0   :  { %7378 = vmatpush1.bf16.msra.mxu1 %v11034_v32  ;;  %7299 = vmatprep.subr.bf16.mxu0 %v11035_v7  ;;  %v11060_v32 = vld [vmem:[%s16305_s1 + $0x414] ss:$8 sps:$4 sm:$0xff]  }
 0x4a1   :  { %7379 = vmatprep.subr.bf16.mxu1 %v11036_v36  ;;  %v11061_v36 = vld [vmem:[%s16305_s1 + $0x2d0] ss:$8 sps:$4 sm:$0xff]  }
 0x4a3   :  { %7300 = vmatpush2.bf16.msra.mxu0 %v11037_v6  ;;  %v11062_v6 = vld [vmem:[%s16305_s1 + $0x410] ss:$8 sps:$4 sm:$0xff]  }
 0x4a4   :  { %7380 = vmatpush1.bf16.msra.mxu1 %v11038_v14  ;;  %7301 = vmatprep.subr.bf16.mxu0 %v11039_v56  ;;  %v11063_v56 = vld [vmem:[%s16305_s1 + $0x2c4] ss:$8 sps:$4 sm:$0xff]  }
 0x4a5   :  { %7381 = vmatprep.subr.bf16.mxu1 %v11040_v38  ;;  %v11064_v38 = vld [vmem:[%s16305_s1 + $0x404] ss:$8 sps:$4 sm:$0xff]  }
 0x4a7   :  { %7302 = vmatpush2.bf16.msra.mxu0 %v11041_v37 }
 0x4a8   :  { %7382 = vmatpush1.bf16.msra.mxu1 %v11042_v45  ;;  %7303 = vmatprep.subr.bf16.mxu0 %v11043_v43  ;;  %v11065_v45 = vld [vmem:[%s16305_s1 + $0x2c0] ss:$8 sps:$4 sm:$0xff]  }
 0x4a9   :  { %7383 = vmatprep.subr.bf16.mxu1 %v11044_v55  ;;  %v11066_v43 = vld [vmem:[%s16305_s1 + $0x400] ss:$8 sps:$4 sm:$0xff]  }
 0x4aa   :  { %v6171_v21 = vpop.f32.mrf.mxu0 }
 0x4ab   :  { %v6172_v40 = vadd.f32 %v6171_v21, %v15229_v8  ;;  %7304 = vmatpush2.bf16.msra.mxu0 %v11045_v54  ;;  %v11048_v8 = vld [vmem:[%s16305_s1 + $0x444] ss:$8 sps:$4 sm:$0xff]   ;;  %v11067_v21 = vld [vmem:[%s16305_s1 + $0x3f4] ss:$8 sps:$4 sm:$0xff]   ;;  %v11069_v54 = vld [vmem:[%s16305_s1 + $0x3f0] ss:$8 sps:$4 sm:$0xff]  }
 0x4ac   :  { %7384 = vmatpush2.bf16.msra.mxu1 %v11046_v33  ;;  %v6173_v58 = vpop.f32.mrf.mxu0  ;;  %7305 = vmatprep.subr.bf16.mxu0 %v11047_v2  ;;  %v11070_v33 = vld [vmem:[%s16305_s1 + $0x470] ss:$8 sps:$4 sm:$0xff]   ;;  %v11072_v2 = vld [vmem:[%s16305_s1 + $0x464] ss:$8 sps:$4 sm:$0xff]  }
 0x4ad   :  { %7385 = vmatprep.subr.bf16.mxu1 %v11048_v8  ;;  %v6213_v29 = vadd.f32 %v15257_v0, %v6172_v40  ;;  %v6174_v49 = vadd.f32 %v6173_v58, %v15243_v48  ;;  %v11051_v0 = vld [vmem:[%s16305_s1 + $0x2f4] ss:$8 sps:$4 sm:$0xff]   ;;  %v11071_v58 = vld [vmem:[%s16305_s1 + $0x3e4] ss:$8 sps:$4 sm:$0xff]  }
 0x4ae   :  { %v6175_v22 = vpop.f32.mrf.mxu0  ;;  %v11052_v48 = vld [vmem:[%s16305_s1 + $0x434] ss:$8 sps:$4 sm:$0xff]   ;;  %v15540_v8 = vld [vmem:[%s16306_s0 + $0x4c] ss:$12 sps:$4 sm:$0x1e]  }
 0x4af   :  { %v6215_v24 = vadd.f32 %v15265_v62, %v6174_v49  ;;  %7306 = vmatpush2.bf16.msra.mxu0 %v11049_v16  ;;  %v11068_v40 = vld [vmem:[%s16305_s1 + $0x474] ss:$8 sps:$4 sm:$0xff]   ;;  %v11074_v49 = vld [vmem:[%s16305_s1 + $0x460] ss:$8 sps:$4 sm:$0xff]   ;;  %v7469_v16 = vrot.slane %v15540_v8, 1 }
 0x4b0   :  { %7386 = vmatpush2.bf16.msra.mxu1 %v11050_v41  ;;  %v6176_v31 = vpop.f32.mrf.mxu0  ;;  %7307 = vmatprep.subr.bf16.mxu0 %v11051_v0  ;;  %v11075_v22 = vld [vmem:[%s16305_s1 + $0x4f4] ss:$8 sps:$4 sm:$0xff]   ;;  %v11078_v0 = vld [vmem:[%s16305_s1 + $0x590] ss:$8 sps:$4 sm:$0xff]  }
 0x4b1   :  { %7387 = vmatprep.subr.bf16.mxu1 %v11052_v48  ;;  %v15561_v41 = vld [vmem:[%s16306_s0 + $0x50] ss:$12 sps:$4 sm:$0x1e]   ;;  %v11079_v48 = vld [vmem:[%s16305_s1 + $0x4e4] ss:$8 sps:$4 sm:$0xff]  }
 0x4b2   :  { %v6510_v20 = vpop.f32.mrf.mxu0  ;;  %v11077_v31 = vld [vmem:[%s16305_s1 + $0x4f0] ss:$8 sps:$4 sm:$0xff]   ;;  %v11237_v8 = vld [vmem:[%s16305_s1 + $0xa74] ss:$8 sps:$4 sm:$0xff]  }
 0x4b3   :  { %v6469_v62 = vpop.f32.mrf.mxu1  ;;  %7308 = vmatpush2.bf16.msra.mxu0 %v11053_v25  ;;  %v11082_v25 = vld [vmem:[%s16305_s1 + $0x580] ss:$8 sps:$4 sm:$0xff]  }
 0x4b4   :  { %v6511_v18 = vadd.f32 %v6510_v20, %v6469_v62  ;;  %7388 = vmatpush2.bf16.msra.mxu1 %v11054_v28  ;;  %v6512_v57 = vpop.f32.mrf.mxu0  ;;  %7309 = vmatprep.subr.bf16.mxu0 %v11055_v27  ;;  %v11080_v62 = vld [vmem:[%s16305_s1 + $0x584] ss:$8 sps:$4 sm:$0xff]   ;;  %v7470_v20 = vrot.slane %v15561_v41, 1  ;;  %v11083_v28 = vld [vmem:[%s16305_s1 + $0x4d4] ss:$8 sps:$4 sm:$0xff]  }
 0x4b5   :  { %v6471_v19 = vpop.f32.mrf.mxu1  ;;  %7389 = vmatprep.subr.bf16.mxu1 %v11056_v47  ;;  %v11086_v27 = vld [vmem:[%s16305_s1 + $0x730] ss:$8 sps:$4 sm:$0xff]   ;;  %v11087_v47 = vld [vmem:[%s16305_s1 + $0x4c4] ss:$8 sps:$4 sm:$0xff]  }
 0x4b6   :  { %v15479_v10 = vadd.f32 %v6511_v18, %v6213_v29  ;;  %v6513_v15 = vadd.f32 %v6512_v57, %v6471_v19  ;;  %v6514_v39 = vpop.f32.mrf.mxu0  ;;  %v11073_v29 = vld [vmem:[%s16305_s1 + $0x3e0] ss:$8 sps:$4 sm:$0xff]   ;;  %v11084_v19 = vld [vmem:[%s16305_s1 + $0x734] ss:$8 sps:$4 sm:$0xff]   ;;  %v11085_v57 = vld [vmem:[%s16305_s1 + $0x4d0] ss:$8 sps:$4 sm:$0xff]  }
 0x4b7   :  { %v6473_v50 = vpop.f32.mrf.mxu1  ;;  %7310 = vmatpush2.bf16.msra.mxu0 %v11057_v17  ;;  %v11081_v18 = vld [vmem:[%s16305_s1 + $0x4e0] ss:$8 sps:$4 sm:$0xff]   ;;  %v11091_v17 = vld [vmem:[%s16305_s1 + $0x4b4] ss:$8 sps:$4 sm:$0xff]  }
 0x4b8   :  { %v15481_v61 = vadd.f32 %v6513_v15, %v6215_v24  ;;  %7390 = vmatpush2.bf16.msra.mxu1 %v11058_v4  ;;  %v6515_v35 = vpop.f32.mrf.mxu0  ;;  %7311 = vmatprep.subr.bf16.mxu0 %v11059_v52  ;;  %v11076_v24 = vld [vmem:[%s16305_s1 + $0x594] ss:$8 sps:$4 sm:$0xff]   ;;  %v11088_v15 = vld [vmem:[%s16305_s1 + $0x724] ss:$8 sps:$4 sm:$0xff]   ;;  %v11089_v50 = vld [vmem:[%s16305_s1 + $0x4c0] ss:$8 sps:$4 sm:$0xff]  }
 0x4b9   :  { %v6474_v63 = vpop.f32.mrf.mxu1  ;;  %7391 = vmatprep.subr.bf16.mxu1 %v11060_v32  ;;  %v11090_v39 = vld [vmem:[%s16305_s1 + $0x720] ss:$8 sps:$4 sm:$0xff]   ;;  %v11092_v4 = vld [vmem:[%s16305_s1 + $0x714] ss:$8 sps:$4 sm:$0xff]   ;;  %v11095_v35 = vld [vmem:[%s16305_s1 + $0x4a4] ss:$8 sps:$4 sm:$0xff]  }
 0x4ba   :  { %v11094_v63 = vld [vmem:[%s16305_s1 + $0x710] ss:$8 sps:$4 sm:$0xff]   ;;  %v11096_v52 = vld [vmem:[%s16305_s1 + $0x704] ss:$8 sps:$4 sm:$0xff]   ;;  %v11097_v32 = vld [vmem:[%s16305_s1 + $0x4a0] ss:$8 sps:$4 sm:$0xff]  }
 0x4bb   :  { %v15495_v7 = vpop.f32.mrf.mxu1  ;;  %7312 = vmatpush2.bf16.msra.mxu0 %v11061_v36  ;;  %v11098_v36 = vld [vmem:[%s16305_s1 + $0x700] ss:$8 sps:$4 sm:$0xff]  }
 0x4bc   :  { %7392 = vmatpush2.bf16.msra.mxu1 %v11062_v6  ;;  %7313 = vmatprep.subr.bf16.mxu0 %v11063_v56  ;;  %v11099_v6 = vld [vmem:[%s16305_s1 + $0x494] ss:$8 sps:$4 sm:$0xff]  }
 0x4bd   :  { %v15503_v14 = vpop.f32.mrf.mxu1  ;;  %7393 = vmatprep.subr.bf16.mxu1 %v11064_v38  ;;  %v11100_v56 = vld [vmem:[%s16305_s1 + $0x6f4] ss:$8 sps:$4 sm:$0xff]   ;;  %v11101_v38 = vld [vmem:[%s16305_s1 + $0x490] ss:$8 sps:$4 sm:$0xff]  }
 0x4bf   :  { %v6814_v37 = vpop.f32.mrf.mxu1  ;;  %7314 = vmatpush2.bf16.msra.mxu0 %v11065_v45  ;;  %v11103_v45 = vld [vmem:[%s16305_s1 + $0x484] ss:$8 sps:$4 sm:$0xff]  }
 0x4c0   :  { %7394 = vmatpush2.bf16.msra.mxu1 %v11066_v43  ;;  %7420 = vmatprep.subr.bf16.mxu0 %v11068_v40  ;;  %v11102_v37 = vld [vmem:[%s16305_s1 + $0x6f0] ss:$8 sps:$4 sm:$0xff]   ;;  %v11104_v43 = vld [vmem:[%s16305_s1 + $0x6e4] ss:$8 sps:$4 sm:$0xff]   ;;  %v11107_v40 = vld [vmem:[%s16305_s1 + $0x574] ss:$8 sps:$4 sm:$0xff]  }
 0x4c1   :  { %v6815_v55 = vpop.f32.mrf.mxu1  ;;  %7395 = vmatprep.subr.bf16.mxu1 %v11067_v21  ;;  %v11106_v21 = vld [vmem:[%s16305_s1 + $0x6e0] ss:$8 sps:$4 sm:$0xff]  }
 0x4c2   :  { %7316 = vmatmul.mubr.bf16.vlgmr.msra.gmra.mxu0 %v14298_v53  ;;  %v11105_v55 = vld [vmem:[%s16305_s1 + $0x480] ss:$8 sps:$4 sm:$0xff]  }
 0x4c3   :  { %7421 = vmatpush1.bf16.msra.mxu0 %v11070_v33  ;;  %7440 = vmatprep.mubr.bf16.mxu0 %v11292_v1  ;;  %v11109_v33 = vld [vmem:[%s16305_s1 + $0x570] ss:$8 sps:$4 sm:$0xff]  }
 0x4c4   :  { %7396 = vmatpush2.bf16.msra.mxu1 %v11069_v54  ;;  %7422 = vmatprep.subr.bf16.mxu0 %v11072_v2  ;;  %v11108_v54 = vld [vmem:[%s16305_s1 + $0x6d4] ss:$8 sps:$4 sm:$0xff]   ;;  %v11111_v2 = vld [vmem:[%s16305_s1 + $0x564] ss:$8 sps:$4 sm:$0xff]  }
 0x4c5   :  { %7397 = vmatprep.subr.bf16.mxu1 %v11071_v58  ;;  %v11110_v58 = vld [vmem:[%s16305_s1 + $0x6d0] ss:$8 sps:$4 sm:$0xff]  }
 0x4c7   :  { %7423 = vmatpush1.bf16.msra.mxu0 %v11074_v49  ;;  %v11113_v49 = vld [vmem:[%s16305_s1 + $0x560] ss:$8 sps:$4 sm:$0xff]  }
 0x4c8   :  { %7398 = vmatpush2.bf16.msra.mxu1 %v11073_v29  ;;  %7476 = vmatprep.subr.bf16.mxu0 %v11075_v22  ;;  %v11112_v29 = vld [vmem:[%s16305_s1 + $0x6c4] ss:$8 sps:$4 sm:$0xff]   ;;  %v11114_v22 = vld [vmem:[%s16305_s1 + $0x6c0] ss:$8 sps:$4 sm:$0xff]  }
 0x4c9   :  { %7529 = vmatprep.subr.bf16.mxu1 %v11076_v24  ;;  %v11115_v24 = vld [vmem:[%s16305_s1 + $0x554] ss:$8 sps:$4 sm:$0xff]  }
 0x4ca   :  { %9439 = vmatmul.mubr.msk.bf16.vlgmr.msra.gmra.mxu0 %vm284_vm0, %v14336_v30 }
 0x4cb   :  { %7400 = vmatmul.mubr.bf16.vlgmr.msra.gmra.mxu1 %v14550_v9  ;;  %7477 = vmatpush1.bf16.msra.mxu0 %v11077_v31  ;;  %v11116_v31 = vld [vmem:[%s16305_s1 + $0x7b4] ss:$8 sps:$4 sm:$0xff]  }
 0x4cc   :  { %7530 = vmatpush1.bf16.msra.mxu1 %v11078_v0  ;;  %7478 = vmatprep.subr.bf16.mxu0 %v11079_v48 }
 0x4cd   :  { %7531 = vmatprep.subr.bf16.mxu1 %v11080_v62  ;;  %7549 = vmatprep.mubr.bf16.mxu1 %v11292_v1  ;;  %v11117_v62 = vld [vmem:[%s16305_s1 + $0x550] ss:$8 sps:$4 sm:$0xff]  }
 0x4ce   :  { %7508 = vmatprep.mubr.bf16.mxu0 %v7469_v16 }
 0x4cf   :  { %7479 = vmatpush1.bf16.msra.mxu0 %v11081_v18  ;;  %v11118_v18 = vld [vmem:[%s16305_s1 + $0x7b0] ss:$8 sps:$4 sm:$0xff]  }
 0x4d0   :  { %7532 = vmatpush1.bf16.msra.mxu1 %v11082_v25  ;;  %7480 = vmatprep.subr.bf16.mxu0 %v11083_v28  ;;  %v11119_v28 = vld [vmem:[%s16305_s1 + $0x544] ss:$8 sps:$4 sm:$0xff]  }
 0x4d1   :  { %7560 = vmatprep.subr.bf16.mxu1 %v11084_v19 }
 0x4d3   :  { %9447 = vmatmul.mubr.msk.bf16.vlgmr.msra.gmra.mxu1 %vm284_vm0, %v7470_v20  ;;  %7481 = vmatpush1.bf16.msra.mxu0 %v11085_v57 }
 0x4d4   :  { %7561 = vmatpush1.bf16.msra.mxu1 %v11086_v27  ;;  %7482 = vmatprep.subr.bf16.mxu0 %v11087_v47 }
 0x4d5   :  { %7562 = vmatprep.subr.bf16.mxu1 %v11088_v15  ;;  %7592 = vmatprep.mubr.bf16.mxu1 %v14052_v60  ;;  %v11093_v60 = vld [vmem:[%s16305_s1 + $0x4b0] ss:$8 sps:$4 sm:$0xff]   ;;  %v11121_v15 = vld [vmem:[%s16305_s1 + $0x540] ss:$8 sps:$4 sm:$0xff]  }
 0x4d7   :  { %7483 = vmatpush1.bf16.msra.mxu0 %v11089_v50  ;;  %v11122_v50 = vld [vmem:[%s16305_s1 + $0x7a0] ss:$8 sps:$4 sm:$0xff]  }
 0x4d8   :  { %7563 = vmatpush1.bf16.msra.mxu1 %v11090_v39  ;;  %7484 = vmatprep.subr.bf16.mxu0 %v11091_v17 }
 0x4d9   :  { %7564 = vmatprep.subr.bf16.mxu1 %v11092_v4 }
 0x4db   :  { %7485 = vmatpush1.bf16.msra.mxu0 %v11093_v60  ;;  %v11125_v60 = vld [vmem:[%s16305_s1 + $0x530] ss:$8 sps:$4 sm:$0xff]  }
 0x4dc   :  { %7565 = vmatpush1.bf16.msra.mxu1 %v11094_v63  ;;  %7486 = vmatprep.subr.bf16.mxu0 %v11095_v35  ;;  %v11126_v63 = vld [vmem:[%s16305_s1 + $0x790] ss:$8 sps:$4 sm:$0xff]  }
 0x4dd   :  { %7566 = vmatprep.subr.bf16.mxu1 %v11096_v52 }
 0x4df   :  { %7487 = vmatpush1.bf16.msra.mxu0 %v11097_v32  ;;  %v11127_v32 = vld [vmem:[%s16305_s1 + $0x524] ss:$8 sps:$4 sm:$0xff]  }
 0x4e0   :  { %7567 = vmatpush1.bf16.msra.mxu1 %v11098_v36  ;;  %7488 = vmatprep.subr.bf16.mxu0 %v11099_v6  ;;  %v11128_v36 = vld [vmem:[%s16305_s1 + $0x784] ss:$8 sps:$4 sm:$0xff]  }
 0x4e1   :  { %7568 = vmatprep.subr.bf16.mxu1 %v11100_v56 }
 0x4e3   :  { %7489 = vmatpush1.bf16.msra.mxu0 %v11101_v38 }
 0x4e4   :  { %7569 = vmatpush1.bf16.msra.mxu1 %v11102_v37  ;;  %7490 = vmatprep.subr.bf16.mxu0 %v11103_v45 }
 0x4e5   :  { %7570 = vmatprep.subr.bf16.mxu1 %v11104_v43 }
 0x4e7   :  { %7491 = vmatpush1.bf16.msra.mxu0 %v11105_v55  ;;  %v11129_v55 = vld [vmem:[%s16305_s1 + $0x520] ss:$8 sps:$4 sm:$0xff]  }
 0x4e8   :  { %7571 = vmatpush1.bf16.msra.mxu1 %v11106_v21  ;;  %7492 = vmatprep.subr.bf16.mxu0 %v11107_v40  ;;  %v11130_v21 = vld [vmem:[%s16305_s1 + $0x780] ss:$8 sps:$4 sm:$0xff]  }
 0x4e9   :  { %7572 = vmatprep.subr.bf16.mxu1 %v11108_v54 }
 0x4eb   :  { %7493 = vmatpush2.bf16.msra.mxu0 %v11109_v33  ;;  %v11131_v33 = vld [vmem:[%s16305_s1 + $0x514] ss:$8 sps:$4 sm:$0xff]  }
 0x4ec   :  { %7573 = vmatpush1.bf16.msra.mxu1 %v11110_v58  ;;  %7494 = vmatprep.subr.bf16.mxu0 %v11111_v2  ;;  %v11132_v58 = vld [vmem:[%s16305_s1 + $0x774] ss:$8 sps:$4 sm:$0xff]  }
 0x4ed   :  { %7574 = vmatprep.subr.bf16.mxu1 %v11112_v29 }
 0x4ef   :  { %7495 = vmatpush2.bf16.msra.mxu0 %v11113_v49  ;;  %v15756_v49 = vld [vmem:[%s16306_s0 + $0x48] ss:$12 sps:$4 sm:$0x1e]  }
 0x4f0   :  { %7575 = vmatpush1.bf16.msra.mxu1 %v11114_v22  ;;  %7496 = vmatprep.subr.bf16.mxu0 %v11115_v24  ;;  %v11133_v22 = vld [vmem:[%s16305_s1 + $0x510] ss:$8 sps:$4 sm:$0xff]  }
 0x4f1   :  { %7576 = vmatprep.subr.bf16.mxu1 %v11116_v31  ;;  %v11134_v24 = vld [vmem:[%s16305_s1 + $0x770] ss:$8 sps:$4 sm:$0xff]  }
 0x4f2   :  { %v6769_v0 = vpop.f32.mrf.mxu0 }
 0x4f3   :  { %v6811_v48 = vadd.f32 %v15495_v7, %v6769_v0  ;;  %7497 = vmatpush2.bf16.msra.mxu0 %v11117_v62  ;;  %v11120_v7 = vld [vmem:[%s16305_s1 + $0x7a4] ss:$8 sps:$4 sm:$0xff]  }
 0x4f4   :  { %7577 = vmatpush2.bf16.msra.mxu1 %v11118_v18  ;;  %v6771_v25 = vpop.f32.mrf.mxu0  ;;  %7498 = vmatprep.subr.bf16.mxu0 %v11119_v28  ;;  %v11135_v0 = vld [vmem:[%s16305_s1 + $0x504] ss:$8 sps:$4 sm:$0xff]   ;;  %v7468_v18 = vrot.slane %v15756_v49, 1  ;;  %v11138_v28 = vld [vmem:[%s16305_s1 + $0x760] ss:$8 sps:$4 sm:$0xff]  }
 0x4f5   :  { %7578 = vmatprep.subr.bf16.mxu1 %v11120_v7  ;;  %v6817_v19 = vadd.f32 %v6811_v48, %v15479_v10  ;;  %v6813_v57 = vadd.f32 %v15503_v14, %v6771_v25  ;;  %v11123_v10 = vld [vmem:[%s16305_s1 + $0x534] ss:$8 sps:$4 sm:$0xff]   ;;  %v11136_v48 = vld [vmem:[%s16305_s1 + $0x764] ss:$8 sps:$4 sm:$0xff]   ;;  %v11137_v25 = vld [vmem:[%s16305_s1 + $0x500] ss:$8 sps:$4 sm:$0xff]  }
 0x4f6   :  { %v6773_v27 = vpop.f32.mrf.mxu0 }
 0x4f7   :  { %v6818_v47 = vadd.f32 %v6813_v57, %v15481_v61  ;;  %7499 = vmatpush2.bf16.msra.mxu0 %v11121_v15  ;;  %v11124_v61 = vld [vmem:[%s16305_s1 + $0x794] ss:$8 sps:$4 sm:$0xff]   ;;  %v11141_v27 = vld [vmem:[%s16305_s1 + $0x750] ss:$8 sps:$4 sm:$0xff]   ;;  %v11143_v15 = vld [vmem:[%s16305_s1 + $0x744] ss:$8 sps:$4 sm:$0xff]  }
 0x4f8   :  { %7579 = vmatpush2.bf16.msra.mxu1 %v11122_v50  ;;  %v6774_v39 = vpop.f32.mrf.mxu0  ;;  %7500 = vmatprep.subr.bf16.mxu0 %v11123_v10  ;;  %v11140_v57 = vld [vmem:[%s16305_s1 + $0x7d4] ss:$8 sps:$4 sm:$0xff]   ;;  %v11144_v50 = vld [vmem:[%s16305_s1 + $0x7c4] ss:$8 sps:$4 sm:$0xff]   ;;  %v11146_v10 = vld [vmem:[%s16305_s1 + $0x7c0] ss:$8 sps:$4 sm:$0xff]  }
 0x4f9   :  { %7580 = vmatprep.subr.bf16.mxu1 %v11124_v61  ;;  %v11145_v39 = vld [vmem:[%s16305_s1 + $0x740] ss:$8 sps:$4 sm:$0xff]   ;;  %v11147_v61 = vld [vmem:[%s16305_s1 + $0x614] ss:$8 sps:$4 sm:$0xff]  }
 0x4fa   :  { %v7110_v17 = vpop.f32.mrf.mxu0 }
 0x4fb   :  { %v7069_v14 = vpop.f32.mrf.mxu1  ;;  %7501 = vmatpush2.bf16.msra.mxu0 %v11125_v60  ;;  %v11151_v60 = vld [vmem:[%s16305_s1 + $0x604] ss:$8 sps:$4 sm:$0xff]  }
 0x4fc   :  { %v7111_v4 = vadd.f32 %v7110_v17, %v7069_v14  ;;  %7581 = vmatpush2.bf16.msra.mxu1 %v11126_v63  ;;  %v7112_v52 = vpop.f32.mrf.mxu0  ;;  %7502 = vmatprep.subr.bf16.mxu0 %v11127_v32  ;;  %v11148_v14 = vld [vmem:[%s16305_s1 + $0x6b4] ss:$8 sps:$4 sm:$0xff]   ;;  %v11149_v17 = vld [vmem:[%s16305_s1 + $0x610] ss:$8 sps:$4 sm:$0xff]   ;;  %v11154_v63 = vld [vmem:[%s16305_s1 + $0x6a0] ss:$8 sps:$4 sm:$0xff]  }
 0x4fd   :  { %v7071_v35 = vpop.f32.mrf.mxu1  ;;  %7582 = vmatprep.subr.bf16.mxu1 %v11128_v36  ;;  %v11158_v32 = vld [vmem:[%s16305_s1 + $0x5f0] ss:$8 sps:$4 sm:$0xff]  }
 0x4fe   :  { %v15731_v6 = vadd.f32 %v7111_v4, %v6817_v19  ;;  %v7113_v56 = vadd.f32 %v7112_v52, %v7071_v35  ;;  %v7114_v37 = vpop.f32.mrf.mxu0  ;;  %v11139_v19 = vld [vmem:[%s16305_s1 + $0x754] ss:$8 sps:$4 sm:$0xff]   ;;  %v11150_v4 = vld [vmem:[%s16305_s1 + $0x6b0] ss:$8 sps:$4 sm:$0xff]  }
 0x4ff   :  { %v7073_v38 = vpop.f32.mrf.mxu1  ;;  %7503 = vmatpush2.bf16.msra.mxu0 %v11129_v55  ;;  %v11155_v35 = vld [vmem:[%s16305_s1 + $0x5f4] ss:$8 sps:$4 sm:$0xff]   ;;  %v11159_v36 = vld [vmem:[%s16305_s1 + $0x850] ss:$8 sps:$4 sm:$0xff]   ;;  %v11162_v37 = vld [vmem:[%s16305_s1 + $0x5e0] ss:$8 sps:$4 sm:$0xff]  }
 0x500   :  { %v7976_v45 = vmax.f32 %v15211_v44, %v15731_v6  ;;  %v15735_v43 = vadd.f32 %v7113_v56, %v6818_v47  ;;  %7583 = vmatpush2.bf16.msra.mxu1 %v11130_v21  ;;  %v7115_v54 = vpop.f32.mrf.mxu0  ;;  %7504 = vmatprep.subr.bf16.mxu0 %v11131_v33  ;;  %v11142_v47 = vld [vmem:[%s16305_s1 + $0x7d0] ss:$8 sps:$4 sm:$0xff]   ;;  %v11156_v52 = vld [vmem:[%s16305_s1 + $0x854] ss:$8 sps:$4 sm:$0xff]   ;;  %v11160_v56 = vld [vmem:[%s16305_s1 + $0x5e4] ss:$8 sps:$4 sm:$0xff]  }
 0x501   :  { %v7074_v40 = vpop.f32.mrf.mxu1  ;;  %7584 = vmatprep.subr.bf16.mxu1 %v11132_v58  ;;  %v11161_v38 = vld [vmem:[%s16305_s1 + $0x844] ss:$8 sps:$4 sm:$0xff]   ;;  %v11163_v55 = vld [vmem:[%s16305_s1 + $0x840] ss:$8 sps:$4 sm:$0xff]   ;;  %v11164_v21 = vld [vmem:[%s16305_s1 + $0x5d4] ss:$8 sps:$4 sm:$0xff]  }
 0x502   :  { %v7977_v2 = vmax.f32 %v15215_v59, %v15735_v43  ;;  %v11165_v40 = vld [vmem:[%s16305_s1 + $0x834] ss:$8 sps:$4 sm:$0xff]   ;;  %v11167_v54 = vld [vmem:[%s16305_s1 + $0x830] ss:$8 sps:$4 sm:$0xff]   ;;  %v11168_v33 = vld [vmem:[%s16305_s1 + $0x5c4] ss:$8 sps:$4 sm:$0xff]  }
 0x503   :  { %v15751_v29 = vpop.f32.mrf.mxu1  ;;  %7505 = vmatpush2.bf16.msra.mxu0 %v11133_v22  ;;  %v11169_v58 = vld [vmem:[%s16305_s1 + $0x824] ss:$8 sps:$4 sm:$0xff]   ;;  %v11170_v22 = vld [vmem:[%s16305_s1 + $0x5c0] ss:$8 sps:$4 sm:$0xff]  }
 0x504   :  { %7585 = vmatpush2.bf16.msra.mxu1 %v11134_v24  ;;  %7506 = vmatprep.subr.bf16.mxu0 %v11135_v0  ;;  %v11171_v24 = vld [vmem:[%s16305_s1 + $0x820] ss:$8 sps:$4 sm:$0xff]   ;;  %v11172_v0 = vld [vmem:[%s16305_s1 + $0x5b4] ss:$8 sps:$4 sm:$0xff]  }
 0x505   :  { %v15764_v31 = vpop.f32.mrf.mxu1  ;;  %7586 = vmatprep.subr.bf16.mxu1 %v11136_v48  ;;  %v11173_v48 = vld [vmem:[%s16305_s1 + $0x814] ss:$8 sps:$4 sm:$0xff]  }
 0x507   :  { %v7198_v62 = vpop.f32.mrf.mxu1  ;;  %7507 = vmatpush2.bf16.msra.mxu0 %v11137_v25  ;;  %v11175_v25 = vld [vmem:[%s16305_s1 + $0x810] ss:$8 sps:$4 sm:$0xff]  }
 0x508   :  { %7587 = vmatpush2.bf16.msra.mxu1 %v11138_v28  ;;  %7613 = vmatprep.subr.bf16.mxu0 %v11140_v57  ;;  %v11174_v62 = vld [vmem:[%s16305_s1 + $0x5b0] ss:$8 sps:$4 sm:$0xff]   ;;  %v11176_v28 = vld [vmem:[%s16305_s1 + $0x5a4] ss:$8 sps:$4 sm:$0xff]   ;;  %v11179_v57 = vld [vmem:[%s16305_s1 + $0x800] ss:$8 sps:$4 sm:$0xff]  }
 0x509   :  { %v7199_v7 = vpop.f32.mrf.mxu1  ;;  %7588 = vmatprep.subr.bf16.mxu1 %v11139_v19  ;;  %v11178_v19 = vld [vmem:[%s16305_s1 + $0x5a0] ss:$8 sps:$4 sm:$0xff]  }
 0x50a   :  { %7509 = vmatmul.mubr.bf16.vlgmr.msra.gmra.mxu0 %v7468_v18  ;;  %v11177_v7 = vld [vmem:[%s16305_s1 + $0x804] ss:$8 sps:$4 sm:$0xff]  }
 0x50b   :  { %7614 = vmatpush1.bf16.msra.mxu0 %v11142_v47  ;;  %7633 = vmatprep.mubr.bf16.mxu0 %v11292_v1  ;;  %v11181_v47 = vld [vmem:[%s16305_s1 + $0x7f4] ss:$8 sps:$4 sm:$0xff]  }
 0x50c   :  { %7589 = vmatpush2.bf16.msra.mxu1 %v11141_v27  ;;  %7615 = vmatprep.subr.bf16.mxu0 %v11144_v50  ;;  %v11180_v27 = vld [vmem:[%s16305_s1 + $0x694] ss:$8 sps:$4 sm:$0xff]   ;;  %v11183_v50 = vld [vmem:[%s16305_s1 + $0x7f0] ss:$8 sps:$4 sm:$0xff]  }
 0x50d   :  { %7590 = vmatprep.subr.bf16.mxu1 %v11143_v15  ;;  %v11182_v15 = vld [vmem:[%s16305_s1 + $0x690] ss:$8 sps:$4 sm:$0xff]  }
 0x50f   :  { %7616 = vmatpush1.bf16.msra.mxu0 %v11146_v10  ;;  %v11185_v10 = vld [vmem:[%s16305_s1 + $0x7e4] ss:$8 sps:$4 sm:$0xff]  }
 0x510   :  { %7591 = vmatpush2.bf16.msra.mxu1 %v11145_v39  ;;  %7642 = vmatprep.subr.bf16.mxu0 %v11147_v61  ;;  %v11184_v39 = vld [vmem:[%s16305_s1 + $0x684] ss:$8 sps:$4 sm:$0xff]   ;;  %v11186_v61 = vld [vmem:[%s16305_s1 + $0x680] ss:$8 sps:$4 sm:$0xff]  }
 0x511   :  { %7695 = vmatprep.subr.bf16.mxu1 %v11148_v14  ;;  %v11187_v14 = vld [vmem:[%s16305_s1 + $0x7e0] ss:$8 sps:$4 sm:$0xff]  }
 0x512   :  { %9448 = vmatmul.mubr.msk.bf16.vlgmr.msra.gmra.mxu0 %vm284_vm0, %v14074_v26  ;;  %v11153_v26 = vld [vmem:[%s16305_s1 + $0x600] ss:$8 sps:$4 sm:$0xff]  }
 0x513   :  { %7593 = vmatmul.mubr.bf16.vlgmr.msra.gmra.mxu1 %v14263_v34  ;;  %7643 = vmatpush1.bf16.msra.mxu0 %v11149_v17  ;;  %v11152_v34 = vld [vmem:[%s16305_s1 + $0x6a4] ss:$8 sps:$4 sm:$0xff]   ;;  %v11188_v17 = vld [vmem:[%s16305_s1 + $0x674] ss:$8 sps:$4 sm:$0xff]  }
 0x514   :  { %7696 = vmatpush1.bf16.msra.mxu1 %v11150_v4  ;;  %7644 = vmatprep.subr.bf16.mxu0 %v11151_v60  ;;  %v11189_v4 = vld [vmem:[%s16305_s1 + $0x8d4] ss:$8 sps:$4 sm:$0xff]  }
 0x515   :  { %7697 = vmatprep.subr.bf16.mxu1 %v11152_v34  ;;  %7715 = vmatprep.mubr.bf16.mxu1 %v11292_v1 }
 0x516   :  { %7674 = vmatprep.mubr.bf16.mxu0 %v13776_v46  ;;  %v11157_v46 = vld [vmem:[%s16306_s0 + $0x50] ss:$0 sps:$4 sm:$0xff]  }
 0x517   :  { %7645 = vmatpush1.bf16.msra.mxu0 %v11153_v26  ;;  %v11190_v26 = vld [vmem:[%s16305_s1 + $0x670] ss:$8 sps:$4 sm:$0xff]  }
 0x518   :  { %7698 = vmatpush1.bf16.msra.mxu1 %v11154_v63  ;;  %7646 = vmatprep.subr.bf16.mxu0 %v11155_v35  ;;  %v11191_v63 = vld [vmem:[%s16305_s1 + $0x8d0] ss:$8 sps:$4 sm:$0xff]  }
 0x519   :  { %7724 = vmatprep.subr.bf16.mxu1 %v11156_v52  ;;  %v11192_v52 = vld [vmem:[%s16305_s1 + $0x664] ss:$8 sps:$4 sm:$0xff]  }
 0x51b   :  { %9449 = vmatmul.mubr.msk.bf16.vlgmr.msra.gmra.mxu1 %vm284_vm0, %v11157_v46  ;;  %7647 = vmatpush1.bf16.msra.mxu0 %v11158_v32 }
 0x51c   :  { %7725 = vmatpush1.bf16.msra.mxu1 %v11159_v36  ;;  %7648 = vmatprep.subr.bf16.mxu0 %v11160_v56  ;;  %v11194_v36 = vld [vmem:[%s16305_s1 + $0x660] ss:$8 sps:$4 sm:$0xff]  }
 0x51d   :  { %7726 = vmatprep.subr.bf16.mxu1 %v11161_v38  ;;  %7756 = vmatprep.mubr.bf16.mxu1 %v14088_v11  ;;  %v11166_v11 = vld [vmem:[%s16305_s1 + $0x5d0] ss:$8 sps:$4 sm:$0xff]   ;;  %v11195_v56 = vld [vmem:[%s16305_s1 + $0x8c0] ss:$8 sps:$4 sm:$0xff]  }
 0x51f   :  { %7649 = vmatpush1.bf16.msra.mxu0 %v11162_v37  ;;  %v11196_v37 = vld [vmem:[%s16305_s1 + $0x654] ss:$8 sps:$4 sm:$0xff]  }
 0x520   :  { %7727 = vmatpush1.bf16.msra.mxu1 %v11163_v55  ;;  %7650 = vmatprep.subr.bf16.mxu0 %v11164_v21 }
 0x521   :  { %7728 = vmatprep.subr.bf16.mxu1 %v11165_v40 }
 0x523   :  { %7651 = vmatpush1.bf16.msra.mxu0 %v11166_v11  ;;  %v11198_v11 = vld [vmem:[%s16305_s1 + $0x650] ss:$8 sps:$4 sm:$0xff]  }
 0x524   :  { %7729 = vmatpush1.bf16.msra.mxu1 %v11167_v54  ;;  %7652 = vmatprep.subr.bf16.mxu0 %v11168_v33  ;;  %v11199_v54 = vld [vmem:[%s16305_s1 + $0x8b0] ss:$8 sps:$4 sm:$0xff]  }
 0x525   :  { %7730 = vmatprep.subr.bf16.mxu1 %v11169_v58 }
 0x527   :  { %7653 = vmatpush1.bf16.msra.mxu0 %v11170_v22  ;;  %v11200_v22 = vld [vmem:[%s16305_s1 + $0x644] ss:$8 sps:$4 sm:$0xff]  }
 0x528   :  { %7731 = vmatpush1.bf16.msra.mxu1 %v11171_v24  ;;  %7654 = vmatprep.subr.bf16.mxu0 %v11172_v0  ;;  %v11201_v24 = vld [vmem:[%s16305_s1 + $0x8a4] ss:$8 sps:$4 sm:$0xff]  }
 0x529   :  { %7732 = vmatprep.subr.bf16.mxu1 %v11173_v48 }
 0x52b   :  { %7655 = vmatpush1.bf16.msra.mxu0 %v11174_v62 }
 0x52c   :  { %7733 = vmatpush1.bf16.msra.mxu1 %v11175_v25  ;;  %7656 = vmatprep.subr.bf16.mxu0 %v11176_v28 }
 0x52d   :  { %7734 = vmatprep.subr.bf16.mxu1 %v11177_v7  ;;  %v11202_v7 = vld [vmem:[%s16305_s1 + $0x640] ss:$8 sps:$4 sm:$0xff]  }
 0x52f   :  { %7657 = vmatpush1.bf16.msra.mxu0 %v11178_v19  ;;  %v11203_v19 = vld [vmem:[%s16305_s1 + $0x8a0] ss:$8 sps:$4 sm:$0xff]  }
 0x530   :  { %7735 = vmatpush1.bf16.msra.mxu1 %v11179_v57  ;;  %7658 = vmatprep.subr.bf16.mxu0 %v11180_v27 }
 0x531   :  { %7736 = vmatprep.subr.bf16.mxu1 %v11181_v47  ;;  %v11204_v47 = vld [vmem:[%s16305_s1 + $0x634] ss:$8 sps:$4 sm:$0xff]  }
 0x533   :  { %7659 = vmatpush2.bf16.msra.mxu0 %v11182_v15  ;;  %v11205_v15 = vld [vmem:[%s16305_s1 + $0x894] ss:$8 sps:$4 sm:$0xff]  }
 0x534   :  { %7737 = vmatpush1.bf16.msra.mxu1 %v11183_v50  ;;  %7660 = vmatprep.subr.bf16.mxu0 %v11184_v39  ;;  %v11206_v39 = vld [vmem:[%s16305_s1 + $0x630] ss:$8 sps:$4 sm:$0xff]  }
 0x535   :  { %7738 = vmatprep.subr.bf16.mxu1 %v11185_v10  ;;  %v11207_v10 = vld [vmem:[%s16305_s1 + $0x890] ss:$8 sps:$4 sm:$0xff]  }
 0x537   :  { %7661 = vmatpush2.bf16.msra.mxu0 %v11186_v61 }
 0x538   :  { %7739 = vmatpush1.bf16.msra.mxu1 %v11187_v14  ;;  %7662 = vmatprep.subr.bf16.mxu0 %v11188_v17  ;;  %v11208_v14 = vld [vmem:[%s16305_s1 + $0x624] ss:$8 sps:$4 sm:$0xff]  }
 0x539   :  { %7740 = vmatprep.subr.bf16.mxu1 %v11189_v4  ;;  %v11209_v17 = vld [vmem:[%s16305_s1 + $0x884] ss:$8 sps:$4 sm:$0xff]  }
 0x53a   :  { %v7153_v60 = vpop.f32.mrf.mxu0 }
 0x53b   :  { %v7195_v34 = vadd.f32 %v15751_v29, %v7153_v60  ;;  %7663 = vmatpush2.bf16.msra.mxu0 %v11190_v26  ;;  %v11193_v29 = vld [vmem:[%s16305_s1 + $0x8c4] ss:$8 sps:$4 sm:$0xff]   ;;  %v11210_v60 = vld [vmem:[%s16305_s1 + $0x620] ss:$8 sps:$4 sm:$0xff]  }
 0x53c   :  { %7741 = vmatpush2.bf16.msra.mxu1 %v11191_v63  ;;  %v7155_v35 = vpop.f32.mrf.mxu0  ;;  %7664 = vmatprep.subr.bf16.mxu0 %v11192_v52  ;;  %v11212_v63 = vld [vmem:[%s16305_s1 + $0x874] ss:$8 sps:$4 sm:$0xff]   ;;  %v11214_v52 = vld [vmem:[%s16305_s1 + $0x870] ss:$8 sps:$4 sm:$0xff]  }
 0x53d   :  { %7742 = vmatprep.subr.bf16.mxu1 %v11193_v29  ;;  %v7197_v46 = vadd.f32 %v15764_v31, %v7155_v35  ;;  %v11197_v31 = vld [vmem:[%s16305_s1 + $0x8b4] ss:$8 sps:$4 sm:$0xff]   ;;  %v11215_v29 = vld [vmem:[%s16305_s1 + $0x8f0] ss:$8 sps:$4 sm:$0xff]  }
 0x53e   :  { %v7157_v32 = vpop.f32.mrf.mxu0  ;;  %v11213_v35 = vld [vmem:[%s16305_s1 + $0x8f4] ss:$8 sps:$4 sm:$0xff]  }
 0x53f   :  { %7665 = vmatpush2.bf16.msra.mxu0 %v11194_v36  ;;  %v11217_v32 = vld [vmem:[%s16305_s1 + $0x8e4] ss:$8 sps:$4 sm:$0xff]   ;;  %v11219_v36 = vld [vmem:[%s16305_s1 + $0x8e0] ss:$8 sps:$4 sm:$0xff]  }
 0x540   :  { %7743 = vmatpush2.bf16.msra.mxu1 %v11195_v56  ;;  %v7158_v38 = vpop.f32.mrf.mxu0  ;;  %7666 = vmatprep.subr.bf16.mxu0 %v11196_v37  ;;  %v11220_v56 = vld [vmem:[%s16305_s1 + $0x974] ss:$8 sps:$4 sm:$0xff]   ;;  %v11222_v37 = vld [vmem:[%s16305_s1 + $0x970] ss:$8 sps:$4 sm:$0xff]  }
 0x541   :  { %7744 = vmatprep.subr.bf16.mxu1 %v11197_v31  ;;  %v11221_v38 = vld [vmem:[%s16305_s1 + $0xa14] ss:$8 sps:$4 sm:$0xff]   ;;  %v11223_v31 = vld [vmem:[%s16305_s1 + $0xa10] ss:$8 sps:$4 sm:$0xff]  }
 0x542   :  { %v7276_v21 = vpop.f32.mrf.mxu0 }
 0x543   :  { %v7235_v55 = vpop.f32.mrf.mxu1  ;;  %7667 = vmatpush2.bf16.msra.mxu0 %v11198_v11  ;;  %v11229_v11 = vld [vmem:[%s16305_s1 + $0xa94] ss:$8 sps:$4 sm:$0xff]  }
 0x544   :  { %v7236_v40 = vadd.f32 %v7235_v55, %v7195_v34  ;;  %7745 = vmatpush2.bf16.msra.mxu1 %v11199_v54  ;;  %v7278_v58 = vpop.f32.mrf.mxu0  ;;  %7668 = vmatprep.subr.bf16.mxu0 %v11200_v22  ;;  %v11211_v34 = vld [vmem:[%s16305_s1 + $0x880] ss:$8 sps:$4 sm:$0xff]   ;;  %v11224_v55 = vld [vmem:[%s16305_s1 + $0x964] ss:$8 sps:$4 sm:$0xff]   ;;  %v11231_v54 = vld [vmem:[%s16305_s1 + $0xa90] ss:$8 sps:$4 sm:$0xff]  }
 0x545   :  { %v7237_v33 = vpop.f32.mrf.mxu1  ;;  %7746 = vmatprep.subr.bf16.mxu1 %v11201_v24  ;;  %v11235_v22 = vld [vmem:[%s16305_s1 + $0xa80] ss:$8 sps:$4 sm:$0xff]   ;;  %v11236_v24 = vld [vmem:[%s16305_s1 + $0x934] ss:$8 sps:$4 sm:$0xff]  }
 0x546   :  { %v15980_v0 = vadd.f32 %v7276_v21, %v7236_v40  ;;  %v7238_v48 = vadd.f32 %v7237_v33, %v7197_v46  ;;  %v7280_v25 = vpop.f32.mrf.mxu0  ;;  %v11216_v46 = vld [vmem:[%s16305_s1 + $0x864] ss:$8 sps:$4 sm:$0xff]   ;;  %v11227_v21 = vld [vmem:[%s16305_s1 + $0xa00] ss:$8 sps:$4 sm:$0xff]   ;;  %v11228_v40 = vld [vmem:[%s16305_s1 + $0x954] ss:$8 sps:$4 sm:$0xff]  }
 0x547   :  { %v7239_v62 = vpop.f32.mrf.mxu1  ;;  %7669 = vmatpush2.bf16.msra.mxu0 %v11202_v7  ;;  %v11232_v33 = vld [vmem:[%s16305_s1 + $0x944] ss:$8 sps:$4 sm:$0xff]   ;;  %v11242_v7 = vld [vmem:[%s16305_s1 + $0x920] ss:$8 sps:$4 sm:$0xff]  }
 0x548   :  { %v15982_v28 = vadd.f32 %v7278_v58, %v7238_v48  ;;  %7747 = vmatpush2.bf16.msra.mxu1 %v11203_v19  ;;  %v7281_v27 = vpop.f32.mrf.mxu0  ;;  %7670 = vmatprep.subr.bf16.mxu0 %v11204_v47  ;;  %v11233_v58 = vld [vmem:[%s16305_s1 + $0xa84] ss:$8 sps:$4 sm:$0xff]   ;;  %v11239_v48 = vld [vmem:[%s16305_s1 + $0xa70] ss:$8 sps:$4 sm:$0xff]   ;;  %v11243_v19 = vld [vmem:[%s16305_s1 + $0xa60] ss:$8 sps:$4 sm:$0xff]  }
 0x549   :  { %v7240_v57 = vpop.f32.mrf.mxu1  ;;  %7748 = vmatprep.subr.bf16.mxu1 %v11205_v15  ;;  %v11240_v62 = vld [vmem:[%s16305_s1 + $0x924] ss:$8 sps:$4 sm:$0xff]   ;;  %v11245_v27 = vld [vmem:[%s16305_s1 + $0xa54] ss:$8 sps:$4 sm:$0xff]   ;;  %v11246_v47 = vld [vmem:[%s16305_s1 + $0x910] ss:$8 sps:$4 sm:$0xff]  }
 0x54a   :  { %v11241_v25 = vld [vmem:[%s16305_s1 + $0xa64] ss:$8 sps:$4 sm:$0xff]   ;;  %v11244_v57 = vld [vmem:[%s16305_s1 + $0x914] ss:$8 sps:$4 sm:$0xff]   ;;  %v11247_v15 = vld [vmem:[%s16305_s1 + $0xa50] ss:$8 sps:$4 sm:$0xff]  }
 0x54b   :  { %v15996_v50 = vpop.f32.mrf.mxu1  ;;  %7671 = vmatpush2.bf16.msra.mxu0 %v11206_v39  ;;  %v11248_v39 = vld [vmem:[%s16305_s1 + $0x904] ss:$8 sps:$4 sm:$0xff]  }
 0x54c   :  { %7749 = vmatpush2.bf16.msra.mxu1 %v11207_v10  ;;  %7672 = vmatprep.subr.bf16.mxu0 %v11208_v14  ;;  %v11249_v10 = vld [vmem:[%s16305_s1 + $0xa44] ss:$8 sps:$4 sm:$0xff]   ;;  %v11250_v14 = vld [vmem:[%s16305_s1 + $0x900] ss:$8 sps:$4 sm:$0xff]  }
 0x54d   :  { %v16004_v61 = vpop.f32.mrf.mxu1  ;;  %7750 = vmatprep.subr.bf16.mxu1 %v11209_v17  ;;  %v11251_v17 = vld [vmem:[%s16305_s1 + $0xa40] ss:$8 sps:$4 sm:$0xff]  }
 0x54f   :  { %v7362_v4 = vpop.f32.mrf.mxu1  ;;  %7673 = vmatpush2.bf16.msra.mxu0 %v11210_v60  ;;  %v11253_v60 = vld [vmem:[%s16305_s1 + $0xa34] ss:$8 sps:$4 sm:$0xff]  }
 0x550   :  { %7751 = vmatpush2.bf16.msra.mxu1 %v11211_v34  ;;  %7777 = vmatprep.subr.bf16.mxu0 %v11213_v35  ;;  %v11252_v4 = vld [vmem:[%s16305_s1 + $0x9f4] ss:$8 sps:$4 sm:$0xff]   ;;  %v11254_v34 = vld [vmem:[%s16305_s1 + $0x9f0] ss:$8 sps:$4 sm:$0xff]   ;;  %v11257_v35 = vld [vmem:[%s16305_s1 + $0xa24] ss:$8 sps:$4 sm:$0xff]  }
 0x551   :  { %v7363_v26 = vpop.f32.mrf.mxu1  ;;  %7752 = vmatprep.subr.bf16.mxu1 %v11212_v63  ;;  %v11256_v63 = vld [vmem:[%s16305_s1 + $0x9e4] ss:$8 sps:$4 sm:$0xff]  }
 0x552   :  { %7675 = vmatmul.mubr.bf16.vlgmr.msra.gmra.mxu0 %v14000_v13  ;;  %v11218_v13 = vld [vmem:[%s16305_s1 + $0x860] ss:$8 sps:$4 sm:$0xff]   ;;  %v11255_v26 = vld [vmem:[%s16305_s1 + $0xa30] ss:$8 sps:$4 sm:$0xff]  }
 0x553   :  { %7778 = vmatpush1.bf16.msra.mxu0 %v11215_v29  ;;  %7797 = vmatprep.mubr.bf16.mxu0 %v11292_v1  ;;  %v11259_v29 = vld [vmem:[%s16305_s1 + $0xa20] ss:$8 sps:$4 sm:$0xff]  }
 0x554   :  { %7753 = vmatpush2.bf16.msra.mxu1 %v11214_v52  ;;  %7779 = vmatprep.subr.bf16.mxu0 %v11217_v32  ;;  %v11258_v52 = vld [vmem:[%s16305_s1 + $0x9e0] ss:$8 sps:$4 sm:$0xff]   ;;  %v11261_v32 = vld [vmem:[%s16305_s1 + $0xb14] ss:$8 sps:$4 sm:$0xff]  }
 0x555   :  { %7754 = vmatprep.subr.bf16.mxu1 %v11216_v46  ;;  %v11260_v46 = vld [vmem:[%s16305_s1 + $0x9d4] ss:$8 sps:$4 sm:$0xff]  }
 0x557   :  { %7780 = vmatpush1.bf16.msra.mxu0 %v11219_v36 }
 0x558   :  { %7755 = vmatpush2.bf16.msra.mxu1 %v11218_v13  ;;  %7808 = vmatprep.subr.bf16.mxu0 %v11220_v56  ;;  %v11262_v56 = vld [vmem:[%s16305_s1 + $0x9d0] ss:$8 sps:$4 sm:$0xff]  }
 0x559   :  { %7861 = vmatprep.subr.bf16.mxu1 %v11221_v38  ;;  %v11263_v38 = vld [vmem:[%s16305_s1 + $0xb10] ss:$8 sps:$4 sm:$0xff]  }
 0x55a   :  { %9450 = vmatmul.mubr.msk.bf16.vlgmr.msra.gmra.mxu0 %vm284_vm0, %v14300_v12  ;;  %v11226_v12 = vld [vmem:[%s16305_s1 + $0x960] ss:$8 sps:$4 sm:$0xff]  }
 0x55b   :  { %7757 = vmatmul.mubr.bf16.vlgmr.msra.gmra.mxu1 %v14298_v53  ;;  %7809 = vmatpush1.bf16.msra.mxu0 %v11222_v37  ;;  %v11225_v53 = vld [vmem:[%s16305_s1 + $0xa04] ss:$8 sps:$4 sm:$0xff]  }
 0x55c   :  { %7862 = vmatpush1.bf16.msra.mxu1 %v11223_v31  ;;  %7810 = vmatprep.subr.bf16.mxu0 %v11224_v55  ;;  %v11264_v31 = vld [vmem:[%s16305_s1 + $0x9c4] ss:$8 sps:$4 sm:$0xff]  }
 0x55d   :  { %7863 = vmatprep.subr.bf16.mxu1 %v11225_v53  ;;  %7881 = vmatprep.mubr.bf16.mxu1 %v11292_v1 }
 0x55e   :  { %7840 = vmatprep.mubr.bf16.mxu0 %v14314_v51  ;;  %v11230_v51 = vld [vmem:[%s16305_s1 + $0x950] ss:$8 sps:$4 sm:$0xff]  }
 0x55f   :  { %7811 = vmatpush1.bf16.msra.mxu0 %v11226_v12 }
 0x560   :  { %7864 = vmatpush1.bf16.msra.mxu1 %v11227_v21  ;;  %7812 = vmatprep.subr.bf16.mxu0 %v11228_v40  ;;  %v11266_v40 = vld [vmem:[%s16305_s1 + $0x9c0] ss:$8 sps:$4 sm:$0xff]  }
 0x561   :  { %7892 = vmatprep.subr.bf16.mxu1 %v11229_v11  ;;  %v11267_v11 = vld [vmem:[%s16305_s1 + $0xb00] ss:$8 sps:$4 sm:$0xff]  }
 0x563   :  { %9451 = vmatmul.mubr.msk.bf16.vlgmr.msra.gmra.mxu1 %vm284_vm0, %v14336_v30  ;;  %7813 = vmatpush1.bf16.msra.mxu0 %v11230_v51  ;;  %v11234_v30 = vld [vmem:[%s16305_s1 + $0x940] ss:$8 sps:$4 sm:$0xff]  }
 0x564   :  { %7893 = vmatpush1.bf16.msra.mxu1 %v11231_v54  ;;  %7814 = vmatprep.subr.bf16.mxu0 %v11232_v33 }
 0x565   :  { %7894 = vmatprep.subr.bf16.mxu1 %v11233_v58  ;;  %7924 = vmatprep.mubr.bf16.mxu1 %v7469_v16  ;;  %v11238_v16 = vld [vmem:[%s16305_s1 + $0x930] ss:$8 sps:$4 sm:$0xff]  }
 0x566   :  { %v11270_v58 = vld [vmem:[%s16305_s1 + $0x9b0] ss:$8 sps:$4 sm:$0xff]  }
 0x567   :  { %7815 = vmatpush1.bf16.msra.mxu0 %v11234_v30  ;;  %v11271_v30 = vld [vmem:[%s16305_s1 + $0xaf0] ss:$8 sps:$4 sm:$0xff]  }
 0x568   :  { %7895 = vmatpush1.bf16.msra.mxu1 %v11235_v22  ;;  %7816 = vmatprep.subr.bf16.mxu0 %v11236_v24 }
 0x569   :  { %7896 = vmatprep.subr.bf16.mxu1 %v11237_v8  ;;  %v11272_v8 = vld [vmem:[%s16305_s1 + $0x9a4] ss:$8 sps:$4 sm:$0xff]  }
 0x56b   :  { %7817 = vmatpush1.bf16.msra.mxu0 %v11238_v16  ;;  %v11273_v16 = vld [vmem:[%s16305_s1 + $0xae4] ss:$8 sps:$4 sm:$0xff]  }
 0x56c   :  { %7897 = vmatpush1.bf16.msra.mxu1 %v11239_v48  ;;  %7818 = vmatprep.subr.bf16.mxu0 %v11240_v62 }
 0x56d   :  { %7898 = vmatprep.subr.bf16.mxu1 %v11241_v25 }
 0x56f   :  { %7819 = vmatpush1.bf16.msra.mxu0 %v11242_v7 }
 0x570   :  { %7899 = vmatpush1.bf16.msra.mxu1 %v11243_v19  ;;  %7820 = vmatprep.subr.bf16.mxu0 %v11244_v57  ;;  %v11274_v57 = vld [vmem:[%s16305_s1 + $0x9a0] ss:$8 sps:$4 sm:$0xff]  }
 0x571   :  { %7900 = vmatprep.subr.bf16.mxu1 %v11245_v27  ;;  %v11275_v27 = vld [vmem:[%s16305_s1 + $0xae0] ss:$8 sps:$4 sm:$0xff]  }
 0x573   :  { %7821 = vmatpush1.bf16.msra.mxu0 %v11246_v47 }
 0x574   :  { %7901 = vmatpush1.bf16.msra.mxu1 %v11247_v15  ;;  %7822 = vmatprep.subr.bf16.mxu0 %v11248_v39  ;;  %v11276_v39 = vld [vmem:[%s16305_s1 + $0x994] ss:$8 sps:$4 sm:$0xff]  }
 0x575   :  { %7902 = vmatprep.subr.bf16.mxu1 %v11249_v10  ;;  %v11277_v10 = vld [vmem:[%s16305_s1 + $0xad4] ss:$8 sps:$4 sm:$0xff]  }
 0x577   :  { %7823 = vmatpush1.bf16.msra.mxu0 %v11250_v14 }
 0x578   :  { %7903 = vmatpush1.bf16.msra.mxu1 %v11251_v17  ;;  %7824 = vmatprep.subr.bf16.mxu0 %v11252_v4  ;;  %v11278_v17 = vld [vmem:[%s16305_s1 + $0x990] ss:$8 sps:$4 sm:$0xff]  }
 0x579   :  { %7904 = vmatprep.subr.bf16.mxu1 %v11253_v60  ;;  %v11279_v4 = vld [vmem:[%s16305_s1 + $0xad0] ss:$8 sps:$4 sm:$0xff]  }
 0x57b   :  { %7825 = vmatpush2.bf16.msra.mxu0 %v11254_v34  ;;  %v11280_v34 = vld [vmem:[%s16305_s1 + $0x984] ss:$8 sps:$4 sm:$0xff]  }
 0x57c   :  { %7905 = vmatpush1.bf16.msra.mxu1 %v11255_v26  ;;  %7826 = vmatprep.subr.bf16.mxu0 %v11256_v63  ;;  %v11281_v26 = vld [vmem:[%s16305_s1 + $0xac4] ss:$8 sps:$4 sm:$0xff]  }
 0x57d   :  { %7906 = vmatprep.subr.bf16.mxu1 %v11257_v35  ;;  %v11282_v35 = vld [vmem:[%s16305_s1 + $0x980] ss:$8 sps:$4 sm:$0xff]  }
 0x57f   :  { %7827 = vmatpush2.bf16.msra.mxu0 %v11258_v52  ;;  %v11283_v52 = vld [vmem:[%s16305_s1 + $0xac0] ss:$8 sps:$4 sm:$0xff]  }
 0x580   :  { %7907 = vmatpush1.bf16.msra.mxu1 %v11259_v29  ;;  %7828 = vmatprep.subr.bf16.mxu0 %v11260_v46  ;;  %v11284_v46 = vld [vmem:[%s16305_s1 + $0xab4] ss:$8 sps:$4 sm:$0xff]  }
 0x581   :  { %7908 = vmatprep.subr.bf16.mxu1 %v11261_v32  ;;  %v11285_v32 = vld [vmem:[%s16305_s1 + $0xb34] ss:$8 sps:$4 sm:$0xff]  }
 0x582   :  { %v7317_v13 = vpop.f32.mrf.mxu0 }
 0x583   :  { %v7359_v36 = vadd.f32 %v15996_v50, %v7317_v13  ;;  %7829 = vmatpush2.bf16.msra.mxu0 %v11262_v56  ;;  %v11265_v50 = vld [vmem:[%s16305_s1 + $0xb04] ss:$8 sps:$4 sm:$0xff]   ;;  %v11286_v13 = vld [vmem:[%s16305_s1 + $0xab0] ss:$8 sps:$4 sm:$0xff]  }
 0x584   :  { %7909 = vmatpush2.bf16.msra.mxu1 %v11263_v38  ;;  %v7319_v37 = vpop.f32.mrf.mxu0  ;;  %7830 = vmatprep.subr.bf16.mxu0 %v11264_v31  ;;  %v11288_v56 = vld [vmem:[%s16305_s1 + $0xaa4] ss:$8 sps:$4 sm:$0xff]  }
 0x585   :  { %7910 = vmatprep.subr.bf16.mxu1 %v11265_v50  ;;  %v7365_v55 = vadd.f32 %v7359_v36, %v15980_v0  ;;  %v7361_v53 = vadd.f32 %v16004_v61, %v7319_v37  ;;  %v11268_v0 = vld [vmem:[%s16305_s1 + $0x9b4] ss:$8 sps:$4 sm:$0xff]   ;;  %v11287_v36 = vld [vmem:[%s16305_s1 + $0xb30] ss:$8 sps:$4 sm:$0xff]   ;;  %v11289_v38 = vld [vmem:[%s16305_s1 + $0xb24] ss:$8 sps:$4 sm:$0xff]  }
 0x586   :  { %v7321_v12 = vpop.f32.mrf.mxu0  ;;  %v11291_v37 = vld [vmem:[%s16305_s1 + $0xb20] ss:$8 sps:$4 sm:$0xff]  }
 0x587   :  { %v7366_v21 = vadd.f32 %v7361_v53, %v15982_v28  ;;  %7831 = vmatpush2.bf16.msra.mxu0 %v11266_v40  ;;  %v11269_v28 = vld [vmem:[%s16305_s1 + $0xaf4] ss:$8 sps:$4 sm:$0xff]  }
 0x588   :  { %7911 = vmatpush2.bf16.msra.mxu1 %v11267_v11  ;;  %v7322_v51 = vpop.f32.mrf.mxu0  ;;  %7832 = vmatprep.subr.bf16.mxu0 %v11268_v0 }
 0x589   :  { %7912 = vmatprep.subr.bf16.mxu1 %v11269_v28 }
 0x58a   :  { %v7442_v54 = vpop.f32.mrf.mxu0 }
 0x58b   :  { %v7401_v61 = vpop.f32.mrf.mxu1  ;;  %7833 = vmatpush2.bf16.msra.mxu0 %v11270_v58 }
 0x58c   :  { %v7443_v33 = vadd.f32 %v7442_v54, %v7401_v61  ;;  %7913 = vmatpush2.bf16.msra.mxu1 %v11271_v30  ;;  %v7444_v24 = vpop.f32.mrf.mxu0  ;;  %7834 = vmatprep.subr.bf16.mxu0 %v11272_v8 }
 0x58d   :  { %v7403_v22 = vpop.f32.mrf.mxu1  ;;  %7914 = vmatprep.subr.bf16.mxu1 %v11273_v16 }
 0x58e   :  { %v7449_v48 = vadd.f32 %v7443_v33, %v7365_v55  ;;  %v7445_v62 = vadd.f32 %v7444_v24, %v7403_v22  ;;  %v7446_v7 = vpop.f32.mrf.mxu0 }
 0x58f   :  { %v7405_v25 = vpop.f32.mrf.mxu1  ;;  %7835 = vmatpush2.bf16.msra.mxu0 %v11274_v57 }
 0x590   :  { %v7450_v19 = vadd.f32 %v7445_v62, %v7366_v21  ;;  %7915 = vmatpush2.bf16.msra.mxu1 %v11275_v27  ;;  %v7447_v15 = vpop.f32.mrf.mxu0  ;;  %7836 = vmatprep.subr.bf16.mxu0 %v11276_v39 }
 0x591   :  { %v7406_v47 = vpop.f32.mrf.mxu1  ;;  %7916 = vmatprep.subr.bf16.mxu1 %v11277_v10 }
 0x593   :  { %v7551_v14 = vpop.f32.mrf.mxu1  ;;  %7837 = vmatpush2.bf16.msra.mxu0 %v11278_v17 }
 0x594   :  { %7917 = vmatpush2.bf16.msra.mxu1 %v11279_v4  ;;  %7838 = vmatprep.subr.bf16.mxu0 %v11280_v34 }
 0x595   :  { %v7553_v60 = vpop.f32.mrf.mxu1  ;;  %7918 = vmatprep.subr.bf16.mxu1 %v11281_v26 }
 0x597   :  { %v7555_v63 = vpop.f32.mrf.mxu1  ;;  %7839 = vmatpush2.bf16.msra.mxu0 %v11282_v35 }
 0x598   :  { %7919 = vmatpush2.bf16.msra.mxu1 %v11283_v52  ;;  %7945 = vmatprep.subr.bf16.mxu0 %v11285_v32 }
 0x599   :  { %v7556_v29 = vpop.f32.mrf.mxu1  ;;  %7920 = vmatprep.subr.bf16.mxu1 %v11284_v46 }
 0x59a   :  { %7841 = vmatmul.mubr.bf16.vlgmr.msra.gmra.mxu0 %v14550_v9  ;;  %v11290_v9 = vld [vmem:[%s16305_s1 + $0xaa0] ss:$8 sps:$4 sm:$0xff]  }
 0x59b   :  { %7946 = vmatpush1.bf16.msra.mxu0 %v11287_v36  ;;  %7965 = vmatprep.mubr.bf16.mxu0 %v11292_v1 }
 0x59c   :  { %7921 = vmatpush2.bf16.msra.mxu1 %v11286_v13  ;;  %7947 = vmatprep.subr.bf16.mxu0 %v11289_v38 }
 0x59d   :  { %7922 = vmatprep.subr.bf16.mxu1 %v11288_v56 }
 0x59f   :  { %7948 = vmatpush1.bf16.msra.mxu0 %v11291_v37 }
 0x5a0   :  { %7923 = vmatpush2.bf16.msra.mxu1 %v11290_v9 }
 0x5a2   :  { %9452 = vmatmul.mubr.msk.bf16.vlgmr.msra.gmra.mxu0 %vm284_vm0, %v7470_v20 }
 0x5a3   :  { %7925 = vmatmul.mubr.bf16.vlgmr.msra.gmra.mxu1 %v7468_v18 }
 0x5ca   :  { %v7510_v31 = vpop.f32.mrf.mxu0 }
 0x5cb   :  { %v7552_v50 = vadd.f32 %v7551_v14, %v7510_v31 }
 0x5cc   :  { %v7512_v1 = vpop.f32.mrf.mxu0 }
 0x5cd   :  { %v16280_v55 = vadd.f32 %v7552_v50, %v7449_v48  ;;  %v7554_v53 = vadd.f32 %v7553_v60, %v7512_v1 }
 0x5ce   :  { %v7514_v12 = vpop.f32.mrf.mxu0 }
 0x5cf   :  { %v16282_v21 = vadd.f32 %v7554_v53, %v7450_v19 }
 0x5d0   :  { %v7515_v40 = vpop.f32.mrf.mxu0 }
 0x5d2   :  { %v7635_v51 = vpop.f32.mrf.mxu0 }
 0x5d3   :  { %v7594_v11 = vpop.f32.mrf.mxu1 }
 0x5d4   :  { %v7636_v0 = vadd.f32 %v7635_v51, %v7594_v11  ;;  %v7637_v49 = vpop.f32.mrf.mxu0 }
 0x5d5   :  { %v7596_v28 = vpop.f32.mrf.mxu1 }
 0x5d6   :  { %v7638_v18 = vadd.f32 %v7637_v49, %v7596_v28  ;;  %v7639_v41 = vpop.f32.mrf.mxu0 }
 0x5d7   :  { %v7598_v61 = vpop.f32.mrf.mxu1 }
 0x5d8   :  { %v7640_v20 = vpop.f32.mrf.mxu0 }
 0x5d9   :  { %v7599_v54 = vpop.f32.mrf.mxu1 }
 0x5db   :  { %v7717_v33 = vpop.f32.mrf.mxu1 }
 0x5dd   :  { %v7719_v58 = vpop.f32.mrf.mxu1 }
 0x5df   :  { %v7721_v30 = vpop.f32.mrf.mxu1 }
 0x5e1   :  { %v7722_v22 = vpop.f32.mrf.mxu1 }
 0x612   :  { %v7676_v24 = vpop.f32.mrf.mxu0 }
 0x613   :  { %v7677_v8 = vadd.f32 %v7676_v24, %v7636_v0 }
 0x614   :  { %v7678_v16 = vpop.f32.mrf.mxu0 }
 0x615   :  { %v7718_v48 = vadd.f32 %v7717_v33, %v7677_v8  ;;  %v7679_v62 = vadd.f32 %v7678_v16, %v7638_v18 }
 0x616   :  { %v7680_v25 = vpop.f32.mrf.mxu0 }
 0x617   :  { %v7720_v7 = vadd.f32 %v7719_v58, %v7679_v62 }
 0x618   :  { %v7681_v19 = vpop.f32.mrf.mxu0 }
 0x61a   :  { %v7799_v27 = vpop.f32.mrf.mxu0 }
 0x61b   :  { %v7758_v57 = vpop.f32.mrf.mxu1 }
 0x61c   :  { %v7800_v47 = vadd.f32 %v7799_v27, %v7758_v57  ;;  %v7801_v39 = vpop.f32.mrf.mxu0 }
 0x61d   :  { %v7760_v15 = vpop.f32.mrf.mxu1 }
 0x61e   :  { %v7806_v10 = vadd.f32 %v7800_v47, %v7718_v48  ;;  %v7802_v14 = vadd.f32 %v7801_v39, %v7760_v15  ;;  %v7803_v4 = vpop.f32.mrf.mxu0 }
 0x61f   :  { %v7762_v17 = vpop.f32.mrf.mxu1 }
 0x620   :  { %v7807_v60 = vadd.f32 %v7802_v14, %v7720_v7  ;;  %v7804_v26 = vpop.f32.mrf.mxu0 }
 0x621   :  { %v7763_v34 = vpop.f32.mrf.mxu1 }
 0x623   :  { %v7883_v63 = vpop.f32.mrf.mxu1 }
 0x625   :  { %v7885_v35 = vpop.f32.mrf.mxu1 }
 0x627   :  { %v7887_v52 = vpop.f32.mrf.mxu1 }
 0x629   :  { %v7888_v29 = vpop.f32.mrf.mxu1 }
 0x65a   :  { %v7842_v46 = vpop.f32.mrf.mxu0 }
 0x65b   :  { %v7884_v32 = vadd.f32 %v7883_v63, %v7842_v46 }
 0x65c   :  { %v7844_v13 = vpop.f32.mrf.mxu0 }
 0x65d   :  { %v7890_v36 = vadd.f32 %v7884_v32, %v7806_v10  ;;  %v7886_v9 = vadd.f32 %v7885_v35, %v7844_v13 }
 0x65e   :  { %v7846_v56 = vpop.f32.mrf.mxu0 }
 0x65f   :  { %v7891_v12 = vadd.f32 %v7886_v9, %v7807_v60 }
 0x660   :  { %v7847_v38 = vpop.f32.mrf.mxu0 }
 0x662   :  { %v7967_v31 = vpop.f32.mrf.mxu0 }
 0x663   :  { %v7926_v37 = vpop.f32.mrf.mxu1 }
 0x664   :  { %v7968_v50 = vadd.f32 %v7967_v31, %v7926_v37  ;;  %v7969_v53 = vpop.f32.mrf.mxu0 }
 0x665   :  { %v7928_v1 = vpop.f32.mrf.mxu1 }
 0x666   :  { %v7974_v40 = vadd.f32 %v7968_v50, %v7890_v36  ;;  %v7970_v11 = vadd.f32 %v7969_v53, %v7928_v1  ;;  %v7971_v0 = vpop.f32.mrf.mxu0 }
 0x667   :  { %v7930_v51 = vpop.f32.mrf.mxu1 }
 0x668   :  { %v7978_v28 = vmax.f32 %v16280_v55, %v7974_v40  ;;  %v7975_v49 = vadd.f32 %v7970_v11, %v7891_v12  ;;  %v7972_v61 = vpop.f32.mrf.mxu0  ;;  %v9454_v55 = vld [vmem:[%s16308_s3 + $0x8] sm:$0xff] }
 0x669   :  { %v7931_v18 = vpop.f32.mrf.mxu1 }
 0x66a   :  { %v7980_v41 = vmax.f32 %v7976_v45, %v7978_v28  ;;  %v7979_v54 = vmax.f32 %v16282_v21, %v7975_v49 }
 0x66c   :  { %v7982_v20 = vadd.f32 %v7980_v41, %v14493_v42  ;;  %v7981_v33 = vmax.f32 %v7977_v2, %v7979_v54 }
 0x66e   :  { %v7983_v58 = vadd.f32 %v7981_v33, %v14501_v23  ;;  %v7984_v30 = vmax.f32 %v7982_v20, 0.0 }
 0x670   :  { %v7985_v22 = vmax.f32 %v7983_v58, 0.0 }
 0x672   :  { %v9457_v24 = vpack.c.bf16 %v7985_v22, %v7984_v30 }
 0x674   :  { %v7996_v44 = vsel %vm4016_vm7, %v9457_v24, %v9454_v55 }
 0x675   :  { %9455 = vst [vmem:[%s16308_s3 + $0x8] sm:$0xff] %v7996_v44 }

</bundles_post_ra>
